<compile_context>
chip_gen: v5e
topology: v5e:2x2
jax: 0.10.0
libtpu: 0.0.40
codegen_flags: <defaults>
</compile_context>

<pallas_src>
import jax
import jax.numpy as jnp
from jax import lax
from jax.experimental import pallas as pl
from jax.experimental.pallas import tpu as pltpu

SUBLANE = 8      # f32 sublane granule
LANE = 128       # lane width (also 4*n_hidden for n_hidden=32)


# ------------------------------ Pallas kernel ------------------------------- #

def wordlstm_fused_kernel(tok_ref,          # (Bp, T) int32  SMEM (scalar prefetch)
                          emb_ref,          # (V, E)  f32
                          h0_ref, c0_ref,   # (L, Bp, 128) f32, lanes [0,H) valid
                          wih0_ref,         # (E, 4H) f32        layer-0 input proj
                          wihr_ref,         # (L-1, 128, 4H) f32 rows [0,H) valid
                          whh_ref,          # (L, 128, 4H) f32   rows [0,H) valid
                          b_ref,            # (L, 1, 4H) f32     b_ih + b_hh
                          fcw_ref,          # (128, 128) f32     rows [0,H), cols [0,V)
                          fcb_ref,          # (1, 128) f32
                          out_ref,          # (T*Bp, 128) f32    logits (time-major rows)
                          hT_ref, cT_ref,   # (L, Bp, 128) f32
                          x0_buf,           # (T*Bp, E)   VMEM scratch: gathered embeddings
                          gx_buf,           # (T*Bp, 4H)  VMEM scratch: input projections
                          y_buf):           # (T*Bp, 4H)  VMEM scratch: inter-layer activations
    Bp, T = tok_ref.shape
    L = whh_ref.shape[0]
    G = whh_ref.shape[2]            # 4*H (== 128)
    H = G // 4

    # ---- embedding gather: SMEM token ids -> VMEM rows (prologue, fully parallel) ----
    for t in range(T):
        for b in range(Bp):
            tok = tok_ref[b, t]
            x0_buf[pl.ds(t * Bp + b, 1), :] = emb_ref[pl.ds(tok, 1), :]

    # tanh lanes (g gate) vs sigmoid lanes (i, f, o) -- hoisted out of all loops.
    lane = lax.broadcasted_iota(jnp.int32, (Bp, G), 1)
    is_g = jnp.logical_and(lane >= 2 * H, lane < 3 * H)

    for layer in range(L):
        # Input projection for ALL timesteps in one matmul (+ combined bias).
        if layer == 0:
            xw = jnp.dot(x0_buf[...], wih0_ref[...],
                         preferred_element_type=jnp.float32)
        else:
            xw = jnp.dot(y_buf[...], wihr_ref[layer - 1],
                         preferred_element_type=jnp.float32)
        gx_buf[...] = xw + b_ref[layer]

        whh = whh_ref[layer]        # hoisted: resident in vregs for the whole loop
        h = h0_ref[layer]           # (Bp, 128), lanes [0,H) valid
        c = c0_ref[layer]

        # Statically unrolled recurrence (T small & static) -> cross-step overlap.
        for t in range(T):
            gates = gx_buf[pl.ds(t * Bp, Bp), :] + jnp.dot(
                h, whh, preferred_element_type=jnp.float32)   # (Bp,4H) = [i|f|g|o]
            # Full-width transcendentals (EUP) + per-lane select; no 32-lane slices.
            act = jnp.where(is_g, jnp.tanh(gates), jax.nn.sigmoid(gates))
            f_al = pltpu.roll(act, 3 * H, 1)     # f -> lanes [0,H)
            g_al = pltpu.roll(act, 2 * H, 1)     # g -> lanes [0,H)
            o_al = pltpu.roll(act, 1 * H, 1)     # o -> lanes [0,H)
            c = f_al * c + act * g_al            # i is already at lanes [0,H)
            h = o_al * jnp.tanh(c)
            y_buf[pl.ds(t * Bp, Bp), :] = h      # full (8,128) unmasked store

        hT_ref[layer] = h
        cT_ref[layer] = c
        # TODO(synk): PyTorch applies inter-layer dropout (p=0.3) in train mode only;
        # eval-mode identity semantics are used here.

    # ---- fused final Linear over all (T*Bp) rows; vocab padded to 128 lanes ----
    # self.dropout(lstm_out) is identity in eval mode.
    out_ref[...] = jnp.dot(y_buf[...], fcw_ref[...],
                           preferred_element_type=jnp.float32) + fcb_ref[...]


# ------------------------------ parameter prep ------------------------------ #

def init_params(key, vocab_size, emb_dim, n_hidden, n_layers):
    """PyTorch-layout parameters (same shapes/init scheme as nn.LSTM / nn.Linear)."""
    params = {}
    k = key
    k, sub = jax.random.split(k)
    params["emb"] = jax.random.normal(sub, (vocab_size, emb_dim), jnp.float32) * 0.1
    bound = 1.0 / jnp.sqrt(jnp.float32(n_hidden))
    for layer in range(n_layers):
        d_in = emb_dim if layer == 0 else n_hidden
        k, k1, k2, k3, k4 = jax.random.split(k, 5)
        params[f"w_ih_{layer}"] = jax.random.uniform(
            k1, (4 * n_hidden, d_in), jnp.float32, -bound, bound)
        params[f"w_hh_{layer}"] = jax.random.uniform(
            k2, (4 * n_hidden, n_hidden), jnp.float32, -bound, bound)
        params[f"b_ih_{layer}"] = jax.random.uniform(
            k3, (4 * n_hidden,), jnp.float32, -bound, bound)
        params[f"b_hh_{layer}"] = jax.random.uniform(
            k4, (4 * n_hidden,), jnp.float32, -bound, bound)
    k, k1, k2 = jax.random.split(k, 3)
    params["fc_w"] = jax.random.uniform(
        k1, (vocab_size, n_hidden), jnp.float32, -bound, bound)
    params["fc_b"] = jax.random.uniform(
        k2, (vocab_size,), jnp.float32, -bound, bound)
    return params


def prepare_params(params, vocab_size, n_hidden, n_layers):
    """One-time prep: pre-transpose, pre-pad weight rows/cols, pre-sum biases."""
    H = n_hidden
    G = 4 * H
    assert G == LANE, "this kernel assumes 4 * n_hidden == 128"
    assert vocab_size <= LANE, "vocab must fit one 128-lane slab for the fused FC"

    wih0 = params["w_ih_0"].T                                   # (E, 4H)
    wihr = jnp.zeros((max(n_layers - 1, 1), LANE, G), jnp.float32)
    whh = jnp.zeros((n_layers, LANE, G), jnp.float32)
    for l in range(n_layers):
        whh = whh.at[l, :H, :].set(params[f"w_hh_{l}"].T)
        if l >= 1:
            wihr = wihr.at[l - 1, :H, :].set(params[f"w_ih_{l}"].T)
    b = jnp.stack([(params[f"b_ih_{l}"] + params[f"b_hh_{l}"])[None, :]
                   for l in range(n_layers)])                   # (L, 1, 4H)
    fcw = jnp.zeros((LANE, LANE), jnp.float32).at[:H, :vocab_size].set(params["fc_w"].T)
    fcb = jnp.zeros((1, LANE), jnp.float32).at[0, :vocab_size].set(params["fc_b"])
    return {"emb": params["emb"], "wih0": wih0, "wihr": wihr, "whh": whh,
            "b": b, "fcw": fcw, "fcb": fcb}


# ------------------------------- forward glue ------------------------------- #

def word_lstm_forward(prep, tokens, hidden):
    """Mirrors WordLSTM.forward(x, hidden) (eval-mode dropout).

    tokens : (B, T) int32
    hidden : (h0, c0), each (n_layers, B, H)
    returns: logits (B*T, vocab), (h_n, c_n)
    """
    h0, c0 = hidden
    L, B, H = h0.shape
    T = tokens.shape[1]
    V, E = prep["emb"].shape
    Bp = ((B + SUBLANE - 1) // SUBLANE) * SUBLANE   # pad batch to sublane granule

    tok_p = jnp.zeros((Bp, T), jnp.int32).at[:B, :].set(tokens.astype(jnp.int32))
    h0_p = jnp.zeros((L, Bp, LANE), jnp.float32).at[:, :B, :H].set(h0)
    c0_p = jnp.zeros((L, Bp, LANE), jnp.float32).at[:, :B, :H].set(c0)

    vmem = pl.BlockSpec(memory_space=pltpu.MemorySpace.VMEM)
    grid_spec = pltpu.PrefetchScalarGridSpec(
        num_scalar_prefetch=1,            # tokens -> SMEM
        grid=(),                          # single invocation; everything is VMEM-resident
        in_specs=[vmem] * 9,
        out_specs=(vmem, vmem, vmem),
        scratch_shapes=[
            pltpu.VMEM((T * Bp, E), jnp.float32),     # gathered embeddings
            pltpu.VMEM((T * Bp, LANE), jnp.float32),  # per-layer input projections
            pltpu.VMEM((T * Bp, LANE), jnp.float32),  # inter-layer activations
        ],
    )
    # NOTE(v7x): single TensorCore on purpose; add a time-blocked grid and an explicit
    # vmem_limit_bytes before scaling T/B/H toward the 64 MiB VMEM ceiling.
    out_p, hT_p, cT_p = pl.pallas_call(
        wordlstm_fused_kernel,
        out_shape=(
            jax.ShapeDtypeStruct((T * Bp, LANE), jnp.float32),
            jax.ShapeDtypeStruct((L, Bp, LANE), jnp.float32),
            jax.ShapeDtypeStruct((L, Bp, LANE), jnp.float32),
        ),
        grid_spec=grid_spec,
    )(tok_p, prep["emb"], h0_p, c0_p, prep["wih0"], prep["wihr"],
      prep["whh"], prep["b"], prep["fcw"], prep["fcb"])

    # kernel rows are time-major (t, b); PyTorch reshape(-1, H) on batch_first is (b, t)
    logits = (out_p.reshape(T, Bp, LANE)
              .transpose(1, 0, 2)[:B, :, :V]
              .reshape(B * T, V))
    h_n = hT_p[:, :B, :H]
    c_n = cT_p[:, :B, :H]
    return logits, (h_n, c_n)


# ---------------------------------- main ------------------------------------ #

if __name__ == "__main__":
    VOCAB = 32
    EMB = 200
    N_HIDDEN = 32
    N_LAYERS = 4
    BATCH = 2
    SEQ = 8

    key = jax.random.PRNGKey(0)
    key, pkey, tkey = jax.random.split(key, 3)

    raw = init_params(pkey, VOCAB, EMB, N_HIDDEN, N_LAYERS)
    prep = prepare_params(raw, VOCAB, N_HIDDEN, N_LAYERS)
    tokens = jax.random.randint(tkey, (BATCH, SEQ), 0, VOCAB, dtype=jnp.int32)

    # init_hidden(batch_size): zeros of (n_layers, B, H)
    hidden = (jnp.zeros((N_LAYERS, BATCH, N_HIDDEN), jnp.float32),
              jnp.zeros((N_LAYERS, BATCH, N_HIDDEN), jnp.float32))

    fwd = jax.jit(word_lstm_forward)
    logits, (h_n, c_n) = fwd(prep, tokens, hidden)
    jax.block_until_ready((logits, h_n, c_n))

    assert logits.shape == (BATCH * SEQ, VOCAB)
    assert h_n.shape == (N_LAYERS, BATCH, N_HIDDEN)
    assert c_n.shape == (N_LAYERS, BATCH, N_HIDDEN)
    assert bool(jnp.all(jnp.isfinite(logits)))
    print("KERNEL_OK")
</pallas_src>

<mosaic_0001>
module attributes {stable_mosaic.version = 11 : i64} {
  func.func @wordlstm_fused_kernel(%arg0: memref<8x8xi32, #tpu.memory_space<smem>>, %arg1: memref<32x200xf32, #tpu.memory_space<vmem>>, %arg2: memref<4x8x128xf32, #tpu.memory_space<vmem>>, %arg3: memref<4x8x128xf32, #tpu.memory_space<vmem>>, %arg4: memref<200x128xf32, #tpu.memory_space<vmem>>, %arg5: memref<3x128x128xf32, #tpu.memory_space<vmem>>, %arg6: memref<4x128x128xf32, #tpu.memory_space<vmem>>, %arg7: memref<4x1x128xf32, #tpu.memory_space<vmem>>, %arg8: memref<128x128xf32, #tpu.memory_space<vmem>>, %arg9: memref<1x128xf32, #tpu.memory_space<vmem>>, %arg10: memref<64x128xf32, #tpu.memory_space<vmem>>, %arg11: memref<4x8x128xf32, #tpu.memory_space<vmem>>, %arg12: memref<4x8x128xf32, #tpu.memory_space<vmem>>, %arg13: memref<64x200xf32, #tpu.memory_space<vmem>>, %arg14: memref<64x128xf32, #tpu.memory_space<vmem>>, %arg15: memref<64x128xf32, #tpu.memory_space<vmem>>) attributes {dimension_semantics = [], scalar_prefetch = 1 : i64, scratch_operands = 3 : i64, tpu.core_type = #tpu.core_type<tc>} {
    %c0 = arith.constant 0 : index
    %c0_0 = arith.constant 0 : index
    %0 = memref.load %arg0[%c0, %c0_0] : memref<8x8xi32, #tpu.memory_space<smem>>
    %1 = arith.index_cast %0 : i32 to index
    %c0_1 = arith.constant 0 : index
    %2 = vector.load %arg1[%1, %c0_1] : memref<32x200xf32, #tpu.memory_space<vmem>>, vector<1x200xf32>
    %c0_2 = arith.constant 0 : index
    %c0_3 = arith.constant 0 : index
    %3 = vector.load %arg13[%c0_2, %c0_3] : memref<64x200xf32, #tpu.memory_space<vmem>>, vector<1x200xf32>
    tpu.vector_store %arg13[%c0_2, %c0_3], %2 {strides = array<i32>} : memref<64x200xf32, #tpu.memory_space<vmem>>, vector<1x200xf32>,
    %c1 = arith.constant 1 : index
    %c0_4 = arith.constant 0 : index
    %4 = memref.load %arg0[%c1, %c0_4] : memref<8x8xi32, #tpu.memory_space<smem>>
    %5 = arith.index_cast %4 : i32 to index
    %c0_5 = arith.constant 0 : index
    %6 = vector.load %arg1[%5, %c0_5] : memref<32x200xf32, #tpu.memory_space<vmem>>, vector<1x200xf32>
    %c1_6 = arith.constant 1 : index
    %c0_7 = arith.constant 0 : index
    %7 = vector.load %arg13[%c1_6, %c0_7] : memref<64x200xf32, #tpu.memory_space<vmem>>, vector<1x200xf32>
    tpu.vector_store %arg13[%c1_6, %c0_7], %6 {strides = array<i32>} : memref<64x200xf32, #tpu.memory_space<vmem>>, vector<1x200xf32>,
    %c2 = arith.constant 2 : index
    %c0_8 = arith.constant 0 : index
    %8 = memref.load %arg0[%c2, %c0_8] : memref<8x8xi32, #tpu.memory_space<smem>>
    %9 = arith.index_cast %8 : i32 to index
    %c0_9 = arith.constant 0 : index
    %10 = vector.load %arg1[%9, %c0_9] : memref<32x200xf32, #tpu.memory_space<vmem>>, vector<1x200xf32>
    %c2_10 = arith.constant 2 : index
    %c0_11 = arith.constant 0 : index
    %11 = vector.load %arg13[%c2_10, %c0_11] : memref<64x200xf32, #tpu.memory_space<vmem>>, vector<1x200xf32>
    tpu.vector_store %arg13[%c2_10, %c0_11], %10 {strides = array<i32>} : memref<64x200xf32, #tpu.memory_space<vmem>>, vector<1x200xf32>,
    %c3 = arith.constant 3 : index
    %c0_12 = arith.constant 0 : index
    %12 = memref.load %arg0[%c3, %c0_12] : memref<8x8xi32, #tpu.memory_space<smem>>
    %13 = arith.index_cast %12 : i32 to index
    %c0_13 = arith.constant 0 : index
    %14 = vector.load %arg1[%13, %c0_13] : memref<32x200xf32, #tpu.memory_space<vmem>>, vector<1x200xf32>
    %c3_14 = arith.constant 3 : index
    %c0_15 = arith.constant 0 : index
    %15 = vector.load %arg13[%c3_14, %c0_15] : memref<64x200xf32, #tpu.memory_space<vmem>>, vector<1x200xf32>
    tpu.vector_store %arg13[%c3_14, %c0_15], %14 {strides = array<i32>} : memref<64x200xf32, #tpu.memory_space<vmem>>, vector<1x200xf32>,
    %c4 = arith.constant 4 : index
    %c0_16 = arith.constant 0 : index
    %16 = memref.load %arg0[%c4, %c0_16] : memref<8x8xi32, #tpu.memory_space<smem>>
    %17 = arith.index_cast %16 : i32 to index
    %c0_17 = arith.constant 0 : index
    %18 = vector.load %arg1[%17, %c0_17] : memref<32x200xf32, #tpu.memory_space<vmem>>, vector<1x200xf32>
    %c4_18 = arith.constant 4 : index
    %c0_19 = arith.constant 0 : index
    %19 = vector.load %arg13[%c4_18, %c0_19] : memref<64x200xf32, #tpu.memory_space<vmem>>, vector<1x200xf32>
    tpu.vector_store %arg13[%c4_18, %c0_19], %18 {strides = array<i32>} : memref<64x200xf32, #tpu.memory_space<vmem>>, vector<1x200xf32>,
    %c5 = arith.constant 5 : index
    %c0_20 = arith.constant 0 : index
    %20 = memref.load %arg0[%c5, %c0_20] : memref<8x8xi32, #tpu.memory_space<smem>>
    %21 = arith.index_cast %20 : i32 to index
    %c0_21 = arith.constant 0 : index
    %22 = vector.load %arg1[%21, %c0_21] : memref<32x200xf32, #tpu.memory_space<vmem>>, vector<1x200xf32>
    %c5_22 = arith.constant 5 : index
    %c0_23 = arith.constant 0 : index
    %23 = vector.load %arg13[%c5_22, %c0_23] : memref<64x200xf32, #tpu.memory_space<vmem>>, vector<1x200xf32>
    tpu.vector_store %arg13[%c5_22, %c0_23], %22 {strides = array<i32>} : memref<64x200xf32, #tpu.memory_space<vmem>>, vector<1x200xf32>,
    %c6 = arith.constant 6 : index
    %c0_24 = arith.constant 0 : index
    %24 = memref.load %arg0[%c6, %c0_24] : memref<8x8xi32, #tpu.memory_space<smem>>
    %25 = arith.index_cast %24 : i32 to index
    %c0_25 = arith.constant 0 : index
    %26 = vector.load %arg1[%25, %c0_25] : memref<32x200xf32, #tpu.memory_space<vmem>>, vector<1x200xf32>
    %c6_26 = arith.constant 6 : index
    %c0_27 = arith.constant 0 : index
    %27 = vector.load %arg13[%c6_26, %c0_27] : memref<64x200xf32, #tpu.memory_space<vmem>>, vector<1x200xf32>
    tpu.vector_store %arg13[%c6_26, %c0_27], %26 {strides = array<i32>} : memref<64x200xf32, #tpu.memory_space<vmem>>, vector<1x200xf32>,
    %c7 = arith.constant 7 : index
    %c0_28 = arith.constant 0 : index
    %28 = memref.load %arg0[%c7, %c0_28] : memref<8x8xi32, #tpu.memory_space<smem>>
    %29 = arith.index_cast %28 : i32 to index
    %c0_29 = arith.constant 0 : index
    %30 = vector.load %arg1[%29, %c0_29] : memref<32x200xf32, #tpu.memory_space<vmem>>, vector<1x200xf32>
    %c7_30 = arith.constant 7 : index
    %c0_31 = arith.constant 0 : index
    %31 = vector.load %arg13[%c7_30, %c0_31] : memref<64x200xf32, #tpu.memory_space<vmem>>, vector<1x200xf32>
    tpu.vector_store %arg13[%c7_30, %c0_31], %30 {strides = array<i32>} : memref<64x200xf32, #tpu.memory_space<vmem>>, vector<1x200xf32>,
    %c0_32 = arith.constant 0 : index
    %c1_33 = arith.constant 1 : index
    %32 = memref.load %arg0[%c0_32, %c1_33] : memref<8x8xi32, #tpu.memory_space<smem>>
    %33 = arith.index_cast %32 : i32 to index
    %c0_34 = arith.constant 0 : index
    %34 = vector.load %arg1[%33, %c0_34] : memref<32x200xf32, #tpu.memory_space<vmem>>, vector<1x200xf32>
    %c8 = arith.constant 8 : index
    %c0_35 = arith.constant 0 : index
    %35 = vector.load %arg13[%c8, %c0_35] : memref<64x200xf32, #tpu.memory_space<vmem>>, vector<1x200xf32>
    tpu.vector_store %arg13[%c8, %c0_35], %34 {strides = array<i32>} : memref<64x200xf32, #tpu.memory_space<vmem>>, vector<1x200xf32>,
    %c1_36 = arith.constant 1 : index
    %c1_37 = arith.constant 1 : index
    %36 = memref.load %arg0[%c1_36, %c1_37] : memref<8x8xi32, #tpu.memory_space<smem>>
    %37 = arith.index_cast %36 : i32 to index
    %c0_38 = arith.constant 0 : index
    %38 = vector.load %arg1[%37, %c0_38] : memref<32x200xf32, #tpu.memory_space<vmem>>, vector<1x200xf32>
    %c9 = arith.constant 9 : index
    %c0_39 = arith.constant 0 : index
    %39 = vector.load %arg13[%c9, %c0_39] : memref<64x200xf32, #tpu.memory_space<vmem>>, vector<1x200xf32>
    tpu.vector_store %arg13[%c9, %c0_39], %38 {strides = array<i32>} : memref<64x200xf32, #tpu.memory_space<vmem>>, vector<1x200xf32>,
    %c2_40 = arith.constant 2 : index
    %c1_41 = arith.constant 1 : index
    %40 = memref.load %arg0[%c2_40, %c1_41] : memref<8x8xi32, #tpu.memory_space<smem>>
    %41 = arith.index_cast %40 : i32 to index
    %c0_42 = arith.constant 0 : index
    %42 = vector.load %arg1[%41, %c0_42] : memref<32x200xf32, #tpu.memory_space<vmem>>, vector<1x200xf32>
    %c10 = arith.constant 10 : index
    %c0_43 = arith.constant 0 : index
    %43 = vector.load %arg13[%c10, %c0_43] : memref<64x200xf32, #tpu.memory_space<vmem>>, vector<1x200xf32>
    tpu.vector_store %arg13[%c10, %c0_43], %42 {strides = array<i32>} : memref<64x200xf32, #tpu.memory_space<vmem>>, vector<1x200xf32>,
    %c3_44 = arith.constant 3 : index
    %c1_45 = arith.constant 1 : index
    %44 = memref.load %arg0[%c3_44, %c1_45] : memref<8x8xi32, #tpu.memory_space<smem>>
    %45 = arith.index_cast %44 : i32 to index
    %c0_46 = arith.constant 0 : index
    %46 = vector.load %arg1[%45, %c0_46] : memref<32x200xf32, #tpu.memory_space<vmem>>, vector<1x200xf32>
    %c11 = arith.constant 11 : index
    %c0_47 = arith.constant 0 : index
    %47 = vector.load %arg13[%c11, %c0_47] : memref<64x200xf32, #tpu.memory_space<vmem>>, vector<1x200xf32>
    tpu.vector_store %arg13[%c11, %c0_47], %46 {strides = array<i32>} : memref<64x200xf32, #tpu.memory_space<vmem>>, vector<1x200xf32>,
    %c4_48 = arith.constant 4 : index
    %c1_49 = arith.constant 1 : index
    %48 = memref.load %arg0[%c4_48, %c1_49] : memref<8x8xi32, #tpu.memory_space<smem>>
    %49 = arith.index_cast %48 : i32 to index
    %c0_50 = arith.constant 0 : index
    %50 = vector.load %arg1[%49, %c0_50] : memref<32x200xf32, #tpu.memory_space<vmem>>, vector<1x200xf32>
    %c12 = arith.constant 12 : index
    %c0_51 = arith.constant 0 : index
    %51 = vector.load %arg13[%c12, %c0_51] : memref<64x200xf32, #tpu.memory_space<vmem>>, vector<1x200xf32>
    tpu.vector_store %arg13[%c12, %c0_51], %50 {strides = array<i32>} : memref<64x200xf32, #tpu.memory_space<vmem>>, vector<1x200xf32>,
    %c5_52 = arith.constant 5 : index
    %c1_53 = arith.constant 1 : index
    %52 = memref.load %arg0[%c5_52, %c1_53] : memref<8x8xi32, #tpu.memory_space<smem>>
    %53 = arith.index_cast %52 : i32 to index
    %c0_54 = arith.constant 0 : index
    %54 = vector.load %arg1[%53, %c0_54] : memref<32x200xf32, #tpu.memory_space<vmem>>, vector<1x200xf32>
    %c13 = arith.constant 13 : index
    %c0_55 = arith.constant 0 : index
    %55 = vector.load %arg13[%c13, %c0_55] : memref<64x200xf32, #tpu.memory_space<vmem>>, vector<1x200xf32>
    tpu.vector_store %arg13[%c13, %c0_55], %54 {strides = array<i32>} : memref<64x200xf32, #tpu.memory_space<vmem>>, vector<1x200xf32>,
    %c6_56 = arith.constant 6 : index
    %c1_57 = arith.constant 1 : index
    %56 = memref.load %arg0[%c6_56, %c1_57] : memref<8x8xi32, #tpu.memory_space<smem>>
    %57 = arith.index_cast %56 : i32 to index
    %c0_58 = arith.constant 0 : index
    %58 = vector.load %arg1[%57, %c0_58] : memref<32x200xf32, #tpu.memory_space<vmem>>, vector<1x200xf32>
    %c14 = arith.constant 14 : index
    %c0_59 = arith.constant 0 : index
    %59 = vector.load %arg13[%c14, %c0_59] : memref<64x200xf32, #tpu.memory_space<vmem>>, vector<1x200xf32>
    tpu.vector_store %arg13[%c14, %c0_59], %58 {strides = array<i32>} : memref<64x200xf32, #tpu.memory_space<vmem>>, vector<1x200xf32>,
    %c7_60 = arith.constant 7 : index
    %c1_61 = arith.constant 1 : index
    %60 = memref.load %arg0[%c7_60, %c1_61] : memref<8x8xi32, #tpu.memory_space<smem>>
    %61 = arith.index_cast %60 : i32 to index
    %c0_62 = arith.constant 0 : index
    %62 = vector.load %arg1[%61, %c0_62] : memref<32x200xf32, #tpu.memory_space<vmem>>, vector<1x200xf32>
    %c15 = arith.constant 15 : index
    %c0_63 = arith.constant 0 : index
    %63 = vector.load %arg13[%c15, %c0_63] : memref<64x200xf32, #tpu.memory_space<vmem>>, vector<1x200xf32>
    tpu.vector_store %arg13[%c15, %c0_63], %62 {strides = array<i32>} : memref<64x200xf32, #tpu.memory_space<vmem>>, vector<1x200xf32>,
    %c0_64 = arith.constant 0 : index
    %c2_65 = arith.constant 2 : index
    %64 = memref.load %arg0[%c0_64, %c2_65] : memref<8x8xi32, #tpu.memory_space<smem>>
    %65 = arith.index_cast %64 : i32 to index
    %c0_66 = arith.constant 0 : index
    %66 = vector.load %arg1[%65, %c0_66] : memref<32x200xf32, #tpu.memory_space<vmem>>, vector<1x200xf32>
    %c16 = arith.constant 16 : index
    %c0_67 = arith.constant 0 : index
    %67 = vector.load %arg13[%c16, %c0_67] : memref<64x200xf32, #tpu.memory_space<vmem>>, vector<1x200xf32>
    tpu.vector_store %arg13[%c16, %c0_67], %66 {strides = array<i32>} : memref<64x200xf32, #tpu.memory_space<vmem>>, vector<1x200xf32>,
    %c1_68 = arith.constant 1 : index
    %c2_69 = arith.constant 2 : index
    %68 = memref.load %arg0[%c1_68, %c2_69] : memref<8x8xi32, #tpu.memory_space<smem>>
    %69 = arith.index_cast %68 : i32 to index
    %c0_70 = arith.constant 0 : index
    %70 = vector.load %arg1[%69, %c0_70] : memref<32x200xf32, #tpu.memory_space<vmem>>, vector<1x200xf32>
    %c17 = arith.constant 17 : index
    %c0_71 = arith.constant 0 : index
    %71 = vector.load %arg13[%c17, %c0_71] : memref<64x200xf32, #tpu.memory_space<vmem>>, vector<1x200xf32>
    tpu.vector_store %arg13[%c17, %c0_71], %70 {strides = array<i32>} : memref<64x200xf32, #tpu.memory_space<vmem>>, vector<1x200xf32>,
    %c2_72 = arith.constant 2 : index
    %c2_73 = arith.constant 2 : index
    %72 = memref.load %arg0[%c2_72, %c2_73] : memref<8x8xi32, #tpu.memory_space<smem>>
    %73 = arith.index_cast %72 : i32 to index
    %c0_74 = arith.constant 0 : index
    %74 = vector.load %arg1[%73, %c0_74] : memref<32x200xf32, #tpu.memory_space<vmem>>, vector<1x200xf32>
    %c18 = arith.constant 18 : index
    %c0_75 = arith.constant 0 : index
    %75 = vector.load %arg13[%c18, %c0_75] : memref<64x200xf32, #tpu.memory_space<vmem>>, vector<1x200xf32>
    tpu.vector_store %arg13[%c18, %c0_75], %74 {strides = array<i32>} : memref<64x200xf32, #tpu.memory_space<vmem>>, vector<1x200xf32>,
    %c3_76 = arith.constant 3 : index
    %c2_77 = arith.constant 2 : index
    %76 = memref.load %arg0[%c3_76, %c2_77] : memref<8x8xi32, #tpu.memory_space<smem>>
    %77 = arith.index_cast %76 : i32 to index
    %c0_78 = arith.constant 0 : index
    %78 = vector.load %arg1[%77, %c0_78] : memref<32x200xf32, #tpu.memory_space<vmem>>, vector<1x200xf32>
    %c19 = arith.constant 19 : index
    %c0_79 = arith.constant 0 : index
    %79 = vector.load %arg13[%c19, %c0_79] : memref<64x200xf32, #tpu.memory_space<vmem>>, vector<1x200xf32>
    tpu.vector_store %arg13[%c19, %c0_79], %78 {strides = array<i32>} : memref<64x200xf32, #tpu.memory_space<vmem>>, vector<1x200xf32>,
    %c4_80 = arith.constant 4 : index
    %c2_81 = arith.constant 2 : index
    %80 = memref.load %arg0[%c4_80, %c2_81] : memref<8x8xi32, #tpu.memory_space<smem>>
    %81 = arith.index_cast %80 : i32 to index
    %c0_82 = arith.constant 0 : index
    %82 = vector.load %arg1[%81, %c0_82] : memref<32x200xf32, #tpu.memory_space<vmem>>, vector<1x200xf32>
    %c20 = arith.constant 20 : index
    %c0_83 = arith.constant 0 : index
    %83 = vector.load %arg13[%c20, %c0_83] : memref<64x200xf32, #tpu.memory_space<vmem>>, vector<1x200xf32>
    tpu.vector_store %arg13[%c20, %c0_83], %82 {strides = array<i32>} : memref<64x200xf32, #tpu.memory_space<vmem>>, vector<1x200xf32>,
    %c5_84 = arith.constant 5 : index
    %c2_85 = arith.constant 2 : index
    %84 = memref.load %arg0[%c5_84, %c2_85] : memref<8x8xi32, #tpu.memory_space<smem>>
    %85 = arith.index_cast %84 : i32 to index
    %c0_86 = arith.constant 0 : index
    %86 = vector.load %arg1[%85, %c0_86] : memref<32x200xf32, #tpu.memory_space<vmem>>, vector<1x200xf32>
    %c21 = arith.constant 21 : index
    %c0_87 = arith.constant 0 : index
    %87 = vector.load %arg13[%c21, %c0_87] : memref<64x200xf32, #tpu.memory_space<vmem>>, vector<1x200xf32>
    tpu.vector_store %arg13[%c21, %c0_87], %86 {strides = array<i32>} : memref<64x200xf32, #tpu.memory_space<vmem>>, vector<1x200xf32>,
    %c6_88 = arith.constant 6 : index
    %c2_89 = arith.constant 2 : index
    %88 = memref.load %arg0[%c6_88, %c2_89] : memref<8x8xi32, #tpu.memory_space<smem>>
    %89 = arith.index_cast %88 : i32 to index
    %c0_90 = arith.constant 0 : index
    %90 = vector.load %arg1[%89, %c0_90] : memref<32x200xf32, #tpu.memory_space<vmem>>, vector<1x200xf32>
    %c22 = arith.constant 22 : index
    %c0_91 = arith.constant 0 : index
    %91 = vector.load %arg13[%c22, %c0_91] : memref<64x200xf32, #tpu.memory_space<vmem>>, vector<1x200xf32>
    tpu.vector_store %arg13[%c22, %c0_91], %90 {strides = array<i32>} : memref<64x200xf32, #tpu.memory_space<vmem>>, vector<1x200xf32>,
    %c7_92 = arith.constant 7 : index
    %c2_93 = arith.constant 2 : index
    %92 = memref.load %arg0[%c7_92, %c2_93] : memref<8x8xi32, #tpu.memory_space<smem>>
    %93 = arith.index_cast %92 : i32 to index
    %c0_94 = arith.constant 0 : index
    %94 = vector.load %arg1[%93, %c0_94] : memref<32x200xf32, #tpu.memory_space<vmem>>, vector<1x200xf32>
    %c23 = arith.constant 23 : index
    %c0_95 = arith.constant 0 : index
    %95 = vector.load %arg13[%c23, %c0_95] : memref<64x200xf32, #tpu.memory_space<vmem>>, vector<1x200xf32>
    tpu.vector_store %arg13[%c23, %c0_95], %94 {strides = array<i32>} : memref<64x200xf32, #tpu.memory_space<vmem>>, vector<1x200xf32>,
    %c0_96 = arith.constant 0 : index
    %c3_97 = arith.constant 3 : index
    %96 = memref.load %arg0[%c0_96, %c3_97] : memref<8x8xi32, #tpu.memory_space<smem>>
    %97 = arith.index_cast %96 : i32 to index
    %c0_98 = arith.constant 0 : index
    %98 = vector.load %arg1[%97, %c0_98] : memref<32x200xf32, #tpu.memory_space<vmem>>, vector<1x200xf32>
    %c24 = arith.constant 24 : index
    %c0_99 = arith.constant 0 : index
    %99 = vector.load %arg13[%c24, %c0_99] : memref<64x200xf32, #tpu.memory_space<vmem>>, vector<1x200xf32>
    tpu.vector_store %arg13[%c24, %c0_99], %98 {strides = array<i32>} : memref<64x200xf32, #tpu.memory_space<vmem>>, vector<1x200xf32>,
    %c1_100 = arith.constant 1 : index
    %c3_101 = arith.constant 3 : index
    %100 = memref.load %arg0[%c1_100, %c3_101] : memref<8x8xi32, #tpu.memory_space<smem>>
    %101 = arith.index_cast %100 : i32 to index
    %c0_102 = arith.constant 0 : index
    %102 = vector.load %arg1[%101, %c0_102] : memref<32x200xf32, #tpu.memory_space<vmem>>, vector<1x200xf32>
    %c25 = arith.constant 25 : index
    %c0_103 = arith.constant 0 : index
    %103 = vector.load %arg13[%c25, %c0_103] : memref<64x200xf32, #tpu.memory_space<vmem>>, vector<1x200xf32>
    tpu.vector_store %arg13[%c25, %c0_103], %102 {strides = array<i32>} : memref<64x200xf32, #tpu.memory_space<vmem>>, vector<1x200xf32>,
    %c2_104 = arith.constant 2 : index
    %c3_105 = arith.constant 3 : index
    %104 = memref.load %arg0[%c2_104, %c3_105] : memref<8x8xi32, #tpu.memory_space<smem>>
    %105 = arith.index_cast %104 : i32 to index
    %c0_106 = arith.constant 0 : index
    %106 = vector.load %arg1[%105, %c0_106] : memref<32x200xf32, #tpu.memory_space<vmem>>, vector<1x200xf32>
    %c26 = arith.constant 26 : index
    %c0_107 = arith.constant 0 : index
    %107 = vector.load %arg13[%c26, %c0_107] : memref<64x200xf32, #tpu.memory_space<vmem>>, vector<1x200xf32>
    tpu.vector_store %arg13[%c26, %c0_107], %106 {strides = array<i32>} : memref<64x200xf32, #tpu.memory_space<vmem>>, vector<1x200xf32>,
    %c3_108 = arith.constant 3 : index
    %c3_109 = arith.constant 3 : index
    %108 = memref.load %arg0[%c3_108, %c3_109] : memref<8x8xi32, #tpu.memory_space<smem>>
    %109 = arith.index_cast %108 : i32 to index
    %c0_110 = arith.constant 0 : index
    %110 = vector.load %arg1[%109, %c0_110] : memref<32x200xf32, #tpu.memory_space<vmem>>, vector<1x200xf32>
    %c27 = arith.constant 27 : index
    %c0_111 = arith.constant 0 : index
    %111 = vector.load %arg13[%c27, %c0_111] : memref<64x200xf32, #tpu.memory_space<vmem>>, vector<1x200xf32>
    tpu.vector_store %arg13[%c27, %c0_111], %110 {strides = array<i32>} : memref<64x200xf32, #tpu.memory_space<vmem>>, vector<1x200xf32>,
    %c4_112 = arith.constant 4 : index
    %c3_113 = arith.constant 3 : index
    %112 = memref.load %arg0[%c4_112, %c3_113] : memref<8x8xi32, #tpu.memory_space<smem>>
    %113 = arith.index_cast %112 : i32 to index
    %c0_114 = arith.constant 0 : index
    %114 = vector.load %arg1[%113, %c0_114] : memref<32x200xf32, #tpu.memory_space<vmem>>, vector<1x200xf32>
    %c28 = arith.constant 28 : index
    %c0_115 = arith.constant 0 : index
    %115 = vector.load %arg13[%c28, %c0_115] : memref<64x200xf32, #tpu.memory_space<vmem>>, vector<1x200xf32>
    tpu.vector_store %arg13[%c28, %c0_115], %114 {strides = array<i32>} : memref<64x200xf32, #tpu.memory_space<vmem>>, vector<1x200xf32>,
    %c5_116 = arith.constant 5 : index
    %c3_117 = arith.constant 3 : index
    %116 = memref.load %arg0[%c5_116, %c3_117] : memref<8x8xi32, #tpu.memory_space<smem>>
    %117 = arith.index_cast %116 : i32 to index
    %c0_118 = arith.constant 0 : index
    %118 = vector.load %arg1[%117, %c0_118] : memref<32x200xf32, #tpu.memory_space<vmem>>, vector<1x200xf32>
    %c29 = arith.constant 29 : index
    %c0_119 = arith.constant 0 : index
    %119 = vector.load %arg13[%c29, %c0_119] : memref<64x200xf32, #tpu.memory_space<vmem>>, vector<1x200xf32>
    tpu.vector_store %arg13[%c29, %c0_119], %118 {strides = array<i32>} : memref<64x200xf32, #tpu.memory_space<vmem>>, vector<1x200xf32>,
    %c6_120 = arith.constant 6 : index
    %c3_121 = arith.constant 3 : index
    %120 = memref.load %arg0[%c6_120, %c3_121] : memref<8x8xi32, #tpu.memory_space<smem>>
    %121 = arith.index_cast %120 : i32 to index
    %c0_122 = arith.constant 0 : index
    %122 = vector.load %arg1[%121, %c0_122] : memref<32x200xf32, #tpu.memory_space<vmem>>, vector<1x200xf32>
    %c30 = arith.constant 30 : index
    %c0_123 = arith.constant 0 : index
    %123 = vector.load %arg13[%c30, %c0_123] : memref<64x200xf32, #tpu.memory_space<vmem>>, vector<1x200xf32>
    tpu.vector_store %arg13[%c30, %c0_123], %122 {strides = array<i32>} : memref<64x200xf32, #tpu.memory_space<vmem>>, vector<1x200xf32>,
    %c7_124 = arith.constant 7 : index
    %c3_125 = arith.constant 3 : index
    %124 = memref.load %arg0[%c7_124, %c3_125] : memref<8x8xi32, #tpu.memory_space<smem>>
    %125 = arith.index_cast %124 : i32 to index
    %c0_126 = arith.constant 0 : index
    %126 = vector.load %arg1[%125, %c0_126] : memref<32x200xf32, #tpu.memory_space<vmem>>, vector<1x200xf32>
    %c31 = arith.constant 31 : index
    %c0_127 = arith.constant 0 : index
    %127 = vector.load %arg13[%c31, %c0_127] : memref<64x200xf32, #tpu.memory_space<vmem>>, vector<1x200xf32>
    tpu.vector_store %arg13[%c31, %c0_127], %126 {strides = array<i32>} : memref<64x200xf32, #tpu.memory_space<vmem>>, vector<1x200xf32>,
    %c0_128 = arith.constant 0 : index
    %c4_129 = arith.constant 4 : index
    %128 = memref.load %arg0[%c0_128, %c4_129] : memref<8x8xi32, #tpu.memory_space<smem>>
    %129 = arith.index_cast %128 : i32 to index
    %c0_130 = arith.constant 0 : index
    %130 = vector.load %arg1[%129, %c0_130] : memref<32x200xf32, #tpu.memory_space<vmem>>, vector<1x200xf32>
    %c32 = arith.constant 32 : index
    %c0_131 = arith.constant 0 : index
    %131 = vector.load %arg13[%c32, %c0_131] : memref<64x200xf32, #tpu.memory_space<vmem>>, vector<1x200xf32>
    tpu.vector_store %arg13[%c32, %c0_131], %130 {strides = array<i32>} : memref<64x200xf32, #tpu.memory_space<vmem>>, vector<1x200xf32>,
    %c1_132 = arith.constant 1 : index
    %c4_133 = arith.constant 4 : index
    %132 = memref.load %arg0[%c1_132, %c4_133] : memref<8x8xi32, #tpu.memory_space<smem>>
    %133 = arith.index_cast %132 : i32 to index
    %c0_134 = arith.constant 0 : index
    %134 = vector.load %arg1[%133, %c0_134] : memref<32x200xf32, #tpu.memory_space<vmem>>, vector<1x200xf32>
    %c33 = arith.constant 33 : index
    %c0_135 = arith.constant 0 : index
    %135 = vector.load %arg13[%c33, %c0_135] : memref<64x200xf32, #tpu.memory_space<vmem>>, vector<1x200xf32>
    tpu.vector_store %arg13[%c33, %c0_135], %134 {strides = array<i32>} : memref<64x200xf32, #tpu.memory_space<vmem>>, vector<1x200xf32>,
    %c2_136 = arith.constant 2 : index
    %c4_137 = arith.constant 4 : index
    %136 = memref.load %arg0[%c2_136, %c4_137] : memref<8x8xi32, #tpu.memory_space<smem>>
    %137 = arith.index_cast %136 : i32 to index
    %c0_138 = arith.constant 0 : index
    %138 = vector.load %arg1[%137, %c0_138] : memref<32x200xf32, #tpu.memory_space<vmem>>, vector<1x200xf32>
    %c34 = arith.constant 34 : index
    %c0_139 = arith.constant 0 : index
    %139 = vector.load %arg13[%c34, %c0_139] : memref<64x200xf32, #tpu.memory_space<vmem>>, vector<1x200xf32>
    tpu.vector_store %arg13[%c34, %c0_139], %138 {strides = array<i32>} : memref<64x200xf32, #tpu.memory_space<vmem>>, vector<1x200xf32>,
    %c3_140 = arith.constant 3 : index
    %c4_141 = arith.constant 4 : index
    %140 = memref.load %arg0[%c3_140, %c4_141] : memref<8x8xi32, #tpu.memory_space<smem>>
    %141 = arith.index_cast %140 : i32 to index
    %c0_142 = arith.constant 0 : index
    %142 = vector.load %arg1[%141, %c0_142] : memref<32x200xf32, #tpu.memory_space<vmem>>, vector<1x200xf32>
    %c35 = arith.constant 35 : index
    %c0_143 = arith.constant 0 : index
    %143 = vector.load %arg13[%c35, %c0_143] : memref<64x200xf32, #tpu.memory_space<vmem>>, vector<1x200xf32>
    tpu.vector_store %arg13[%c35, %c0_143], %142 {strides = array<i32>} : memref<64x200xf32, #tpu.memory_space<vmem>>, vector<1x200xf32>,
    %c4_144 = arith.constant 4 : index
    %c4_145 = arith.constant 4 : index
    %144 = memref.load %arg0[%c4_144, %c4_145] : memref<8x8xi32, #tpu.memory_space<smem>>
    %145 = arith.index_cast %144 : i32 to index
    %c0_146 = arith.constant 0 : index
    %146 = vector.load %arg1[%145, %c0_146] : memref<32x200xf32, #tpu.memory_space<vmem>>, vector<1x200xf32>
    %c36 = arith.constant 36 : index
    %c0_147 = arith.constant 0 : index
    %147 = vector.load %arg13[%c36, %c0_147] : memref<64x200xf32, #tpu.memory_space<vmem>>, vector<1x200xf32>
    tpu.vector_store %arg13[%c36, %c0_147], %146 {strides = array<i32>} : memref<64x200xf32, #tpu.memory_space<vmem>>, vector<1x200xf32>,
    %c5_148 = arith.constant 5 : index
    %c4_149 = arith.constant 4 : index
    %148 = memref.load %arg0[%c5_148, %c4_149] : memref<8x8xi32, #tpu.memory_space<smem>>
    %149 = arith.index_cast %148 : i32 to index
    %c0_150 = arith.constant 0 : index
    %150 = vector.load %arg1[%149, %c0_150] : memref<32x200xf32, #tpu.memory_space<vmem>>, vector<1x200xf32>
    %c37 = arith.constant 37 : index
    %c0_151 = arith.constant 0 : index
    %151 = vector.load %arg13[%c37, %c0_151] : memref<64x200xf32, #tpu.memory_space<vmem>>, vector<1x200xf32>
    tpu.vector_store %arg13[%c37, %c0_151], %150 {strides = array<i32>} : memref<64x200xf32, #tpu.memory_space<vmem>>, vector<1x200xf32>,
    %c6_152 = arith.constant 6 : index
    %c4_153 = arith.constant 4 : index
    %152 = memref.load %arg0[%c6_152, %c4_153] : memref<8x8xi32, #tpu.memory_space<smem>>
    %153 = arith.index_cast %152 : i32 to index
    %c0_154 = arith.constant 0 : index
    %154 = vector.load %arg1[%153, %c0_154] : memref<32x200xf32, #tpu.memory_space<vmem>>, vector<1x200xf32>
    %c38 = arith.constant 38 : index
    %c0_155 = arith.constant 0 : index
    %155 = vector.load %arg13[%c38, %c0_155] : memref<64x200xf32, #tpu.memory_space<vmem>>, vector<1x200xf32>
    tpu.vector_store %arg13[%c38, %c0_155], %154 {strides = array<i32>} : memref<64x200xf32, #tpu.memory_space<vmem>>, vector<1x200xf32>,
    %c7_156 = arith.constant 7 : index
    %c4_157 = arith.constant 4 : index
    %156 = memref.load %arg0[%c7_156, %c4_157] : memref<8x8xi32, #tpu.memory_space<smem>>
    %157 = arith.index_cast %156 : i32 to index
    %c0_158 = arith.constant 0 : index
    %158 = vector.load %arg1[%157, %c0_158] : memref<32x200xf32, #tpu.memory_space<vmem>>, vector<1x200xf32>
    %c39 = arith.constant 39 : index
    %c0_159 = arith.constant 0 : index
    %159 = vector.load %arg13[%c39, %c0_159] : memref<64x200xf32, #tpu.memory_space<vmem>>, vector<1x200xf32>
    tpu.vector_store %arg13[%c39, %c0_159], %158 {strides = array<i32>} : memref<64x200xf32, #tpu.memory_space<vmem>>, vector<1x200xf32>,
    %c0_160 = arith.constant 0 : index
    %c5_161 = arith.constant 5 : index
    %160 = memref.load %arg0[%c0_160, %c5_161] : memref<8x8xi32, #tpu.memory_space<smem>>
    %161 = arith.index_cast %160 : i32 to index
    %c0_162 = arith.constant 0 : index
    %162 = vector.load %arg1[%161, %c0_162] : memref<32x200xf32, #tpu.memory_space<vmem>>, vector<1x200xf32>
    %c40 = arith.constant 40 : index
    %c0_163 = arith.constant 0 : index
    %163 = vector.load %arg13[%c40, %c0_163] : memref<64x200xf32, #tpu.memory_space<vmem>>, vector<1x200xf32>
    tpu.vector_store %arg13[%c40, %c0_163], %162 {strides = array<i32>} : memref<64x200xf32, #tpu.memory_space<vmem>>, vector<1x200xf32>,
    %c1_164 = arith.constant 1 : index
    %c5_165 = arith.constant 5 : index
    %164 = memref.load %arg0[%c1_164, %c5_165] : memref<8x8xi32, #tpu.memory_space<smem>>
    %165 = arith.index_cast %164 : i32 to index
    %c0_166 = arith.constant 0 : index
    %166 = vector.load %arg1[%165, %c0_166] : memref<32x200xf32, #tpu.memory_space<vmem>>, vector<1x200xf32>
    %c41 = arith.constant 41 : index
    %c0_167 = arith.constant 0 : index
    %167 = vector.load %arg13[%c41, %c0_167] : memref<64x200xf32, #tpu.memory_space<vmem>>, vector<1x200xf32>
    tpu.vector_store %arg13[%c41, %c0_167], %166 {strides = array<i32>} : memref<64x200xf32, #tpu.memory_space<vmem>>, vector<1x200xf32>,
    %c2_168 = arith.constant 2 : index
    %c5_169 = arith.constant 5 : index
    %168 = memref.load %arg0[%c2_168, %c5_169] : memref<8x8xi32, #tpu.memory_space<smem>>
    %169 = arith.index_cast %168 : i32 to index
    %c0_170 = arith.constant 0 : index
    %170 = vector.load %arg1[%169, %c0_170] : memref<32x200xf32, #tpu.memory_space<vmem>>, vector<1x200xf32>
    %c42 = arith.constant 42 : index
    %c0_171 = arith.constant 0 : index
    %171 = vector.load %arg13[%c42, %c0_171] : memref<64x200xf32, #tpu.memory_space<vmem>>, vector<1x200xf32>
    tpu.vector_store %arg13[%c42, %c0_171], %170 {strides = array<i32>} : memref<64x200xf32, #tpu.memory_space<vmem>>, vector<1x200xf32>,
    %c3_172 = arith.constant 3 : index
    %c5_173 = arith.constant 5 : index
    %172 = memref.load %arg0[%c3_172, %c5_173] : memref<8x8xi32, #tpu.memory_space<smem>>
    %173 = arith.index_cast %172 : i32 to index
    %c0_174 = arith.constant 0 : index
    %174 = vector.load %arg1[%173, %c0_174] : memref<32x200xf32, #tpu.memory_space<vmem>>, vector<1x200xf32>
    %c43 = arith.constant 43 : index
    %c0_175 = arith.constant 0 : index
    %175 = vector.load %arg13[%c43, %c0_175] : memref<64x200xf32, #tpu.memory_space<vmem>>, vector<1x200xf32>
    tpu.vector_store %arg13[%c43, %c0_175], %174 {strides = array<i32>} : memref<64x200xf32, #tpu.memory_space<vmem>>, vector<1x200xf32>,
    %c4_176 = arith.constant 4 : index
    %c5_177 = arith.constant 5 : index
    %176 = memref.load %arg0[%c4_176, %c5_177] : memref<8x8xi32, #tpu.memory_space<smem>>
    %177 = arith.index_cast %176 : i32 to index
    %c0_178 = arith.constant 0 : index
    %178 = vector.load %arg1[%177, %c0_178] : memref<32x200xf32, #tpu.memory_space<vmem>>, vector<1x200xf32>
    %c44 = arith.constant 44 : index
    %c0_179 = arith.constant 0 : index
    %179 = vector.load %arg13[%c44, %c0_179] : memref<64x200xf32, #tpu.memory_space<vmem>>, vector<1x200xf32>
    tpu.vector_store %arg13[%c44, %c0_179], %178 {strides = array<i32>} : memref<64x200xf32, #tpu.memory_space<vmem>>, vector<1x200xf32>,
    %c5_180 = arith.constant 5 : index
    %c5_181 = arith.constant 5 : index
    %180 = memref.load %arg0[%c5_180, %c5_181] : memref<8x8xi32, #tpu.memory_space<smem>>
    %181 = arith.index_cast %180 : i32 to index
    %c0_182 = arith.constant 0 : index
    %182 = vector.load %arg1[%181, %c0_182] : memref<32x200xf32, #tpu.memory_space<vmem>>, vector<1x200xf32>
    %c45 = arith.constant 45 : index
    %c0_183 = arith.constant 0 : index
    %183 = vector.load %arg13[%c45, %c0_183] : memref<64x200xf32, #tpu.memory_space<vmem>>, vector<1x200xf32>
    tpu.vector_store %arg13[%c45, %c0_183], %182 {strides = array<i32>} : memref<64x200xf32, #tpu.memory_space<vmem>>, vector<1x200xf32>,
    %c6_184 = arith.constant 6 : index
    %c5_185 = arith.constant 5 : index
    %184 = memref.load %arg0[%c6_184, %c5_185] : memref<8x8xi32, #tpu.memory_space<smem>>
    %185 = arith.index_cast %184 : i32 to index
    %c0_186 = arith.constant 0 : index
    %186 = vector.load %arg1[%185, %c0_186] : memref<32x200xf32, #tpu.memory_space<vmem>>, vector<1x200xf32>
    %c46 = arith.constant 46 : index
    %c0_187 = arith.constant 0 : index
    %187 = vector.load %arg13[%c46, %c0_187] : memref<64x200xf32, #tpu.memory_space<vmem>>, vector<1x200xf32>
    tpu.vector_store %arg13[%c46, %c0_187], %186 {strides = array<i32>} : memref<64x200xf32, #tpu.memory_space<vmem>>, vector<1x200xf32>,
    %c7_188 = arith.constant 7 : index
    %c5_189 = arith.constant 5 : index
    %188 = memref.load %arg0[%c7_188, %c5_189] : memref<8x8xi32, #tpu.memory_space<smem>>
    %189 = arith.index_cast %188 : i32 to index
    %c0_190 = arith.constant 0 : index
    %190 = vector.load %arg1[%189, %c0_190] : memref<32x200xf32, #tpu.memory_space<vmem>>, vector<1x200xf32>
    %c47 = arith.constant 47 : index
    %c0_191 = arith.constant 0 : index
    %191 = vector.load %arg13[%c47, %c0_191] : memref<64x200xf32, #tpu.memory_space<vmem>>, vector<1x200xf32>
    tpu.vector_store %arg13[%c47, %c0_191], %190 {strides = array<i32>} : memref<64x200xf32, #tpu.memory_space<vmem>>, vector<1x200xf32>,
    %c0_192 = arith.constant 0 : index
    %c6_193 = arith.constant 6 : index
    %192 = memref.load %arg0[%c0_192, %c6_193] : memref<8x8xi32, #tpu.memory_space<smem>>
    %193 = arith.index_cast %192 : i32 to index
    %c0_194 = arith.constant 0 : index
    %194 = vector.load %arg1[%193, %c0_194] : memref<32x200xf32, #tpu.memory_space<vmem>>, vector<1x200xf32>
    %c48 = arith.constant 48 : index
    %c0_195 = arith.constant 0 : index
    %195 = vector.load %arg13[%c48, %c0_195] : memref<64x200xf32, #tpu.memory_space<vmem>>, vector<1x200xf32>
    tpu.vector_store %arg13[%c48, %c0_195], %194 {strides = array<i32>} : memref<64x200xf32, #tpu.memory_space<vmem>>, vector<1x200xf32>,
    %c1_196 = arith.constant 1 : index
    %c6_197 = arith.constant 6 : index
    %196 = memref.load %arg0[%c1_196, %c6_197] : memref<8x8xi32, #tpu.memory_space<smem>>
    %197 = arith.index_cast %196 : i32 to index
    %c0_198 = arith.constant 0 : index
    %198 = vector.load %arg1[%197, %c0_198] : memref<32x200xf32, #tpu.memory_space<vmem>>, vector<1x200xf32>
    %c49 = arith.constant 49 : index
    %c0_199 = arith.constant 0 : index
    %199 = vector.load %arg13[%c49, %c0_199] : memref<64x200xf32, #tpu.memory_space<vmem>>, vector<1x200xf32>
    tpu.vector_store %arg13[%c49, %c0_199], %198 {strides = array<i32>} : memref<64x200xf32, #tpu.memory_space<vmem>>, vector<1x200xf32>,
    %c2_200 = arith.constant 2 : index
    %c6_201 = arith.constant 6 : index
    %200 = memref.load %arg0[%c2_200, %c6_201] : memref<8x8xi32, #tpu.memory_space<smem>>
    %201 = arith.index_cast %200 : i32 to index
    %c0_202 = arith.constant 0 : index
    %202 = vector.load %arg1[%201, %c0_202] : memref<32x200xf32, #tpu.memory_space<vmem>>, vector<1x200xf32>
    %c50 = arith.constant 50 : index
    %c0_203 = arith.constant 0 : index
    %203 = vector.load %arg13[%c50, %c0_203] : memref<64x200xf32, #tpu.memory_space<vmem>>, vector<1x200xf32>
    tpu.vector_store %arg13[%c50, %c0_203], %202 {strides = array<i32>} : memref<64x200xf32, #tpu.memory_space<vmem>>, vector<1x200xf32>,
    %c3_204 = arith.constant 3 : index
    %c6_205 = arith.constant 6 : index
    %204 = memref.load %arg0[%c3_204, %c6_205] : memref<8x8xi32, #tpu.memory_space<smem>>
    %205 = arith.index_cast %204 : i32 to index
    %c0_206 = arith.constant 0 : index
    %206 = vector.load %arg1[%205, %c0_206] : memref<32x200xf32, #tpu.memory_space<vmem>>, vector<1x200xf32>
    %c51 = arith.constant 51 : index
    %c0_207 = arith.constant 0 : index
    %207 = vector.load %arg13[%c51, %c0_207] : memref<64x200xf32, #tpu.memory_space<vmem>>, vector<1x200xf32>
    tpu.vector_store %arg13[%c51, %c0_207], %206 {strides = array<i32>} : memref<64x200xf32, #tpu.memory_space<vmem>>, vector<1x200xf32>,
    %c4_208 = arith.constant 4 : index
    %c6_209 = arith.constant 6 : index
    %208 = memref.load %arg0[%c4_208, %c6_209] : memref<8x8xi32, #tpu.memory_space<smem>>
    %209 = arith.index_cast %208 : i32 to index
    %c0_210 = arith.constant 0 : index
    %210 = vector.load %arg1[%209, %c0_210] : memref<32x200xf32, #tpu.memory_space<vmem>>, vector<1x200xf32>
    %c52 = arith.constant 52 : index
    %c0_211 = arith.constant 0 : index
    %211 = vector.load %arg13[%c52, %c0_211] : memref<64x200xf32, #tpu.memory_space<vmem>>, vector<1x200xf32>
    tpu.vector_store %arg13[%c52, %c0_211], %210 {strides = array<i32>} : memref<64x200xf32, #tpu.memory_space<vmem>>, vector<1x200xf32>,
    %c5_212 = arith.constant 5 : index
    %c6_213 = arith.constant 6 : index
    %212 = memref.load %arg0[%c5_212, %c6_213] : memref<8x8xi32, #tpu.memory_space<smem>>
    %213 = arith.index_cast %212 : i32 to index
    %c0_214 = arith.constant 0 : index
    %214 = vector.load %arg1[%213, %c0_214] : memref<32x200xf32, #tpu.memory_space<vmem>>, vector<1x200xf32>
    %c53 = arith.constant 53 : index
    %c0_215 = arith.constant 0 : index
    %215 = vector.load %arg13[%c53, %c0_215] : memref<64x200xf32, #tpu.memory_space<vmem>>, vector<1x200xf32>
    tpu.vector_store %arg13[%c53, %c0_215], %214 {strides = array<i32>} : memref<64x200xf32, #tpu.memory_space<vmem>>, vector<1x200xf32>,
    %c6_216 = arith.constant 6 : index
    %c6_217 = arith.constant 6 : index
    %216 = memref.load %arg0[%c6_216, %c6_217] : memref<8x8xi32, #tpu.memory_space<smem>>
    %217 = arith.index_cast %216 : i32 to index
    %c0_218 = arith.constant 0 : index
    %218 = vector.load %arg1[%217, %c0_218] : memref<32x200xf32, #tpu.memory_space<vmem>>, vector<1x200xf32>
    %c54 = arith.constant 54 : index
    %c0_219 = arith.constant 0 : index
    %219 = vector.load %arg13[%c54, %c0_219] : memref<64x200xf32, #tpu.memory_space<vmem>>, vector<1x200xf32>
    tpu.vector_store %arg13[%c54, %c0_219], %218 {strides = array<i32>} : memref<64x200xf32, #tpu.memory_space<vmem>>, vector<1x200xf32>,
    %c7_220 = arith.constant 7 : index
    %c6_221 = arith.constant 6 : index
    %220 = memref.load %arg0[%c7_220, %c6_221] : memref<8x8xi32, #tpu.memory_space<smem>>
    %221 = arith.index_cast %220 : i32 to index
    %c0_222 = arith.constant 0 : index
    %222 = vector.load %arg1[%221, %c0_222] : memref<32x200xf32, #tpu.memory_space<vmem>>, vector<1x200xf32>
    %c55 = arith.constant 55 : index
    %c0_223 = arith.constant 0 : index
    %223 = vector.load %arg13[%c55, %c0_223] : memref<64x200xf32, #tpu.memory_space<vmem>>, vector<1x200xf32>
    tpu.vector_store %arg13[%c55, %c0_223], %222 {strides = array<i32>} : memref<64x200xf32, #tpu.memory_space<vmem>>, vector<1x200xf32>,
    %c0_224 = arith.constant 0 : index
    %c7_225 = arith.constant 7 : index
    %224 = memref.load %arg0[%c0_224, %c7_225] : memref<8x8xi32, #tpu.memory_space<smem>>
    %225 = arith.index_cast %224 : i32 to index
    %c0_226 = arith.constant 0 : index
    %226 = vector.load %arg1[%225, %c0_226] : memref<32x200xf32, #tpu.memory_space<vmem>>, vector<1x200xf32>
    %c56 = arith.constant 56 : index
    %c0_227 = arith.constant 0 : index
    %227 = vector.load %arg13[%c56, %c0_227] : memref<64x200xf32, #tpu.memory_space<vmem>>, vector<1x200xf32>
    tpu.vector_store %arg13[%c56, %c0_227], %226 {strides = array<i32>} : memref<64x200xf32, #tpu.memory_space<vmem>>, vector<1x200xf32>,
    %c1_228 = arith.constant 1 : index
    %c7_229 = arith.constant 7 : index
    %228 = memref.load %arg0[%c1_228, %c7_229] : memref<8x8xi32, #tpu.memory_space<smem>>
    %229 = arith.index_cast %228 : i32 to index
    %c0_230 = arith.constant 0 : index
    %230 = vector.load %arg1[%229, %c0_230] : memref<32x200xf32, #tpu.memory_space<vmem>>, vector<1x200xf32>
    %c57 = arith.constant 57 : index
    %c0_231 = arith.constant 0 : index
    %231 = vector.load %arg13[%c57, %c0_231] : memref<64x200xf32, #tpu.memory_space<vmem>>, vector<1x200xf32>
    tpu.vector_store %arg13[%c57, %c0_231], %230 {strides = array<i32>} : memref<64x200xf32, #tpu.memory_space<vmem>>, vector<1x200xf32>,
    %c2_232 = arith.constant 2 : index
    %c7_233 = arith.constant 7 : index
    %232 = memref.load %arg0[%c2_232, %c7_233] : memref<8x8xi32, #tpu.memory_space<smem>>
    %233 = arith.index_cast %232 : i32 to index
    %c0_234 = arith.constant 0 : index
    %234 = vector.load %arg1[%233, %c0_234] : memref<32x200xf32, #tpu.memory_space<vmem>>, vector<1x200xf32>
    %c58 = arith.constant 58 : index
    %c0_235 = arith.constant 0 : index
    %235 = vector.load %arg13[%c58, %c0_235] : memref<64x200xf32, #tpu.memory_space<vmem>>, vector<1x200xf32>
    tpu.vector_store %arg13[%c58, %c0_235], %234 {strides = array<i32>} : memref<64x200xf32, #tpu.memory_space<vmem>>, vector<1x200xf32>,
    %c3_236 = arith.constant 3 : index
    %c7_237 = arith.constant 7 : index
    %236 = memref.load %arg0[%c3_236, %c7_237] : memref<8x8xi32, #tpu.memory_space<smem>>
    %237 = arith.index_cast %236 : i32 to index
    %c0_238 = arith.constant 0 : index
    %238 = vector.load %arg1[%237, %c0_238] : memref<32x200xf32, #tpu.memory_space<vmem>>, vector<1x200xf32>
    %c59 = arith.constant 59 : index
    %c0_239 = arith.constant 0 : index
    %239 = vector.load %arg13[%c59, %c0_239] : memref<64x200xf32, #tpu.memory_space<vmem>>, vector<1x200xf32>
    tpu.vector_store %arg13[%c59, %c0_239], %238 {strides = array<i32>} : memref<64x200xf32, #tpu.memory_space<vmem>>, vector<1x200xf32>,
    %c4_240 = arith.constant 4 : index
    %c7_241 = arith.constant 7 : index
    %240 = memref.load %arg0[%c4_240, %c7_241] : memref<8x8xi32, #tpu.memory_space<smem>>
    %241 = arith.index_cast %240 : i32 to index
    %c0_242 = arith.constant 0 : index
    %242 = vector.load %arg1[%241, %c0_242] : memref<32x200xf32, #tpu.memory_space<vmem>>, vector<1x200xf32>
    %c60 = arith.constant 60 : index
    %c0_243 = arith.constant 0 : index
    %243 = vector.load %arg13[%c60, %c0_243] : memref<64x200xf32, #tpu.memory_space<vmem>>, vector<1x200xf32>
    tpu.vector_store %arg13[%c60, %c0_243], %242 {strides = array<i32>} : memref<64x200xf32, #tpu.memory_space<vmem>>, vector<1x200xf32>,
    %c5_244 = arith.constant 5 : index
    %c7_245 = arith.constant 7 : index
    %244 = memref.load %arg0[%c5_244, %c7_245] : memref<8x8xi32, #tpu.memory_space<smem>>
    %245 = arith.index_cast %244 : i32 to index
    %c0_246 = arith.constant 0 : index
    %246 = vector.load %arg1[%245, %c0_246] : memref<32x200xf32, #tpu.memory_space<vmem>>, vector<1x200xf32>
    %c61 = arith.constant 61 : index
    %c0_247 = arith.constant 0 : index
    %247 = vector.load %arg13[%c61, %c0_247] : memref<64x200xf32, #tpu.memory_space<vmem>>, vector<1x200xf32>
    tpu.vector_store %arg13[%c61, %c0_247], %246 {strides = array<i32>} : memref<64x200xf32, #tpu.memory_space<vmem>>, vector<1x200xf32>,
    %c6_248 = arith.constant 6 : index
    %c7_249 = arith.constant 7 : index
    %248 = memref.load %arg0[%c6_248, %c7_249] : memref<8x8xi32, #tpu.memory_space<smem>>
    %249 = arith.index_cast %248 : i32 to index
    %c0_250 = arith.constant 0 : index
    %250 = vector.load %arg1[%249, %c0_250] : memref<32x200xf32, #tpu.memory_space<vmem>>, vector<1x200xf32>
    %c62 = arith.constant 62 : index
    %c0_251 = arith.constant 0 : index
    %251 = vector.load %arg13[%c62, %c0_251] : memref<64x200xf32, #tpu.memory_space<vmem>>, vector<1x200xf32>
    tpu.vector_store %arg13[%c62, %c0_251], %250 {strides = array<i32>} : memref<64x200xf32, #tpu.memory_space<vmem>>, vector<1x200xf32>,
    %c7_252 = arith.constant 7 : index
    %c7_253 = arith.constant 7 : index
    %252 = memref.load %arg0[%c7_252, %c7_253] : memref<8x8xi32, #tpu.memory_space<smem>>
    %253 = arith.index_cast %252 : i32 to index
    %c0_254 = arith.constant 0 : index
    %254 = vector.load %arg1[%253, %c0_254] : memref<32x200xf32, #tpu.memory_space<vmem>>, vector<1x200xf32>
    %c63 = arith.constant 63 : index
    %c0_255 = arith.constant 0 : index
    %255 = vector.load %arg13[%c63, %c0_255] : memref<64x200xf32, #tpu.memory_space<vmem>>, vector<1x200xf32>
    tpu.vector_store %arg13[%c63, %c0_255], %254 {strides = array<i32>} : memref<64x200xf32, #tpu.memory_space<vmem>>, vector<1x200xf32>,
    %256 = tpu.iota {dimensions = array<i32: 1>} : vector<8x128xi32>
    %c64_i32 = arith.constant 64 : i32
    %257 = vector.broadcast %c64_i32 : i32 to vector<8x128xi32>
    %258 = arith.cmpi sge, %256, %257 : vector<8x128xi32>
    %c96_i32 = arith.constant 96 : i32
    %259 = vector.broadcast %c96_i32 : i32 to vector<8x128xi32>
    %260 = arith.cmpi slt, %256, %259 : vector<8x128xi32>
    %261 = arith.andi %258, %260 : vector<8x128xi1>
    %c0_256 = arith.constant 0 : index
    %c0_257 = arith.constant 0 : index
    %262 = vector.load %arg13[%c0_256, %c0_257] : memref<64x200xf32, #tpu.memory_space<vmem>>, vector<64x200xf32>
    %c0_258 = arith.constant 0 : index
    %c0_259 = arith.constant 0 : index
    %263 = vector.load %arg4[%c0_258, %c0_259] : memref<200x128xf32, #tpu.memory_space<vmem>>, vector<200x128xf32>
    %cst = arith.constant dense<0.000000e+00> : vector<64x128xf32>
    %264 = tpu.matmul %262, %263, %cst {dimension_numbers = #tpu.dot_dimension_numbers<[1], [0], [0], [1], [0, 0, 1, 1], [], []>} : vector<64x200xf32>, vector<200x128xf32>, vector<64x128xf32> -> vector<64x128xf32>
    %c0_260 = arith.constant 0 : index
    %c0_261 = arith.constant 0 : index
    %c0_262 = arith.constant 0 : index
    %265 = vector.load %arg7[%c0_260, %c0_261, %c0_262] : memref<4x1x128xf32, #tpu.memory_space<vmem>>, vector<1x1x128xf32>
    %266 = vector.shape_cast %265 : vector<1x1x128xf32> to vector<1x128xf32>
    %267 = vector.broadcast %266 : vector<1x128xf32> to vector<64x128xf32>
    %268 = arith.addf %264, %267 : vector<64x128xf32>
    %c0_263 = arith.constant 0 : index
    %c0_264 = arith.constant 0 : index
    %269 = vector.load %arg14[%c0_263, %c0_264] : memref<64x128xf32, #tpu.memory_space<vmem>>, vector<64x128xf32>
    tpu.vector_store %arg14[%c0_263, %c0_264], %268 {strides = array<i32>} : memref<64x128xf32, #tpu.memory_space<vmem>>, vector<64x128xf32>,
    %c0_265 = arith.constant 0 : index
    %c0_266 = arith.constant 0 : index
    %c0_267 = arith.constant 0 : index
    %270 = vector.load %arg6[%c0_265, %c0_266, %c0_267] : memref<4x128x128xf32, #tpu.memory_space<vmem>>, vector<1x128x128xf32>
    %271 = vector.shape_cast %270 : vector<1x128x128xf32> to vector<128x128xf32>
    %c0_268 = arith.constant 0 : index
    %c0_269 = arith.constant 0 : index
    %c0_270 = arith.constant 0 : index
    %272 = vector.load %arg2[%c0_268, %c0_269, %c0_270] : memref<4x8x128xf32, #tpu.memory_space<vmem>>, vector<1x8x128xf32>
    %273 = vector.shape_cast %272 : vector<1x8x128xf32> to vector<8x128xf32>
    %c0_271 = arith.constant 0 : index
    %c0_272 = arith.constant 0 : index
    %c0_273 = arith.constant 0 : index
    %274 = vector.load %arg3[%c0_271, %c0_272, %c0_273] : memref<4x8x128xf32, #tpu.memory_space<vmem>>, vector<1x8x128xf32>
    %275 = vector.shape_cast %274 : vector<1x8x128xf32> to vector<8x128xf32>
    %c0_274 = arith.constant 0 : index
    %c0_275 = arith.constant 0 : index
    %276 = vector.load %arg14[%c0_274, %c0_275] : memref<64x128xf32, #tpu.memory_space<vmem>>, vector<8x128xf32>
    %cst_276 = arith.constant dense<0.000000e+00> : vector<8x128xf32>
    %277 = tpu.matmul %273, %271, %cst_276 {dimension_numbers = #tpu.dot_dimension_numbers<[1], [0], [0], [1], [0, 0, 1, 1], [], []>} : vector<8x128xf32>, vector<128x128xf32>, vector<8x128xf32> -> vector<8x128xf32>
    %278 = arith.addf %276, %277 : vector<8x128xf32>
    %279 = math.tanh %278 : vector<8x128xf32>
    %280 = arith.negf %278 : vector<8x128xf32>
    %281 = math.exp %280 : vector<8x128xf32>
    %cst_277 = arith.constant 1.000000e+00 : f32
    %282 = vector.broadcast %cst_277 : f32 to vector<8x128xf32>
    %283 = arith.addf %282, %281 : vector<8x128xf32>
    %284 = arith.divf %282, %283 : vector<8x128xf32>
    %285 = arith.select %261, %279, %284 : vector<8x128xi1>, vector<8x128xf32>
    %c96_i32_278 = arith.constant 96 : i32
    %286 = tpu.dynamic_rotate %285 by %c96_i32_278 dim 1 : vector<8x128xf32>, i32 -> vector<8x128xf32>
    %c64_i32_279 = arith.constant 64 : i32
    %287 = tpu.dynamic_rotate %285 by %c64_i32_279 dim 1 : vector<8x128xf32>, i32 -> vector<8x128xf32>
    %c32_i32 = arith.constant 32 : i32
    %288 = tpu.dynamic_rotate %285 by %c32_i32 dim 1 : vector<8x128xf32>, i32 -> vector<8x128xf32>
    %289 = arith.mulf %286, %275 : vector<8x128xf32>
    %290 = arith.mulf %285, %287 : vector<8x128xf32>
    %291 = arith.addf %289, %290 : vector<8x128xf32>
    %292 = math.tanh %291 : vector<8x128xf32>
    %293 = arith.mulf %288, %292 : vector<8x128xf32>
    %c0_280 = arith.constant 0 : index
    %c0_281 = arith.constant 0 : index
    %294 = vector.load %arg15[%c0_280, %c0_281] : memref<64x128xf32, #tpu.memory_space<vmem>>, vector<8x128xf32>
    tpu.vector_store %arg15[%c0_280, %c0_281], %293 {strides = array<i32>} : memref<64x128xf32, #tpu.memory_space<vmem>>, vector<8x128xf32>,
    %c8_282 = arith.constant 8 : index
    %c0_283 = arith.constant 0 : index
    %295 = vector.load %arg14[%c8_282, %c0_283] : memref<64x128xf32, #tpu.memory_space<vmem>>, vector<8x128xf32>
    %cst_284 = arith.constant dense<0.000000e+00> : vector<8x128xf32>
    %296 = tpu.matmul %293, %271, %cst_284 {dimension_numbers = #tpu.dot_dimension_numbers<[1], [0], [0], [1], [0, 0, 1, 1], [], []>} : vector<8x128xf32>, vector<128x128xf32>, vector<8x128xf32> -> vector<8x128xf32>
    %297 = arith.addf %295, %296 : vector<8x128xf32>
    %298 = math.tanh %297 : vector<8x128xf32>
    %299 = arith.negf %297 : vector<8x128xf32>
    %300 = math.exp %299 : vector<8x128xf32>
    %cst_285 = arith.constant 1.000000e+00 : f32
    %301 = vector.broadcast %cst_285 : f32 to vector<8x128xf32>
    %302 = arith.addf %301, %300 : vector<8x128xf32>
    %303 = arith.divf %301, %302 : vector<8x128xf32>
    %304 = arith.select %261, %298, %303 : vector<8x128xi1>, vector<8x128xf32>
    %c96_i32_286 = arith.constant 96 : i32
    %305 = tpu.dynamic_rotate %304 by %c96_i32_286 dim 1 : vector<8x128xf32>, i32 -> vector<8x128xf32>
    %c64_i32_287 = arith.constant 64 : i32
    %306 = tpu.dynamic_rotate %304 by %c64_i32_287 dim 1 : vector<8x128xf32>, i32 -> vector<8x128xf32>
    %c32_i32_288 = arith.constant 32 : i32
    %307 = tpu.dynamic_rotate %304 by %c32_i32_288 dim 1 : vector<8x128xf32>, i32 -> vector<8x128xf32>
    %308 = arith.mulf %305, %291 : vector<8x128xf32>
    %309 = arith.mulf %304, %306 : vector<8x128xf32>
    %310 = arith.addf %308, %309 : vector<8x128xf32>
    %311 = math.tanh %310 : vector<8x128xf32>
    %312 = arith.mulf %307, %311 : vector<8x128xf32>
    %c8_289 = arith.constant 8 : index
    %c0_290 = arith.constant 0 : index
    %313 = vector.load %arg15[%c8_289, %c0_290] : memref<64x128xf32, #tpu.memory_space<vmem>>, vector<8x128xf32>
    tpu.vector_store %arg15[%c8_289, %c0_290], %312 {strides = array<i32>} : memref<64x128xf32, #tpu.memory_space<vmem>>, vector<8x128xf32>,
    %c16_291 = arith.constant 16 : index
    %c0_292 = arith.constant 0 : index
    %314 = vector.load %arg14[%c16_291, %c0_292] : memref<64x128xf32, #tpu.memory_space<vmem>>, vector<8x128xf32>
    %cst_293 = arith.constant dense<0.000000e+00> : vector<8x128xf32>
    %315 = tpu.matmul %312, %271, %cst_293 {dimension_numbers = #tpu.dot_dimension_numbers<[1], [0], [0], [1], [0, 0, 1, 1], [], []>} : vector<8x128xf32>, vector<128x128xf32>, vector<8x128xf32> -> vector<8x128xf32>
    %316 = arith.addf %314, %315 : vector<8x128xf32>
    %317 = math.tanh %316 : vector<8x128xf32>
    %318 = arith.negf %316 : vector<8x128xf32>
    %319 = math.exp %318 : vector<8x128xf32>
    %cst_294 = arith.constant 1.000000e+00 : f32
    %320 = vector.broadcast %cst_294 : f32 to vector<8x128xf32>
    %321 = arith.addf %320, %319 : vector<8x128xf32>
    %322 = arith.divf %320, %321 : vector<8x128xf32>
    %323 = arith.select %261, %317, %322 : vector<8x128xi1>, vector<8x128xf32>
    %c96_i32_295 = arith.constant 96 : i32
    %324 = tpu.dynamic_rotate %323 by %c96_i32_295 dim 1 : vector<8x128xf32>, i32 -> vector<8x128xf32>
    %c64_i32_296 = arith.constant 64 : i32
    %325 = tpu.dynamic_rotate %323 by %c64_i32_296 dim 1 : vector<8x128xf32>, i32 -> vector<8x128xf32>
    %c32_i32_297 = arith.constant 32 : i32
    %326 = tpu.dynamic_rotate %323 by %c32_i32_297 dim 1 : vector<8x128xf32>, i32 -> vector<8x128xf32>
    %327 = arith.mulf %324, %310 : vector<8x128xf32>
    %328 = arith.mulf %323, %325 : vector<8x128xf32>
    %329 = arith.addf %327, %328 : vector<8x128xf32>
    %330 = math.tanh %329 : vector<8x128xf32>
    %331 = arith.mulf %326, %330 : vector<8x128xf32>
    %c16_298 = arith.constant 16 : index
    %c0_299 = arith.constant 0 : index
    %332 = vector.load %arg15[%c16_298, %c0_299] : memref<64x128xf32, #tpu.memory_space<vmem>>, vector<8x128xf32>
    tpu.vector_store %arg15[%c16_298, %c0_299], %331 {strides = array<i32>} : memref<64x128xf32, #tpu.memory_space<vmem>>, vector<8x128xf32>,
    %c24_300 = arith.constant 24 : index
    %c0_301 = arith.constant 0 : index
    %333 = vector.load %arg14[%c24_300, %c0_301] : memref<64x128xf32, #tpu.memory_space<vmem>>, vector<8x128xf32>
    %cst_302 = arith.constant dense<0.000000e+00> : vector<8x128xf32>
    %334 = tpu.matmul %331, %271, %cst_302 {dimension_numbers = #tpu.dot_dimension_numbers<[1], [0], [0], [1], [0, 0, 1, 1], [], []>} : vector<8x128xf32>, vector<128x128xf32>, vector<8x128xf32> -> vector<8x128xf32>
    %335 = arith.addf %333, %334 : vector<8x128xf32>
    %336 = math.tanh %335 : vector<8x128xf32>
    %337 = arith.negf %335 : vector<8x128xf32>
    %338 = math.exp %337 : vector<8x128xf32>
    %cst_303 = arith.constant 1.000000e+00 : f32
    %339 = vector.broadcast %cst_303 : f32 to vector<8x128xf32>
    %340 = arith.addf %339, %338 : vector<8x128xf32>
    %341 = arith.divf %339, %340 : vector<8x128xf32>
    %342 = arith.select %261, %336, %341 : vector<8x128xi1>, vector<8x128xf32>
    %c96_i32_304 = arith.constant 96 : i32
    %343 = tpu.dynamic_rotate %342 by %c96_i32_304 dim 1 : vector<8x128xf32>, i32 -> vector<8x128xf32>
    %c64_i32_305 = arith.constant 64 : i32
    %344 = tpu.dynamic_rotate %342 by %c64_i32_305 dim 1 : vector<8x128xf32>, i32 -> vector<8x128xf32>
    %c32_i32_306 = arith.constant 32 : i32
    %345 = tpu.dynamic_rotate %342 by %c32_i32_306 dim 1 : vector<8x128xf32>, i32 -> vector<8x128xf32>
    %346 = arith.mulf %343, %329 : vector<8x128xf32>
    %347 = arith.mulf %342, %344 : vector<8x128xf32>
    %348 = arith.addf %346, %347 : vector<8x128xf32>
    %349 = math.tanh %348 : vector<8x128xf32>
    %350 = arith.mulf %345, %349 : vector<8x128xf32>
    %c24_307 = arith.constant 24 : index
    %c0_308 = arith.constant 0 : index
    %351 = vector.load %arg15[%c24_307, %c0_308] : memref<64x128xf32, #tpu.memory_space<vmem>>, vector<8x128xf32>
    tpu.vector_store %arg15[%c24_307, %c0_308], %350 {strides = array<i32>} : memref<64x128xf32, #tpu.memory_space<vmem>>, vector<8x128xf32>,
    %c32_309 = arith.constant 32 : index
    %c0_310 = arith.constant 0 : index
    %352 = vector.load %arg14[%c32_309, %c0_310] : memref<64x128xf32, #tpu.memory_space<vmem>>, vector<8x128xf32>
    %cst_311 = arith.constant dense<0.000000e+00> : vector<8x128xf32>
    %353 = tpu.matmul %350, %271, %cst_311 {dimension_numbers = #tpu.dot_dimension_numbers<[1], [0], [0], [1], [0, 0, 1, 1], [], []>} : vector<8x128xf32>, vector<128x128xf32>, vector<8x128xf32> -> vector<8x128xf32>
    %354 = arith.addf %352, %353 : vector<8x128xf32>
    %355 = math.tanh %354 : vector<8x128xf32>
    %356 = arith.negf %354 : vector<8x128xf32>
    %357 = math.exp %356 : vector<8x128xf32>
    %cst_312 = arith.constant 1.000000e+00 : f32
    %358 = vector.broadcast %cst_312 : f32 to vector<8x128xf32>
    %359 = arith.addf %358, %357 : vector<8x128xf32>
    %360 = arith.divf %358, %359 : vector<8x128xf32>
    %361 = arith.select %261, %355, %360 : vector<8x128xi1>, vector<8x128xf32>
    %c96_i32_313 = arith.constant 96 : i32
    %362 = tpu.dynamic_rotate %361 by %c96_i32_313 dim 1 : vector<8x128xf32>, i32 -> vector<8x128xf32>
    %c64_i32_314 = arith.constant 64 : i32
    %363 = tpu.dynamic_rotate %361 by %c64_i32_314 dim 1 : vector<8x128xf32>, i32 -> vector<8x128xf32>
    %c32_i32_315 = arith.constant 32 : i32
    %364 = tpu.dynamic_rotate %361 by %c32_i32_315 dim 1 : vector<8x128xf32>, i32 -> vector<8x128xf32>
    %365 = arith.mulf %362, %348 : vector<8x128xf32>
    %366 = arith.mulf %361, %363 : vector<8x128xf32>
    %367 = arith.addf %365, %366 : vector<8x128xf32>
    %368 = math.tanh %367 : vector<8x128xf32>
    %369 = arith.mulf %364, %368 : vector<8x128xf32>
    %c32_316 = arith.constant 32 : index
    %c0_317 = arith.constant 0 : index
    %370 = vector.load %arg15[%c32_316, %c0_317] : memref<64x128xf32, #tpu.memory_space<vmem>>, vector<8x128xf32>
    tpu.vector_store %arg15[%c32_316, %c0_317], %369 {strides = array<i32>} : memref<64x128xf32, #tpu.memory_space<vmem>>, vector<8x128xf32>,
    %c40_318 = arith.constant 40 : index
    %c0_319 = arith.constant 0 : index
    %371 = vector.load %arg14[%c40_318, %c0_319] : memref<64x128xf32, #tpu.memory_space<vmem>>, vector<8x128xf32>
    %cst_320 = arith.constant dense<0.000000e+00> : vector<8x128xf32>
    %372 = tpu.matmul %369, %271, %cst_320 {dimension_numbers = #tpu.dot_dimension_numbers<[1], [0], [0], [1], [0, 0, 1, 1], [], []>} : vector<8x128xf32>, vector<128x128xf32>, vector<8x128xf32> -> vector<8x128xf32>
    %373 = arith.addf %371, %372 : vector<8x128xf32>
    %374 = math.tanh %373 : vector<8x128xf32>
    %375 = arith.negf %373 : vector<8x128xf32>
    %376 = math.exp %375 : vector<8x128xf32>
    %cst_321 = arith.constant 1.000000e+00 : f32
    %377 = vector.broadcast %cst_321 : f32 to vector<8x128xf32>
    %378 = arith.addf %377, %376 : vector<8x128xf32>
    %379 = arith.divf %377, %378 : vector<8x128xf32>
    %380 = arith.select %261, %374, %379 : vector<8x128xi1>, vector<8x128xf32>
    %c96_i32_322 = arith.constant 96 : i32
    %381 = tpu.dynamic_rotate %380 by %c96_i32_322 dim 1 : vector<8x128xf32>, i32 -> vector<8x128xf32>
    %c64_i32_323 = arith.constant 64 : i32
    %382 = tpu.dynamic_rotate %380 by %c64_i32_323 dim 1 : vector<8x128xf32>, i32 -> vector<8x128xf32>
    %c32_i32_324 = arith.constant 32 : i32
    %383 = tpu.dynamic_rotate %380 by %c32_i32_324 dim 1 : vector<8x128xf32>, i32 -> vector<8x128xf32>
    %384 = arith.mulf %381, %367 : vector<8x128xf32>
    %385 = arith.mulf %380, %382 : vector<8x128xf32>
    %386 = arith.addf %384, %385 : vector<8x128xf32>
    %387 = math.tanh %386 : vector<8x128xf32>
    %388 = arith.mulf %383, %387 : vector<8x128xf32>
    %c40_325 = arith.constant 40 : index
    %c0_326 = arith.constant 0 : index
    %389 = vector.load %arg15[%c40_325, %c0_326] : memref<64x128xf32, #tpu.memory_space<vmem>>, vector<8x128xf32>
    tpu.vector_store %arg15[%c40_325, %c0_326], %388 {strides = array<i32>} : memref<64x128xf32, #tpu.memory_space<vmem>>, vector<8x128xf32>,
    %c48_327 = arith.constant 48 : index
    %c0_328 = arith.constant 0 : index
    %390 = vector.load %arg14[%c48_327, %c0_328] : memref<64x128xf32, #tpu.memory_space<vmem>>, vector<8x128xf32>
    %cst_329 = arith.constant dense<0.000000e+00> : vector<8x128xf32>
    %391 = tpu.matmul %388, %271, %cst_329 {dimension_numbers = #tpu.dot_dimension_numbers<[1], [0], [0], [1], [0, 0, 1, 1], [], []>} : vector<8x128xf32>, vector<128x128xf32>, vector<8x128xf32> -> vector<8x128xf32>
    %392 = arith.addf %390, %391 : vector<8x128xf32>
    %393 = math.tanh %392 : vector<8x128xf32>
    %394 = arith.negf %392 : vector<8x128xf32>
    %395 = math.exp %394 : vector<8x128xf32>
    %cst_330 = arith.constant 1.000000e+00 : f32
    %396 = vector.broadcast %cst_330 : f32 to vector<8x128xf32>
    %397 = arith.addf %396, %395 : vector<8x128xf32>
    %398 = arith.divf %396, %397 : vector<8x128xf32>
    %399 = arith.select %261, %393, %398 : vector<8x128xi1>, vector<8x128xf32>
    %c96_i32_331 = arith.constant 96 : i32
    %400 = tpu.dynamic_rotate %399 by %c96_i32_331 dim 1 : vector<8x128xf32>, i32 -> vector<8x128xf32>
    %c64_i32_332 = arith.constant 64 : i32
    %401 = tpu.dynamic_rotate %399 by %c64_i32_332 dim 1 : vector<8x128xf32>, i32 -> vector<8x128xf32>
    %c32_i32_333 = arith.constant 32 : i32
    %402 = tpu.dynamic_rotate %399 by %c32_i32_333 dim 1 : vector<8x128xf32>, i32 -> vector<8x128xf32>
    %403 = arith.mulf %400, %386 : vector<8x128xf32>
    %404 = arith.mulf %399, %401 : vector<8x128xf32>
    %405 = arith.addf %403, %404 : vector<8x128xf32>
    %406 = math.tanh %405 : vector<8x128xf32>
    %407 = arith.mulf %402, %406 : vector<8x128xf32>
    %c48_334 = arith.constant 48 : index
    %c0_335 = arith.constant 0 : index
    %408 = vector.load %arg15[%c48_334, %c0_335] : memref<64x128xf32, #tpu.memory_space<vmem>>, vector<8x128xf32>
    tpu.vector_store %arg15[%c48_334, %c0_335], %407 {strides = array<i32>} : memref<64x128xf32, #tpu.memory_space<vmem>>, vector<8x128xf32>,
    %c56_336 = arith.constant 56 : index
    %c0_337 = arith.constant 0 : index
    %409 = vector.load %arg14[%c56_336, %c0_337] : memref<64x128xf32, #tpu.memory_space<vmem>>, vector<8x128xf32>
    %cst_338 = arith.constant dense<0.000000e+00> : vector<8x128xf32>
    %410 = tpu.matmul %407, %271, %cst_338 {dimension_numbers = #tpu.dot_dimension_numbers<[1], [0], [0], [1], [0, 0, 1, 1], [], []>} : vector<8x128xf32>, vector<128x128xf32>, vector<8x128xf32> -> vector<8x128xf32>
    %411 = arith.addf %409, %410 : vector<8x128xf32>
    %412 = math.tanh %411 : vector<8x128xf32>
    %413 = arith.negf %411 : vector<8x128xf32>
    %414 = math.exp %413 : vector<8x128xf32>
    %cst_339 = arith.constant 1.000000e+00 : f32
    %415 = vector.broadcast %cst_339 : f32 to vector<8x128xf32>
    %416 = arith.addf %415, %414 : vector<8x128xf32>
    %417 = arith.divf %415, %416 : vector<8x128xf32>
    %418 = arith.select %261, %412, %417 : vector<8x128xi1>, vector<8x128xf32>
    %c96_i32_340 = arith.constant 96 : i32
    %419 = tpu.dynamic_rotate %418 by %c96_i32_340 dim 1 : vector<8x128xf32>, i32 -> vector<8x128xf32>
    %c64_i32_341 = arith.constant 64 : i32
    %420 = tpu.dynamic_rotate %418 by %c64_i32_341 dim 1 : vector<8x128xf32>, i32 -> vector<8x128xf32>
    %c32_i32_342 = arith.constant 32 : i32
    %421 = tpu.dynamic_rotate %418 by %c32_i32_342 dim 1 : vector<8x128xf32>, i32 -> vector<8x128xf32>
    %422 = arith.mulf %419, %405 : vector<8x128xf32>
    %423 = arith.mulf %418, %420 : vector<8x128xf32>
    %424 = arith.addf %422, %423 : vector<8x128xf32>
    %425 = math.tanh %424 : vector<8x128xf32>
    %426 = arith.mulf %421, %425 : vector<8x128xf32>
    %c56_343 = arith.constant 56 : index
    %c0_344 = arith.constant 0 : index
    %427 = vector.load %arg15[%c56_343, %c0_344] : memref<64x128xf32, #tpu.memory_space<vmem>>, vector<8x128xf32>
    tpu.vector_store %arg15[%c56_343, %c0_344], %426 {strides = array<i32>} : memref<64x128xf32, #tpu.memory_space<vmem>>, vector<8x128xf32>,
    %c0_345 = arith.constant 0 : index
    %c0_346 = arith.constant 0 : index
    %c0_347 = arith.constant 0 : index
    %428 = vector.load %arg11[%c0_345, %c0_346, %c0_347] : memref<4x8x128xf32, #tpu.memory_space<vmem>>, vector<1x8x128xf32>
    %429 = vector.shape_cast %428 : vector<1x8x128xf32> to vector<8x128xf32>
    %430 = vector.shape_cast %426 : vector<8x128xf32> to vector<1x8x128xf32>
    tpu.vector_store %arg11[%c0_345, %c0_346, %c0_347], %430 {strides = array<i32>} : memref<4x8x128xf32, #tpu.memory_space<vmem>>, vector<1x8x128xf32>,
    %c0_348 = arith.constant 0 : index
    %c0_349 = arith.constant 0 : index
    %c0_350 = arith.constant 0 : index
    %431 = vector.load %arg12[%c0_348, %c0_349, %c0_350] : memref<4x8x128xf32, #tpu.memory_space<vmem>>, vector<1x8x128xf32>
    %432 = vector.shape_cast %431 : vector<1x8x128xf32> to vector<8x128xf32>
    %433 = vector.shape_cast %424 : vector<8x128xf32> to vector<1x8x128xf32>
    tpu.vector_store %arg12[%c0_348, %c0_349, %c0_350], %433 {strides = array<i32>} : memref<4x8x128xf32, #tpu.memory_space<vmem>>, vector<1x8x128xf32>,
    %c0_351 = arith.constant 0 : index
    %c0_352 = arith.constant 0 : index
    %434 = vector.load %arg15[%c0_351, %c0_352] : memref<64x128xf32, #tpu.memory_space<vmem>>, vector<64x128xf32>
    %c0_353 = arith.constant 0 : index
    %c0_354 = arith.constant 0 : index
    %c0_355 = arith.constant 0 : index
    %435 = vector.load %arg5[%c0_353, %c0_354, %c0_355] : memref<3x128x128xf32, #tpu.memory_space<vmem>>, vector<1x128x128xf32>
    %436 = vector.shape_cast %435 : vector<1x128x128xf32> to vector<128x128xf32>
    %cst_356 = arith.constant dense<0.000000e+00> : vector<64x128xf32>
    %437 = tpu.matmul %434, %436, %cst_356 {dimension_numbers = #tpu.dot_dimension_numbers<[1], [0], [0], [1], [0, 0, 1, 1], [], []>} : vector<64x128xf32>, vector<128x128xf32>, vector<64x128xf32> -> vector<64x128xf32>
    %c1_357 = arith.constant 1 : index
    %c0_358 = arith.constant 0 : index
    %c0_359 = arith.constant 0 : index
    %438 = vector.load %arg7[%c1_357, %c0_358, %c0_359] : memref<4x1x128xf32, #tpu.memory_space<vmem>>, vector<1x1x128xf32>
    %439 = vector.shape_cast %438 : vector<1x1x128xf32> to vector<1x128xf32>
    %440 = vector.broadcast %439 : vector<1x128xf32> to vector<64x128xf32>
    %441 = arith.addf %437, %440 : vector<64x128xf32>
    %c0_360 = arith.constant 0 : index
    %c0_361 = arith.constant 0 : index
    %442 = vector.load %arg14[%c0_360, %c0_361] : memref<64x128xf32, #tpu.memory_space<vmem>>, vector<64x128xf32>
    tpu.vector_store %arg14[%c0_360, %c0_361], %441 {strides = array<i32>} : memref<64x128xf32, #tpu.memory_space<vmem>>, vector<64x128xf32>,
    %c1_362 = arith.constant 1 : index
    %c0_363 = arith.constant 0 : index
    %c0_364 = arith.constant 0 : index
    %443 = vector.load %arg6[%c1_362, %c0_363, %c0_364] : memref<4x128x128xf32, #tpu.memory_space<vmem>>, vector<1x128x128xf32>
    %444 = vector.shape_cast %443 : vector<1x128x128xf32> to vector<128x128xf32>
    %c1_365 = arith.constant 1 : index
    %c0_366 = arith.constant 0 : index
    %c0_367 = arith.constant 0 : index
    %445 = vector.load %arg2[%c1_365, %c0_366, %c0_367] : memref<4x8x128xf32, #tpu.memory_space<vmem>>, vector<1x8x128xf32>
    %446 = vector.shape_cast %445 : vector<1x8x128xf32> to vector<8x128xf32>
    %c1_368 = arith.constant 1 : index
    %c0_369 = arith.constant 0 : index
    %c0_370 = arith.constant 0 : index
    %447 = vector.load %arg3[%c1_368, %c0_369, %c0_370] : memref<4x8x128xf32, #tpu.memory_space<vmem>>, vector<1x8x128xf32>
    %448 = vector.shape_cast %447 : vector<1x8x128xf32> to vector<8x128xf32>
    %c0_371 = arith.constant 0 : index
    %c0_372 = arith.constant 0 : index
    %449 = vector.load %arg14[%c0_371, %c0_372] : memref<64x128xf32, #tpu.memory_space<vmem>>, vector<8x128xf32>
    %cst_373 = arith.constant dense<0.000000e+00> : vector<8x128xf32>
    %450 = tpu.matmul %446, %444, %cst_373 {dimension_numbers = #tpu.dot_dimension_numbers<[1], [0], [0], [1], [0, 0, 1, 1], [], []>} : vector<8x128xf32>, vector<128x128xf32>, vector<8x128xf32> -> vector<8x128xf32>
    %451 = arith.addf %449, %450 : vector<8x128xf32>
    %452 = math.tanh %451 : vector<8x128xf32>
    %453 = arith.negf %451 : vector<8x128xf32>
    %454 = math.exp %453 : vector<8x128xf32>
    %cst_374 = arith.constant 1.000000e+00 : f32
    %455 = vector.broadcast %cst_374 : f32 to vector<8x128xf32>
    %456 = arith.addf %455, %454 : vector<8x128xf32>
    %457 = arith.divf %455, %456 : vector<8x128xf32>
    %458 = arith.select %261, %452, %457 : vector<8x128xi1>, vector<8x128xf32>
    %c96_i32_375 = arith.constant 96 : i32
    %459 = tpu.dynamic_rotate %458 by %c96_i32_375 dim 1 : vector<8x128xf32>, i32 -> vector<8x128xf32>
    %c64_i32_376 = arith.constant 64 : i32
    %460 = tpu.dynamic_rotate %458 by %c64_i32_376 dim 1 : vector<8x128xf32>, i32 -> vector<8x128xf32>
    %c32_i32_377 = arith.constant 32 : i32
    %461 = tpu.dynamic_rotate %458 by %c32_i32_377 dim 1 : vector<8x128xf32>, i32 -> vector<8x128xf32>
    %462 = arith.mulf %459, %448 : vector<8x128xf32>
    %463 = arith.mulf %458, %460 : vector<8x128xf32>
    %464 = arith.addf %462, %463 : vector<8x128xf32>
    %465 = math.tanh %464 : vector<8x128xf32>
    %466 = arith.mulf %461, %465 : vector<8x128xf32>
    %c0_378 = arith.constant 0 : index
    %c0_379 = arith.constant 0 : index
    %467 = vector.load %arg15[%c0_378, %c0_379] : memref<64x128xf32, #tpu.memory_space<vmem>>, vector<8x128xf32>
    tpu.vector_store %arg15[%c0_378, %c0_379], %466 {strides = array<i32>} : memref<64x128xf32, #tpu.memory_space<vmem>>, vector<8x128xf32>,
    %c8_380 = arith.constant 8 : index
    %c0_381 = arith.constant 0 : index
    %468 = vector.load %arg14[%c8_380, %c0_381] : memref<64x128xf32, #tpu.memory_space<vmem>>, vector<8x128xf32>
    %cst_382 = arith.constant dense<0.000000e+00> : vector<8x128xf32>
    %469 = tpu.matmul %466, %444, %cst_382 {dimension_numbers = #tpu.dot_dimension_numbers<[1], [0], [0], [1], [0, 0, 1, 1], [], []>} : vector<8x128xf32>, vector<128x128xf32>, vector<8x128xf32> -> vector<8x128xf32>
    %470 = arith.addf %468, %469 : vector<8x128xf32>
    %471 = math.tanh %470 : vector<8x128xf32>
    %472 = arith.negf %470 : vector<8x128xf32>
    %473 = math.exp %472 : vector<8x128xf32>
    %cst_383 = arith.constant 1.000000e+00 : f32
    %474 = vector.broadcast %cst_383 : f32 to vector<8x128xf32>
    %475 = arith.addf %474, %473 : vector<8x128xf32>
    %476 = arith.divf %474, %475 : vector<8x128xf32>
    %477 = arith.select %261, %471, %476 : vector<8x128xi1>, vector<8x128xf32>
    %c96_i32_384 = arith.constant 96 : i32
    %478 = tpu.dynamic_rotate %477 by %c96_i32_384 dim 1 : vector<8x128xf32>, i32 -> vector<8x128xf32>
    %c64_i32_385 = arith.constant 64 : i32
    %479 = tpu.dynamic_rotate %477 by %c64_i32_385 dim 1 : vector<8x128xf32>, i32 -> vector<8x128xf32>
    %c32_i32_386 = arith.constant 32 : i32
    %480 = tpu.dynamic_rotate %477 by %c32_i32_386 dim 1 : vector<8x128xf32>, i32 -> vector<8x128xf32>
    %481 = arith.mulf %478, %464 : vector<8x128xf32>
    %482 = arith.mulf %477, %479 : vector<8x128xf32>
    %483 = arith.addf %481, %482 : vector<8x128xf32>
    %484 = math.tanh %483 : vector<8x128xf32>
    %485 = arith.mulf %480, %484 : vector<8x128xf32>
    %c8_387 = arith.constant 8 : index
    %c0_388 = arith.constant 0 : index
    %486 = vector.load %arg15[%c8_387, %c0_388] : memref<64x128xf32, #tpu.memory_space<vmem>>, vector<8x128xf32>
    tpu.vector_store %arg15[%c8_387, %c0_388], %485 {strides = array<i32>} : memref<64x128xf32, #tpu.memory_space<vmem>>, vector<8x128xf32>,
    %c16_389 = arith.constant 16 : index
    %c0_390 = arith.constant 0 : index
    %487 = vector.load %arg14[%c16_389, %c0_390] : memref<64x128xf32, #tpu.memory_space<vmem>>, vector<8x128xf32>
    %cst_391 = arith.constant dense<0.000000e+00> : vector<8x128xf32>
    %488 = tpu.matmul %485, %444, %cst_391 {dimension_numbers = #tpu.dot_dimension_numbers<[1], [0], [0], [1], [0, 0, 1, 1], [], []>} : vector<8x128xf32>, vector<128x128xf32>, vector<8x128xf32> -> vector<8x128xf32>
    %489 = arith.addf %487, %488 : vector<8x128xf32>
    %490 = math.tanh %489 : vector<8x128xf32>
    %491 = arith.negf %489 : vector<8x128xf32>
    %492 = math.exp %491 : vector<8x128xf32>
    %cst_392 = arith.constant 1.000000e+00 : f32
    %493 = vector.broadcast %cst_392 : f32 to vector<8x128xf32>
    %494 = arith.addf %493, %492 : vector<8x128xf32>
    %495 = arith.divf %493, %494 : vector<8x128xf32>
    %496 = arith.select %261, %490, %495 : vector<8x128xi1>, vector<8x128xf32>
    %c96_i32_393 = arith.constant 96 : i32
    %497 = tpu.dynamic_rotate %496 by %c96_i32_393 dim 1 : vector<8x128xf32>, i32 -> vector<8x128xf32>
    %c64_i32_394 = arith.constant 64 : i32
    %498 = tpu.dynamic_rotate %496 by %c64_i32_394 dim 1 : vector<8x128xf32>, i32 -> vector<8x128xf32>
    %c32_i32_395 = arith.constant 32 : i32
    %499 = tpu.dynamic_rotate %496 by %c32_i32_395 dim 1 : vector<8x128xf32>, i32 -> vector<8x128xf32>
    %500 = arith.mulf %497, %483 : vector<8x128xf32>
    %501 = arith.mulf %496, %498 : vector<8x128xf32>
    %502 = arith.addf %500, %501 : vector<8x128xf32>
    %503 = math.tanh %502 : vector<8x128xf32>
    %504 = arith.mulf %499, %503 : vector<8x128xf32>
    %c16_396 = arith.constant 16 : index
    %c0_397 = arith.constant 0 : index
    %505 = vector.load %arg15[%c16_396, %c0_397] : memref<64x128xf32, #tpu.memory_space<vmem>>, vector<8x128xf32>
    tpu.vector_store %arg15[%c16_396, %c0_397], %504 {strides = array<i32>} : memref<64x128xf32, #tpu.memory_space<vmem>>, vector<8x128xf32>,
    %c24_398 = arith.constant 24 : index
    %c0_399 = arith.constant 0 : index
    %506 = vector.load %arg14[%c24_398, %c0_399] : memref<64x128xf32, #tpu.memory_space<vmem>>, vector<8x128xf32>
    %cst_400 = arith.constant dense<0.000000e+00> : vector<8x128xf32>
    %507 = tpu.matmul %504, %444, %cst_400 {dimension_numbers = #tpu.dot_dimension_numbers<[1], [0], [0], [1], [0, 0, 1, 1], [], []>} : vector<8x128xf32>, vector<128x128xf32>, vector<8x128xf32> -> vector<8x128xf32>
    %508 = arith.addf %506, %507 : vector<8x128xf32>
    %509 = math.tanh %508 : vector<8x128xf32>
    %510 = arith.negf %508 : vector<8x128xf32>
    %511 = math.exp %510 : vector<8x128xf32>
    %cst_401 = arith.constant 1.000000e+00 : f32
    %512 = vector.broadcast %cst_401 : f32 to vector<8x128xf32>
    %513 = arith.addf %512, %511 : vector<8x128xf32>
    %514 = arith.divf %512, %513 : vector<8x128xf32>
    %515 = arith.select %261, %509, %514 : vector<8x128xi1>, vector<8x128xf32>
    %c96_i32_402 = arith.constant 96 : i32
    %516 = tpu.dynamic_rotate %515 by %c96_i32_402 dim 1 : vector<8x128xf32>, i32 -> vector<8x128xf32>
    %c64_i32_403 = arith.constant 64 : i32
    %517 = tpu.dynamic_rotate %515 by %c64_i32_403 dim 1 : vector<8x128xf32>, i32 -> vector<8x128xf32>
    %c32_i32_404 = arith.constant 32 : i32
    %518 = tpu.dynamic_rotate %515 by %c32_i32_404 dim 1 : vector<8x128xf32>, i32 -> vector<8x128xf32>
    %519 = arith.mulf %516, %502 : vector<8x128xf32>
    %520 = arith.mulf %515, %517 : vector<8x128xf32>
    %521 = arith.addf %519, %520 : vector<8x128xf32>
    %522 = math.tanh %521 : vector<8x128xf32>
    %523 = arith.mulf %518, %522 : vector<8x128xf32>
    %c24_405 = arith.constant 24 : index
    %c0_406 = arith.constant 0 : index
    %524 = vector.load %arg15[%c24_405, %c0_406] : memref<64x128xf32, #tpu.memory_space<vmem>>, vector<8x128xf32>
    tpu.vector_store %arg15[%c24_405, %c0_406], %523 {strides = array<i32>} : memref<64x128xf32, #tpu.memory_space<vmem>>, vector<8x128xf32>,
    %c32_407 = arith.constant 32 : index
    %c0_408 = arith.constant 0 : index
    %525 = vector.load %arg14[%c32_407, %c0_408] : memref<64x128xf32, #tpu.memory_space<vmem>>, vector<8x128xf32>
    %cst_409 = arith.constant dense<0.000000e+00> : vector<8x128xf32>
    %526 = tpu.matmul %523, %444, %cst_409 {dimension_numbers = #tpu.dot_dimension_numbers<[1], [0], [0], [1], [0, 0, 1, 1], [], []>} : vector<8x128xf32>, vector<128x128xf32>, vector<8x128xf32> -> vector<8x128xf32>
    %527 = arith.addf %525, %526 : vector<8x128xf32>
    %528 = math.tanh %527 : vector<8x128xf32>
    %529 = arith.negf %527 : vector<8x128xf32>
    %530 = math.exp %529 : vector<8x128xf32>
    %cst_410 = arith.constant 1.000000e+00 : f32
    %531 = vector.broadcast %cst_410 : f32 to vector<8x128xf32>
    %532 = arith.addf %531, %530 : vector<8x128xf32>
    %533 = arith.divf %531, %532 : vector<8x128xf32>
    %534 = arith.select %261, %528, %533 : vector<8x128xi1>, vector<8x128xf32>
    %c96_i32_411 = arith.constant 96 : i32
    %535 = tpu.dynamic_rotate %534 by %c96_i32_411 dim 1 : vector<8x128xf32>, i32 -> vector<8x128xf32>
    %c64_i32_412 = arith.constant 64 : i32
    %536 = tpu.dynamic_rotate %534 by %c64_i32_412 dim 1 : vector<8x128xf32>, i32 -> vector<8x128xf32>
    %c32_i32_413 = arith.constant 32 : i32
    %537 = tpu.dynamic_rotate %534 by %c32_i32_413 dim 1 : vector<8x128xf32>, i32 -> vector<8x128xf32>
    %538 = arith.mulf %535, %521 : vector<8x128xf32>
    %539 = arith.mulf %534, %536 : vector<8x128xf32>
    %540 = arith.addf %538, %539 : vector<8x128xf32>
    %541 = math.tanh %540 : vector<8x128xf32>
    %542 = arith.mulf %537, %541 : vector<8x128xf32>
    %c32_414 = arith.constant 32 : index
    %c0_415 = arith.constant 0 : index
    %543 = vector.load %arg15[%c32_414, %c0_415] : memref<64x128xf32, #tpu.memory_space<vmem>>, vector<8x128xf32>
    tpu.vector_store %arg15[%c32_414, %c0_415], %542 {strides = array<i32>} : memref<64x128xf32, #tpu.memory_space<vmem>>, vector<8x128xf32>,
    %c40_416 = arith.constant 40 : index
    %c0_417 = arith.constant 0 : index
    %544 = vector.load %arg14[%c40_416, %c0_417] : memref<64x128xf32, #tpu.memory_space<vmem>>, vector<8x128xf32>
    %cst_418 = arith.constant dense<0.000000e+00> : vector<8x128xf32>
    %545 = tpu.matmul %542, %444, %cst_418 {dimension_numbers = #tpu.dot_dimension_numbers<[1], [0], [0], [1], [0, 0, 1, 1], [], []>} : vector<8x128xf32>, vector<128x128xf32>, vector<8x128xf32> -> vector<8x128xf32>
    %546 = arith.addf %544, %545 : vector<8x128xf32>
    %547 = math.tanh %546 : vector<8x128xf32>
    %548 = arith.negf %546 : vector<8x128xf32>
    %549 = math.exp %548 : vector<8x128xf32>
    %cst_419 = arith.constant 1.000000e+00 : f32
    %550 = vector.broadcast %cst_419 : f32 to vector<8x128xf32>
    %551 = arith.addf %550, %549 : vector<8x128xf32>
    %552 = arith.divf %550, %551 : vector<8x128xf32>
    %553 = arith.select %261, %547, %552 : vector<8x128xi1>, vector<8x128xf32>
    %c96_i32_420 = arith.constant 96 : i32
    %554 = tpu.dynamic_rotate %553 by %c96_i32_420 dim 1 : vector<8x128xf32>, i32 -> vector<8x128xf32>
    %c64_i32_421 = arith.constant 64 : i32
    %555 = tpu.dynamic_rotate %553 by %c64_i32_421 dim 1 : vector<8x128xf32>, i32 -> vector<8x128xf32>
    %c32_i32_422 = arith.constant 32 : i32
    %556 = tpu.dynamic_rotate %553 by %c32_i32_422 dim 1 : vector<8x128xf32>, i32 -> vector<8x128xf32>
    %557 = arith.mulf %554, %540 : vector<8x128xf32>
    %558 = arith.mulf %553, %555 : vector<8x128xf32>
    %559 = arith.addf %557, %558 : vector<8x128xf32>
    %560 = math.tanh %559 : vector<8x128xf32>
    %561 = arith.mulf %556, %560 : vector<8x128xf32>
    %c40_423 = arith.constant 40 : index
    %c0_424 = arith.constant 0 : index
    %562 = vector.load %arg15[%c40_423, %c0_424] : memref<64x128xf32, #tpu.memory_space<vmem>>, vector<8x128xf32>
    tpu.vector_store %arg15[%c40_423, %c0_424], %561 {strides = array<i32>} : memref<64x128xf32, #tpu.memory_space<vmem>>, vector<8x128xf32>,
    %c48_425 = arith.constant 48 : index
    %c0_426 = arith.constant 0 : index
    %563 = vector.load %arg14[%c48_425, %c0_426] : memref<64x128xf32, #tpu.memory_space<vmem>>, vector<8x128xf32>
    %cst_427 = arith.constant dense<0.000000e+00> : vector<8x128xf32>
    %564 = tpu.matmul %561, %444, %cst_427 {dimension_numbers = #tpu.dot_dimension_numbers<[1], [0], [0], [1], [0, 0, 1, 1], [], []>} : vector<8x128xf32>, vector<128x128xf32>, vector<8x128xf32> -> vector<8x128xf32>
    %565 = arith.addf %563, %564 : vector<8x128xf32>
    %566 = math.tanh %565 : vector<8x128xf32>
    %567 = arith.negf %565 : vector<8x128xf32>
    %568 = math.exp %567 : vector<8x128xf32>
    %cst_428 = arith.constant 1.000000e+00 : f32
    %569 = vector.broadcast %cst_428 : f32 to vector<8x128xf32>
    %570 = arith.addf %569, %568 : vector<8x128xf32>
    %571 = arith.divf %569, %570 : vector<8x128xf32>
    %572 = arith.select %261, %566, %571 : vector<8x128xi1>, vector<8x128xf32>
    %c96_i32_429 = arith.constant 96 : i32
    %573 = tpu.dynamic_rotate %572 by %c96_i32_429 dim 1 : vector<8x128xf32>, i32 -> vector<8x128xf32>
    %c64_i32_430 = arith.constant 64 : i32
    %574 = tpu.dynamic_rotate %572 by %c64_i32_430 dim 1 : vector<8x128xf32>, i32 -> vector<8x128xf32>
    %c32_i32_431 = arith.constant 32 : i32
    %575 = tpu.dynamic_rotate %572 by %c32_i32_431 dim 1 : vector<8x128xf32>, i32 -> vector<8x128xf32>
    %576 = arith.mulf %573, %559 : vector<8x128xf32>
    %577 = arith.mulf %572, %574 : vector<8x128xf32>
    %578 = arith.addf %576, %577 : vector<8x128xf32>
    %579 = math.tanh %578 : vector<8x128xf32>
    %580 = arith.mulf %575, %579 : vector<8x128xf32>
    %c48_432 = arith.constant 48 : index
    %c0_433 = arith.constant 0 : index
    %581 = vector.load %arg15[%c48_432, %c0_433] : memref<64x128xf32, #tpu.memory_space<vmem>>, vector<8x128xf32>
    tpu.vector_store %arg15[%c48_432, %c0_433], %580 {strides = array<i32>} : memref<64x128xf32, #tpu.memory_space<vmem>>, vector<8x128xf32>,
    %c56_434 = arith.constant 56 : index
    %c0_435 = arith.constant 0 : index
    %582 = vector.load %arg14[%c56_434, %c0_435] : memref<64x128xf32, #tpu.memory_space<vmem>>, vector<8x128xf32>
    %cst_436 = arith.constant dense<0.000000e+00> : vector<8x128xf32>
    %583 = tpu.matmul %580, %444, %cst_436 {dimension_numbers = #tpu.dot_dimension_numbers<[1], [0], [0], [1], [0, 0, 1, 1], [], []>} : vector<8x128xf32>, vector<128x128xf32>, vector<8x128xf32> -> vector<8x128xf32>
    %584 = arith.addf %582, %583 : vector<8x128xf32>
    %585 = math.tanh %584 : vector<8x128xf32>
    %586 = arith.negf %584 : vector<8x128xf32>
    %587 = math.exp %586 : vector<8x128xf32>
    %cst_437 = arith.constant 1.000000e+00 : f32
    %588 = vector.broadcast %cst_437 : f32 to vector<8x128xf32>
    %589 = arith.addf %588, %587 : vector<8x128xf32>
    %590 = arith.divf %588, %589 : vector<8x128xf32>
    %591 = arith.select %261, %585, %590 : vector<8x128xi1>, vector<8x128xf32>
    %c96_i32_438 = arith.constant 96 : i32
    %592 = tpu.dynamic_rotate %591 by %c96_i32_438 dim 1 : vector<8x128xf32>, i32 -> vector<8x128xf32>
    %c64_i32_439 = arith.constant 64 : i32
    %593 = tpu.dynamic_rotate %591 by %c64_i32_439 dim 1 : vector<8x128xf32>, i32 -> vector<8x128xf32>
    %c32_i32_440 = arith.constant 32 : i32
    %594 = tpu.dynamic_rotate %591 by %c32_i32_440 dim 1 : vector<8x128xf32>, i32 -> vector<8x128xf32>
    %595 = arith.mulf %592, %578 : vector<8x128xf32>
    %596 = arith.mulf %591, %593 : vector<8x128xf32>
    %597 = arith.addf %595, %596 : vector<8x128xf32>
    %598 = math.tanh %597 : vector<8x128xf32>
    %599 = arith.mulf %594, %598 : vector<8x128xf32>
    %c56_441 = arith.constant 56 : index
    %c0_442 = arith.constant 0 : index
    %600 = vector.load %arg15[%c56_441, %c0_442] : memref<64x128xf32, #tpu.memory_space<vmem>>, vector<8x128xf32>
    tpu.vector_store %arg15[%c56_441, %c0_442], %599 {strides = array<i32>} : memref<64x128xf32, #tpu.memory_space<vmem>>, vector<8x128xf32>,
    %c1_443 = arith.constant 1 : index
    %c0_444 = arith.constant 0 : index
    %c0_445 = arith.constant 0 : index
    %601 = vector.load %arg11[%c1_443, %c0_444, %c0_445] : memref<4x8x128xf32, #tpu.memory_space<vmem>>, vector<1x8x128xf32>
    %602 = vector.shape_cast %601 : vector<1x8x128xf32> to vector<8x128xf32>
    %603 = vector.shape_cast %599 : vector<8x128xf32> to vector<1x8x128xf32>
    tpu.vector_store %arg11[%c1_443, %c0_444, %c0_445], %603 {strides = array<i32>} : memref<4x8x128xf32, #tpu.memory_space<vmem>>, vector<1x8x128xf32>,
    %c1_446 = arith.constant 1 : index
    %c0_447 = arith.constant 0 : index
    %c0_448 = arith.constant 0 : index
    %604 = vector.load %arg12[%c1_446, %c0_447, %c0_448] : memref<4x8x128xf32, #tpu.memory_space<vmem>>, vector<1x8x128xf32>
    %605 = vector.shape_cast %604 : vector<1x8x128xf32> to vector<8x128xf32>
    %606 = vector.shape_cast %597 : vector<8x128xf32> to vector<1x8x128xf32>
    tpu.vector_store %arg12[%c1_446, %c0_447, %c0_448], %606 {strides = array<i32>} : memref<4x8x128xf32, #tpu.memory_space<vmem>>, vector<1x8x128xf32>,
    %c0_449 = arith.constant 0 : index
    %c0_450 = arith.constant 0 : index
    %607 = vector.load %arg15[%c0_449, %c0_450] : memref<64x128xf32, #tpu.memory_space<vmem>>, vector<64x128xf32>
    %c1_451 = arith.constant 1 : index
    %c0_452 = arith.constant 0 : index
    %c0_453 = arith.constant 0 : index
    %608 = vector.load %arg5[%c1_451, %c0_452, %c0_453] : memref<3x128x128xf32, #tpu.memory_space<vmem>>, vector<1x128x128xf32>
    %609 = vector.shape_cast %608 : vector<1x128x128xf32> to vector<128x128xf32>
    %cst_454 = arith.constant dense<0.000000e+00> : vector<64x128xf32>
    %610 = tpu.matmul %607, %609, %cst_454 {dimension_numbers = #tpu.dot_dimension_numbers<[1], [0], [0], [1], [0, 0, 1, 1], [], []>} : vector<64x128xf32>, vector<128x128xf32>, vector<64x128xf32> -> vector<64x128xf32>
    %c2_455 = arith.constant 2 : index
    %c0_456 = arith.constant 0 : index
    %c0_457 = arith.constant 0 : index
    %611 = vector.load %arg7[%c2_455, %c0_456, %c0_457] : memref<4x1x128xf32, #tpu.memory_space<vmem>>, vector<1x1x128xf32>
    %612 = vector.shape_cast %611 : vector<1x1x128xf32> to vector<1x128xf32>
    %613 = vector.broadcast %612 : vector<1x128xf32> to vector<64x128xf32>
    %614 = arith.addf %610, %613 : vector<64x128xf32>
    %c0_458 = arith.constant 0 : index
    %c0_459 = arith.constant 0 : index
    %615 = vector.load %arg14[%c0_458, %c0_459] : memref<64x128xf32, #tpu.memory_space<vmem>>, vector<64x128xf32>
    tpu.vector_store %arg14[%c0_458, %c0_459], %614 {strides = array<i32>} : memref<64x128xf32, #tpu.memory_space<vmem>>, vector<64x128xf32>,
    %c2_460 = arith.constant 2 : index
    %c0_461 = arith.constant 0 : index
    %c0_462 = arith.constant 0 : index
    %616 = vector.load %arg6[%c2_460, %c0_461, %c0_462] : memref<4x128x128xf32, #tpu.memory_space<vmem>>, vector<1x128x128xf32>
    %617 = vector.shape_cast %616 : vector<1x128x128xf32> to vector<128x128xf32>
    %c2_463 = arith.constant 2 : index
    %c0_464 = arith.constant 0 : index
    %c0_465 = arith.constant 0 : index
    %618 = vector.load %arg2[%c2_463, %c0_464, %c0_465] : memref<4x8x128xf32, #tpu.memory_space<vmem>>, vector<1x8x128xf32>
    %619 = vector.shape_cast %618 : vector<1x8x128xf32> to vector<8x128xf32>
    %c2_466 = arith.constant 2 : index
    %c0_467 = arith.constant 0 : index
    %c0_468 = arith.constant 0 : index
    %620 = vector.load %arg3[%c2_466, %c0_467, %c0_468] : memref<4x8x128xf32, #tpu.memory_space<vmem>>, vector<1x8x128xf32>
    %621 = vector.shape_cast %620 : vector<1x8x128xf32> to vector<8x128xf32>
    %c0_469 = arith.constant 0 : index
    %c0_470 = arith.constant 0 : index
    %622 = vector.load %arg14[%c0_469, %c0_470] : memref<64x128xf32, #tpu.memory_space<vmem>>, vector<8x128xf32>
    %cst_471 = arith.constant dense<0.000000e+00> : vector<8x128xf32>
    %623 = tpu.matmul %619, %617, %cst_471 {dimension_numbers = #tpu.dot_dimension_numbers<[1], [0], [0], [1], [0, 0, 1, 1], [], []>} : vector<8x128xf32>, vector<128x128xf32>, vector<8x128xf32> -> vector<8x128xf32>
    %624 = arith.addf %622, %623 : vector<8x128xf32>
    %625 = math.tanh %624 : vector<8x128xf32>
    %626 = arith.negf %624 : vector<8x128xf32>
    %627 = math.exp %626 : vector<8x128xf32>
    %cst_472 = arith.constant 1.000000e+00 : f32
    %628 = vector.broadcast %cst_472 : f32 to vector<8x128xf32>
    %629 = arith.addf %628, %627 : vector<8x128xf32>
    %630 = arith.divf %628, %629 : vector<8x128xf32>
    %631 = arith.select %261, %625, %630 : vector<8x128xi1>, vector<8x128xf32>
    %c96_i32_473 = arith.constant 96 : i32
    %632 = tpu.dynamic_rotate %631 by %c96_i32_473 dim 1 : vector<8x128xf32>, i32 -> vector<8x128xf32>
    %c64_i32_474 = arith.constant 64 : i32
    %633 = tpu.dynamic_rotate %631 by %c64_i32_474 dim 1 : vector<8x128xf32>, i32 -> vector<8x128xf32>
    %c32_i32_475 = arith.constant 32 : i32
    %634 = tpu.dynamic_rotate %631 by %c32_i32_475 dim 1 : vector<8x128xf32>, i32 -> vector<8x128xf32>
    %635 = arith.mulf %632, %621 : vector<8x128xf32>
    %636 = arith.mulf %631, %633 : vector<8x128xf32>
    %637 = arith.addf %635, %636 : vector<8x128xf32>
    %638 = math.tanh %637 : vector<8x128xf32>
    %639 = arith.mulf %634, %638 : vector<8x128xf32>
    %c0_476 = arith.constant 0 : index
    %c0_477 = arith.constant 0 : index
    %640 = vector.load %arg15[%c0_476, %c0_477] : memref<64x128xf32, #tpu.memory_space<vmem>>, vector<8x128xf32>
    tpu.vector_store %arg15[%c0_476, %c0_477], %639 {strides = array<i32>} : memref<64x128xf32, #tpu.memory_space<vmem>>, vector<8x128xf32>,
    %c8_478 = arith.constant 8 : index
    %c0_479 = arith.constant 0 : index
    %641 = vector.load %arg14[%c8_478, %c0_479] : memref<64x128xf32, #tpu.memory_space<vmem>>, vector<8x128xf32>
    %cst_480 = arith.constant dense<0.000000e+00> : vector<8x128xf32>
    %642 = tpu.matmul %639, %617, %cst_480 {dimension_numbers = #tpu.dot_dimension_numbers<[1], [0], [0], [1], [0, 0, 1, 1], [], []>} : vector<8x128xf32>, vector<128x128xf32>, vector<8x128xf32> -> vector<8x128xf32>
    %643 = arith.addf %641, %642 : vector<8x128xf32>
    %644 = math.tanh %643 : vector<8x128xf32>
    %645 = arith.negf %643 : vector<8x128xf32>
    %646 = math.exp %645 : vector<8x128xf32>
    %cst_481 = arith.constant 1.000000e+00 : f32
    %647 = vector.broadcast %cst_481 : f32 to vector<8x128xf32>
    %648 = arith.addf %647, %646 : vector<8x128xf32>
    %649 = arith.divf %647, %648 : vector<8x128xf32>
    %650 = arith.select %261, %644, %649 : vector<8x128xi1>, vector<8x128xf32>
    %c96_i32_482 = arith.constant 96 : i32
    %651 = tpu.dynamic_rotate %650 by %c96_i32_482 dim 1 : vector<8x128xf32>, i32 -> vector<8x128xf32>
    %c64_i32_483 = arith.constant 64 : i32
    %652 = tpu.dynamic_rotate %650 by %c64_i32_483 dim 1 : vector<8x128xf32>, i32 -> vector<8x128xf32>
    %c32_i32_484 = arith.constant 32 : i32
    %653 = tpu.dynamic_rotate %650 by %c32_i32_484 dim 1 : vector<8x128xf32>, i32 -> vector<8x128xf32>
    %654 = arith.mulf %651, %637 : vector<8x128xf32>
    %655 = arith.mulf %650, %652 : vector<8x128xf32>
    %656 = arith.addf %654, %655 : vector<8x128xf32>
    %657 = math.tanh %656 : vector<8x128xf32>
    %658 = arith.mulf %653, %657 : vector<8x128xf32>
    %c8_485 = arith.constant 8 : index
    %c0_486 = arith.constant 0 : index
    %659 = vector.load %arg15[%c8_485, %c0_486] : memref<64x128xf32, #tpu.memory_space<vmem>>, vector<8x128xf32>
    tpu.vector_store %arg15[%c8_485, %c0_486], %658 {strides = array<i32>} : memref<64x128xf32, #tpu.memory_space<vmem>>, vector<8x128xf32>,
    %c16_487 = arith.constant 16 : index
    %c0_488 = arith.constant 0 : index
    %660 = vector.load %arg14[%c16_487, %c0_488] : memref<64x128xf32, #tpu.memory_space<vmem>>, vector<8x128xf32>
    %cst_489 = arith.constant dense<0.000000e+00> : vector<8x128xf32>
    %661 = tpu.matmul %658, %617, %cst_489 {dimension_numbers = #tpu.dot_dimension_numbers<[1], [0], [0], [1], [0, 0, 1, 1], [], []>} : vector<8x128xf32>, vector<128x128xf32>, vector<8x128xf32> -> vector<8x128xf32>
    %662 = arith.addf %660, %661 : vector<8x128xf32>
    %663 = math.tanh %662 : vector<8x128xf32>
    %664 = arith.negf %662 : vector<8x128xf32>
    %665 = math.exp %664 : vector<8x128xf32>
    %cst_490 = arith.constant 1.000000e+00 : f32
    %666 = vector.broadcast %cst_490 : f32 to vector<8x128xf32>
    %667 = arith.addf %666, %665 : vector<8x128xf32>
    %668 = arith.divf %666, %667 : vector<8x128xf32>
    %669 = arith.select %261, %663, %668 : vector<8x128xi1>, vector<8x128xf32>
    %c96_i32_491 = arith.constant 96 : i32
    %670 = tpu.dynamic_rotate %669 by %c96_i32_491 dim 1 : vector<8x128xf32>, i32 -> vector<8x128xf32>
    %c64_i32_492 = arith.constant 64 : i32
    %671 = tpu.dynamic_rotate %669 by %c64_i32_492 dim 1 : vector<8x128xf32>, i32 -> vector<8x128xf32>
    %c32_i32_493 = arith.constant 32 : i32
    %672 = tpu.dynamic_rotate %669 by %c32_i32_493 dim 1 : vector<8x128xf32>, i32 -> vector<8x128xf32>
    %673 = arith.mulf %670, %656 : vector<8x128xf32>
    %674 = arith.mulf %669, %671 : vector<8x128xf32>
    %675 = arith.addf %673, %674 : vector<8x128xf32>
    %676 = math.tanh %675 : vector<8x128xf32>
    %677 = arith.mulf %672, %676 : vector<8x128xf32>
    %c16_494 = arith.constant 16 : index
    %c0_495 = arith.constant 0 : index
    %678 = vector.load %arg15[%c16_494, %c0_495] : memref<64x128xf32, #tpu.memory_space<vmem>>, vector<8x128xf32>
    tpu.vector_store %arg15[%c16_494, %c0_495], %677 {strides = array<i32>} : memref<64x128xf32, #tpu.memory_space<vmem>>, vector<8x128xf32>,
    %c24_496 = arith.constant 24 : index
    %c0_497 = arith.constant 0 : index
    %679 = vector.load %arg14[%c24_496, %c0_497] : memref<64x128xf32, #tpu.memory_space<vmem>>, vector<8x128xf32>
    %cst_498 = arith.constant dense<0.000000e+00> : vector<8x128xf32>
    %680 = tpu.matmul %677, %617, %cst_498 {dimension_numbers = #tpu.dot_dimension_numbers<[1], [0], [0], [1], [0, 0, 1, 1], [], []>} : vector<8x128xf32>, vector<128x128xf32>, vector<8x128xf32> -> vector<8x128xf32>
    %681 = arith.addf %679, %680 : vector<8x128xf32>
    %682 = math.tanh %681 : vector<8x128xf32>
    %683 = arith.negf %681 : vector<8x128xf32>
    %684 = math.exp %683 : vector<8x128xf32>
    %cst_499 = arith.constant 1.000000e+00 : f32
    %685 = vector.broadcast %cst_499 : f32 to vector<8x128xf32>
    %686 = arith.addf %685, %684 : vector<8x128xf32>
    %687 = arith.divf %685, %686 : vector<8x128xf32>
    %688 = arith.select %261, %682, %687 : vector<8x128xi1>, vector<8x128xf32>
    %c96_i32_500 = arith.constant 96 : i32
    %689 = tpu.dynamic_rotate %688 by %c96_i32_500 dim 1 : vector<8x128xf32>, i32 -> vector<8x128xf32>
    %c64_i32_501 = arith.constant 64 : i32
    %690 = tpu.dynamic_rotate %688 by %c64_i32_501 dim 1 : vector<8x128xf32>, i32 -> vector<8x128xf32>
    %c32_i32_502 = arith.constant 32 : i32
    %691 = tpu.dynamic_rotate %688 by %c32_i32_502 dim 1 : vector<8x128xf32>, i32 -> vector<8x128xf32>
    %692 = arith.mulf %689, %675 : vector<8x128xf32>
    %693 = arith.mulf %688, %690 : vector<8x128xf32>
    %694 = arith.addf %692, %693 : vector<8x128xf32>
    %695 = math.tanh %694 : vector<8x128xf32>
    %696 = arith.mulf %691, %695 : vector<8x128xf32>
    %c24_503 = arith.constant 24 : index
    %c0_504 = arith.constant 0 : index
    %697 = vector.load %arg15[%c24_503, %c0_504] : memref<64x128xf32, #tpu.memory_space<vmem>>, vector<8x128xf32>
    tpu.vector_store %arg15[%c24_503, %c0_504], %696 {strides = array<i32>} : memref<64x128xf32, #tpu.memory_space<vmem>>, vector<8x128xf32>,
    %c32_505 = arith.constant 32 : index
    %c0_506 = arith.constant 0 : index
    %698 = vector.load %arg14[%c32_505, %c0_506] : memref<64x128xf32, #tpu.memory_space<vmem>>, vector<8x128xf32>
    %cst_507 = arith.constant dense<0.000000e+00> : vector<8x128xf32>
    %699 = tpu.matmul %696, %617, %cst_507 {dimension_numbers = #tpu.dot_dimension_numbers<[1], [0], [0], [1], [0, 0, 1, 1], [], []>} : vector<8x128xf32>, vector<128x128xf32>, vector<8x128xf32> -> vector<8x128xf32>
    %700 = arith.addf %698, %699 : vector<8x128xf32>
    %701 = math.tanh %700 : vector<8x128xf32>
    %702 = arith.negf %700 : vector<8x128xf32>
    %703 = math.exp %702 : vector<8x128xf32>
    %cst_508 = arith.constant 1.000000e+00 : f32
    %704 = vector.broadcast %cst_508 : f32 to vector<8x128xf32>
    %705 = arith.addf %704, %703 : vector<8x128xf32>
    %706 = arith.divf %704, %705 : vector<8x128xf32>
    %707 = arith.select %261, %701, %706 : vector<8x128xi1>, vector<8x128xf32>
    %c96_i32_509 = arith.constant 96 : i32
    %708 = tpu.dynamic_rotate %707 by %c96_i32_509 dim 1 : vector<8x128xf32>, i32 -> vector<8x128xf32>
    %c64_i32_510 = arith.constant 64 : i32
    %709 = tpu.dynamic_rotate %707 by %c64_i32_510 dim 1 : vector<8x128xf32>, i32 -> vector<8x128xf32>
    %c32_i32_511 = arith.constant 32 : i32
    %710 = tpu.dynamic_rotate %707 by %c32_i32_511 dim 1 : vector<8x128xf32>, i32 -> vector<8x128xf32>
    %711 = arith.mulf %708, %694 : vector<8x128xf32>
    %712 = arith.mulf %707, %709 : vector<8x128xf32>
    %713 = arith.addf %711, %712 : vector<8x128xf32>
    %714 = math.tanh %713 : vector<8x128xf32>
    %715 = arith.mulf %710, %714 : vector<8x128xf32>
    %c32_512 = arith.constant 32 : index
    %c0_513 = arith.constant 0 : index
    %716 = vector.load %arg15[%c32_512, %c0_513] : memref<64x128xf32, #tpu.memory_space<vmem>>, vector<8x128xf32>
    tpu.vector_store %arg15[%c32_512, %c0_513], %715 {strides = array<i32>} : memref<64x128xf32, #tpu.memory_space<vmem>>, vector<8x128xf32>,
    %c40_514 = arith.constant 40 : index
    %c0_515 = arith.constant 0 : index
    %717 = vector.load %arg14[%c40_514, %c0_515] : memref<64x128xf32, #tpu.memory_space<vmem>>, vector<8x128xf32>
    %cst_516 = arith.constant dense<0.000000e+00> : vector<8x128xf32>
    %718 = tpu.matmul %715, %617, %cst_516 {dimension_numbers = #tpu.dot_dimension_numbers<[1], [0], [0], [1], [0, 0, 1, 1], [], []>} : vector<8x128xf32>, vector<128x128xf32>, vector<8x128xf32> -> vector<8x128xf32>
    %719 = arith.addf %717, %718 : vector<8x128xf32>
    %720 = math.tanh %719 : vector<8x128xf32>
    %721 = arith.negf %719 : vector<8x128xf32>
    %722 = math.exp %721 : vector<8x128xf32>
    %cst_517 = arith.constant 1.000000e+00 : f32
    %723 = vector.broadcast %cst_517 : f32 to vector<8x128xf32>
    %724 = arith.addf %723, %722 : vector<8x128xf32>
    %725 = arith.divf %723, %724 : vector<8x128xf32>
    %726 = arith.select %261, %720, %725 : vector<8x128xi1>, vector<8x128xf32>
    %c96_i32_518 = arith.constant 96 : i32
    %727 = tpu.dynamic_rotate %726 by %c96_i32_518 dim 1 : vector<8x128xf32>, i32 -> vector<8x128xf32>
    %c64_i32_519 = arith.constant 64 : i32
    %728 = tpu.dynamic_rotate %726 by %c64_i32_519 dim 1 : vector<8x128xf32>, i32 -> vector<8x128xf32>
    %c32_i32_520 = arith.constant 32 : i32
    %729 = tpu.dynamic_rotate %726 by %c32_i32_520 dim 1 : vector<8x128xf32>, i32 -> vector<8x128xf32>
    %730 = arith.mulf %727, %713 : vector<8x128xf32>
    %731 = arith.mulf %726, %728 : vector<8x128xf32>
    %732 = arith.addf %730, %731 : vector<8x128xf32>
    %733 = math.tanh %732 : vector<8x128xf32>
    %734 = arith.mulf %729, %733 : vector<8x128xf32>
    %c40_521 = arith.constant 40 : index
    %c0_522 = arith.constant 0 : index
    %735 = vector.load %arg15[%c40_521, %c0_522] : memref<64x128xf32, #tpu.memory_space<vmem>>, vector<8x128xf32>
    tpu.vector_store %arg15[%c40_521, %c0_522], %734 {strides = array<i32>} : memref<64x128xf32, #tpu.memory_space<vmem>>, vector<8x128xf32>,
    %c48_523 = arith.constant 48 : index
    %c0_524 = arith.constant 0 : index
    %736 = vector.load %arg14[%c48_523, %c0_524] : memref<64x128xf32, #tpu.memory_space<vmem>>, vector<8x128xf32>
    %cst_525 = arith.constant dense<0.000000e+00> : vector<8x128xf32>
    %737 = tpu.matmul %734, %617, %cst_525 {dimension_numbers = #tpu.dot_dimension_numbers<[1], [0], [0], [1], [0, 0, 1, 1], [], []>} : vector<8x128xf32>, vector<128x128xf32>, vector<8x128xf32> -> vector<8x128xf32>
    %738 = arith.addf %736, %737 : vector<8x128xf32>
    %739 = math.tanh %738 : vector<8x128xf32>
    %740 = arith.negf %738 : vector<8x128xf32>
    %741 = math.exp %740 : vector<8x128xf32>
    %cst_526 = arith.constant 1.000000e+00 : f32
    %742 = vector.broadcast %cst_526 : f32 to vector<8x128xf32>
    %743 = arith.addf %742, %741 : vector<8x128xf32>
    %744 = arith.divf %742, %743 : vector<8x128xf32>
    %745 = arith.select %261, %739, %744 : vector<8x128xi1>, vector<8x128xf32>
    %c96_i32_527 = arith.constant 96 : i32
    %746 = tpu.dynamic_rotate %745 by %c96_i32_527 dim 1 : vector<8x128xf32>, i32 -> vector<8x128xf32>
    %c64_i32_528 = arith.constant 64 : i32
    %747 = tpu.dynamic_rotate %745 by %c64_i32_528 dim 1 : vector<8x128xf32>, i32 -> vector<8x128xf32>
    %c32_i32_529 = arith.constant 32 : i32
    %748 = tpu.dynamic_rotate %745 by %c32_i32_529 dim 1 : vector<8x128xf32>, i32 -> vector<8x128xf32>
    %749 = arith.mulf %746, %732 : vector<8x128xf32>
    %750 = arith.mulf %745, %747 : vector<8x128xf32>
    %751 = arith.addf %749, %750 : vector<8x128xf32>
    %752 = math.tanh %751 : vector<8x128xf32>
    %753 = arith.mulf %748, %752 : vector<8x128xf32>
    %c48_530 = arith.constant 48 : index
    %c0_531 = arith.constant 0 : index
    %754 = vector.load %arg15[%c48_530, %c0_531] : memref<64x128xf32, #tpu.memory_space<vmem>>, vector<8x128xf32>
    tpu.vector_store %arg15[%c48_530, %c0_531], %753 {strides = array<i32>} : memref<64x128xf32, #tpu.memory_space<vmem>>, vector<8x128xf32>,
    %c56_532 = arith.constant 56 : index
    %c0_533 = arith.constant 0 : index
    %755 = vector.load %arg14[%c56_532, %c0_533] : memref<64x128xf32, #tpu.memory_space<vmem>>, vector<8x128xf32>
    %cst_534 = arith.constant dense<0.000000e+00> : vector<8x128xf32>
    %756 = tpu.matmul %753, %617, %cst_534 {dimension_numbers = #tpu.dot_dimension_numbers<[1], [0], [0], [1], [0, 0, 1, 1], [], []>} : vector<8x128xf32>, vector<128x128xf32>, vector<8x128xf32> -> vector<8x128xf32>
    %757 = arith.addf %755, %756 : vector<8x128xf32>
    %758 = math.tanh %757 : vector<8x128xf32>
    %759 = arith.negf %757 : vector<8x128xf32>
    %760 = math.exp %759 : vector<8x128xf32>
    %cst_535 = arith.constant 1.000000e+00 : f32
    %761 = vector.broadcast %cst_535 : f32 to vector<8x128xf32>
    %762 = arith.addf %761, %760 : vector<8x128xf32>
    %763 = arith.divf %761, %762 : vector<8x128xf32>
    %764 = arith.select %261, %758, %763 : vector<8x128xi1>, vector<8x128xf32>
    %c96_i32_536 = arith.constant 96 : i32
    %765 = tpu.dynamic_rotate %764 by %c96_i32_536 dim 1 : vector<8x128xf32>, i32 -> vector<8x128xf32>
    %c64_i32_537 = arith.constant 64 : i32
    %766 = tpu.dynamic_rotate %764 by %c64_i32_537 dim 1 : vector<8x128xf32>, i32 -> vector<8x128xf32>
    %c32_i32_538 = arith.constant 32 : i32
    %767 = tpu.dynamic_rotate %764 by %c32_i32_538 dim 1 : vector<8x128xf32>, i32 -> vector<8x128xf32>
    %768 = arith.mulf %765, %751 : vector<8x128xf32>
    %769 = arith.mulf %764, %766 : vector<8x128xf32>
    %770 = arith.addf %768, %769 : vector<8x128xf32>
    %771 = math.tanh %770 : vector<8x128xf32>
    %772 = arith.mulf %767, %771 : vector<8x128xf32>
    %c56_539 = arith.constant 56 : index
    %c0_540 = arith.constant 0 : index
    %773 = vector.load %arg15[%c56_539, %c0_540] : memref<64x128xf32, #tpu.memory_space<vmem>>, vector<8x128xf32>
    tpu.vector_store %arg15[%c56_539, %c0_540], %772 {strides = array<i32>} : memref<64x128xf32, #tpu.memory_space<vmem>>, vector<8x128xf32>,
    %c2_541 = arith.constant 2 : index
    %c0_542 = arith.constant 0 : index
    %c0_543 = arith.constant 0 : index
    %774 = vector.load %arg11[%c2_541, %c0_542, %c0_543] : memref<4x8x128xf32, #tpu.memory_space<vmem>>, vector<1x8x128xf32>
    %775 = vector.shape_cast %774 : vector<1x8x128xf32> to vector<8x128xf32>
    %776 = vector.shape_cast %772 : vector<8x128xf32> to vector<1x8x128xf32>
    tpu.vector_store %arg11[%c2_541, %c0_542, %c0_543], %776 {strides = array<i32>} : memref<4x8x128xf32, #tpu.memory_space<vmem>>, vector<1x8x128xf32>,
    %c2_544 = arith.constant 2 : index
    %c0_545 = arith.constant 0 : index
    %c0_546 = arith.constant 0 : index
    %777 = vector.load %arg12[%c2_544, %c0_545, %c0_546] : memref<4x8x128xf32, #tpu.memory_space<vmem>>, vector<1x8x128xf32>
    %778 = vector.shape_cast %777 : vector<1x8x128xf32> to vector<8x128xf32>
    %779 = vector.shape_cast %770 : vector<8x128xf32> to vector<1x8x128xf32>
    tpu.vector_store %arg12[%c2_544, %c0_545, %c0_546], %779 {strides = array<i32>} : memref<4x8x128xf32, #tpu.memory_space<vmem>>, vector<1x8x128xf32>,
    %c0_547 = arith.constant 0 : index
    %c0_548 = arith.constant 0 : index
    %780 = vector.load %arg15[%c0_547, %c0_548] : memref<64x128xf32, #tpu.memory_space<vmem>>, vector<64x128xf32>
    %c2_549 = arith.constant 2 : index
    %c0_550 = arith.constant 0 : index
    %c0_551 = arith.constant 0 : index
    %781 = vector.load %arg5[%c2_549, %c0_550, %c0_551] : memref<3x128x128xf32, #tpu.memory_space<vmem>>, vector<1x128x128xf32>
    %782 = vector.shape_cast %781 : vector<1x128x128xf32> to vector<128x128xf32>
    %cst_552 = arith.constant dense<0.000000e+00> : vector<64x128xf32>
    %783 = tpu.matmul %780, %782, %cst_552 {dimension_numbers = #tpu.dot_dimension_numbers<[1], [0], [0], [1], [0, 0, 1, 1], [], []>} : vector<64x128xf32>, vector<128x128xf32>, vector<64x128xf32> -> vector<64x128xf32>
    %c3_553 = arith.constant 3 : index
    %c0_554 = arith.constant 0 : index
    %c0_555 = arith.constant 0 : index
    %784 = vector.load %arg7[%c3_553, %c0_554, %c0_555] : memref<4x1x128xf32, #tpu.memory_space<vmem>>, vector<1x1x128xf32>
    %785 = vector.shape_cast %784 : vector<1x1x128xf32> to vector<1x128xf32>
    %786 = vector.broadcast %785 : vector<1x128xf32> to vector<64x128xf32>
    %787 = arith.addf %783, %786 : vector<64x128xf32>
    %c0_556 = arith.constant 0 : index
    %c0_557 = arith.constant 0 : index
    %788 = vector.load %arg14[%c0_556, %c0_557] : memref<64x128xf32, #tpu.memory_space<vmem>>, vector<64x128xf32>
    tpu.vector_store %arg14[%c0_556, %c0_557], %787 {strides = array<i32>} : memref<64x128xf32, #tpu.memory_space<vmem>>, vector<64x128xf32>,
    %c3_558 = arith.constant 3 : index
    %c0_559 = arith.constant 0 : index
    %c0_560 = arith.constant 0 : index
    %789 = vector.load %arg6[%c3_558, %c0_559, %c0_560] : memref<4x128x128xf32, #tpu.memory_space<vmem>>, vector<1x128x128xf32>
    %790 = vector.shape_cast %789 : vector<1x128x128xf32> to vector<128x128xf32>
    %c3_561 = arith.constant 3 : index
    %c0_562 = arith.constant 0 : index
    %c0_563 = arith.constant 0 : index
    %791 = vector.load %arg2[%c3_561, %c0_562, %c0_563] : memref<4x8x128xf32, #tpu.memory_space<vmem>>, vector<1x8x128xf32>
    %792 = vector.shape_cast %791 : vector<1x8x128xf32> to vector<8x128xf32>
    %c3_564 = arith.constant 3 : index
    %c0_565 = arith.constant 0 : index
    %c0_566 = arith.constant 0 : index
    %793 = vector.load %arg3[%c3_564, %c0_565, %c0_566] : memref<4x8x128xf32, #tpu.memory_space<vmem>>, vector<1x8x128xf32>
    %794 = vector.shape_cast %793 : vector<1x8x128xf32> to vector<8x128xf32>
    %c0_567 = arith.constant 0 : index
    %c0_568 = arith.constant 0 : index
    %795 = vector.load %arg14[%c0_567, %c0_568] : memref<64x128xf32, #tpu.memory_space<vmem>>, vector<8x128xf32>
    %cst_569 = arith.constant dense<0.000000e+00> : vector<8x128xf32>
    %796 = tpu.matmul %792, %790, %cst_569 {dimension_numbers = #tpu.dot_dimension_numbers<[1], [0], [0], [1], [0, 0, 1, 1], [], []>} : vector<8x128xf32>, vector<128x128xf32>, vector<8x128xf32> -> vector<8x128xf32>
    %797 = arith.addf %795, %796 : vector<8x128xf32>
    %798 = math.tanh %797 : vector<8x128xf32>
    %799 = arith.negf %797 : vector<8x128xf32>
    %800 = math.exp %799 : vector<8x128xf32>
    %cst_570 = arith.constant 1.000000e+00 : f32
    %801 = vector.broadcast %cst_570 : f32 to vector<8x128xf32>
    %802 = arith.addf %801, %800 : vector<8x128xf32>
    %803 = arith.divf %801, %802 : vector<8x128xf32>
    %804 = arith.select %261, %798, %803 : vector<8x128xi1>, vector<8x128xf32>
    %c96_i32_571 = arith.constant 96 : i32
    %805 = tpu.dynamic_rotate %804 by %c96_i32_571 dim 1 : vector<8x128xf32>, i32 -> vector<8x128xf32>
    %c64_i32_572 = arith.constant 64 : i32
    %806 = tpu.dynamic_rotate %804 by %c64_i32_572 dim 1 : vector<8x128xf32>, i32 -> vector<8x128xf32>
    %c32_i32_573 = arith.constant 32 : i32
    %807 = tpu.dynamic_rotate %804 by %c32_i32_573 dim 1 : vector<8x128xf32>, i32 -> vector<8x128xf32>
    %808 = arith.mulf %805, %794 : vector<8x128xf32>
    %809 = arith.mulf %804, %806 : vector<8x128xf32>
    %810 = arith.addf %808, %809 : vector<8x128xf32>
    %811 = math.tanh %810 : vector<8x128xf32>
    %812 = arith.mulf %807, %811 : vector<8x128xf32>
    %c0_574 = arith.constant 0 : index
    %c0_575 = arith.constant 0 : index
    %813 = vector.load %arg15[%c0_574, %c0_575] : memref<64x128xf32, #tpu.memory_space<vmem>>, vector<8x128xf32>
    tpu.vector_store %arg15[%c0_574, %c0_575], %812 {strides = array<i32>} : memref<64x128xf32, #tpu.memory_space<vmem>>, vector<8x128xf32>,
    %c8_576 = arith.constant 8 : index
    %c0_577 = arith.constant 0 : index
    %814 = vector.load %arg14[%c8_576, %c0_577] : memref<64x128xf32, #tpu.memory_space<vmem>>, vector<8x128xf32>
    %cst_578 = arith.constant dense<0.000000e+00> : vector<8x128xf32>
    %815 = tpu.matmul %812, %790, %cst_578 {dimension_numbers = #tpu.dot_dimension_numbers<[1], [0], [0], [1], [0, 0, 1, 1], [], []>} : vector<8x128xf32>, vector<128x128xf32>, vector<8x128xf32> -> vector<8x128xf32>
    %816 = arith.addf %814, %815 : vector<8x128xf32>
    %817 = math.tanh %816 : vector<8x128xf32>
    %818 = arith.negf %816 : vector<8x128xf32>
    %819 = math.exp %818 : vector<8x128xf32>
    %cst_579 = arith.constant 1.000000e+00 : f32
    %820 = vector.broadcast %cst_579 : f32 to vector<8x128xf32>
    %821 = arith.addf %820, %819 : vector<8x128xf32>
    %822 = arith.divf %820, %821 : vector<8x128xf32>
    %823 = arith.select %261, %817, %822 : vector<8x128xi1>, vector<8x128xf32>
    %c96_i32_580 = arith.constant 96 : i32
    %824 = tpu.dynamic_rotate %823 by %c96_i32_580 dim 1 : vector<8x128xf32>, i32 -> vector<8x128xf32>
    %c64_i32_581 = arith.constant 64 : i32
    %825 = tpu.dynamic_rotate %823 by %c64_i32_581 dim 1 : vector<8x128xf32>, i32 -> vector<8x128xf32>
    %c32_i32_582 = arith.constant 32 : i32
    %826 = tpu.dynamic_rotate %823 by %c32_i32_582 dim 1 : vector<8x128xf32>, i32 -> vector<8x128xf32>
    %827 = arith.mulf %824, %810 : vector<8x128xf32>
    %828 = arith.mulf %823, %825 : vector<8x128xf32>
    %829 = arith.addf %827, %828 : vector<8x128xf32>
    %830 = math.tanh %829 : vector<8x128xf32>
    %831 = arith.mulf %826, %830 : vector<8x128xf32>
    %c8_583 = arith.constant 8 : index
    %c0_584 = arith.constant 0 : index
    %832 = vector.load %arg15[%c8_583, %c0_584] : memref<64x128xf32, #tpu.memory_space<vmem>>, vector<8x128xf32>
    tpu.vector_store %arg15[%c8_583, %c0_584], %831 {strides = array<i32>} : memref<64x128xf32, #tpu.memory_space<vmem>>, vector<8x128xf32>,
    %c16_585 = arith.constant 16 : index
    %c0_586 = arith.constant 0 : index
    %833 = vector.load %arg14[%c16_585, %c0_586] : memref<64x128xf32, #tpu.memory_space<vmem>>, vector<8x128xf32>
    %cst_587 = arith.constant dense<0.000000e+00> : vector<8x128xf32>
    %834 = tpu.matmul %831, %790, %cst_587 {dimension_numbers = #tpu.dot_dimension_numbers<[1], [0], [0], [1], [0, 0, 1, 1], [], []>} : vector<8x128xf32>, vector<128x128xf32>, vector<8x128xf32> -> vector<8x128xf32>
    %835 = arith.addf %833, %834 : vector<8x128xf32>
    %836 = math.tanh %835 : vector<8x128xf32>
    %837 = arith.negf %835 : vector<8x128xf32>
    %838 = math.exp %837 : vector<8x128xf32>
    %cst_588 = arith.constant 1.000000e+00 : f32
    %839 = vector.broadcast %cst_588 : f32 to vector<8x128xf32>
    %840 = arith.addf %839, %838 : vector<8x128xf32>
    %841 = arith.divf %839, %840 : vector<8x128xf32>
    %842 = arith.select %261, %836, %841 : vector<8x128xi1>, vector<8x128xf32>
    %c96_i32_589 = arith.constant 96 : i32
    %843 = tpu.dynamic_rotate %842 by %c96_i32_589 dim 1 : vector<8x128xf32>, i32 -> vector<8x128xf32>
    %c64_i32_590 = arith.constant 64 : i32
    %844 = tpu.dynamic_rotate %842 by %c64_i32_590 dim 1 : vector<8x128xf32>, i32 -> vector<8x128xf32>
    %c32_i32_591 = arith.constant 32 : i32
    %845 = tpu.dynamic_rotate %842 by %c32_i32_591 dim 1 : vector<8x128xf32>, i32 -> vector<8x128xf32>
    %846 = arith.mulf %843, %829 : vector<8x128xf32>
    %847 = arith.mulf %842, %844 : vector<8x128xf32>
    %848 = arith.addf %846, %847 : vector<8x128xf32>
    %849 = math.tanh %848 : vector<8x128xf32>
    %850 = arith.mulf %845, %849 : vector<8x128xf32>
    %c16_592 = arith.constant 16 : index
    %c0_593 = arith.constant 0 : index
    %851 = vector.load %arg15[%c16_592, %c0_593] : memref<64x128xf32, #tpu.memory_space<vmem>>, vector<8x128xf32>
    tpu.vector_store %arg15[%c16_592, %c0_593], %850 {strides = array<i32>} : memref<64x128xf32, #tpu.memory_space<vmem>>, vector<8x128xf32>,
    %c24_594 = arith.constant 24 : index
    %c0_595 = arith.constant 0 : index
    %852 = vector.load %arg14[%c24_594, %c0_595] : memref<64x128xf32, #tpu.memory_space<vmem>>, vector<8x128xf32>
    %cst_596 = arith.constant dense<0.000000e+00> : vector<8x128xf32>
    %853 = tpu.matmul %850, %790, %cst_596 {dimension_numbers = #tpu.dot_dimension_numbers<[1], [0], [0], [1], [0, 0, 1, 1], [], []>} : vector<8x128xf32>, vector<128x128xf32>, vector<8x128xf32> -> vector<8x128xf32>
    %854 = arith.addf %852, %853 : vector<8x128xf32>
    %855 = math.tanh %854 : vector<8x128xf32>
    %856 = arith.negf %854 : vector<8x128xf32>
    %857 = math.exp %856 : vector<8x128xf32>
    %cst_597 = arith.constant 1.000000e+00 : f32
    %858 = vector.broadcast %cst_597 : f32 to vector<8x128xf32>
    %859 = arith.addf %858, %857 : vector<8x128xf32>
    %860 = arith.divf %858, %859 : vector<8x128xf32>
    %861 = arith.select %261, %855, %860 : vector<8x128xi1>, vector<8x128xf32>
    %c96_i32_598 = arith.constant 96 : i32
    %862 = tpu.dynamic_rotate %861 by %c96_i32_598 dim 1 : vector<8x128xf32>, i32 -> vector<8x128xf32>
    %c64_i32_599 = arith.constant 64 : i32
    %863 = tpu.dynamic_rotate %861 by %c64_i32_599 dim 1 : vector<8x128xf32>, i32 -> vector<8x128xf32>
    %c32_i32_600 = arith.constant 32 : i32
    %864 = tpu.dynamic_rotate %861 by %c32_i32_600 dim 1 : vector<8x128xf32>, i32 -> vector<8x128xf32>
    %865 = arith.mulf %862, %848 : vector<8x128xf32>
    %866 = arith.mulf %861, %863 : vector<8x128xf32>
    %867 = arith.addf %865, %866 : vector<8x128xf32>
    %868 = math.tanh %867 : vector<8x128xf32>
    %869 = arith.mulf %864, %868 : vector<8x128xf32>
    %c24_601 = arith.constant 24 : index
    %c0_602 = arith.constant 0 : index
    %870 = vector.load %arg15[%c24_601, %c0_602] : memref<64x128xf32, #tpu.memory_space<vmem>>, vector<8x128xf32>
    tpu.vector_store %arg15[%c24_601, %c0_602], %869 {strides = array<i32>} : memref<64x128xf32, #tpu.memory_space<vmem>>, vector<8x128xf32>,
    %c32_603 = arith.constant 32 : index
    %c0_604 = arith.constant 0 : index
    %871 = vector.load %arg14[%c32_603, %c0_604] : memref<64x128xf32, #tpu.memory_space<vmem>>, vector<8x128xf32>
    %cst_605 = arith.constant dense<0.000000e+00> : vector<8x128xf32>
    %872 = tpu.matmul %869, %790, %cst_605 {dimension_numbers = #tpu.dot_dimension_numbers<[1], [0], [0], [1], [0, 0, 1, 1], [], []>} : vector<8x128xf32>, vector<128x128xf32>, vector<8x128xf32> -> vector<8x128xf32>
    %873 = arith.addf %871, %872 : vector<8x128xf32>
    %874 = math.tanh %873 : vector<8x128xf32>
    %875 = arith.negf %873 : vector<8x128xf32>
    %876 = math.exp %875 : vector<8x128xf32>
    %cst_606 = arith.constant 1.000000e+00 : f32
    %877 = vector.broadcast %cst_606 : f32 to vector<8x128xf32>
    %878 = arith.addf %877, %876 : vector<8x128xf32>
    %879 = arith.divf %877, %878 : vector<8x128xf32>
    %880 = arith.select %261, %874, %879 : vector<8x128xi1>, vector<8x128xf32>
    %c96_i32_607 = arith.constant 96 : i32
    %881 = tpu.dynamic_rotate %880 by %c96_i32_607 dim 1 : vector<8x128xf32>, i32 -> vector<8x128xf32>
    %c64_i32_608 = arith.constant 64 : i32
    %882 = tpu.dynamic_rotate %880 by %c64_i32_608 dim 1 : vector<8x128xf32>, i32 -> vector<8x128xf32>
    %c32_i32_609 = arith.constant 32 : i32
    %883 = tpu.dynamic_rotate %880 by %c32_i32_609 dim 1 : vector<8x128xf32>, i32 -> vector<8x128xf32>
    %884 = arith.mulf %881, %867 : vector<8x128xf32>
    %885 = arith.mulf %880, %882 : vector<8x128xf32>
    %886 = arith.addf %884, %885 : vector<8x128xf32>
    %887 = math.tanh %886 : vector<8x128xf32>
    %888 = arith.mulf %883, %887 : vector<8x128xf32>
    %c32_610 = arith.constant 32 : index
    %c0_611 = arith.constant 0 : index
    %889 = vector.load %arg15[%c32_610, %c0_611] : memref<64x128xf32, #tpu.memory_space<vmem>>, vector<8x128xf32>
    tpu.vector_store %arg15[%c32_610, %c0_611], %888 {strides = array<i32>} : memref<64x128xf32, #tpu.memory_space<vmem>>, vector<8x128xf32>,
    %c40_612 = arith.constant 40 : index
    %c0_613 = arith.constant 0 : index
    %890 = vector.load %arg14[%c40_612, %c0_613] : memref<64x128xf32, #tpu.memory_space<vmem>>, vector<8x128xf32>
    %cst_614 = arith.constant dense<0.000000e+00> : vector<8x128xf32>
    %891 = tpu.matmul %888, %790, %cst_614 {dimension_numbers = #tpu.dot_dimension_numbers<[1], [0], [0], [1], [0, 0, 1, 1], [], []>} : vector<8x128xf32>, vector<128x128xf32>, vector<8x128xf32> -> vector<8x128xf32>
    %892 = arith.addf %890, %891 : vector<8x128xf32>
    %893 = math.tanh %892 : vector<8x128xf32>
    %894 = arith.negf %892 : vector<8x128xf32>
    %895 = math.exp %894 : vector<8x128xf32>
    %cst_615 = arith.constant 1.000000e+00 : f32
    %896 = vector.broadcast %cst_615 : f32 to vector<8x128xf32>
    %897 = arith.addf %896, %895 : vector<8x128xf32>
    %898 = arith.divf %896, %897 : vector<8x128xf32>
    %899 = arith.select %261, %893, %898 : vector<8x128xi1>, vector<8x128xf32>
    %c96_i32_616 = arith.constant 96 : i32
    %900 = tpu.dynamic_rotate %899 by %c96_i32_616 dim 1 : vector<8x128xf32>, i32 -> vector<8x128xf32>
    %c64_i32_617 = arith.constant 64 : i32
    %901 = tpu.dynamic_rotate %899 by %c64_i32_617 dim 1 : vector<8x128xf32>, i32 -> vector<8x128xf32>
    %c32_i32_618 = arith.constant 32 : i32
    %902 = tpu.dynamic_rotate %899 by %c32_i32_618 dim 1 : vector<8x128xf32>, i32 -> vector<8x128xf32>
    %903 = arith.mulf %900, %886 : vector<8x128xf32>
    %904 = arith.mulf %899, %901 : vector<8x128xf32>
    %905 = arith.addf %903, %904 : vector<8x128xf32>
    %906 = math.tanh %905 : vector<8x128xf32>
    %907 = arith.mulf %902, %906 : vector<8x128xf32>
    %c40_619 = arith.constant 40 : index
    %c0_620 = arith.constant 0 : index
    %908 = vector.load %arg15[%c40_619, %c0_620] : memref<64x128xf32, #tpu.memory_space<vmem>>, vector<8x128xf32>
    tpu.vector_store %arg15[%c40_619, %c0_620], %907 {strides = array<i32>} : memref<64x128xf32, #tpu.memory_space<vmem>>, vector<8x128xf32>,
    %c48_621 = arith.constant 48 : index
    %c0_622 = arith.constant 0 : index
    %909 = vector.load %arg14[%c48_621, %c0_622] : memref<64x128xf32, #tpu.memory_space<vmem>>, vector<8x128xf32>
    %cst_623 = arith.constant dense<0.000000e+00> : vector<8x128xf32>
    %910 = tpu.matmul %907, %790, %cst_623 {dimension_numbers = #tpu.dot_dimension_numbers<[1], [0], [0], [1], [0, 0, 1, 1], [], []>} : vector<8x128xf32>, vector<128x128xf32>, vector<8x128xf32> -> vector<8x128xf32>
    %911 = arith.addf %909, %910 : vector<8x128xf32>
    %912 = math.tanh %911 : vector<8x128xf32>
    %913 = arith.negf %911 : vector<8x128xf32>
    %914 = math.exp %913 : vector<8x128xf32>
    %cst_624 = arith.constant 1.000000e+00 : f32
    %915 = vector.broadcast %cst_624 : f32 to vector<8x128xf32>
    %916 = arith.addf %915, %914 : vector<8x128xf32>
    %917 = arith.divf %915, %916 : vector<8x128xf32>
    %918 = arith.select %261, %912, %917 : vector<8x128xi1>, vector<8x128xf32>
    %c96_i32_625 = arith.constant 96 : i32
    %919 = tpu.dynamic_rotate %918 by %c96_i32_625 dim 1 : vector<8x128xf32>, i32 -> vector<8x128xf32>
    %c64_i32_626 = arith.constant 64 : i32
    %920 = tpu.dynamic_rotate %918 by %c64_i32_626 dim 1 : vector<8x128xf32>, i32 -> vector<8x128xf32>
    %c32_i32_627 = arith.constant 32 : i32
    %921 = tpu.dynamic_rotate %918 by %c32_i32_627 dim 1 : vector<8x128xf32>, i32 -> vector<8x128xf32>
    %922 = arith.mulf %919, %905 : vector<8x128xf32>
    %923 = arith.mulf %918, %920 : vector<8x128xf32>
    %924 = arith.addf %922, %923 : vector<8x128xf32>
    %925 = math.tanh %924 : vector<8x128xf32>
    %926 = arith.mulf %921, %925 : vector<8x128xf32>
    %c48_628 = arith.constant 48 : index
    %c0_629 = arith.constant 0 : index
    %927 = vector.load %arg15[%c48_628, %c0_629] : memref<64x128xf32, #tpu.memory_space<vmem>>, vector<8x128xf32>
    tpu.vector_store %arg15[%c48_628, %c0_629], %926 {strides = array<i32>} : memref<64x128xf32, #tpu.memory_space<vmem>>, vector<8x128xf32>,
    %c56_630 = arith.constant 56 : index
    %c0_631 = arith.constant 0 : index
    %928 = vector.load %arg14[%c56_630, %c0_631] : memref<64x128xf32, #tpu.memory_space<vmem>>, vector<8x128xf32>
    %cst_632 = arith.constant dense<0.000000e+00> : vector<8x128xf32>
    %929 = tpu.matmul %926, %790, %cst_632 {dimension_numbers = #tpu.dot_dimension_numbers<[1], [0], [0], [1], [0, 0, 1, 1], [], []>} : vector<8x128xf32>, vector<128x128xf32>, vector<8x128xf32> -> vector<8x128xf32>
    %930 = arith.addf %928, %929 : vector<8x128xf32>
    %931 = math.tanh %930 : vector<8x128xf32>
    %932 = arith.negf %930 : vector<8x128xf32>
    %933 = math.exp %932 : vector<8x128xf32>
    %cst_633 = arith.constant 1.000000e+00 : f32
    %934 = vector.broadcast %cst_633 : f32 to vector<8x128xf32>
    %935 = arith.addf %934, %933 : vector<8x128xf32>
    %936 = arith.divf %934, %935 : vector<8x128xf32>
    %937 = arith.select %261, %931, %936 : vector<8x128xi1>, vector<8x128xf32>
    %c96_i32_634 = arith.constant 96 : i32
    %938 = tpu.dynamic_rotate %937 by %c96_i32_634 dim 1 : vector<8x128xf32>, i32 -> vector<8x128xf32>
    %c64_i32_635 = arith.constant 64 : i32
    %939 = tpu.dynamic_rotate %937 by %c64_i32_635 dim 1 : vector<8x128xf32>, i32 -> vector<8x128xf32>
    %c32_i32_636 = arith.constant 32 : i32
    %940 = tpu.dynamic_rotate %937 by %c32_i32_636 dim 1 : vector<8x128xf32>, i32 -> vector<8x128xf32>
    %941 = arith.mulf %938, %924 : vector<8x128xf32>
    %942 = arith.mulf %937, %939 : vector<8x128xf32>
    %943 = arith.addf %941, %942 : vector<8x128xf32>
    %944 = math.tanh %943 : vector<8x128xf32>
    %945 = arith.mulf %940, %944 : vector<8x128xf32>
    %c56_637 = arith.constant 56 : index
    %c0_638 = arith.constant 0 : index
    %946 = vector.load %arg15[%c56_637, %c0_638] : memref<64x128xf32, #tpu.memory_space<vmem>>, vector<8x128xf32>
    tpu.vector_store %arg15[%c56_637, %c0_638], %945 {strides = array<i32>} : memref<64x128xf32, #tpu.memory_space<vmem>>, vector<8x128xf32>,
    %c3_639 = arith.constant 3 : index
    %c0_640 = arith.constant 0 : index
    %c0_641 = arith.constant 0 : index
    %947 = vector.load %arg11[%c3_639, %c0_640, %c0_641] : memref<4x8x128xf32, #tpu.memory_space<vmem>>, vector<1x8x128xf32>
    %948 = vector.shape_cast %947 : vector<1x8x128xf32> to vector<8x128xf32>
    %949 = vector.shape_cast %945 : vector<8x128xf32> to vector<1x8x128xf32>
    tpu.vector_store %arg11[%c3_639, %c0_640, %c0_641], %949 {strides = array<i32>} : memref<4x8x128xf32, #tpu.memory_space<vmem>>, vector<1x8x128xf32>,
    %c3_642 = arith.constant 3 : index
    %c0_643 = arith.constant 0 : index
    %c0_644 = arith.constant 0 : index
    %950 = vector.load %arg12[%c3_642, %c0_643, %c0_644] : memref<4x8x128xf32, #tpu.memory_space<vmem>>, vector<1x8x128xf32>
    %951 = vector.shape_cast %950 : vector<1x8x128xf32> to vector<8x128xf32>
    %952 = vector.shape_cast %943 : vector<8x128xf32> to vector<1x8x128xf32>
    tpu.vector_store %arg12[%c3_642, %c0_643, %c0_644], %952 {strides = array<i32>} : memref<4x8x128xf32, #tpu.memory_space<vmem>>, vector<1x8x128xf32>,
    %c0_645 = arith.constant 0 : index
    %c0_646 = arith.constant 0 : index
    %953 = vector.load %arg15[%c0_645, %c0_646] : memref<64x128xf32, #tpu.memory_space<vmem>>, vector<64x128xf32>
    %c0_647 = arith.constant 0 : index
    %c0_648 = arith.constant 0 : index
    %954 = vector.load %arg8[%c0_647, %c0_648] : memref<128x128xf32, #tpu.memory_space<vmem>>, vector<128x128xf32>
    %cst_649 = arith.constant dense<0.000000e+00> : vector<64x128xf32>
    %955 = tpu.matmul %953, %954, %cst_649 {dimension_numbers = #tpu.dot_dimension_numbers<[1], [0], [0], [1], [0, 0, 1, 1], [], []>} : vector<64x128xf32>, vector<128x128xf32>, vector<64x128xf32> -> vector<64x128xf32>
    %c0_650 = arith.constant 0 : index
    %c0_651 = arith.constant 0 : index
    %956 = vector.load %arg9[%c0_650, %c0_651] : memref<1x128xf32, #tpu.memory_space<vmem>>, vector<1x128xf32>
    %957 = vector.broadcast %956 : vector<1x128xf32> to vector<64x128xf32>
    %958 = arith.addf %955, %957 : vector<64x128xf32>
    %c0_652 = arith.constant 0 : index
    %c0_653 = arith.constant 0 : index
    %959 = vector.load %arg10[%c0_652, %c0_653] : memref<64x128xf32, #tpu.memory_space<vmem>>, vector<64x128xf32>
    tpu.vector_store %arg10[%c0_652, %c0_653], %958 {strides = array<i32>} : memref<64x128xf32, #tpu.memory_space<vmem>>, vector<64x128xf32>,
    return
  }
}

</mosaic_0001>

<bundles_post_ra>
// kernel: word_lstm_forward.1
= control target key start
LH: loop header
LB: loop body
LE: loop exit
PB: predicated region body
PF: predicated region fallthrough
CT: control target
= control target key end

     0   :  { %s4191_s24 = smov [#allocation6]   ;;  %s6228_s0 = inlined_call_operand.vmem [shape: s32[8,8], index: 0, kind: input, shape index: {}]   ;;  %s6229_s1 = inlined_call_operand.vmem [shape: f32[32,200], index: 1, kind: input, shape index: {}]   ;;  %s6230_s2 = inlined_call_operand.vmem [shape: f32[4,8,128], index: 2, kind: input, shape index: {}]   ;;  %s6231_s3 = inlined_call_operand.vmem [shape: f32[4,8,128], index: 3, kind: input, shape index: {}]   ;;  %s6232_s4 = inlined_call_operand.hbm [shape: f32[200,128], index: 4, kind: input, shape index: {}]   ;;  %s6233_s5 = inlined_call_operand.hbm [shape: f32[3,128,128], index: 5, kind: input, shape index: {}]   ;;  %s6234_s6 = inlined_call_operand.hbm [shape: f32[4,128,128], index: 6, kind: input, shape index: {}]   ;;  %s6235_s7 = inlined_call_operand.vmem [shape: f32[4,1,128], index: 7, kind: input, shape index: {}]   ;;  %s6236_s8 = inlined_call_operand.hbm [shape: f32[128,128], index: 8, kind: input, shape index: {}]   ;;  %s6237_s9 = inlined_call_operand.vmem [shape: f32[1,128], index: 9, kind: input, shape index: {}]   ;;  %s6238_s10 = inlined_call_operand.vmem [shape: f32[64,128], index: 10, kind: output, shape index: {0}]   ;;  %s6239_s11 = inlined_call_operand.vmem [shape: f32[4,8,128], index: 11, kind: output, shape index: {1}]   ;;  %s6240_s12 = inlined_call_operand.vmem [shape: f32[4,8,128], index: 12, kind: output, shape index: {2}]  }
   0x1   :  { %6281 = sst [smem:[#allocation44_spill]] %s6229_s1  ;;  %s19_s23 = sshll.u32 %s6228_s0, 4  ;;  %s20_s23 = int_to_ptr.vmem [resolvable:$true] %s19_s23 }
   0x2   :  { %6282 = sst [smem:[#allocation45_spill]] %s6230_s2 }
   0x3   :  { %6283 = sst [smem:[#allocation46_spill]] %s6231_s3 }
   0x4   :  { %6284 = sst [smem:[#allocation47_spill]] %s6235_s7 }
   0x5   :  { %6285 = sst [smem:[#allocation48_spill]] %s6237_s9 }
   0x6   :  { %6286 = sst [smem:[#allocation49_spill]] %s6238_s10 }
   0x7   :  { %6287 = sst [smem:[#allocation50_spill]] %s6239_s11 }
   0x8   :  { %6288 = sst [smem:[#allocation51_spill]] %s6240_s12 }
   0x9   :  { %22 = dma.vmem_to_smem %s20_s23, 128, %s4191_s24, [#allocation5] }
   0xa   :  { %4183 = dma.done.wait [#allocation5], 128 }
   0xb   :  { %4184 = vsyncadd [#allocation5], 4294967168 }
   0xc   :  { %25 = sfence }
   0xd   :  { %26 = vsyncpa [#allocation8], 0 }
   0xe   :  { %27 = vsyncpa [#allocation10], 0 }
   0xf   :  { %28 = vsyncpa [#allocation13], 0  ;;  %s52_s27 = sshll.u32 %s6233_s5, 4  ;;  %s4192_s28 = smov [#allocation9]   ;;  %s53_s27 = int_to_ptr.hbm [resolvable:$true] %s52_s27 }
  0x10   :  { %s54_s29 = sshll.u32 %s4192_s28, 4  ;;  %s39_s0 = sshll.u32 %s6232_s4, 4  ;;  %s55_s29 = int_to_ptr.vmem [resolvable:$true] %s54_s29  ;;  %s40_s0 = int_to_ptr.hbm [resolvable:$true] %s39_s0 }
  0x11   :  { %s4193_s14 = smov 128   ;;  %s4194_s15 = smov 8  }
  0x12   :  { %60 = dma.hbm_to_vmem [thread:$0]  %s53_s27, 6144, %s55_s29, [#allocation10], %s4193_s14, %s4193_s14, %s4194_s15  }
  0x13   :  { %s4195_s16 = smov [#allocation7]   ;;  %s65_s20 = sshll.u32 %s6234_s6, 4  ;;  %s66_s20 = int_to_ptr.hbm [resolvable:$true] %s65_s20 }
  0x14   :  { %s41_s17 = sshll.u32 %s4195_s16, 4  ;;  %s80_s22 = sshll.u32 %s6236_s8, 4  ;;  %s42_s17 = int_to_ptr.vmem [resolvable:$true] %s41_s17  ;;  %s81_s22 = int_to_ptr.hbm [resolvable:$true] %s80_s22 }
  0x15   :  { %47 = dma.hbm_to_vmem [thread:$0]  %s40_s0, 3200, %s42_s17, [#allocation8], %s4193_s14, %s4193_s14, %s4194_s15  }
  0x16   :  { %s4196_s23 = smov [#allocation11]   ;;  %s4197_s4 = smov [#allocation12]  }
  0x17   :  { %s67_s24 = sshll.u32 %s4196_s23, 4  ;;  %s82_s25 = sshll.u32 %s4197_s4, 4  ;;  %s68_s24 = int_to_ptr.vmem [resolvable:$true] %s67_s24  ;;  %s83_s25 = int_to_ptr.vmem [resolvable:$true] %s82_s25 }
  0x18   :  { %73 = dma.hbm_to_vmem [thread:$0]  %s66_s20, 8192, %s68_s24, [#allocation10], %s4193_s14, %s4193_s14, %s4194_s15  }
  0x19   :  { %88 = dma.hbm_to_vmem [thread:$0]  %s81_s22, 2048, %s83_s25, [#allocation13], %s4193_s14, %s4193_s14, %s4194_s15  }
  0x1a   :  { %4185 = dma.done.wait [#allocation8], 3200  }
  0x1b   :  { %4186 = vsyncadd [#allocation8], 4294964096 }
  0x1c   :  { %4187 = dma.done.wait [#allocation10], 14336  }
  0x1d   :  { %4188 = vsyncadd [#allocation10], 4294952960 }
  0x1e   :  { %4189 = dma.done.wait [#allocation13], 2048  }
  0x1f   :  { %4190 = vsyncadd [#allocation13], 4294965248  ;;  %s107_s6 = sld [smem:[#allocation6]]  ;;  %v4289_v0 = vld [vmem:[#allocation11 + $0x78] sm:$0xff]  ;;  %v978_v1 = vld [vmem:[#allocation7 + $0x78] sm:$0xff]  ;;  %v117_v12 = vlaneseq  ;;  %vm992_vm1 = vcmask 588800  }
  0x20   :  { %s4281_s26 = sld [smem:[#allocation6 + $0x80]]  ;;  %v4291_v2 = vld [vmem:[#allocation11 + $0x70] sm:$0xff]  ;;  %1126 = vmatpush.msra.mxu3 %v4289_v0  ;;  %1017 = vmatpush.msra.mxu0 %v978_v1  ;;  %v977_v3 = vld [vmem:[#allocation7 + $0x70] sm:$0xff]  ;;  %v976_v5 = vld [vmem:[#allocation7 + $0x68] sm:$0xff] }
  0x21   :  { %s4283_s8 = sld [smem:[#allocation6 + $0x100]]  ;;  %v4295_v4 = vld [vmem:[#allocation11 + $0x68] sm:$0xff]  ;;  %v4303_v6 = vld [vmem:[#allocation11 + $0x60] sm:$0xff]  ;;  %v975_v7 = vld [vmem:[#allocation7 + $0x60] sm:$0xff]  ;;  %vm4342_vm0 = vcmp.lt.s32.totalorder %v117_v12, 200 }
  0x22   :  { %s4285_s27 = sld [smem:[#allocation6 + $0x180]]  ;;  %1127 = vmatpush.msra.mxu3 %v4291_v2  ;;  %1018 = vmatpush.msra.mxu0 %v977_v3  ;;  %v4314_v8 = vld [vmem:[#allocation11 + $0x58] sm:$0xff]  ;;  %v974_v9 = vld [vmem:[#allocation7 + $0x58] sm:$0xff]  ;;  %v973_v14 = vld [vmem:[#allocation7 + $0x50] sm:$0xff]  ;;  %v943_v3 = vand.u32 127, %v117_v12 }
  0x23   :  { %s4287_s28 = sld [smem:[#allocation6 + $0x200]]  ;;  %v987_v10 = vld [vmem:[#allocation7 + $0xc0] sm:$0xff]  ;;  %v986_v11 = vld [vmem:[#allocation7 + $0xb8] sm:$0xff]  ;;  %v985_v15 = vld [vmem:[#allocation7 + $0xb0] sm:$0xff] }
  0x24   :  { %s4301_s17 = sld [smem:[#allocation6 + $0x280]]  ;;  %1128 = vmatpush.msra.mxu3 %v4295_v4  ;;  %1019 = vmatpush.msra.mxu0 %v976_v5  ;;  %v4321_v13 = vld [vmem:[#allocation11 + $0x50] sm:$0xff]  ;;  %v4333_v16 = vld [vmem:[#allocation11 + $0x48] sm:$0xff]  ;;  %v972_v17 = vld [vmem:[#allocation7 + $0x48] sm:$0xff]  ;;  %vm944_vm2 = vcmp.ge.s32.totalorder %v943_v3, 64  ;;  %vm945_vm3 = vcmp.lt.s32.totalorder %v943_v3, 96 }
  0x25   :  { %s108_s29 = sshra.s32 %s107_s6, 3  ;;  %s111_s30 = sand.u32 7, %s107_s6  ;;  %1065 = vmatpush.msra.mxu1 %v987_v10  ;;  %3792 = vmatpush.msra.mxu2 %v987_v10  ;;  %v4339_v18 = vld [vmem:[#allocation11 + $0x40] sm:$0xff]  ;;  %v971_v21 = vld [vmem:[#allocation7 + $0x40] sm:$0xff]  ;;  %v970_v23 = vld [vmem:[#allocation7 + $0x38] sm:$0xff] }
  0x26   :  { %s3728_s13 = sshll.u32 %s108_s29, 4  ;;  %s124_s0 = sshra.s32 %s4281_s26, 3  ;;  %1129 = vmatpush.msra.mxu3 %v4303_v6  ;;  %1020 = vmatpush.msra.mxu0 %v975_v7  ;;  %v984_v19 = vld [vmem:[#allocation7 + $0xa8] sm:$0xff]  ;;  %v4347_v22 = vld [vmem:[#allocation11 + $0x38] sm:$0xff]  ;;  %v982_v25 = vld [vmem:[#allocation7 + $0x98] sm:$0xff] }
  0x27   :  { %s4297_s14 = sadd.s32 %s3728_s13, %s111_s30  ;;  %s127_s15 = sand.u32 7, %s4281_s26  ;;  %1066 = vmatpush.msra.mxu1 %v986_v11  ;;  %3793 = vmatpush.msra.mxu2 %v986_v11  ;;  %v983_v24 = vld [vmem:[#allocation7 + $0xa0] sm:$0xff]  ;;  %v4362_v27 = vld [vmem:[#allocation11 + $0x30] sm:$0xff]  ;;  %v969_v28 = vld [vmem:[#allocation7 + $0x30] sm:$0xff] }
  0x28   :  { %s3729_s16 = sshll.u32 %s124_s0, 4  ;;  %s115_s20 = scalar_lea.vmem %s6229_s1, %s4297_s14  ;;  %1130 = vmatpush.msra.mxu3 %v4314_v8  ;;  %1021 = vmatpush.msra.mxu0 %v974_v9  ;;  %v981_v30 = vld [vmem:[#allocation7 + $0x90] sm:$0xff]  ;;  %v968_v33 = vld [vmem:[#allocation7 + $0x28] sm:$0xff]  ;;  %v967_v39 = vld [vmem:[#allocation7 + $0x20] sm:$0xff] }
  0x29   :  { %s137_s5 = sshra.s32 %s4283_s8, 3  ;;  %s4311_s21 = sadd.s32 %s3729_s16, %s127_s15  ;;  %1067 = vmatpush.msra.mxu1 %v985_v15  ;;  %3794 = vmatpush.msra.mxu2 %v985_v15  ;;  %v116_v26 = vld [vmem:[%s115_s20] ss:$8 sm:$0x3]  ;;  %v4386_v32 = vld [vmem:[#allocation11 + $0x28] sm:$0xff]  ;;  %v966_v42 = vld [vmem:[#allocation7 + $0x18] sm:$0xff] }
  0x2a   :  { %s140_s22 = sand.u32 7, %s4283_s8  ;;  %s3730_s23 = sshll.u32 %s137_s5, 4  ;;  %1131 = vmatpush.msra.mxu3 %v4321_v13  ;;  %1022 = vmatpush.msra.mxu0 %v973_v14  ;;  %121 = vst.msk [vmem:[#allocation2] ss:$8 sm:$0x3] %vm4342_vm0, %v116_v26  ;;  %v4393_v36 = vld [vmem:[#allocation11 + $0x20] sm:$0xff]  ;;  %vm4539_vm5 = vmand %vm944_vm2, %vm945_vm3 }
  0x2b   :  { %s150_s24 = sshra.s32 %s4285_s27, 3  ;;  %s4318_s4 = sadd.s32 %s3730_s23, %s140_s22  ;;  %1068 = vmatpush.msra.mxu1 %v984_v19  ;;  %3795 = vmatpush.msra.mxu2 %v984_v19  ;;  %v980_v38 = vld [vmem:[#allocation7 + $0x88] sm:$0xff]  ;;  %v979_v40 = vld [vmem:[#allocation7 + $0x80] sm:$0xff]  ;;  %v4408_v43 = vld [vmem:[#allocation11 + $0x10] sm:$0xff] }
  0x2c   :  { %s153_s25 = sand.u32 7, %s4285_s27  ;;  %s131_s8 = scalar_lea.vmem %s6229_s1, %s4311_s21  ;;  %1132 = vmatpush.msra.mxu3 %v4333_v16  ;;  %1023 = vmatpush.msra.mxu0 %v972_v17  ;;  %v4405_v41 = vld [vmem:[#allocation11 + $0x18] sm:$0xff]  ;;  %v965_v44 = vld [vmem:[#allocation7 + $0x10] sm:$0xff]  ;;  %v964_v46 = vld [vmem:[#allocation7 + $0x8] sm:$0xff] }
  0x2d   :  { %s3731_s29 = sshll.u32 %s150_s24, 4  ;;  %s144_s27 = scalar_lea.vmem %s6229_s1, %s4318_s4  ;;  %v132_v29 = vld [vmem:[%s131_s8] ss:$8 sm:$0x3]  ;;  %1069 = vmatpush.msra.mxu1 %v983_v24  ;;  %3796 = vmatpush.msra.mxu2 %v983_v24  ;;  %v4413_v45 = vld [vmem:[#allocation11 + $0x8] sm:$0xff] }
  0x2e   :  { %s163_s0 = sshra.s32 %s4287_s28, 3  ;;  %s4335_s15 = sadd.s32 %s3731_s29, %s153_s25  ;;  %1133 = vmatpush.msra.mxu3 %v4339_v18  ;;  %1024 = vmatpush.msra.mxu0 %v971_v21  ;;  %134 = vst.msk [vmem:[#allocation2 + $0x1] ss:$8 sm:$0x3] %vm4342_vm0, %v132_v29  ;;  %v4420_v47 = vld [vmem:[#allocation11] sm:$0xff]  ;;  %v963_v48 = vld [vmem:[#allocation7] sm:$0xff] }
  0x2f   :  { %s166_s16 = sand.u32 7, %s4287_s28  ;;  %s3732_s18 = sshll.u32 %s163_s0, 4  ;;  %v145_v31 = vld [vmem:[%s144_s27] ss:$8 sm:$0x3]  ;;  %1070 = vmatpush.msra.mxu1 %v982_v25  ;;  %3797 = vmatpush.msra.mxu2 %v982_v25 }
  0x30   :  { %s176_s19 = sshra.s32 %s4301_s17, 3  ;;  %s4349_s28 = sadd.s32 %s3732_s18, %s166_s16  ;;  %147 = vst.msk [vmem:[#allocation2 + $0x2] ss:$8 sm:$0x3] %vm4342_vm0, %v145_v31  ;;  %1134 = vmatpush.msra.mxu3 %v4347_v22  ;;  %1025 = vmatpush.msra.mxu0 %v970_v23  ;;  %v1123_v49 = vld [vmem:[%s6230_s2] sm:$0xff] }
  0x31   :  { %s179_s5 = sand.u32 7, %s4301_s17  ;;  %s157_s6 = scalar_lea.vmem %s6229_s1, %s4335_s15  ;;  %1071 = vmatpush.msra.mxu1 %v981_v30  ;;  %3798 = vmatpush.msra.mxu2 %v981_v30  ;;  %v4535_v54 = vld [vmem:[%s6235_s7] ss:$0 sm:$0xff] }
  0x32   :  { %s3733_s26 = sshll.u32 %s176_s19, 4  ;;  %s170_s20 = scalar_lea.vmem %s6229_s1, %s4349_s28  ;;  %v158_v34 = vld [vmem:[%s157_s6] ss:$8 sm:$0x3]  ;;  %1135 = vmatpush.msra.mxu3 %v4362_v27  ;;  %1026 = vmatpush.msra.mxu0 %v969_v28 }
  0x33   :  { %s182_s13 = sadd.s32 %s3733_s26, %s179_s5  ;;  %160 = vst.msk [vmem:[#allocation2 + $0x3] ss:$8 sm:$0x3] %vm4342_vm0, %v158_v34  ;;  %v171_v35 = vld [vmem:[%s170_s20] ss:$8 sm:$0x3]  ;;  %1072 = vmatpush.msra.mxu1 %v980_v38  ;;  %3799 = vmatpush.msra.mxu2 %v980_v38 }
  0x34   :  { %s183_s16 = scalar_lea.vmem %s6229_s1, %s182_s13  ;;  %173 = vst.msk [vmem:[#allocation2 + $0x4] ss:$8 sm:$0x3] %vm4342_vm0, %v171_v35  ;;  %s4400_s4 = sld [smem:[#allocation6 + $0x300]]  ;;  %1136 = vmatpush.msra.mxu3 %v4386_v32  ;;  %1027 = vmatpush.msra.mxu0 %v968_v33  ;;  %v5362_v20 = vld [vmem:[#allocation11 + $0xb8] sm:$0xff] }
  0x35   :  { %v184_v37 = vld [vmem:[%s183_s16] ss:$8 sm:$0x3]  ;;  %s4402_s27 = sld [smem:[#allocation6 + $0x380]]  ;;  %1073 = vmatpush.msra.mxu1 %v979_v40  ;;  %3800 = vmatpush.msra.mxu2 %v979_v40  ;;  %s6241_s21 = smov 32  }
  0x36   :  { %186 = vst.msk [vmem:[#allocation2 + $0x5] ss:$8 sm:$0x3] %vm4342_vm0, %v184_v37  ;;  %1137 = vmatpush.msra.mxu3 %v4393_v36  ;;  %1028 = vmatpush.msra.mxu0 %v967_v39  ;;  %s6243_s8 = smov 96   ;;  %s6245_s16 = smov 64  }
  0x37   :  { %1236 = vmatpush.msrb.mxu1 %v4289_v0  ;;  %1456 = vmatpush.msrb.mxu2 %v4289_v0  ;;  %s4555_s17 = sld [smem:[#allocation6 + $0x281]] }
  0x38   :  { %1138 = vmatpush.msra.mxu3 %v4405_v41  ;;  %1029 = vmatpush.msra.mxu0 %v966_v42  ;;  %s4561_s20 = sld [smem:[#allocation6 + $0x381]] }
  0x39   :  { %1237 = vmatpush.msrb.mxu1 %v4291_v2  ;;  %1457 = vmatpush.msrb.mxu2 %v4291_v2 }
  0x3a   :  { %s189_s18 = sshra.s32 %s4400_s4, 3  ;;  %s192_s19 = sand.u32 7, %s4400_s4  ;;  %1139 = vmatpush.msra.mxu3 %v4408_v43  ;;  %1030 = vmatpush.msra.mxu0 %v965_v44 }
  0x3b   :  { %s3734_s28 = sshll.u32 %s189_s18, 4  ;;  %s202_s5 = sshra.s32 %s4402_s27, 3  ;;  %1238 = vmatpush.msrb.mxu1 %v4295_v4  ;;  %1458 = vmatpush.msrb.mxu2 %v4295_v4 }
  0x3c   :  { %s195_s22 = sadd.s32 %s3734_s28, %s192_s19  ;;  %s205_s23 = sand.u32 7, %s4402_s27  ;;  %1140 = vmatpush.msra.mxu3 %v4413_v45  ;;  %1031 = vmatpush.msra.mxu0 %v964_v46 }
  0x3d   :  { %s196_s6 = scalar_lea.vmem %s6229_s1, %s195_s22  ;;  %s3735_s26 = sshll.u32 %s202_s5, 4  ;;  %1239 = vmatpush.msrb.mxu1 %v4303_v6  ;;  %1459 = vmatpush.msrb.mxu2 %v4303_v6 }
  0x3e   :  { %v197_v50 = vld [vmem:[%s196_s6] ss:$8 sm:$0x3]  ;;  %s208_s14 = sadd.s32 %s3735_s26, %s205_s23  ;;  %1141 = vmatpush.msra.mxu3 %v4420_v47  ;;  %1032 = vmatpush.msra.mxu0 %v963_v48  ;;  %s3505_s4 = sld [smem:[#allocation6 + $0x1]] }
  0x3f   :  { %199 = vst.msk [vmem:[#allocation2 + $0x6] ss:$8 sm:$0x3] %vm4342_vm0, %v197_v50  ;;  %s209_s13 = scalar_lea.vmem %s6229_s1, %s208_s14  ;;  %1142 = vmatmul.f32.vlgmr.msra.gmra.mxu3 %v1123_v49  ;;  %1240 = vmatpush.msrb.mxu1 %v4314_v8  ;;  %s3508_s27 = sld [smem:[#allocation6 + $0x81]] }
  0x40   :  { %v210_v51 = vld [vmem:[%s209_s13] ss:$8 sm:$0x3]  ;;  %1181 = vmatpush.msrb.mxu3 %v4289_v0  ;;  %1401 = vmatpush.msrb.mxu0 %v4289_v0  ;;  %s3511_s18 = sld [smem:[#allocation6 + $0x101]]  ;;  %s280_s9 = sshra.s32 %s4555_s17, 3 }
  0x41   :  { %212 = vst.msk [vmem:[#allocation2 + $0x7] ss:$8 sm:$0x3] %vm4342_vm0, %v210_v51  ;;  %1241 = vmatpush.msrb.mxu1 %v4321_v13  ;;  %1460 = vmatpush.msrb.mxu2 %v4314_v8  ;;  %s3514_s28 = sld [smem:[#allocation6 + $0x181]]  ;;  %s306_s11 = sshra.s32 %s4561_s20, 3 }
  0x42   :  { %1182 = vmatpush.msrb.mxu3 %v4291_v2  ;;  %1402 = vmatpush.msrb.mxu0 %v4291_v2  ;;  %s3517_s22 = sld [smem:[#allocation6 + $0x201]]  ;;  %s283_s12 = sand.u32 7, %s4555_s17 }
  0x43   :  { %1242 = vmatpush.msrb.mxu1 %v4333_v16  ;;  %1461 = vmatpush.msrb.mxu2 %v4321_v13  ;;  %s4557_s14 = sld [smem:[#allocation6 + $0x301]]  ;;  %s309_s3 = sand.u32 7, %s4561_s20 }
  0x44   :  { %1183 = vmatpush.msrb.mxu3 %v4295_v4  ;;  %1403 = vmatpush.msrb.mxu0 %v4295_v4  ;;  %s215_s19 = sshra.s32 %s3505_s4, 3  ;;  %s218_s23 = sand.u32 7, %s3505_s4 }
  0x45   :  { %1243 = vmatpush.msrb.mxu1 %v4339_v18  ;;  %1462 = vmatpush.msrb.mxu2 %v4333_v16  ;;  %s228_s5 = sshra.s32 %s3508_s27, 3  ;;  %s3736_s24 = sshll.u32 %s215_s19, 4 }
  0x46   :  { %1184 = vmatpush.msrb.mxu3 %v4303_v6  ;;  %1404 = vmatpush.msrb.mxu0 %v4303_v6  ;;  %s231_s25 = sand.u32 7, %s3508_s27  ;;  %s3737_s6 = sshll.u32 %s228_s5, 4 }
  0x47   :  { %1244 = vmatpush.msrb.mxu1 %v4347_v22  ;;  %1463 = vmatpush.msrb.mxu2 %v4339_v18  ;;  %s4553_s26 = sadd.s32 %s3736_s24, %s218_s23  ;;  %s241_s29 = sshra.s32 %s3511_s18, 3 }
  0x48   :  { %v947_v52 = vld [vmem:[#allocation2] sm:$0xff]  ;;  %v948_v53 = vld [vmem:[#allocation2 + $0x8] sm:$0xff]  ;;  %1185 = vmatpush.msrb.mxu3 %v4314_v8  ;;  %1405 = vmatpush.msrb.mxu0 %v4314_v8  ;;  %s4559_s30 = sadd.s32 %s3737_s6, %s231_s25  ;;  %s222_s15 = scalar_lea.vmem %s6229_s1, %s4553_s26 }
  0x49   :  { %1033 = vmatmul.f32.vlgmr.msra.gmra.mxu0 %v947_v52  ;;  %3673 = vmatmul.msk.f32.vlgmr.msra.gmra.mxu1 %vm992_vm1, %v948_v53  ;;  %s254_s4 = sshra.s32 %s3514_s28, 3  ;;  %s244_s27 = sand.u32 7, %s3511_s18  ;;  %v223_v24 = vld [vmem:[%s222_s15] ss:$8 sm:$0x3] }
  0x4a   :  { %1186 = vmatpush.msrb.mxu3 %v4321_v13  ;;  %1406 = vmatpush.msrb.mxu0 %v4321_v13  ;;  %s267_s19 = sshra.s32 %s3517_s22, 3  ;;  %s235_s24 = scalar_lea.vmem %s6229_s1, %s4559_s30  ;;  %225 = vst.msk [vmem:[#allocation2 + $0x10] ss:$8 sm:$0x3] %vm4342_vm0, %v223_v24 }
  0x4b   :  { %1245 = vmatpush.msrb.mxu1 %v4362_v27  ;;  %1464 = vmatpush.msrb.mxu2 %v4347_v22  ;;  %s3738_s25 = sshll.u32 %s241_s29, 4  ;;  %s257_s6 = sand.u32 7, %s3514_s28  ;;  %v236_v25 = vld [vmem:[%s235_s24] ss:$8 sm:$0x3] }
  0x4c   :  { %1187 = vmatpush.msrb.mxu3 %v4333_v16  ;;  %1407 = vmatpush.msrb.mxu0 %v4333_v16  ;;  %s247_s10 = sadd.s32 %s3738_s25, %s244_s27  ;;  %s293_s0 = sshra.s32 %s4557_s14, 3  ;;  %238 = vst.msk [vmem:[#allocation2 + $0x11] ss:$8 sm:$0x3] %vm4342_vm0, %v236_v25 }
  0x4d   :  { %1246 = vmatpush.msrb.mxu1 %v4386_v32  ;;  %1465 = vmatpush.msrb.mxu2 %v4362_v27  ;;  %s3741_s18 = sshll.u32 %s280_s9, 4  ;;  %s296_s7 = sand.u32 7, %s4557_s14 }
  0x4e   :  { %1188 = vmatpush.msrb.mxu3 %v4339_v18  ;;  %1408 = vmatpush.msrb.mxu0 %v4339_v18  ;;  %s3742_s2 = sshll.u32 %s293_s0, 4  ;;  %s3743_s5 = sshll.u32 %s306_s11, 4 }
  0x4f   :  { %1247 = vmatpush.msrb.mxu1 %v4393_v36  ;;  %1466 = vmatpush.msrb.mxu2 %v4386_v32  ;;  %s248_s29 = scalar_lea.vmem %s6229_s1, %s247_s10  ;;  %s286_s28 = sadd.s32 %s3741_s18, %s283_s12 }
  0x50   :  { %1189 = vmatpush.msrb.mxu3 %v4347_v22  ;;  %1409 = vmatpush.msrb.mxu0 %v4347_v22  ;;  %v249_v26 = vld [vmem:[%s248_s29] ss:$8 sm:$0x3]  ;;  %s287_s10 = scalar_lea.vmem %s6229_s1, %s286_s28  ;;  %s6293_s25 = sld [smem:[#allocation46_spill]] }
  0x51   :  { %1248 = vmatpush.msrb.mxu1 %v4405_v41  ;;  %1467 = vmatpush.msrb.mxu2 %v4393_v36  ;;  %251 = vst.msk [vmem:[#allocation2 + $0x12] ss:$8 sm:$0x3] %vm4342_vm0, %v249_v26  ;;  %v288_v30 = vld [vmem:[%s287_s10] ss:$8 sm:$0x3] }
  0x52   :  { %1190 = vmatpush.msrb.mxu3 %v4362_v27  ;;  %1410 = vmatpush.msrb.mxu0 %v4362_v27  ;;  %290 = vst.msk [vmem:[#allocation2 + $0x15] ss:$8 sm:$0x3] %vm4342_vm0, %v288_v30  ;;  %s6296_s0 = smov 32   ;;  %s3532_s18 = sld [smem:[#allocation6 + $0x82]] }
  0x53   :  { %1249 = vmatpush.msrb.mxu1 %v4408_v43  ;;  %1468 = vmatpush.msrb.mxu2 %v4405_v41  ;;  %s3538_s23 = sld [smem:[#allocation6 + $0x182]] }
  0x54   :  { %1191 = vmatpush.msrb.mxu3 %v4386_v32  ;;  %1411 = vmatpush.msrb.mxu0 %v4386_v32  ;;  %s3541_s28 = sld [smem:[#allocation6 + $0x202]] }
  0x55   :  { %1250 = vmatpush.msrb.mxu1 %v4413_v45  ;;  %1469 = vmatpush.msrb.mxu2 %v4408_v43 }
  0x56   :  { %1192 = vmatpush.msrb.mxu3 %v4393_v36  ;;  %1412 = vmatpush.msrb.mxu0 %v4393_v36  ;;  %v1124_v38 = vld [vmem:[%s6293_s25] sm:$0xff] }
  0x57   :  { %1251 = vmatpush.msrb.mxu1 %v4420_v47  ;;  %1470 = vmatpush.msrb.mxu2 %v4413_v45 }
  0x58   :  { %1193 = vmatpush.msrb.mxu3 %v4405_v41  ;;  %1413 = vmatpush.msrb.mxu0 %v4405_v41  ;;  %s332_s29 = sshra.s32 %s3532_s18, 3 }
  0x59   :  { %1346 = vmatpush.msra.mxu1 %v4289_v0  ;;  %1471 = vmatpush.msrb.mxu2 %v4420_v47 }
  0x5a   :  { %1194 = vmatpush.msrb.mxu3 %v4408_v43  ;;  %1414 = vmatpush.msrb.mxu0 %v4408_v43 }
  0x5b   :  { %1347 = vmatpush.msra.mxu1 %v4291_v2 }
  0x5c   :  { %1195 = vmatpush.msrb.mxu3 %v4413_v45  ;;  %1415 = vmatpush.msrb.mxu0 %v4413_v45 }
  0x5d   :  { %1348 = vmatpush.msra.mxu1 %v4295_v4 }
  0x5e   :  { %1196 = vmatpush.msrb.mxu3 %v4420_v47  ;;  %1416 = vmatpush.msrb.mxu0 %v4420_v47 }
  0x5f   :  { %1349 = vmatpush.msra.mxu1 %v4303_v6 }
  0x60   :  { %1291 = vmatpush.msra.mxu3 %v4289_v0 }
  0x61   :  { %1350 = vmatpush.msra.mxu1 %v4314_v8 }
  0x62   :  { %1292 = vmatpush.msra.mxu3 %v4291_v2 }
  0x63   :  { %1351 = vmatpush.msra.mxu1 %v4321_v13 }
  0x64   :  { %1293 = vmatpush.msra.mxu3 %v4295_v4 }
  0x65   :  { %1352 = vmatpush.msra.mxu1 %v4333_v16 }
  0x66   :  { %1294 = vmatpush.msra.mxu3 %v4303_v6 }
  0x67   :  { %1353 = vmatpush.msra.mxu1 %v4339_v18 }
  0x68   :  { %1295 = vmatpush.msra.mxu3 %v4314_v8 }
  0x69   :  { %1354 = vmatpush.msra.mxu1 %v4347_v22 }
  0x6a   :  { %1296 = vmatpush.msra.mxu3 %v4321_v13 }
  0x6b   :  { %1355 = vmatpush.msra.mxu1 %v4362_v27 }
  0x6c   :  { %1297 = vmatpush.msra.mxu3 %v4333_v16 }
  0x6d   :  { %1356 = vmatpush.msra.mxu1 %v4386_v32 }
  0x6e   :  { %1298 = vmatpush.msra.mxu3 %v4339_v18 }
  0x6f   :  { %1357 = vmatpush.msra.mxu1 %v4393_v36 }
  0x70   :  { %1299 = vmatpush.msra.mxu3 %v4347_v22 }
  0x71   :  { %1358 = vmatpush.msra.mxu1 %v4405_v41 }
  0x72   :  { %1300 = vmatpush.msra.mxu3 %v4362_v27 }
  0x73   :  { %1359 = vmatpush.msra.mxu1 %v4408_v43 }
  0x74   :  { %1301 = vmatpush.msra.mxu3 %v4386_v32 }
  0x75   :  { %1360 = vmatpush.msra.mxu1 %v4413_v45 }
  0x76   :  { %1302 = vmatpush.msra.mxu3 %v4393_v36 }
  0x77   :  { %1361 = vmatpush.msra.mxu1 %v4420_v47 }
  0x78   :  { %1303 = vmatpush.msra.mxu3 %v4405_v41 }
  0x7a   :  { %1304 = vmatpush.msra.mxu3 %v4408_v43 }
  0x7c   :  { %1305 = vmatpush.msra.mxu3 %v4413_v45 }
  0x7e   :  { %1306 = vmatpush.msra.mxu3 %v4420_v47 }
  0xc2   :  { %v1143_v58 = vpop.f32.mrf.mxu3 }
  0xc6   :  { %v1034_v55 = vpop.f32.mrf.mxu0  ;;  %v1075_v56 = vpop.f32.mrf.mxu1 }
  0xc7   :  { %v1035_v57 = vadd.f32 %v4535_v54, %v1034_v55 }
  0xc9   :  { %v1076_v59 = vadd.f32 %v1075_v56, %v1035_v57 }
  0xcb   :  { %v1146_v60 = vadd.f32 %v1143_v58, %v1076_v59 }
  0xcd   :  { %v3681_v61 = vmul.f32 -1.442695, %v1146_v60 }
  0xcf   :  { %3816 = vpow2.f32 %v3681_v61 }
  0xd5   :  { %v3817_v62 = vpop.eup %3816 }
  0xd6   :  { %v1151_v63 = vadd.f32 1.0, %v3817_v62 }
  0xd8   :  { %3818 = vrcp.f32 %v1151_v63  ;;  %v1163_v9 = vand.u32 2147483648, %v1151_v63  ;;  %v1161_v11 = vand.u32 2147483647, %v1151_v63  ;;  %vm1157_vm6 = vweird.f32 %v1151_v63 }
  0xd9   :  { %3820 = vtanh.f32 %v1146_v60 }
  0xda   :  { %v1164_v17 = vor.u32 1.1754944e-38, %v1163_v9  ;;  %vm1162_vm8 = vcmp.eq.f32.partialorder %v1161_v11, 8.507059e+37 }
  0xde   :  { %v3819_v1 = vpop.eup %3818 }
  0xdf   :  { %v1153_v5 = vmul.f32 %v3819_v1, %v1151_v63  ;;  %vm1158_vm4 = vweird.f32 %v3819_v1  ;;  %v3821_v12 = vpop.eup %3820 }
  0xe0   :  { %vm1159_vm7 = vmor %vm1157_vm6, %vm1158_vm4 }
  0xe1   :  { %v1154_v7 = vsub.f32 1.0, %v1153_v5 }
  0xe3   :  { %v1155_v10 = vmul.f32 %v3819_v1, %v1154_v7 }
  0xe5   :  { %v1156_v15 = vadd.f32 %v3819_v1, %v1155_v10 }
  0xe7   :  { %v1160_v19 = vsel %vm1159_vm7, %v3819_v1, %v1156_v15 }
  0xe8   :  { %v1165_v21 = vsel %vm1162_vm8, %v1164_v17, %v1160_v19 }
  0xe9   :  { %v4545_v23 = vsel %vm4539_vm5, %v3821_v12, %v1165_v21 }
  0xea   :  { %1172 = vrot.lane.b32.xlu1 %v4545_v23, %s6241_s21  ;;  %1168 = vrot.lane.b32.xlu0 %v4545_v23, %s6243_s8  ;;  %s3739_s21 = sshll.u32 %s254_s4, 4  ;;  %s270_s8 = sand.u32 7, %s3517_s22 }
  0xeb   :  { %s260_s13 = sadd.s32 %s3739_s21, %s257_s6  ;;  %s6294_s6 = smov 64  }
  0xec   :  { %s261_s27 = scalar_lea.vmem %s6229_s1, %s260_s13  ;;  %s6295_s13 = smov 96  }
  0xed   :  { %v262_v28 = vld [vmem:[%s261_s27] ss:$8 sm:$0x3]  ;;  %s335_s27 = sand.u32 7, %s3532_s18 }
  0xee   :  { %264 = vst.msk [vmem:[#allocation2 + $0x13] ss:$8 sm:$0x3] %vm4342_vm0, %v262_v28 }
  0xf2   :  { %1170 = vrot.lane.b32.xlu0 %v4545_v23, %s6245_s16  ;;  %s3740_s16 = sshll.u32 %s267_s19, 4  ;;  %s299_s19 = sadd.s32 %s3742_s2, %s296_s7 }
  0xf3   :  { %s273_s26 = sadd.s32 %s3740_s16, %s270_s8  ;;  %s312_s16 = sadd.s32 %s3743_s5, %s309_s3 }
  0xf4   :  { %s274_s9 = scalar_lea.vmem %s6229_s1, %s273_s26  ;;  %s300_s12 = scalar_lea.vmem %s6229_s1, %s299_s19 }
  0xf5   :  { %v275_v29 = vld [vmem:[%s274_s9] ss:$8 sm:$0x3]  ;;  %s313_s20 = scalar_lea.vmem %s6229_s1, %s312_s16  ;;  %s3529_s26 = sld [smem:[#allocation6 + $0x2]] }
  0xf6   :  { %277 = vst.msk [vmem:[#allocation2 + $0x14] ss:$8 sm:$0x3] %vm4342_vm0, %v275_v29  ;;  %v301_v31 = vld [vmem:[%s300_s12] ss:$8 sm:$0x3] }
  0xf7   :  { %v314_v33 = vld [vmem:[%s313_s20] ss:$8 sm:$0x3]  ;;  %303 = vst.msk [vmem:[#allocation2 + $0x16] ss:$8 sm:$0x3] %vm4342_vm0, %v301_v31 }
  0xf8   :  { %316 = vst.msk [vmem:[#allocation2 + $0x17] ss:$8 sm:$0x3] %vm4342_vm0, %v314_v33  ;;  %s3535_s5 = sld [smem:[#allocation6 + $0x102]]  ;;  %s3745_s19 = sshll.u32 %s332_s29, 4 }
  0xf9   :  { %s4649_s8 = sld [smem:[#allocation6 + $0x282]]  ;;  %s358_s9 = sshra.s32 %s3538_s23, 3 }
  0xfa   :  { %s4651_s16 = sld [smem:[#allocation6 + $0x302]]  ;;  %s4655_s17 = sadd.s32 %s3745_s19, %s335_s27 }
  0xfb   :  { %s319_s30 = sshra.s32 %s3529_s26, 3  ;;  %s322_s4 = sand.u32 7, %s3529_s26 }
  0xfc   :  { %s3744_s22 = sshll.u32 %s319_s30, 4  ;;  %s361_s7 = sand.u32 7, %s3538_s23 }
  0xfd   :  { %s4653_s11 = sadd.s32 %s3744_s22, %s322_s4  ;;  %s3747_s12 = sshll.u32 %s358_s9, 4 }
  0xfe   :  { %s345_s21 = sshra.s32 %s3535_s5, 3  ;;  %s348_s10 = sand.u32 7, %s3535_s5 }
  0xff   :  { %v949_v34 = vld [vmem:[#allocation2 + $0x10] sm:$0xff]  ;;  %v950_v35 = vld [vmem:[#allocation2 + $0x18] sm:$0xff]  ;;  %s3746_s2 = sshll.u32 %s345_s21, 4  ;;  %s371_s3 = sshra.s32 %s3541_s28, 3 }
 0x100   :  { %1036 = vmatmul.f32.gmra.mxu0 %v949_v34  ;;  %3674 = vmatmul.msk.f32.gmra.mxu1 %vm992_vm1, %v950_v35  ;;  %s4661_s24 = sadd.s32 %s3746_s2, %s348_s10  ;;  %s4667_s29 = sadd.s32 %s3747_s12, %s361_s7 }
 0x101   :  { %s374_s5 = sand.u32 7, %s3541_s28  ;;  %s3748_s23 = sshll.u32 %s371_s3, 4 }
 0x102   :  { %s4673_s19 = sld [smem:[#allocation6 + $0x382]]  ;;  %s384_s2 = sshra.s32 %s4649_s8, 3 }
 0x103   :  { %s4680_s14 = sadd.s32 %s3748_s23, %s374_s5  ;;  %s4682_s7 = sld [smem:[#allocation6 + $0x3]] }
 0x104   :  { %6297 = sst [smem:[#allocation18_spill]] %s4680_s14  ;;  %s387_s28 = sand.u32 7, %s4649_s8 }
 0x105   :  { %s397_s12 = sshra.s32 %s4651_s16, 3  ;;  %s3749_s3 = sshll.u32 %s384_s2, 4 }
 0x106   :  { %s4686_s20 = sld [smem:[#allocation6 + $0x83]]  ;;  %s400_s22 = sand.u32 7, %s4651_s16 }
 0x107   :  { %s3750_s21 = sshll.u32 %s397_s12, 4  ;;  %s4693_s5 = sld [smem:[#allocation6 + $0x103]] }
 0x108   :  { %s4695_s23 = sadd.s32 %s3749_s3, %s387_s28  ;;  %s4697_s9 = sld [smem:[#allocation6 + $0x183]] }
 0x109   :  { %s410_s8 = sshra.s32 %s4673_s19, 3  ;;  %s4700_s2 = sld [smem:[#allocation6 + $0x203]] }
 0x10a   :  { %s4702_s26 = sadd.s32 %s3750_s21, %s400_s22  ;;  %s413_s18 = sand.u32 7, %s4673_s19 }
 0x10b   :  { %s423_s16 = sshra.s32 %s4682_s7, 3  ;;  %s4706_s12 = sld [smem:[#allocation6 + $0x283]] }
 0x10c   :  { %s3751_s4 = sshll.u32 %s410_s8, 4  ;;  %s4708_s10 = sld [smem:[#allocation6 + $0x303]] }
 0x10d   :  { %s436_s28 = sshra.s32 %s4686_s20, 3  ;;  %s4711_s3 = sld [smem:[#allocation6 + $0x383]] }
 0x10e   :  { %6298 = sst [smem:[#allocation19_spill]] %s4697_s9  ;;  %s426_s27 = sand.u32 7, %s4682_s7 }
 0x10f   :  { %6299 = sst [smem:[#allocation20_spill]] %s4700_s2  ;;  %s3752_s30 = sshll.u32 %s423_s16, 4 }
 0x110   :  { %s439_s22 = sand.u32 7, %s4686_s20  ;;  %s449_s19 = sshra.s32 %s4693_s5, 3 }
 0x111   :  { %s3753_s21 = sshll.u32 %s436_s28, 4  ;;  %s462_s15 = sshra.s32 %s4697_s9, 3 }
 0x112   :  { %s452_s25 = sand.u32 7, %s4693_s5  ;;  %s475_s8 = sshra.s32 %s4700_s2, 3 }
 0x113   :  { %6300 = sst [smem:[#allocation21_spill]] %s4711_s3  ;;  %s4723_s14 = sshll.u32 %s475_s8, 4 }
 0x114   :  { %6302 = sst [smem:[#allocation23_spill]] %s4723_s14  ;;  %s416_s7 = sadd.s32 %s3751_s4, %s413_s18 }
 0x115   :  { %s6303_s16 = sld [smem:[#allocation18_spill]] }
 0x116   :  { %s6311_s18 = sld [smem:[#allocation20_spill]] }
 0x15c   :  { %v1169_v37 = vpop.permute.xlu0 %1168  ;;  %v1173_v48 = vpop.permute.xlu1 %1172 }
 0x15d   :  { %v1174_v40 = vmul.f32 %v1169_v37, %v1124_v38 }
 0x164   :  { %v1171_v39 = vpop.permute.xlu0 %1170 }
 0x165   :  { %v1175_v42 = vmul.f32 %v1171_v39, %v4545_v23 }
 0x167   :  { %v4616_v44 = vadd.f32 %v1175_v42, %v1174_v40 }
 0x169   :  { %3822 = vtanh.f32 %v4616_v44 }
 0x16f   :  { %v3823_v46 = vpop.eup %3822 }
 0x170   :  { %v4619_v49 = vmul.f32 %v3823_v46, %v1173_v48 }
 0x172   :  { %1197 = vmatmul.f32.vlgmr.msrb.gmra.mxu3 %v4619_v49 }
 0x173   :  { %1511 = vmatpush.msrb.mxu3 %v4289_v0 }
 0x175   :  { %1512 = vmatpush.msrb.mxu3 %v4291_v2 }
 0x177   :  { %1513 = vmatpush.msrb.mxu3 %v4295_v4 }
 0x179   :  { %1514 = vmatpush.msrb.mxu3 %v4303_v6 }
 0x17b   :  { %1515 = vmatpush.msrb.mxu3 %v4314_v8 }
 0x17d   :  { %1516 = vmatpush.msrb.mxu3 %v4321_v13  ;;  %v1037_v0 = vpop.f32.mrf.mxu0  ;;  %v1078_v4 = vpop.f32.mrf.mxu1 }
 0x17e   :  { %v1038_v2 = vadd.f32 %v4535_v54, %v1037_v0 }
 0x17f   :  { %1517 = vmatpush.msrb.mxu3 %v4333_v16 }
 0x180   :  { %v1079_v6 = vadd.f32 %v1078_v4, %v1038_v2 }
 0x181   :  { %1518 = vmatpush.msrb.mxu3 %v4339_v18 }
 0x183   :  { %1519 = vmatpush.msrb.mxu3 %v4347_v22 }
 0x185   :  { %1520 = vmatpush.msrb.mxu3 %v4362_v27 }
 0x187   :  { %1521 = vmatpush.msrb.mxu3 %v4386_v32 }
 0x189   :  { %1522 = vmatpush.msrb.mxu3 %v4393_v36 }
 0x18b   :  { %1523 = vmatpush.msrb.mxu3 %v4405_v41 }
 0x18d   :  { %1524 = vmatpush.msrb.mxu3 %v4408_v43 }
 0x18f   :  { %1525 = vmatpush.msrb.mxu3 %v4413_v45 }
 0x191   :  { %1526 = vmatpush.msrb.mxu3 %v4420_v47 }
 0x1f5   :  { %v1198_v8 = vpop.f32.mrf.mxu3 }
 0x1f6   :  { %v1201_v13 = vadd.f32 %v1198_v8, %v1079_v6 }
 0x1f8   :  { %v3682_v16 = vmul.f32 -1.442695, %v1201_v13 }
 0x1fa   :  { %3824 = vpow2.f32 %v3682_v16 }
 0x200   :  { %v3825_v18 = vpop.eup %3824 }
 0x201   :  { %v1206_v22 = vadd.f32 1.0, %v3825_v18 }
 0x203   :  { %3826 = vrcp.f32 %v1206_v22  ;;  %v1218_v41 = vand.u32 2147483648, %v1206_v22  ;;  %v1216_v45 = vand.u32 2147483647, %v1206_v22  ;;  %vm1212_vm10 = vweird.f32 %v1206_v22 }
 0x204   :  { %3828 = vtanh.f32 %v1201_v13 }
 0x205   :  { %v1219_v50 = vor.u32 1.1754944e-38, %v1218_v41  ;;  %vm1217_vm12 = vcmp.eq.f32.partialorder %v1216_v45, 8.507059e+37 }
 0x209   :  { %v3827_v27 = vpop.eup %3826 }
 0x20a   :  { %v1208_v32 = vmul.f32 %v3827_v27, %v1206_v22  ;;  %vm1213_vm9 = vweird.f32 %v3827_v27  ;;  %v3829_v52 = vpop.eup %3828 }
 0x20b   :  { %vm1214_vm11 = vmor %vm1212_vm10, %vm1213_vm9 }
 0x20c   :  { %v1209_v36 = vsub.f32 1.0, %v1208_v32 }
 0x20e   :  { %v1210_v43 = vmul.f32 %v3827_v27, %v1209_v36 }
 0x210   :  { %v1211_v47 = vadd.f32 %v3827_v27, %v1210_v43 }
 0x212   :  { %v1215_v51 = vsel %vm1214_vm11, %v3827_v27, %v1211_v47 }
 0x213   :  { %v1220_v53 = vsel %vm1217_vm12, %v1219_v50, %v1215_v51 }
 0x214   :  { %v4641_v55 = vsel %vm4539_vm5, %v3829_v52, %v1220_v53 }
 0x215   :  { %1225 = vrot.lane.b32.xlu2 %v4641_v55, %s6294_s6  ;;  %1223 = vrot.lane.b32.xlu1 %v4641_v55, %s6295_s13  ;;  %s3754_s13 = sshll.u32 %s449_s19, 4  ;;  %s6304_s6 = smov %s6229_s1 }
 0x216   :  { %s6305_s9 = scalar_lea.vmem %s6304_s6, %s4653_s11  ;;  %s6306_s1 = scalar_lea.vmem %s6304_s6, %s4655_s17 }
 0x217   :  { %v327_v56 = vld [vmem:[%s6305_s9] ss:$8 sm:$0x3]  ;;  %s391_s14 = scalar_lea.vmem %s6304_s6, %s4695_s23  ;;  %s6307_s3 = scalar_lea.vmem %s6304_s6, %s4661_s24 }
 0x218   :  { %v340_v57 = vld [vmem:[%s6306_s1] ss:$8 sm:$0x3]  ;;  %329 = vst.msk [vmem:[#allocation2 + $0x20] ss:$8 sm:$0x3] %vm4342_vm0, %v327_v56  ;;  %s404_s5 = scalar_lea.vmem %s6304_s6, %s4702_s26  ;;  %s6308_s4 = scalar_lea.vmem %s6304_s6, %s4667_s29 }
 0x219   :  { %v353_v58 = vld [vmem:[%s6307_s3] ss:$8 sm:$0x3]  ;;  %342 = vst.msk [vmem:[#allocation2 + $0x21] ss:$8 sm:$0x3] %vm4342_vm0, %v340_v57  ;;  %s442_s3 = sadd.s32 %s3753_s21, %s439_s22  ;;  %s4762_s20 = sadd.s32 %s3754_s13, %s452_s25 }
 0x21a   :  { %s6309_s23 = sld [smem:[#allocation19_spill]]  ;;  %v366_v59 = vld [vmem:[%s6308_s4] ss:$8 sm:$0x3]  ;;  %s6313_s26 = scalar_lea.vmem %s6304_s6, %s6303_s16 }
 0x21b   :  { %s6312_s24 = sld [smem:[#allocation23_spill]]  ;;  %355 = vst.msk [vmem:[#allocation2 + $0x22] ss:$8 sm:$0x3] %vm4342_vm0, %v353_v58  ;;  %s417_s19 = scalar_lea.vmem %s6304_s6, %s416_s7 }
 0x21c   :  { %v379_v60 = vld [vmem:[%s6313_s26] ss:$8 sm:$0x3]  ;;  %368 = vst.msk [vmem:[#allocation2 + $0x23] ss:$8 sm:$0x3] %vm4342_vm0, %v366_v59  ;;  %s443_s7 = scalar_lea.vmem %s6304_s6, %s442_s3  ;;  %s456_s9 = scalar_lea.vmem %s6304_s6, %s4762_s20 }
 0x21d   :  { %1227 = vrot.lane.b32.xlu2 %v4641_v55, %s6296_s0  ;;  %s4720_s0 = sshll.u32 %s462_s15, 4  ;;  %v392_v61 = vld [vmem:[%s391_s14] ss:$8 sm:$0x3]  ;;  %s6314_s22 = sld [smem:[#allocation21_spill]] }
 0x21e   :  { %6301 = sst [smem:[#allocation22_spill]] %s4720_s0  ;;  %s4753_s0 = sadd.s32 %s3752_s30, %s426_s27  ;;  %381 = vst.msk [vmem:[#allocation2 + $0x24] ss:$8 sm:$0x3] %vm4342_vm0, %v379_v60 }
 0x21f   :  { %s6310_s2 = sld [smem:[#allocation22_spill]]  ;;  %s430_s21 = scalar_lea.vmem %s6304_s6, %s4753_s0  ;;  %v405_v62 = vld [vmem:[%s404_s5] ss:$8 sm:$0x3] }
 0x220   :  { %394 = vst.msk [vmem:[#allocation2 + $0x25] ss:$8 sm:$0x3] %vm4342_vm0, %v392_v61  ;;  %v418_v63 = vld [vmem:[%s417_s19] ss:$8 sm:$0x3] }
 0x221   :  { %s6315_s14 = sand.u32 7, %s6309_s23  ;;  %s6316_s0 = sand.u32 7, %s6311_s18  ;;  %407 = vst.msk [vmem:[#allocation2 + $0x26] ss:$8 sm:$0x3] %vm4342_vm0, %v405_v62 }
 0x222   :  { %s481_s17 = sadd.s32 %s6312_s24, %s6316_s0  ;;  %s491_s5 = sand.u32 7, %s4706_s12  ;;  %420 = vst.msk [vmem:[#allocation2 + $0x27] ss:$8 sm:$0x3] %vm4342_vm0, %v418_v63 }
 0x223   :  { %s6317_s4 = sshra.s32 %s4706_s12, 3  ;;  %s504_s3 = sand.u32 7, %s4708_s10  ;;  %v431_v1 = vld [vmem:[%s430_s21] ss:$8 sm:$0x3] }
 0x224   :  { %s3757_s30 = sshll.u32 %s6317_s4, 4  ;;  %s6318_s27 = sshra.s32 %s4708_s10, 3  ;;  %v444_v3 = vld [vmem:[%s443_s7] ss:$8 sm:$0x3] }
 0x225   :  { %s468_s1 = sadd.s32 %s6310_s2, %s6315_s14  ;;  %s3758_s20 = sshll.u32 %s6318_s27, 4  ;;  %433 = vst.msk [vmem:[#allocation2 + $0x30] ss:$8 sm:$0x3] %vm4342_vm0, %v431_v1 }
 0x226   :  { %s517_s26 = sand.u32 7, %s6314_s22  ;;  %s6319_s29 = sshra.s32 %s6314_s22, 3  ;;  %v457_v5 = vld [vmem:[%s456_s9] ss:$8 sm:$0x3] }
 0x227   :  { %s3759_s28 = sshll.u32 %s6319_s29, 4  ;;  %s469_s2 = scalar_lea.vmem %s6304_s6, %s468_s1  ;;  %446 = vst.msk [vmem:[#allocation2 + $0x31] ss:$8 sm:$0x3] %vm4342_vm0, %v444_v3 }
 0x228   :  { %s494_s18 = sadd.s32 %s3757_s30, %s491_s5  ;;  %s482_s12 = scalar_lea.vmem %s6304_s6, %s481_s17  ;;  %v470_v7 = vld [vmem:[%s469_s2] ss:$8 sm:$0x3]  ;;  %459 = vst.msk [vmem:[#allocation2 + $0x32] ss:$8 sm:$0x3] %vm4342_vm0, %v457_v5 }
 0x229   :  { %s507_s13 = sadd.s32 %s3758_s20, %s504_s3  ;;  %s520_s10 = sadd.s32 %s3759_s28, %s517_s26  ;;  %v483_v9 = vld [vmem:[%s482_s12] ss:$8 sm:$0x3]  ;;  %472 = vst.msk [vmem:[#allocation2 + $0x33] ss:$8 sm:$0x3] %vm4342_vm0, %v470_v7 }
 0x22a   :  { %s495_s15 = scalar_lea.vmem %s6304_s6, %s494_s18  ;;  %s508_s8 = scalar_lea.vmem %s6304_s6, %s507_s13  ;;  %v951_v10 = vld [vmem:[#allocation2 + $0x20] sm:$0xff]  ;;  %v952_v11 = vld [vmem:[#allocation2 + $0x28] sm:$0xff]  ;;  %485 = vst.msk [vmem:[#allocation2 + $0x34] ss:$8 sm:$0x3] %vm4342_vm0, %v483_v9 }
 0x22b   :  { %s521_s14 = scalar_lea.vmem %s6304_s6, %s520_s10  ;;  %1039 = vmatmul.f32.gmra.mxu0 %v951_v10  ;;  %3675 = vmatmul.msk.f32.gmra.mxu1 %vm992_vm1, %v952_v11  ;;  %v496_v15 = vld [vmem:[%s495_s15] ss:$8 sm:$0x3]  ;;  %s6320_s1 = smov 32  }
 0x22c   :  { %498 = vst.msk [vmem:[#allocation2 + $0x35] ss:$8 sm:$0x3] %vm4342_vm0, %v496_v15  ;;  %v509_v17 = vld [vmem:[%s508_s8] ss:$8 sm:$0x3] }
 0x22d   :  { %511 = vst.msk [vmem:[#allocation2 + $0x36] ss:$8 sm:$0x3] %vm4342_vm0, %v509_v17  ;;  %v522_v19 = vld [vmem:[%s521_s14] ss:$8 sm:$0x3] }
 0x22e   :  { %524 = vst.msk [vmem:[#allocation2 + $0x37] ss:$8 sm:$0x3] %vm4342_vm0, %v522_v19  ;;  %s6321_s0 = smov 64   ;;  %s6322_s17 = smov 96  }
 0x22f   :  { %s3577_s5 = sld [smem:[#allocation6 + $0x4]] }
 0x230   :  { %s3580_s4 = sld [smem:[#allocation6 + $0x84]] }
 0x231   :  { %s4871_s30 = sld [smem:[#allocation6 + $0x104]] }
 0x232   :  { %s4873_s3 = sld [smem:[#allocation6 + $0x184]] }
 0x233   :  { %s4875_s20 = sld [smem:[#allocation6 + $0x204]] }
 0x234   :  { %s4877_s29 = sld [smem:[#allocation6 + $0x284]] }
 0x235   :  { %v953_v12 = vld [vmem:[#allocation2 + $0x30] sm:$0xff]  ;;  %v954_v21 = vld [vmem:[#allocation2 + $0x38] sm:$0xff]  ;;  %s527_s27 = sshra.s32 %s3577_s5, 3  ;;  %s4880_s19 = sld [smem:[#allocation6 + $0x304]] }
 0x236   :  { %1042 = vmatmul.f32.gmra.mxu0 %v953_v12  ;;  %3676 = vmatmul.msk.f32.gmra.mxu1 %vm992_vm1, %v954_v21  ;;  %v1590_v12 = vld [vmem:[#allocation9 + $0x78] sm:$0xff]  ;;  %v1589_v21 = vld [vmem:[#allocation9 + $0x70] sm:$0xff]  ;;  %s540_s26 = sshra.s32 %s3580_s4, 3  ;;  %s530_s23 = sand.u32 7, %s3577_s5 }
 0x237   :  { %s553_s28 = sshra.s32 %s4871_s30, 3  ;;  %s3760_s2 = sshll.u32 %s527_s27, 4 }
 0x238   :  { %s543_s18 = sand.u32 7, %s3580_s4  ;;  %s3761_s24 = sshll.u32 %s540_s26, 4 }
 0x239   :  { %s556_s25 = sand.u32 7, %s4871_s30  ;;  %s3762_s12 = sshll.u32 %s553_s28, 4 }
 0x23a   :  { %s533_s13 = sadd.s32 %s3760_s2, %s530_s23  ;;  %s566_s10 = sshra.s32 %s4873_s3, 3 }
 0x23b   :  { %s546_s22 = sadd.s32 %s3761_s24, %s543_s18  ;;  %s4884_s16 = sld [smem:[#allocation6 + $0x384]] }
 0x23c   :  { %s559_s15 = sadd.s32 %s3762_s12, %s556_s25  ;;  %s569_s21 = sand.u32 7, %s4873_s3 }
 0x23d   :  { %s3763_s7 = sshll.u32 %s566_s10, 4  ;;  %s534_s9 = scalar_lea.vmem %s6304_s6, %s533_s13 }
 0x23e   :  { %s547_s4 = scalar_lea.vmem %s6304_s6, %s546_s22  ;;  %s560_s26 = scalar_lea.vmem %s6304_s6, %s559_s15 }
 0x23f   :  { %s579_s28 = sshra.s32 %s4875_s20, 3  ;;  %s572_s23 = sadd.s32 %s3763_s7, %s569_s21 }
 0x240   :  { %s592_s2 = sshra.s32 %s4877_s29, 3  ;;  %s582_s18 = sand.u32 7, %s4875_s20 }
 0x241   :  { %s605_s24 = sshra.s32 %s4880_s19, 3  ;;  %s3764_s3 = sshll.u32 %s579_s28, 4 }
 0x242   :  { %s595_s25 = sand.u32 7, %s4877_s29  ;;  %s3765_s12 = sshll.u32 %s592_s2, 4 }
 0x243   :  { %s618_s10 = sshra.s32 %s4884_s16, 3  ;;  %s608_s8 = sand.u32 7, %s4880_s19 }
 0x244   :  { %s3766_s13 = sshll.u32 %s605_s24, 4  ;;  %s573_s14 = scalar_lea.vmem %s6304_s6, %s572_s23 }
 0x245   :  { %s585_s22 = sadd.s32 %s3764_s3, %s582_s18  ;;  %s621_s5 = sand.u32 7, %s4884_s16 }
 0x246   :  { %s598_s15 = sadd.s32 %s3765_s12, %s595_s25  ;;  %s611_s21 = sadd.s32 %s3766_s13, %s608_s8 }
 0x247   :  { %s586_s19 = scalar_lea.vmem %s6304_s6, %s585_s22  ;;  %s612_s27 = scalar_lea.vmem %s6304_s6, %s611_s21 }
 0x248   :  { %s3601_s23 = sld [smem:[#allocation6 + $0x5]]  ;;  %s6323_s2 = smov 64  }
 0x249   :  { %s3604_s18 = sld [smem:[#allocation6 + $0x85]]  ;;  %s6324_s24 = smov 96  }
 0x24a   :  { %s3607_s3 = sld [smem:[#allocation6 + $0x105]] }
 0x24b   :  { %s3610_s12 = sld [smem:[#allocation6 + $0x185]] }
 0x24e   :  { %s631_s25 = sshra.s32 %s3601_s23, 3  ;;  %s634_s8 = sand.u32 7, %s3601_s23 }
 0x24f   :  { %s3768_s13 = sshll.u32 %s631_s25, 4  ;;  %s644_s11 = sshra.s32 %s3604_s18, 3 }
 0x250   :  { %s4955_s22 = sadd.s32 %s3768_s13, %s634_s8  ;;  %s3769_s21 = sshll.u32 %s644_s11, 4 }
 0x251   :  { %s660_s20 = sand.u32 7, %s3607_s3  ;;  %s4973_s8 = sld [smem:[#allocation6 + $0x385]] }
 0x252   :  { %s5002_s11 = sld [smem:[#allocation6 + $0x186]] }
 0x258   :  { %6326 = sst [smem:[#allocation19_spill]] %s5002_s11 }
 0x26f   :  { %v1226_v23 = vpop.permute.xlu2 %1225 }
 0x270   :  { %v1230_v25 = vmul.f32 %v1226_v23, %v4641_v55  ;;  %v1588_v23 = vld [vmem:[#allocation9 + $0x68] sm:$0xff] }
 0x277   :  { %v1228_v30 = vpop.permute.xlu2 %1227 }
 0x287   :  { %v1224_v24 = vpop.permute.xlu1 %1223 }
 0x288   :  { %v1229_v26 = vmul.f32 %v1224_v24, %v4616_v44  ;;  %v1587_v24 = vld [vmem:[#allocation9 + $0x60] sm:$0xff] }
 0x28a   :  { %v1231_v28 = vadd.f32 %v1230_v25, %v1229_v26  ;;  %v1586_v25 = vld [vmem:[#allocation9 + $0x58] sm:$0xff] }
 0x28b   :  { %v535_v26 = vld [vmem:[%s534_s9] ss:$8 sm:$0x3]  ;;  %s599_s9 = scalar_lea.vmem %s6304_s6, %s598_s15  ;;  %s647_s15 = sand.u32 7, %s3604_s18 }
 0x28c   :  { %3830 = vtanh.f32 %v1231_v28  ;;  %537 = vst.msk [vmem:[#allocation2 + $0x40] ss:$8 sm:$0x3] %vm4342_vm0, %v535_v26  ;;  %s5042_s18 = sld [smem:[#allocation6 + $0x87]] }
 0x292   :  { %v3831_v29 = vpop.eup %3830  ;;  %6335 = sst [smem:[#allocation28_spill]] %s5042_s18 }
 0x293   :  { %v4845_v31 = vmul.f32 %v3831_v29, %v1228_v30  ;;  %v561_v29 = vld [vmem:[%s560_s26] ss:$8 sm:$0x3] }
 0x294   :  { %v574_v30 = vld [vmem:[%s573_s14] ss:$8 sm:$0x3]  ;;  %563 = vst.msk [vmem:[#allocation2 + $0x42] ss:$8 sm:$0x3] %vm4342_vm0, %v561_v29 }
 0x295   :  { %1252 = vmatmul.f32.vlgmr.msrb.gmra.mxu1 %v4845_v31  ;;  %576 = vst.msk [vmem:[#allocation2 + $0x43] ss:$8 sm:$0x3] %vm4342_vm0, %v574_v30  ;;  %s657_s14 = sshra.s32 %s3607_s3, 3 }
 0x296   :  { %1596 = vmatpush.msrb.mxu1 %v1590_v12  ;;  %s3770_s29 = sshll.u32 %s657_s14, 4  ;;  %s5009_s14 = sld [smem:[#allocation6 + $0x206]] }
 0x297   :  { %s4967_s30 = sadd.s32 %s3770_s29, %s660_s20  ;;  %s4982_s20 = sld [smem:[#allocation6 + $0x6]] }
 0x298   :  { %1597 = vmatpush.msrb.mxu1 %v1589_v21  ;;  %v5190_v21 = vld [vmem:[#allocation11 + $0xf8] sm:$0xff] }
 0x299   :  { %1667 = vmatpush.msra.mxu0 %v5190_v21 }
 0x29a   :  { %1598 = vmatpush.msrb.mxu1 %v1588_v23  ;;  %v5192_v23 = vld [vmem:[#allocation11 + $0xf0] sm:$0xff] }
 0x29b   :  { %1668 = vmatpush.msra.mxu0 %v5192_v23 }
 0x29c   :  { %1599 = vmatpush.msrb.mxu1 %v1587_v24  ;;  %6327 = sst [smem:[#allocation22_spill]] %s5009_s14  ;;  %v5197_v24 = vld [vmem:[#allocation11 + $0xe8] sm:$0xff] }
 0x29d   :  { %1669 = vmatpush.msra.mxu0 %v5197_v24 }
 0x29e   :  { %1600 = vmatpush.msrb.mxu1 %v1586_v25 }
 0x2a8   :  { %v1081_v33 = vpop.f32.mrf.mxu1  ;;  %v1040_v35 = vpop.f32.mrf.mxu0 }
 0x2a9   :  { %v1041_v37 = vadd.f32 %v4535_v54, %v1040_v35  ;;  %v1584_v35 = vld [vmem:[#allocation9 + $0x48] sm:$0xff] }
 0x2ab   :  { %v1082_v38 = vadd.f32 %v1081_v33, %v1041_v37  ;;  %v1585_v33 = vld [vmem:[#allocation9 + $0x50] sm:$0xff]  ;;  %v600_v37 = vld [vmem:[%s599_s9] ss:$8 sm:$0x3]  ;;  %s5030_s9 = sld [smem:[#allocation6 + $0x386]] }
 0x2ac   :  { %1601 = vmatpush.msrb.mxu1 %v1585_v33  ;;  %602 = vst.msk [vmem:[#allocation2 + $0x45] ss:$8 sm:$0x3] %vm4342_vm0, %v600_v37 }
 0x2ae   :  { %1602 = vmatpush.msrb.mxu1 %v1584_v35 }
 0x2b1   :  { %6331 = sst [smem:[#allocation24_spill]] %s5030_s9 }
 0x2b3   :  { %v1084_v34 = vpop.f32.mrf.mxu1  ;;  %v1043_v53 = vpop.f32.mrf.mxu0 }
 0x2b4   :  { %v1044_v55 = vadd.f32 %v4535_v54, %v1043_v53 }
 0x2b6   :  { %v1085_v56 = vadd.f32 %v1084_v34, %v1044_v55  ;;  %v587_v34 = vld [vmem:[%s586_s19] ss:$8 sm:$0x3]  ;;  %s670_s19 = sshra.s32 %s3610_s12, 3 }
 0x2b7   :  { %589 = vst.msk [vmem:[#allocation2 + $0x44] ss:$8 sm:$0x3] %vm4342_vm0, %v587_v34  ;;  %s3771_s26 = sshll.u32 %s670_s19, 4  ;;  %s4988_s19 = sld [smem:[#allocation6 + $0x86]] }
 0x312   :  { %v1253_v39 = vpop.f32.mrf.mxu1 }
 0x313   :  { %v1256_v40 = vadd.f32 %v1253_v39, %v1082_v38  ;;  %v613_v38 = vld [vmem:[%s612_s27] ss:$8 sm:$0x3] }
 0x314   :  { %v1583_v39 = vld [vmem:[#allocation9 + $0x40] sm:$0xff]  ;;  %615 = vst.msk [vmem:[#allocation2 + $0x46] ss:$8 sm:$0x3] %vm4342_vm0, %v613_v38 }
 0x315   :  { %v3683_v42 = vmul.f32 -1.442695, %v1256_v40  ;;  %1603 = vmatpush.msrb.mxu1 %v1583_v39  ;;  %v5284_v38 = vld [vmem:[#allocation11 + $0xe0] sm:$0xff] }
 0x316   :  { %1670 = vmatpush.msra.mxu0 %v5284_v38 }
 0x317   :  { %3832 = vpow2.f32 %v3683_v42  ;;  %v1582_v42 = vld [vmem:[#allocation9 + $0x38] sm:$0xff] }
 0x318   :  { %1604 = vmatpush.msrb.mxu1 %v1582_v42 }
 0x31d   :  { %v3833_v46 = vpop.eup %3832 }
 0x31e   :  { %v1261_v44 = vadd.f32 1.0, %v3833_v46  ;;  %v1581_v46 = vld [vmem:[#allocation9 + $0x30] sm:$0xff] }
 0x31f   :  { %1605 = vmatpush.msrb.mxu1 %v1581_v46 }
 0x320   :  { %3834 = vrcp.f32 %v1261_v44  ;;  %v1273_v4 = vand.u32 2147483648, %v1261_v44  ;;  %v1271_v8 = vand.u32 2147483647, %v1261_v44  ;;  %vm1267_vm14 = vweird.f32 %v1261_v44 }
 0x321   :  { %3836 = vtanh.f32 %v1256_v40 }
 0x322   :  { %v1274_v16 = vor.u32 1.1754944e-38, %v1273_v4  ;;  %vm1272_vm2 = vcmp.eq.f32.partialorder %v1271_v8, 8.507059e+37  ;;  %v1578_v4 = vld [vmem:[#allocation9 + $0x18] sm:$0xff]  ;;  %v1576_v8 = vld [vmem:[#allocation9 + $0x8] sm:$0xff] }
 0x326   :  { %v3835_v48 = vpop.eup %3834 }
 0x327   :  { %v1263_v0 = vmul.f32 %v3835_v48, %v1261_v44  ;;  %vm1268_vm13 = vweird.f32 %v3835_v48  ;;  %v3837_v22 = vpop.eup %3836  ;;  %v1580_v44 = vld [vmem:[#allocation9 + $0x28] sm:$0xff] }
 0x328   :  { %vm1269_vm15 = vmor %vm1267_vm14, %vm1268_vm13  ;;  %1606 = vmatpush.msrb.mxu1 %v1580_v44 }
 0x329   :  { %v1264_v2 = vsub.f32 1.0, %v1263_v0 }
 0x32b   :  { %v1265_v6 = vmul.f32 %v3835_v48, %v1264_v2 }
 0x32d   :  { %v1266_v13 = vadd.f32 %v3835_v48, %v1265_v6  ;;  %v1577_v6 = vld [vmem:[#allocation9 + $0x10] sm:$0xff] }
 0x32f   :  { %v1270_v18 = vsel %vm1269_vm15, %v3835_v48, %v1266_v13  ;;  %v1579_v48 = vld [vmem:[#allocation9 + $0x20] sm:$0xff] }
 0x330   :  { %v1275_v27 = vsel %vm1272_vm2, %v1274_v16, %v1270_v18  ;;  %1607 = vmatpush.msrb.mxu1 %v1579_v48  ;;  %v1575_v13 = vld [vmem:[#allocation9] sm:$0xff] }
 0x331   :  { %v1277_v32 = vsel %vm4539_vm5, %v3837_v22, %v1275_v27 }
 0x332   :  { %1282 = vrot.lane.b32.xlu2 %v1277_v32, %s6320_s1  ;;  %1280 = vrot.lane.b32.xlu1 %v1277_v32, %s6321_s0 }
 0x333   :  { %1278 = vrot.lane.b32.xlu0 %v1277_v32, %s6322_s17  ;;  %1608 = vmatpush.msrb.mxu1 %v1578_v4 }
 0x335   :  { %1609 = vmatpush.msrb.mxu1 %v1577_v6 }
 0x337   :  { %1610 = vmatpush.msrb.mxu1 %v1576_v8 }
 0x339   :  { %1611 = vmatpush.msrb.mxu1 %v1575_v13  ;;  %v5343_v13 = vld [vmem:[#allocation11 + $0xd0] sm:$0xff] }
 0x38c   :  { %v1283_v51 = vpop.permute.xlu2 %1282 }
 0x3a4   :  { %v1281_v36 = vpop.permute.xlu1 %1280 }
 0x3a5   :  { %v1285_v41 = vmul.f32 %v1281_v36, %v1277_v32  ;;  %v1279_v43 = vpop.permute.xlu0 %1278 }
 0x3a6   :  { %v1284_v45 = vmul.f32 %v1279_v43, %v1231_v28  ;;  %v548_v28 = vld [vmem:[%s547_s4] ss:$8 sm:$0x3]  ;;  %s4965_s4 = sadd.s32 %s3769_s21, %s647_s15 }
 0x3a7   :  { %550 = vst.msk [vmem:[#allocation2 + $0x41] ss:$8 sm:$0x3] %vm4342_vm0, %v548_v28 }
 0x3a8   :  { %v4854_v47 = vadd.f32 %v1285_v41, %v1284_v45 }
 0x3aa   :  { %3838 = vtanh.f32 %v4854_v47 }
 0x3b0   :  { %v3839_v50 = vpop.eup %3838 }
 0x3b1   :  { %v4857_v52 = vmul.f32 %v3839_v50, %v1283_v51 }
 0x3b3   :  { %1307 = vmatmul.f32.vlgmr.msra.gmra.mxu3 %v4857_v52 }
 0x3b4   :  { %1777 = vmatpush.msra.mxu3 %v5190_v21 }
 0x3b6   :  { %1778 = vmatpush.msra.mxu3 %v5192_v23 }
 0x3b8   :  { %1779 = vmatpush.msra.mxu3 %v5197_v24 }
 0x3ba   :  { %1780 = vmatpush.msra.mxu3 %v5284_v38 }
 0x436   :  { %v1308_v57 = vpop.f32.mrf.mxu3 }
 0x437   :  { %v1311_v58 = vadd.f32 %v1308_v57, %v1085_v56 }
 0x439   :  { %v3684_v59 = vmul.f32 -1.442695, %v1311_v58 }
 0x43b   :  { %3840 = vpow2.f32 %v3684_v59 }
 0x441   :  { %v3841_v60 = vpop.eup %3840 }
 0x442   :  { %v1316_v61 = vadd.f32 1.0, %v3841_v60 }
 0x444   :  { %3842 = vrcp.f32 %v1316_v61  ;;  %v1328_v3 = vand.u32 2147483648, %v1316_v61  ;;  %v1326_v7 = vand.u32 2147483647, %v1316_v61  ;;  %vm1322_vm4 = vweird.f32 %v1316_v61 }
 0x445   :  { %3844 = vtanh.f32 %v1311_v58 }
 0x446   :  { %v1329_v10 = vor.u32 1.1754944e-38, %v1328_v3  ;;  %vm1327_vm7 = vcmp.eq.f32.partialorder %v1326_v7, 8.507059e+37 }
 0x44a   :  { %v3843_v62 = vpop.eup %3842 }
 0x44b   :  { %v1318_v63 = vmul.f32 %v3843_v62, %v1316_v61  ;;  %vm1323_vm3 = vweird.f32 %v3843_v62  ;;  %v3845_v15 = vpop.eup %3844 }
 0x44c   :  { %vm1324_vm6 = vmor %vm1322_vm4, %vm1323_vm3 }
 0x44d   :  { %v1319_v1 = vsub.f32 1.0, %v1318_v63 }
 0x44f   :  { %v1320_v5 = vmul.f32 %v3843_v62, %v1319_v1 }
 0x451   :  { %v1321_v9 = vadd.f32 %v3843_v62, %v1320_v5 }
 0x453   :  { %v1325_v11 = vsel %vm1324_vm6, %v3843_v62, %v1321_v9 }
 0x454   :  { %v1330_v17 = vsel %vm1327_vm7, %v1329_v10, %v1325_v11 }
 0x455   :  { %v4863_v19 = vsel %vm4539_vm5, %v3845_v15, %v1330_v17 }
 0x456   :  { %1337 = vrot.lane.b32.xlu2 %v4863_v19, %s6320_s1  ;;  %1335 = vrot.lane.b32.xlu1 %v4863_v19, %s6321_s0  ;;  %s3767_s0 = sshll.u32 %s618_s10, 4  ;;  %s3613_s10 = sld [smem:[#allocation6 + $0x205]] }
 0x457   :  { %1333 = vrot.lane.b32.xlu0 %v4863_v19, %s6322_s17  ;;  %s624_s17 = sadd.s32 %s3767_s0, %s621_s5  ;;  %s4957_s5 = sld [smem:[#allocation6 + $0x285]] }
 0x458   :  { %s625_s28 = scalar_lea.vmem %s6304_s6, %s624_s17  ;;  %s4959_s17 = sld [smem:[#allocation6 + $0x305]] }
 0x459   :  { %v626_v40 = vld [vmem:[%s625_s28] ss:$8 sm:$0x3]  ;;  %s673_s0 = sand.u32 7, %s3610_s12  ;;  %s5060_s6 = sld [smem:[#allocation6 + $0x287]] }
 0x45a   :  { %628 = vst.msk [vmem:[#allocation2 + $0x47] ss:$8 sm:$0x3] %vm4342_vm0, %v626_v40  ;;  %s4979_s15 = sadd.s32 %s3771_s26, %s673_s0  ;;  %s4991_s0 = sld [smem:[#allocation6 + $0x106]]  ;;  %v5296_v40 = vld [vmem:[#allocation11 + $0xd8] sm:$0xff] }
 0x45b   :  { %1671 = vmatpush.msra.mxu0 %v5296_v40  ;;  %1781 = vmatpush.msra.mxu3 %v5296_v40 }
 0x45c   :  { %s683_s27 = sshra.s32 %s3613_s10, 3  ;;  %s686_s3 = sand.u32 7, %s3613_s10 }
 0x45d   :  { %s3772_s25 = sshll.u32 %s683_s27, 4  ;;  %s696_s21 = sshra.s32 %s4957_s5, 3  ;;  %1672 = vmatpush.msra.mxu0 %v5343_v13  ;;  %1782 = vmatpush.msra.mxu3 %v5343_v13 }
 0x45e   :  { %s4984_s12 = sadd.s32 %s3772_s25, %s686_s3  ;;  %s709_s10 = sshra.s32 %s4959_s17, 3 }
 0x45f   :  { %s699_s29 = sand.u32 7, %s4957_s5  ;;  %s3773_s16 = sshll.u32 %s696_s21, 4 }
 0x460   :  { %s712_s7 = sand.u32 7, %s4959_s17  ;;  %s3774_s27 = sshll.u32 %s709_s10, 4 }
 0x461   :  { %v956_v0 = vld [vmem:[#allocation2 + $0x48] sm:$0xff]  ;;  %v955_v2 = vld [vmem:[#allocation2 + $0x40] sm:$0xff]  ;;  %6325 = sst [smem:[#allocation18_spill]] %s4991_s0  ;;  %s722_s5 = sshra.s32 %s4973_s8, 3 }
 0x462   :  { %3677 = vmatmul.msk.f32.vlgmr.msra.gmra.mxu2 %vm992_vm1, %v956_v0  ;;  %1045 = vmatmul.f32.gmra.mxu0 %v955_v2  ;;  %s5004_s21 = sadd.s32 %s3773_s16, %s699_s29  ;;  %s5006_s17 = sadd.s32 %s3774_s27, %s712_s7 }
 0x463   :  { %s735_s10 = sshra.s32 %s4982_s20, 3  ;;  %s5012_s28 = sshll.u32 %s722_s5, 4  ;;  %1722 = vmatpush.msra.mxu2 %v5190_v21 }
 0x464   :  { %s748_s3 = sshra.s32 %s4988_s19, 3  ;;  %s5015_s25 = sld [smem:[#allocation6 + $0x286]] }
 0x465   :  { %s5018_s23 = sshll.u32 %s735_s10, 4  ;;  %s761_s29 = sshra.s32 %s4991_s0, 3  ;;  %1723 = vmatpush.msra.mxu2 %v5192_v23 }
 0x466   :  { %s5021_s16 = sld [smem:[#allocation6 + $0x306]]  ;;  %s5024_s27 = sshll.u32 %s748_s3, 4 }
 0x467   :  { %s774_s5 = sshra.s32 %s5002_s11, 3  ;;  %s5028_s26 = sshll.u32 %s761_s29, 4  ;;  %1724 = vmatpush.msra.mxu2 %v5197_v24 }
 0x468   :  { %6330 = sst [smem:[#allocation21_spill]] %s5028_s26  ;;  %s787_s10 = sshra.s32 %s5009_s14, 3 }
 0x469   :  { %s5034_s13 = sshll.u32 %s774_s5, 4  ;;  %s5040_s3 = sshll.u32 %s787_s10, 4  ;;  %1725 = vmatpush.msra.mxu2 %v5284_v38 }
 0x46a   :  { %6328 = sst [smem:[#allocation20_spill]] %s5015_s25  ;;  %s826_s10 = sshra.s32 %s5030_s9, 3 }
 0x46b   :  { %6332 = sst [smem:[#allocation25_spill]] %s5034_s13  ;;  %s904_s9 = sshra.s32 %s5060_s6, 3  ;;  %1726 = vmatpush.msra.mxu2 %v5296_v40 }
 0x46c   :  { %6329 = sst [smem:[#allocation23_spill]] %s5021_s16  ;;  %s813_s29 = sshra.s32 %s5021_s16, 3 }
 0x46d   :  { %6334 = sst [smem:[#allocation27_spill]] %s5040_s3  ;;  %s5053_s7 = sshll.u32 %s813_s29, 4  ;;  %1727 = vmatpush.msra.mxu2 %v5343_v13 }
 0x46e   :  { %s5045_s26 = sld [smem:[#allocation6 + $0x107]]  ;;  %s852_s29 = sshra.s32 %s5042_s18, 3 }
 0x46f   :  { %s5051_s13 = sld [smem:[#allocation6 + $0x187]] }
 0x470   :  { %6339 = sst [smem:[#allocation32_spill]] %s5053_s7 }
 0x471   :  { %s5057_s14 = sld [smem:[#allocation6 + $0x207]] }
 0x472   :  { %6341 = sst [smem:[#allocation34_spill]] %s5060_s6  ;;  %s6355_s6 = sand.u32 7, %s4982_s20 }
 0x473   :  { %s5072_s16 = sld [smem:[#allocation6 + $0x387]]  ;;  %s6361_s20 = sand.u32 7, %s4988_s19 }
 0x474   :  { %6336 = sst [smem:[#allocation29_spill]] %s5045_s26  ;;  %s865_s3 = sshra.s32 %s5045_s26, 3 }
 0x475   :  { %6338 = sst [smem:[#allocation31_spill]] %s5051_s13 }
 0x476   :  { %s6351_s26 = sld [smem:[#allocation44_spill]] }
 0x477   :  { %6340 = sst [smem:[#allocation33_spill]] %s5057_s14  ;;  %s891_s5 = sshra.s32 %s5057_s14, 3 }
 0x478   :  { %s5087_s18 = sshll.u32 %s891_s5, 4  ;;  %s6367_s19 = sld [smem:[#allocation23_spill]] }
 0x479   :  { %6345 = sst [smem:[#allocation38_spill]] %s5072_s16 }
 0x47a   :  { %6349 = sst [smem:[#allocation42_spill]] %s5087_s18  ;;  %s6354_s18 = sand.u32 7, %s4973_s8 }
 0x47b   :  { %s6360_s8 = sld [smem:[#allocation25_spill]] }
 0x47c   :  { %s6353_s5 = scalar_lea.vmem %s6351_s26, %s4965_s4  ;;  %s6359_s4 = sld [smem:[#allocation19_spill]] }
 0x47d   :  { %v652_v9 = vld [vmem:[%s6353_s5] ss:$8 sm:$0x3] }
 0x47e   :  { %654 = vst.msk [vmem:[#allocation2 + $0x51] ss:$8 sm:$0x3] %vm4342_vm0, %v652_v9 }
 0x4b0   :  { %v1338_v41 = vpop.permute.xlu2 %1337 }
 0x4c8   :  { %v1336_v16 = vpop.permute.xlu1 %1335 }
 0x4c9   :  { %v1340_v18 = vmul.f32 %v1336_v16, %v4863_v19  ;;  %v1334_v22 = vpop.permute.xlu0 %1333 }
 0x4ca   :  { %v1339_v27 = vmul.f32 %v1334_v22, %v4854_v47  ;;  %v5357_v22 = vld [vmem:[#allocation11 + $0xc0] sm:$0xff] }
 0x4cc   :  { %v4938_v32 = vadd.f32 %v1340_v18, %v1339_v27  ;;  %v5351_v18 = vld [vmem:[#allocation11 + $0xc8] sm:$0xff]  ;;  %v5365_v27 = vld [vmem:[#allocation11 + $0xb0] sm:$0xff] }
 0x4cd   :  { %1673 = vmatpush.msra.mxu0 %v5351_v18  ;;  %1728 = vmatpush.msra.mxu2 %v5351_v18 }
 0x4ce   :  { %3846 = vtanh.f32 %v4938_v32  ;;  %1783 = vmatpush.msra.mxu3 %v5351_v18 }
 0x4cf   :  { %1674 = vmatpush.msra.mxu0 %v5357_v22  ;;  %1729 = vmatpush.msra.mxu2 %v5357_v22 }
 0x4d0   :  { %1784 = vmatpush.msra.mxu3 %v5357_v22 }
 0x4d1   :  { %1675 = vmatpush.msra.mxu0 %v5362_v20  ;;  %1730 = vmatpush.msra.mxu2 %v5362_v20 }
 0x4d2   :  { %1785 = vmatpush.msra.mxu3 %v5362_v20 }
 0x4d3   :  { %1676 = vmatpush.msra.mxu0 %v5365_v27  ;;  %1731 = vmatpush.msra.mxu2 %v5365_v27 }
 0x4d4   :  { %v3847_v36 = vpop.eup %3846  ;;  %1786 = vmatpush.msra.mxu3 %v5365_v27 }
 0x4d5   :  { %v1343_v43 = vmul.f32 %v3847_v36, %v1338_v41  ;;  %v5371_v36 = vld [vmem:[#allocation11 + $0xa8] sm:$0xff] }
 0x4d6   :  { %1677 = vmatpush.msra.mxu0 %v5371_v36  ;;  %1732 = vmatpush.msra.mxu2 %v5371_v36 }
 0x4d7   :  { %1362 = vmatmul.f32.vlgmr.msra.gmra.mxu1 %v1343_v43  ;;  %1787 = vmatpush.msra.mxu3 %v5371_v36 }
 0x4d8   :  { %1997 = vmatpush.msra.mxu1 %v5190_v21 }
 0x4da   :  { %1998 = vmatpush.msra.mxu1 %v5192_v23 }
 0x4dc   :  { %1999 = vmatpush.msra.mxu1 %v5197_v24 }
 0x4de   :  { %2000 = vmatpush.msra.mxu1 %v5284_v38 }
 0x4df   :  { %1612 = vmatmul.f32.vlgmr.msrb.gmra.mxu1 %v4619_v49  ;;  %v1046_v45 = vpop.f32.mrf.mxu0 }
 0x4e0   :  { %v1047_v50 = vadd.f32 %v4535_v54, %v1046_v45  ;;  %2001 = vmatpush.msra.mxu1 %v5296_v40  ;;  %v5378_v45 = vld [vmem:[#allocation11 + $0xa0] sm:$0xff] }
 0x4e1   :  { %1678 = vmatpush.msra.mxu0 %v5378_v45  ;;  %1733 = vmatpush.msra.mxu2 %v5378_v45 }
 0x4e2   :  { %2002 = vmatpush.msra.mxu1 %v5343_v13  ;;  %1788 = vmatpush.msra.mxu3 %v5378_v45 }
 0x4e4   :  { %2003 = vmatpush.msra.mxu1 %v5351_v18 }
 0x4e5   :  { %v1087_v51 = vpop.f32.mrf.mxu2 }
 0x4e6   :  { %v1088_v47 = vadd.f32 %v1087_v51, %v1047_v50  ;;  %2004 = vmatpush.msra.mxu1 %v5357_v22  ;;  %v5386_v50 = vld [vmem:[#allocation11 + $0x98] sm:$0xff]  ;;  %v5388_v51 = vld [vmem:[#allocation11 + $0x90] sm:$0xff] }
 0x4e7   :  { %1615 = vmatmul.f32.gmra.mxu1 %v4845_v31  ;;  %1679 = vmatpush.msra.mxu0 %v5386_v50 }
 0x4e8   :  { %2005 = vmatpush.msra.mxu1 %v5362_v20  ;;  %1734 = vmatpush.msra.mxu2 %v5386_v50 }
 0x4e9   :  { %1680 = vmatpush.msra.mxu0 %v5388_v51  ;;  %1789 = vmatpush.msra.mxu3 %v5386_v50 }
 0x4ea   :  { %2006 = vmatpush.msra.mxu1 %v5365_v27  ;;  %1735 = vmatpush.msra.mxu2 %v5388_v51 }
 0x4eb   :  { %1790 = vmatpush.msra.mxu3 %v5388_v51 }
 0x4ec   :  { %2007 = vmatpush.msra.mxu1 %v5371_v36 }
 0x4ee   :  { %2008 = vmatpush.msra.mxu1 %v5378_v45 }
 0x4ef   :  { %1618 = vmatmul.f32.gmra.mxu1 %v4857_v52 }
 0x4f0   :  { %2009 = vmatpush.msra.mxu1 %v5386_v50 }
 0x4f2   :  { %2010 = vmatpush.msra.mxu1 %v5388_v51 }
 0x4f7   :  { %1621 = vmatmul.f32.gmra.mxu1 %v1343_v43 }
 0x554   :  { %v1363_v53 = vpop.f32.mrf.mxu1 }
 0x555   :  { %v1366_v55 = vadd.f32 %v1363_v53, %v1088_v47  ;;  %v5394_v47 = vld [vmem:[#allocation11 + $0x88] sm:$0xff]  ;;  %v5400_v53 = vld [vmem:[#allocation11 + $0x80] sm:$0xff] }
 0x556   :  { %1681 = vmatpush.msra.mxu0 %v5394_v47  ;;  %1736 = vmatpush.msra.mxu2 %v5394_v47 }
 0x557   :  { %v3685_v56 = vmul.f32 -1.442695, %v1366_v55  ;;  %1791 = vmatpush.msra.mxu3 %v5394_v47  ;;  %2011 = vmatpush.msra.mxu1 %v5394_v47 }
 0x558   :  { %1682 = vmatpush.msra.mxu0 %v5400_v53  ;;  %1737 = vmatpush.msra.mxu2 %v5400_v53 }
 0x559   :  { %3848 = vpow2.f32 %v3685_v56  ;;  %1792 = vmatpush.msra.mxu3 %v5400_v53  ;;  %2012 = vmatpush.msra.mxu1 %v5400_v53 }
 0x55f   :  { %v3849_v57 = vpop.eup %3848 }
 0x560   :  { %v1371_v58 = vadd.f32 1.0, %v3849_v57 }
 0x562   :  { %3850 = vrcp.f32 %v1371_v58  ;;  %v1383_v31 = vand.u32 2147483648, %v1371_v58  ;;  %v1381_v52 = vand.u32 2147483647, %v1371_v58  ;;  %vm1377_vm9 = vweird.f32 %v1371_v58 }
 0x563   :  { %3852 = vtanh.f32 %v1366_v55 }
 0x564   :  { %v1384_v54 = vor.u32 1.1754944e-38, %v1383_v31  ;;  %vm1382_vm11 = vcmp.eq.f32.partialorder %v1381_v52, 8.507059e+37 }
 0x568   :  { %v3851_v59 = vpop.eup %3850 }
 0x569   :  { %v1373_v60 = vmul.f32 %v3851_v59, %v1371_v58  ;;  %vm1378_vm8 = vweird.f32 %v3851_v59  ;;  %v3853_v1 = vpop.eup %3852 }
 0x56a   :  { %vm1379_vm10 = vmor %vm1377_vm9, %vm1378_vm8 }
 0x56b   :  { %v1374_v49 = vsub.f32 1.0, %v1373_v60 }
 0x56d   :  { %v1375_v61 = vmul.f32 %v3851_v59, %v1374_v49 }
 0x56f   :  { %v1376_v62 = vadd.f32 %v3851_v59, %v1375_v61 }
 0x571   :  { %v1380_v63 = vsel %vm1379_vm10, %v3851_v59, %v1376_v62 }
 0x572   :  { %v1385_v3 = vsel %vm1382_vm11, %v1384_v54, %v1380_v63 }
 0x573   :  { %v4947_v5 = vsel %vm4539_vm5, %v3853_v1, %v1385_v3 }
 0x574   :  { %1392 = vrot.lane.b32.xlu2 %v4947_v5, %s6320_s1  ;;  %1390 = vrot.lane.b32.xlu1 %v4947_v5, %s6323_s2  ;;  %s800_s2 = sshra.s32 %s5015_s25, 3  ;;  %s5062_s1 = sshll.u32 %s826_s10, 4 }
 0x575   :  { %1388 = vrot.lane.b32.xlu0 %v4947_v5, %s6324_s24  ;;  %s5036_s24 = sld [smem:[#allocation6 + $0x7]]  ;;  %s5048_s11 = sshll.u32 %s800_s2, 4 }
 0x576   :  { %6337 = sst [smem:[#allocation30_spill]] %s5048_s11  ;;  %s5074_s11 = sshll.u32 %s852_s29, 4 }
 0x577   :  { %6342 = sst [smem:[#allocation35_spill]] %s5062_s1  ;;  %s878_s10 = sshra.s32 %s5051_s13, 3 }
 0x578   :  { %s5064_s2 = sld [smem:[#allocation6 + $0x307]]  ;;  %s5078_s25 = sshll.u32 %s865_s3, 4 }
 0x579   :  { %6346 = sst [smem:[#allocation39_spill]] %s5074_s11  ;;  %s5090_s3 = sshll.u32 %s904_s9, 4 }
 0x57a   :  { %6347 = sst [smem:[#allocation40_spill]] %s5078_s25  ;;  %s728_s1 = sadd.s32 %s5012_s28, %s6354_s18 }
 0x57b   :  { %6333 = sst [smem:[#allocation26_spill]] %s5036_s24  ;;  %s839_s0 = sshra.s32 %s5036_s24, 3 }
 0x57c   :  { %s5068_s7 = sshll.u32 %s839_s0, 4  ;;  %6350 = sst [smem:[#allocation43_spill]] %s5090_s3 }
 0x57d   :  { %6344 = sst [smem:[#allocation37_spill]] %s5068_s7  ;;  %s5082_s7 = sshll.u32 %s878_s10, 4 }
 0x57e   :  { %6343 = sst [smem:[#allocation36_spill]] %s5064_s2  ;;  %s917_s11 = sshra.s32 %s5064_s2, 3 }
 0x57f   :  { %6348 = sst [smem:[#allocation41_spill]] %s5082_s7  ;;  %s5093_s0 = sshll.u32 %s917_s11, 4 }
 0x580   :  { %s6352_s24 = scalar_lea.vmem %s6351_s26, %s4955_s22  ;;  %s6356_s9 = sld [smem:[#allocation18_spill]] }
 0x581   :  { %v639_v7 = vld [vmem:[%s6352_s24] ss:$8 sm:$0x3]  ;;  %s6357_s3 = sld [smem:[#allocation21_spill]]  ;;  %s5112_s2 = sadd.s32 %s5018_s23, %s6355_s6 }
 0x582   :  { %641 = vst.msk [vmem:[#allocation2 + $0x50] ss:$8 sm:$0x3] %vm4342_vm0, %v639_v7  ;;  %s6358_s24 = scalar_lea.vmem %s6351_s26, %s4967_s30  ;;  %s703_s18 = scalar_lea.vmem %s6351_s26, %s5004_s21 }
 0x583   :  { %v665_v10 = vld [vmem:[%s6358_s24] ss:$8 sm:$0x3]  ;;  %s6362_s28 = sld [smem:[#allocation22_spill]]  ;;  %s5128_s6 = sadd.s32 %s5024_s27, %s6361_s20 }
 0x584   :  { %s6363_s29 = sld [smem:[#allocation27_spill]]  ;;  %s6364_s30 = scalar_lea.vmem %s6351_s26, %s4979_s15  ;;  %667 = vst.msk [vmem:[#allocation2 + $0x52] ss:$8 sm:$0x3] %vm4342_vm0, %v665_v10 }
 0x585   :  { %v678_v11 = vld [vmem:[%s6364_s30] ss:$8 sm:$0x3]  ;;  %s6365_s7 = sld [smem:[#allocation20_spill]]  ;;  %s716_s21 = scalar_lea.vmem %s6351_s26, %s5006_s17 }
 0x586   :  { %s6366_s24 = sld [smem:[#allocation30_spill]]  ;;  %s6369_s20 = scalar_lea.vmem %s6351_s26, %s4984_s12  ;;  %680 = vst.msk [vmem:[#allocation2 + $0x53] ss:$8 sm:$0x3] %vm4342_vm0, %v678_v11  ;;  %v1613_v11 = vpop.f32.mrf.mxu1 }
 0x587   :  { %s6368_s27 = sld [smem:[#allocation32_spill]]  ;;  %v691_v15 = vld [vmem:[%s6369_s20] ss:$8 sm:$0x3]  ;;  %s729_s15 = scalar_lea.vmem %s6351_s26, %s728_s1 }
 0x588   :  { %s742_s5 = scalar_lea.vmem %s6351_s26, %s5112_s2  ;;  %v704_v17 = vld [vmem:[%s703_s18] ss:$8 sm:$0x3]  ;;  %s755_s25 = scalar_lea.vmem %s6351_s26, %s5128_s6  ;;  %693 = vst.msk [vmem:[#allocation2 + $0x54] ss:$8 sm:$0x3] %vm4342_vm0, %v691_v15 }
 0x589   :  { %s6370_s16 = sand.u32 7, %s6356_s9  ;;  %v717_v19 = vld [vmem:[%s716_s21] ss:$8 sm:$0x3]  ;;  %s6371_s12 = sand.u32 7, %s6359_s4 }
 0x58a   :  { %s767_s22 = sadd.s32 %s6357_s3, %s6370_s16  ;;  %s5169_s1 = sadd.s32 %s6360_s8, %s6371_s12  ;;  %706 = vst.msk [vmem:[#allocation2 + $0x55] ss:$8 sm:$0x3] %vm4342_vm0, %v704_v17  ;;  %v730_v12 = vld [vmem:[%s729_s15] ss:$8 sm:$0x3] }
 0x58b   :  { %s6372_s13 = sand.u32 7, %s6362_s28  ;;  %s6373_s18 = sand.u32 7, %s6365_s7  ;;  %719 = vst.msk [vmem:[#allocation2 + $0x56] ss:$8 sm:$0x3] %vm4342_vm0, %v717_v19 }
 0x58c   :  { %s5174_s2 = sadd.s32 %s6363_s29, %s6372_s13  ;;  %s5181_s6 = sadd.s32 %s6366_s24, %s6373_s18  ;;  %732 = vst.msk [vmem:[#allocation2 + $0x57] ss:$8 sm:$0x3] %vm4342_vm0, %v730_v12  ;;  %v743_v25 = vld [vmem:[%s742_s5] ss:$8 sm:$0x3] }
 0x58d   :  { %s6374_s16 = sand.u32 7, %s6367_s19  ;;  %s768_s8 = scalar_lea.vmem %s6351_s26, %s767_s22  ;;  %745 = vst.msk [vmem:[#allocation2 + $0x60] ss:$8 sm:$0x3] %vm4342_vm0, %v743_v25 }
 0x58e   :  { %s5186_s3 = sadd.s32 %s6368_s27, %s6374_s16  ;;  %s6375_s28 = sld [smem:[#allocation24_spill]]  ;;  %v756_v26 = vld [vmem:[%s755_s25] ss:$8 sm:$0x3] }
 0x58f   :  { %s6376_s29 = sld [smem:[#allocation35_spill]]  ;;  %s781_s27 = scalar_lea.vmem %s6351_s26, %s5169_s1  ;;  %758 = vst.msk [vmem:[#allocation2 + $0x61] ss:$8 sm:$0x3] %vm4342_vm0, %v756_v26 }
 0x590   :  { %s6377_s7 = sld [smem:[#allocation26_spill]]  ;;  %s794_s23 = scalar_lea.vmem %s6351_s26, %s5174_s2  ;;  %v769_v28 = vld [vmem:[%s768_s8] ss:$8 sm:$0x3] }
 0x591   :  { %s6378_s24 = sld [smem:[#allocation37_spill]]  ;;  %s807_s22 = scalar_lea.vmem %s6351_s26, %s5181_s6  ;;  %771 = vst.msk [vmem:[#allocation2 + $0x62] ss:$8 sm:$0x3] %vm4342_vm0, %v769_v28 }
 0x592   :  { %s6379_s15 = sld [smem:[#allocation28_spill]]  ;;  %s820_s13 = scalar_lea.vmem %s6351_s26, %s5186_s3  ;;  %v782_v29 = vld [vmem:[%s781_s27] ss:$8 sm:$0x3] }
 0x593   :  { %s6380_s10 = sld [smem:[#allocation39_spill]]  ;;  %784 = vst.msk [vmem:[#allocation2 + $0x63] ss:$8 sm:$0x3] %vm4342_vm0, %v782_v29  ;;  %v958_v35 = vld [vmem:[#allocation2 + $0x58] sm:$0xff]  ;;  %v957_v37 = vld [vmem:[#allocation2 + $0x50] sm:$0xff] }
 0x594   :  { %s6381_s30 = sld [smem:[#allocation29_spill]]  ;;  %s6385_s25 = sand.u32 7, %s6375_s28  ;;  %v795_v30 = vld [vmem:[%s794_s23] ss:$8 sm:$0x3]  ;;  %3678 = vmatmul.msk.f32.gmra.mxu2 %vm992_vm1, %v958_v35  ;;  %1048 = vmatmul.f32.gmra.mxu0 %v957_v37 }
 0x595   :  { %s6382_s17 = sld [smem:[#allocation40_spill]]  ;;  %s5229_s16 = sadd.s32 %s6376_s29, %s6385_s25  ;;  %797 = vst.msk [vmem:[#allocation2 + $0x64] ss:$8 sm:$0x3] %vm4342_vm0, %v795_v30 }
 0x596   :  { %s6383_s2 = sld [smem:[#allocation31_spill]]  ;;  %s6386_s6 = sand.u32 7, %s6377_s7  ;;  %v808_v33 = vld [vmem:[%s807_s22] ss:$8 sm:$0x3] }
 0x597   :  { %s6384_s18 = sld [smem:[#allocation41_spill]]  ;;  %s5234_s9 = sadd.s32 %s6378_s24, %s6386_s6  ;;  %810 = vst.msk [vmem:[#allocation2 + $0x65] ss:$8 sm:$0x3] %vm4342_vm0, %v808_v33 }
 0x598   :  { %s6387_s3 = sand.u32 7, %s6379_s15  ;;  %s6390_s29 = sld [smem:[#allocation33_spill]]  ;;  %v821_v34 = vld [vmem:[%s820_s13] ss:$8 sm:$0x3] }
 0x599   :  { %s5242_s4 = sadd.s32 %s6380_s10, %s6387_s3  ;;  %s6391_s7 = sld [smem:[#allocation42_spill]]  ;;  %823 = vst.msk [vmem:[#allocation2 + $0x66] ss:$8 sm:$0x3] %vm4342_vm0, %v821_v34 }
 0x59a   :  { %s6388_s21 = sand.u32 7, %s6381_s30  ;;  %s833_s14 = scalar_lea.vmem %s6351_s26, %s5229_s16 }
 0x59b   :  { %s5247_s19 = sadd.s32 %s6382_s17, %s6388_s21  ;;  %s846_s15 = scalar_lea.vmem %s6351_s26, %s5234_s9  ;;  %v834_v39 = vld [vmem:[%s833_s14] ss:$8 sm:$0x3] }
 0x59c   :  { %s6389_s8 = sand.u32 7, %s6383_s2  ;;  %s6392_s10 = sld [smem:[#allocation34_spill]]  ;;  %836 = vst.msk [vmem:[#allocation2 + $0x67] ss:$8 sm:$0x3] %vm4342_vm0, %v834_v39 }
 0x59d   :  { %s5257_s28 = sadd.s32 %s6384_s18, %s6389_s8  ;;  %s6393_s30 = sld [smem:[#allocation43_spill]]  ;;  %v847_v42 = vld [vmem:[%s846_s15] ss:$8 sm:$0x3] }
 0x59e   :  { %s6394_s17 = sld [smem:[#allocation36_spill]]  ;;  %s859_s22 = scalar_lea.vmem %s6351_s26, %s5242_s4  ;;  %849 = vst.msk [vmem:[#allocation2 + $0x70] ss:$8 sm:$0x3] %vm4342_vm0, %v847_v42 }
 0x59f   :  { %s6395_s2 = sld [smem:[#allocation38_spill]]  ;;  %s872_s18 = scalar_lea.vmem %s6351_s26, %s5247_s19  ;;  %v860_v46 = vld [vmem:[%s859_s22] ss:$8 sm:$0x3] }
 0x5a0   :  { %s885_s13 = scalar_lea.vmem %s6351_s26, %s5257_s28  ;;  %s6396_s6 = sand.u32 7, %s6390_s29  ;;  %v873_v44 = vld [vmem:[%s872_s18] ss:$8 sm:$0x3] }
 0x5a1   :  { %s5293_s9 = sadd.s32 %s6391_s7, %s6396_s6  ;;  %862 = vst.msk [vmem:[#allocation2 + $0x71] ss:$8 sm:$0x3] %vm4342_vm0, %v860_v46  ;;  %v886_v48 = vld [vmem:[%s885_s13] ss:$8 sm:$0x3] }
 0x5a2   :  { %s6397_s3 = sand.u32 7, %s6392_s10  ;;  %s898_s27 = scalar_lea.vmem %s6351_s26, %s5293_s9  ;;  %875 = vst.msk [vmem:[#allocation2 + $0x72] ss:$8 sm:$0x3] %vm4342_vm0, %v873_v44 }
 0x5a3   :  { %s910_s4 = sadd.s32 %s6393_s30, %s6397_s3  ;;  %v899_v0 = vld [vmem:[%s898_s27] ss:$8 sm:$0x3]  ;;  %888 = vst.msk [vmem:[#allocation2 + $0x73] ss:$8 sm:$0x3] %vm4342_vm0, %v886_v48 }
 0x5a4   :  { %s6398_s21 = sand.u32 7, %s6394_s17  ;;  %s911_s20 = scalar_lea.vmem %s6351_s26, %s910_s4  ;;  %901 = vst.msk [vmem:[#allocation2 + $0x74] ss:$8 sm:$0x3] %vm4342_vm0, %v899_v0  ;;  %v960_v6 = vld [vmem:[#allocation2 + $0x68] sm:$0xff]  ;;  %v959_v8 = vld [vmem:[#allocation2 + $0x60] sm:$0xff] }
 0x5a5   :  { %s923_s19 = sadd.s32 %s5093_s0, %s6398_s21  ;;  %s933_s8 = sand.u32 7, %s6395_s2  ;;  %v912_v2 = vld [vmem:[%s911_s20] ss:$8 sm:$0x3]  ;;  %3679 = vmatmul.msk.f32.gmra.mxu2 %vm992_vm1, %v960_v6  ;;  %1051 = vmatmul.f32.gmra.mxu0 %v959_v8 }
 0x5a6   :  { %s6399_s28 = sshra.s32 %s6395_s2, 3  ;;  %s924_s10 = scalar_lea.vmem %s6351_s26, %s923_s19  ;;  %914 = vst.msk [vmem:[#allocation2 + $0x75] ss:$8 sm:$0x3] %vm4342_vm0, %v912_v2 }
 0x5a7   :  { %s3791_s29 = sshll.u32 %s6399_s28, 4  ;;  %v925_v4 = vld [vmem:[%s924_s10] ss:$8 sm:$0x3]  ;;  %s6400_s12 = sld [smem:[#allocation45_spill]] }
 0x5a8   :  { %s936_s30 = sadd.s32 %s3791_s29, %s933_s8  ;;  %927 = vst.msk [vmem:[#allocation2 + $0x76] ss:$8 sm:$0x3] %vm4342_vm0, %v925_v4  ;;  %s6401_s18 = sld [smem:[#allocation47_spill]] }
 0x5a9   :  { %s937_s5 = scalar_lea.vmem %s6351_s26, %s936_s30  ;;  %s6402_s13 = smov 64  }
 0x5aa   :  { %v938_v16 = vld [vmem:[%s937_s5] ss:$8 sm:$0x3]  ;;  %s6403_s6 = smov 96   ;;  %s6404_s9 = smov 32  }
 0x5ab   :  { %940 = vst.msk [vmem:[#allocation2 + $0x77] ss:$8 sm:$0x3] %vm4342_vm0, %v938_v16  ;;  %s6405_s21 = sld [smem:[#allocation46_spill]] }
 0x5ac   :  { %s6406_s28 = sld [smem:[#allocation51_spill]] }
 0x5ad   :  { %v3690_v61 = vld [vmem:[%s6400_s12 + $0x8] sm:$0xff]  ;;  %s6407_s0 = sld [smem:[#allocation50_spill]] }
 0x5ae   :  { %v5461_v54 = vld [vmem:[%s6401_s18] ss:$0 sm:$0xff]  ;;  %v5467_v9 = vld [vmem:[%s6401_s18 + $0x1] ss:$0 sm:$0xff]  ;;  %s6408_s19 = sld [smem:[#allocation48_spill]] }
 0x5af   :  { %v1614_v15 = vadd.f32 %v5467_v9, %v1613_v11  ;;  %s6409_s7 = sld [smem:[#allocation49_spill]] }
 0x5b2   :  { %v962_v41 = vld [vmem:[#allocation2 + $0x78] sm:$0xff]  ;;  %v961_v43 = vld [vmem:[#allocation2 + $0x70] sm:$0xff] }
 0x5b3   :  { %3680 = vmatmul.msk.f32.gmra.mxu2 %vm992_vm1, %v962_v41  ;;  %1054 = vmatmul.f32.gmra.mxu0 %v961_v43 }
 0x5ce   :  { %v1393_v49 = vpop.permute.xlu2 %1392 }
 0x5e6   :  { %v1391_v55 = vpop.permute.xlu1 %1390 }
 0x5e7   :  { %v1395_v56 = vmul.f32 %v1391_v55, %v4947_v5  ;;  %v1389_v57 = vpop.permute.xlu0 %1388 }
 0x5e8   :  { %v1394_v58 = vmul.f32 %v1389_v57, %v4938_v32 }
 0x5ea   :  { %v5416_v59 = vadd.f32 %v1395_v56, %v1394_v58 }
 0x5ec   :  { %3854 = vtanh.f32 %v5416_v59 }
 0x5f2   :  { %v3855_v60 = vpop.eup %3854 }
 0x5f3   :  { %v1398_v31 = vmul.f32 %v3855_v60, %v1393_v49 }
 0x5f5   :  { %1417 = vmatmul.f32.vlgmr.msrb.gmra.mxu0 %v1398_v31  ;;  %1624 = vmatmul.f32.gmra.mxu1 %v1398_v31 }
 0x5f6   :  { %1832 = vmatpush.msrb.mxu0 %v5190_v21 }
 0x5f8   :  { %1833 = vmatpush.msrb.mxu0 %v5192_v23 }
 0x5fa   :  { %1834 = vmatpush.msrb.mxu0 %v5197_v24 }
 0x5fc   :  { %1835 = vmatpush.msrb.mxu0 %v5284_v38 }
 0x5fd   :  { %1683 = vmatmul.f32.vlgmr.msra.gmra.mxu0 %v3690_v61 }
 0x5fe   :  { %1836 = vmatpush.msrb.mxu0 %v5296_v40 }
 0x600   :  { %1837 = vmatpush.msrb.mxu0 %v5343_v13 }
 0x602   :  { %1838 = vmatpush.msrb.mxu0 %v5351_v18 }
 0x604   :  { %1839 = vmatpush.msrb.mxu0 %v5357_v22 }
 0x606   :  { %1840 = vmatpush.msrb.mxu0 %v5362_v20 }
 0x608   :  { %1841 = vmatpush.msrb.mxu0 %v5365_v27 }
 0x60a   :  { %1842 = vmatpush.msrb.mxu0 %v5371_v36 }
 0x60c   :  { %1843 = vmatpush.msrb.mxu0 %v5378_v45 }
 0x60e   :  { %1844 = vmatpush.msrb.mxu0 %v5386_v50 }
 0x610   :  { %1845 = vmatpush.msrb.mxu0 %v5388_v51 }
 0x611   :  { %v1049_v32 = vpop.f32.mrf.mxu0 }
 0x612   :  { %1846 = vmatpush.msrb.mxu0 %v5394_v47  ;;  %v1050_v63 = vadd.f32 %v5461_v54, %v1049_v32 }
 0x614   :  { %1847 = vmatpush.msrb.mxu0 %v5400_v53 }
 0x616   :  { %2052 = vmatpush.msra.mxu0 %v5190_v21 }
 0x617   :  { %v1090_v1 = vpop.f32.mrf.mxu2 }
 0x618   :  { %2053 = vmatpush.msra.mxu0 %v5192_v23  ;;  %v1091_v3 = vadd.f32 %v1090_v1, %v1050_v63 }
 0x61a   :  { %2054 = vmatpush.msra.mxu0 %v5197_v24 }
 0x61c   :  { %2055 = vmatpush.msra.mxu0 %v5284_v38 }
 0x61e   :  { %2056 = vmatpush.msra.mxu0 %v5296_v40 }
 0x620   :  { %2057 = vmatpush.msra.mxu0 %v5343_v13 }
 0x622   :  { %2058 = vmatpush.msra.mxu0 %v5351_v18  ;;  %v5454_v52 = vpop.f32.mrf.mxu0 }
 0x624   :  { %2059 = vmatpush.msra.mxu0 %v5357_v22 }
 0x626   :  { %2060 = vmatpush.msra.mxu0 %v5362_v20 }
 0x628   :  { %2061 = vmatpush.msra.mxu0 %v5365_v27 }
 0x62a   :  { %2062 = vmatpush.msra.mxu0 %v5371_v36 }
 0x62c   :  { %2063 = vmatpush.msra.mxu0 %v5378_v45 }
 0x62e   :  { %2064 = vmatpush.msra.mxu0 %v5386_v50 }
 0x630   :  { %2065 = vmatpush.msra.mxu0 %v5388_v51  ;;  %v5456_v62 = vpop.f32.mrf.mxu0 }
 0x632   :  { %2066 = vmatpush.msra.mxu0 %v5394_v47 }
 0x634   :  { %2067 = vmatpush.msra.mxu0 %v5400_v53 }
 0x672   :  { %v1418_v5 = vpop.f32.mrf.mxu0 }
 0x673   :  { %v1421_v7 = vadd.f32 %v1418_v5, %v1091_v3  ;;  %v3691_v3 = vld [vmem:[%s6405_s21 + $0x8] sm:$0xff] }
 0x675   :  { %v3686_v10 = vmul.f32 -1.442695, %v1421_v7 }
 0x677   :  { %3856 = vpow2.f32 %v3686_v10 }
 0x67a   :  { %v1684_v17 = vpop.f32.mrf.mxu0 }
 0x67b   :  { %v1687_v19 = vadd.f32 %v1684_v17, %v1614_v15 }
 0x67d   :  { %v3857_v12 = vpop.eup %3856  ;;  %v3692_v25 = vmul.f32 -1.442695, %v1687_v19 }
 0x67e   :  { %v1426_v26 = vadd.f32 1.0, %v3857_v12 }
 0x67f   :  { %3858 = vpow2.f32 %v3692_v25 }
 0x680   :  { %3860 = vrcp.f32 %v1426_v26  ;;  %v1438_v35 = vand.u32 2147483648, %v1426_v26  ;;  %v1436_v39 = vand.u32 2147483647, %v1426_v26  ;;  %vm1432_vm1 = vweird.f32 %v1426_v26 }
 0x682   :  { %v1439_v44 = vor.u32 1.1754944e-38, %v1438_v35  ;;  %vm1437_vm13 = vcmp.eq.f32.partialorder %v1436_v39, 8.507059e+37  ;;  %v1616_v39 = vpop.f32.mrf.mxu1 }
 0x685   :  { %v3859_v28 = vpop.eup %3858 }
 0x686   :  { %v3861_v29 = vpop.eup %3860  ;;  %v1692_v30 = vadd.f32 1.0, %v3859_v28  ;;  %v1093_v28 = vpop.f32.mrf.mxu2 }
 0x687   :  { %v1428_v33 = vmul.f32 %v3861_v29, %v1426_v26  ;;  %vm1433_vm0 = vweird.f32 %v3861_v29 }
 0x688   :  { %3862 = vrcp.f32 %v1692_v30  ;;  %vm1434_vm12 = vmor %vm1432_vm1, %vm1433_vm0  ;;  %v1704_v16 = vand.u32 2147483648, %v1692_v30  ;;  %v1702_v43 = vand.u32 2147483647, %v1692_v30  ;;  %vm1698_vm15 = vweird.f32 %v1692_v30 }
 0x689   :  { %v1429_v34 = vsub.f32 1.0, %v1428_v33  ;;  %3864 = vtanh.f32 %v1421_v7 }
 0x68a   :  { %3866 = vtanh.f32 %v1687_v19  ;;  %v1705_v56 = vor.u32 1.1754944e-38, %v1704_v16  ;;  %vm1703_vm3 = vcmp.eq.f32.partialorder %v1702_v43, 8.507059e+37 }
 0x68b   :  { %v1430_v37 = vmul.f32 %v3861_v29, %v1429_v34 }
 0x68d   :  { %v1431_v42 = vadd.f32 %v3861_v29, %v1430_v37 }
 0x68e   :  { %v3863_v46 = vpop.eup %3862 }
 0x68f   :  { %v1435_v48 = vsel %vm1434_vm12, %v3861_v29, %v1431_v42  ;;  %v1694_v0 = vmul.f32 %v3863_v46, %v1692_v30  ;;  %v3865_v2 = vpop.eup %3864  ;;  %vm1699_vm14 = vweird.f32 %v3863_v46  ;;  %v5509_v29 = vpop.f32.mrf.mxu2  ;;  %v1053_v30 = vadd.f32 %v5461_v54, %v5454_v52 }
 0x690   :  { %v1440_v4 = vsel %vm1437_vm13, %v1439_v44, %v1435_v48  ;;  %vm1700_vm2 = vmor %vm1698_vm15, %vm1699_vm14  ;;  %v3867_v58 = vpop.eup %3866  ;;  %v1617_v42 = vadd.f32 %v5467_v9, %v1616_v39 }
 0x691   :  { %v1442_v6 = vsel %vm4539_vm5, %v3865_v2, %v1440_v4  ;;  %v1695_v8 = vsub.f32 1.0, %v1694_v0  ;;  %v1094_v33 = vadd.f32 %v1093_v28, %v1053_v30 }
 0x692   :  { %1445 = vrot.lane.b32.xlu1 %v1442_v6, %s6402_s13  ;;  %1443 = vrot.lane.b32.xlu0 %v1442_v6, %s6403_s6 }
 0x693   :  { %v1696_v41 = vmul.f32 %v3863_v46, %v1695_v8 }
 0x695   :  { %v1697_v55 = vadd.f32 %v3863_v46, %v1696_v41 }
 0x697   :  { %v1701_v57 = vsel %vm1700_vm2, %v3863_v46, %v1697_v55 }
 0x698   :  { %v1706_v60 = vsel %vm1703_vm3, %v1705_v56, %v1701_v57 }
 0x699   :  { %v1708_v49 = vsel %vm4539_vm5, %v3867_v58, %v1706_v60 }
 0x69a   :  { %1709 = vrot.lane.b32.xlu2 %v1708_v49, %s6403_s6  ;;  %1447 = vrot.lane.b32.xlu1 %v1442_v6, %s6404_s9 }
 0x69b   :  { %1711 = vrot.lane.b32.xlu0 %v1708_v49, %s6402_s13 }
 0x6a2   :  { %1713 = vrot.lane.b32.xlu2 %v1708_v49, %s6404_s9 }
 0x6f4   :  { %v1710_v5 = vpop.permute.xlu2 %1709 }
 0x6f5   :  { %v1715_v10 = vmul.f32 %v3691_v3, %v1710_v5 }
 0x6fc   :  { %v1714_v25 = vpop.permute.xlu2 %1713 }
 0x704   :  { %v1446_v31 = vpop.permute.xlu1 %1445  ;;  %v1444_v61 = vpop.permute.xlu0 %1443 }
 0x705   :  { %v1450_v32 = vmul.f32 %v1446_v31, %v1442_v6  ;;  %v1449_v63 = vmul.f32 %v1444_v61, %v5416_v59 }
 0x707   :  { %v5481_v1 = vadd.f32 %v1450_v32, %v1449_v63 }
 0x709   :  { %3868 = vtanh.f32 %v5481_v1 }
 0x70c   :  { %v1448_v17 = vpop.permute.xlu1 %1447 }
 0x70d   :  { %v1712_v7 = vpop.permute.xlu0 %1711 }
 0x70e   :  { %v1716_v11 = vmul.f32 %v1712_v7, %v1708_v49 }
 0x70f   :  { %v3869_v15 = vpop.eup %3868 }
 0x710   :  { %v1453_v19 = vmul.f32 %v3869_v15, %v1448_v17  ;;  %v5487_v12 = vadd.f32 %v1716_v11, %v1715_v10 }
 0x712   :  { %3870 = vtanh.f32 %v5487_v12  ;;  %1472 = vmatmul.f32.vlgmr.msrb.gmra.mxu2 %v1453_v19  ;;  %1627 = vmatmul.f32.gmra.mxu1 %v1453_v19 }
 0x713   :  { %1887 = vmatpush.msrb.mxu2 %v5190_v21 }
 0x715   :  { %1888 = vmatpush.msrb.mxu2 %v5192_v23 }
 0x717   :  { %1889 = vmatpush.msrb.mxu2 %v5197_v24 }
 0x718   :  { %v3871_v59 = vpop.eup %3870 }
 0x719   :  { %v5493_v26 = vmul.f32 %v3871_v59, %v1714_v25  ;;  %1890 = vmatpush.msrb.mxu2 %v5284_v38 }
 0x71b   :  { %1738 = vmatmul.f32.vlgmr.msra.gmra.mxu2 %v5493_v26 }
 0x71c   :  { %1891 = vmatpush.msrb.mxu2 %v5296_v40 }
 0x71e   :  { %1892 = vmatpush.msrb.mxu2 %v5343_v13 }
 0x720   :  { %1893 = vmatpush.msrb.mxu2 %v5351_v18 }
 0x722   :  { %1894 = vmatpush.msrb.mxu2 %v5357_v22 }
 0x724   :  { %1895 = vmatpush.msrb.mxu2 %v5362_v20 }
 0x726   :  { %1896 = vmatpush.msrb.mxu2 %v5365_v27 }
 0x728   :  { %1897 = vmatpush.msrb.mxu2 %v5371_v36 }
 0x72a   :  { %1898 = vmatpush.msrb.mxu2 %v5378_v45 }
 0x72c   :  { %1899 = vmatpush.msrb.mxu2 %v5386_v50 }
 0x72e   :  { %1900 = vmatpush.msrb.mxu2 %v5388_v51 }
 0x730   :  { %1901 = vmatpush.msrb.mxu2 %v5394_v47 }
 0x732   :  { %1902 = vmatpush.msrb.mxu2 %v5400_v53 }
 0x795   :  { %v1473_v34 = vpop.f32.mrf.mxu2 }
 0x796   :  { %v1476_v35 = vadd.f32 %v1473_v34, %v1094_v33 }
 0x798   :  { %v3687_v37 = vmul.f32 -1.442695, %v1476_v35 }
 0x79a   :  { %3872 = vpow2.f32 %v3687_v37 }
 0x79e   :  { %v1739_v46 = vpop.f32.mrf.mxu2 }
 0x79f   :  { %v1742_v44 = vadd.f32 %v1739_v46, %v1617_v42 }
 0x7a0   :  { %v3873_v48 = vpop.eup %3872 }
 0x7a1   :  { %v1481_v0 = vadd.f32 1.0, %v3873_v48  ;;  %v3693_v2 = vmul.f32 -1.442695, %v1742_v44 }
 0x7a3   :  { %3874 = vrcp.f32 %v1481_v0  ;;  %v1493_v41 = vand.u32 2147483648, %v1481_v0  ;;  %v1491_v55 = vand.u32 2147483647, %v1481_v0  ;;  %vm1487_vm6 = vweird.f32 %v1481_v0 }
 0x7a4   :  { %3876 = vpow2.f32 %v3693_v2 }
 0x7a5   :  { %3878 = vtanh.f32 %v1476_v35  ;;  %v1494_v57 = vor.u32 1.1754944e-38, %v1493_v41  ;;  %vm1492_vm8 = vcmp.eq.f32.partialorder %v1491_v55, 8.507059e+37 }
 0x7a9   :  { %v3875_v4 = vpop.eup %3874 }
 0x7aa   :  { %v3877_v6 = vpop.eup %3876  ;;  %v1483_v8 = vmul.f32 %v3875_v4, %v1481_v0  ;;  %vm1488_vm4 = vweird.f32 %v3875_v4 }
 0x7ab   :  { %v1747_v16 = vadd.f32 1.0, %v3877_v6  ;;  %vm1489_vm7 = vmor %vm1487_vm6, %vm1488_vm4  ;;  %v3879_v58 = vpop.eup %3878 }
 0x7ac   :  { %v1484_v52 = vsub.f32 1.0, %v1483_v8 }
 0x7ad   :  { %3880 = vrcp.f32 %v1747_v16  ;;  %v1759_v3 = vand.u32 2147483648, %v1747_v16  ;;  %v1757_v7 = vand.u32 2147483647, %v1747_v16  ;;  %vm1753_vm10 = vweird.f32 %v1747_v16 }
 0x7ae   :  { %v1485_v43 = vmul.f32 %v3875_v4, %v1484_v52  ;;  %3882 = vtanh.f32 %v1742_v44 }
 0x7af   :  { %v1760_v11 = vor.u32 1.1754944e-38, %v1759_v3  ;;  %vm1758_vm0 = vcmp.eq.f32.partialorder %v1757_v7, 8.507059e+37 }
 0x7b0   :  { %v1486_v56 = vadd.f32 %v3875_v4, %v1485_v43 }
 0x7b2   :  { %v1490_v60 = vsel %vm1489_vm7, %v3875_v4, %v1486_v56 }
 0x7b3   :  { %v3881_v49 = vpop.eup %3880  ;;  %v1495_v31 = vsel %vm1492_vm8, %v1494_v57, %v1490_v60 }
 0x7b4   :  { %v1497_v61 = vsel %vm4539_vm5, %v3879_v58, %v1495_v31  ;;  %v1749_v32 = vmul.f32 %v3881_v49, %v1747_v16  ;;  %vm1754_vm9 = vweird.f32 %v3881_v49  ;;  %v3883_v17 = vpop.eup %3882 }
 0x7b5   :  { %1500 = vrot.lane.b32.xlu1 %v1497_v61, %s6402_s13  ;;  %1498 = vrot.lane.b32.xlu0 %v1497_v61, %s6403_s6  ;;  %vm1755_vm11 = vmor %vm1753_vm10, %vm1754_vm9 }
 0x7b6   :  { %v1750_v63 = vsub.f32 1.0, %v1749_v32 }
 0x7b8   :  { %v1751_v5 = vmul.f32 %v3881_v49, %v1750_v63 }
 0x7ba   :  { %v1752_v10 = vadd.f32 %v3881_v49, %v1751_v5 }
 0x7bc   :  { %v1756_v15 = vsel %vm1755_vm11, %v3881_v49, %v1752_v10 }
 0x7bd   :  { %1502 = vrot.lane.b32.xlu1 %v1497_v61, %s6404_s9  ;;  %v1761_v19 = vsel %vm1758_vm0, %v1760_v11, %v1756_v15 }
 0x7be   :  { %v1763_v59 = vsel %vm4539_vm5, %v3883_v17, %v1761_v19 }
 0x7bf   :  { %1766 = vrot.lane.b32.xlu0 %v1763_v59, %s6402_s13  ;;  %1764 = vrot.lane.b32.xlu2 %v1763_v59, %s6403_s6 }
 0x7c7   :  { %1768 = vrot.lane.b32.xlu2 %v1763_v59, %s6404_s9 }
 0x819   :  { %v1765_v35 = vpop.permute.xlu2 %1764 }
 0x81a   :  { %v1770_v42 = vmul.f32 %v1765_v35, %v5487_v12 }
 0x821   :  { %v1769_v2 = vpop.permute.xlu2 %1768 }
 0x827   :  { %v1501_v25 = vpop.permute.xlu1 %1500  ;;  %v1499_v28 = vpop.permute.xlu0 %1498 }
 0x828   :  { %v1505_v30 = vmul.f32 %v1501_v25, %v1497_v61  ;;  %v1504_v33 = vmul.f32 %v1499_v28, %v5481_v1 }
 0x82a   :  { %v5525_v34 = vadd.f32 %v1505_v30, %v1504_v33 }
 0x82c   :  { %3884 = vtanh.f32 %v5525_v34 }
 0x82f   :  { %v1503_v46 = vpop.permute.xlu1 %1502 }
 0x831   :  { %v1767_v37 = vpop.permute.xlu0 %1766 }
 0x832   :  { %v3885_v39 = vpop.eup %3884  ;;  %v1771_v44 = vmul.f32 %v1767_v37, %v1763_v59  ;;  %v2134_v37 = vld [vmem:[#allocation9 + $0xf8] sm:$0xff] }
 0x833   :  { %v1508_v48 = vmul.f32 %v3885_v39, %v1503_v46  ;;  %v2133_v39 = vld [vmem:[#allocation9 + $0xf0] sm:$0xff]  ;;  %2140 = vmatpush.msra.mxu2 %v2134_v37  ;;  %v2131_v46 = vld [vmem:[#allocation9 + $0xe0] sm:$0xff] }
 0x834   :  { %v1772_v0 = vadd.f32 %v1771_v44, %v1770_v42  ;;  %v2132_v42 = vld [vmem:[#allocation9 + $0xe8] sm:$0xff]  ;;  %v2130_v44 = vld [vmem:[#allocation9 + $0xd8] sm:$0xff]  ;;  %v5613_v37 = vld [vmem:[#allocation11 + $0x160] sm:$0xff] }
 0x835   :  { %1527 = vmatmul.f32.vlgmr.msrb.gmra.mxu3 %v1508_v48  ;;  %1630 = vmatmul.f32.gmra.mxu1 %v1508_v48  ;;  %v2129_v48 = vld [vmem:[#allocation9 + $0xd0] sm:$0xff] }
 0x836   :  { %3886 = vtanh.f32 %v1772_v0  ;;  %1942 = vmatpush.msrb.mxu3 %v5190_v21  ;;  %v1056_v21 = vadd.f32 %v5461_v54, %v5456_v62  ;;  %2141 = vmatpush.msra.mxu2 %v2133_v39  ;;  %v5619_v39 = vld [vmem:[#allocation11 + $0x158] sm:$0xff] }
 0x838   :  { %1943 = vmatpush.msrb.mxu3 %v5192_v23  ;;  %v1097_v23 = vadd.f32 %v5509_v29, %v1056_v21  ;;  %2142 = vmatpush.msra.mxu2 %v2132_v42  ;;  %v2125_v21 = vld [vmem:[#allocation9 + $0xb0] sm:$0xff] }
 0x839   :  { %v5631_v42 = vld [vmem:[#allocation11 + $0x150] sm:$0xff] }
 0x83a   :  { %1944 = vmatpush.msrb.mxu3 %v5197_v24  ;;  %2143 = vmatpush.msra.mxu2 %v2131_v46  ;;  %v5635_v46 = vld [vmem:[#allocation11 + $0x148] sm:$0xff] }
 0x83c   :  { %v3887_v1 = vpop.eup %3886  ;;  %1945 = vmatpush.msrb.mxu3 %v5284_v38  ;;  %2144 = vmatpush.msra.mxu2 %v2130_v44  ;;  %v5641_v44 = vld [vmem:[#allocation11 + $0x140] sm:$0xff] }
 0x83d   :  { %v5533_v4 = vmul.f32 %v3887_v1, %v1769_v2  ;;  %v2127_v1 = vld [vmem:[#allocation9 + $0xc0] sm:$0xff]  ;;  %v2126_v2 = vld [vmem:[#allocation9 + $0xb8] sm:$0xff] }
 0x83e   :  { %1946 = vmatpush.msrb.mxu3 %v5296_v40  ;;  %v1619_v40 = vpop.f32.mrf.mxu1  ;;  %2145 = vmatpush.msra.mxu2 %v2129_v48  ;;  %v5646_v48 = vld [vmem:[#allocation11 + $0x138] sm:$0xff] }
 0x83f   :  { %1793 = vmatmul.f32.vlgmr.msra.gmra.mxu3 %v5533_v4 }
 0x840   :  { %1947 = vmatpush.msrb.mxu3 %v5343_v13  ;;  %v1620_v13 = vadd.f32 %v5467_v9, %v1619_v40  ;;  %v2122_v40 = vld [vmem:[#allocation9 + $0x98] sm:$0xff] }
 0x842   :  { %1948 = vmatpush.msrb.mxu3 %v5351_v18 }
 0x844   :  { %1949 = vmatpush.msrb.mxu3 %v5357_v22 }
 0x846   :  { %1950 = vmatpush.msrb.mxu3 %v5362_v20  ;;  %v1622_v49 = vpop.f32.mrf.mxu1 }
 0x847   :  { %v1623_v31 = vadd.f32 %v5467_v9, %v1622_v49 }
 0x848   :  { %1951 = vmatpush.msrb.mxu3 %v5365_v27 }
 0x84a   :  { %1952 = vmatpush.msrb.mxu3 %v5371_v36 }
 0x84c   :  { %1953 = vmatpush.msrb.mxu3 %v5378_v45 }
 0x84e   :  { %1954 = vmatpush.msrb.mxu3 %v5386_v50 }
 0x850   :  { %1955 = vmatpush.msrb.mxu3 %v5388_v51 }
 0x852   :  { %1956 = vmatpush.msrb.mxu3 %v5394_v47 }
 0x854   :  { %1957 = vmatpush.msrb.mxu3 %v5400_v53 }
 0x8b8   :  { %v1528_v24 = vpop.f32.mrf.mxu3 }
 0x8b9   :  { %v5551_v38 = vadd.f32 %v1528_v24, %v1097_v23  ;;  %v2124_v23 = vld [vmem:[#allocation9 + $0xa8] sm:$0xff]  ;;  %v2123_v24 = vld [vmem:[#allocation9 + $0xa0] sm:$0xff] }
 0x8c2   :  { %v1794_v18 = vpop.f32.mrf.mxu3 }
 0x8c3   :  { %v1797_v22 = vadd.f32 %v1794_v18, %v1620_v13  ;;  %v2121_v13 = vld [vmem:[#allocation9 + $0x90] sm:$0xff]  ;;  %v2120_v18 = vld [vmem:[#allocation9 + $0x88] sm:$0xff] }
 0x8c5   :  { %v3694_v20 = vmul.f32 -1.442695, %v1797_v22 }
 0x8c7   :  { %3888 = vpow2.f32 %v3694_v20 }
 0x8cd   :  { %v3889_v27 = vpop.eup %3888 }
 0x8ce   :  { %v1802_v36 = vadd.f32 1.0, %v3889_v27 }
 0x8d0   :  { %3890 = vrcp.f32 %v1802_v36  ;;  %v1814_v47 = vand.u32 2147483648, %v1802_v36  ;;  %v1812_v62 = vand.u32 2147483647, %v1802_v36  ;;  %vm1808_vm12 = vweird.f32 %v1802_v36 }
 0x8d1   :  { %3892 = vtanh.f32 %v1797_v22  ;;  %v2119_v22 = vld [vmem:[#allocation9 + $0x80] sm:$0xff] }
 0x8d2   :  { %v1815_v12 = vor.u32 1.1754944e-38, %v1814_v47  ;;  %vm1813_vm14 = vcmp.eq.f32.partialorder %v1812_v62, 8.507059e+37  ;;  %v3688_v62 = vmul.f32 -1.442695, %v5551_v38 }
 0x8d6   :  { %v3891_v45 = vpop.eup %3890 }
 0x8d7   :  { %v1804_v50 = vmul.f32 %v3891_v45, %v1802_v36  ;;  %vm1809_vm1 = vweird.f32 %v3891_v45  ;;  %v3893_v6 = vpop.eup %3892 }
 0x8d8   :  { %vm1810_vm13 = vmor %vm1808_vm12, %vm1809_vm1 }
 0x8d9   :  { %v1805_v51 = vsub.f32 1.0, %v1804_v50 }
 0x8db   :  { %v1806_v53 = vmul.f32 %v3891_v45, %v1805_v51 }
 0x8dd   :  { %v1807_v54 = vadd.f32 %v3891_v45, %v1806_v53 }
 0x8df   :  { %v1811_v29 = vsel %vm1810_vm13, %v3891_v45, %v1807_v54  ;;  %v1625_v54 = vpop.f32.mrf.mxu1 }
 0x8e0   :  { %v1816_v8 = vsel %vm1813_vm14, %v1815_v12, %v1811_v29  ;;  %v1626_v12 = vadd.f32 %v5467_v9, %v1625_v54 }
 0x8e1   :  { %v1818_v16 = vsel %vm4539_vm5, %v3893_v6, %v1816_v8 }
 0x8e2   :  { %1823 = vrot.lane.b32.xlu2 %v1818_v16, %s6404_s9  ;;  %1821 = vrot.lane.b32.xlu1 %v1818_v16, %s6402_s13 }
 0x8e3   :  { %1819 = vrot.lane.b32.xlu0 %v1818_v16, %s6403_s6 }
 0x93c   :  { %v1824_v58 = vpop.permute.xlu2 %1823 }
 0x954   :  { %v1822_v52 = vpop.permute.xlu1 %1821 }
 0x955   :  { %v1826_v41 = vmul.f32 %v1822_v52, %v1818_v16  ;;  %v1820_v43 = vpop.permute.xlu0 %1819 }
 0x956   :  { %v1825_v55 = vmul.f32 %v1820_v43, %v1772_v0  ;;  %v2128_v0 = vld [vmem:[#allocation9 + $0xc8] sm:$0xff] }
 0x957   :  { %2146 = vmatpush.msra.mxu2 %v2128_v0  ;;  %v5653_v0 = vld [vmem:[#allocation11 + $0x130] sm:$0xff] }
 0x958   :  { %v5559_v56 = vadd.f32 %v1826_v41, %v1825_v55 }
 0x959   :  { %2147 = vmatpush.msra.mxu2 %v2127_v1  ;;  %v5659_v1 = vld [vmem:[#allocation11 + $0x128] sm:$0xff] }
 0x95a   :  { %3894 = vtanh.f32 %v5559_v56 }
 0x95b   :  { %2148 = vmatpush.msra.mxu2 %v2126_v2  ;;  %v5665_v2 = vld [vmem:[#allocation11 + $0x120] sm:$0xff] }
 0x95d   :  { %2149 = vmatpush.msra.mxu2 %v2125_v21  ;;  %v5671_v21 = vld [vmem:[#allocation11 + $0x118] sm:$0xff] }
 0x95f   :  { %2150 = vmatpush.msra.mxu2 %v2124_v23  ;;  %v5677_v23 = vld [vmem:[#allocation11 + $0x110] sm:$0xff] }
 0x960   :  { %v3895_v57 = vpop.eup %3894 }
 0x961   :  { %v5562_v60 = vmul.f32 %v3895_v57, %v1824_v58  ;;  %2151 = vmatpush.msra.mxu2 %v2123_v24  ;;  %v5683_v24 = vld [vmem:[#allocation11 + $0x108] sm:$0xff] }
 0x963   :  { %1848 = vmatmul.f32.vlgmr.msrb.gmra.mxu0 %v5562_v60  ;;  %2152 = vmatpush.msra.mxu2 %v2122_v40  ;;  %v5689_v40 = vld [vmem:[#allocation11 + $0x100] sm:$0xff] }
 0x965   :  { %2153 = vmatpush.msra.mxu2 %v2121_v13 }
 0x967   :  { %2154 = vmatpush.msra.mxu2 %v2120_v18 }
 0x969   :  { %2155 = vmatpush.msra.mxu2 %v2119_v22 }
 0x9e0   :  { %v1849_v61 = vpop.f32.mrf.mxu0 }
 0x9e1   :  { %v1852_v32 = vadd.f32 %v1849_v61, %v1623_v31 }
 0x9e3   :  { %v3695_v63 = vmul.f32 -1.442695, %v1852_v32 }
 0x9e5   :  { %3896 = vpow2.f32 %v3695_v63 }
 0x9eb   :  { %v3897_v3 = vpop.eup %3896 }
 0x9ec   :  { %v1857_v5 = vadd.f32 1.0, %v3897_v3 }
 0x9ee   :  { %3898 = vrcp.f32 %v1857_v5  ;;  %v1869_v15 = vand.u32 2147483648, %v1857_v5  ;;  %v1867_v19 = vand.u32 2147483647, %v1857_v5  ;;  %vm1863_vm2 = vweird.f32 %v1857_v5 }
 0x9ef   :  { %3900 = vtanh.f32 %v1852_v32 }
 0x9f0   :  { %v1870_v25 = vor.u32 1.1754944e-38, %v1869_v15  ;;  %vm1868_vm4 = vcmp.eq.f32.partialorder %v1867_v19, 8.507059e+37 }
 0x9f4   :  { %v3899_v7 = vpop.eup %3898 }
 0x9f5   :  { %v1859_v10 = vmul.f32 %v3899_v7, %v1857_v5  ;;  %vm1864_vm15 = vweird.f32 %v3899_v7  ;;  %v3901_v30 = vpop.eup %3900 }
 0x9f6   :  { %vm1865_vm3 = vmor %vm1863_vm2, %vm1864_vm15 }
 0x9f7   :  { %v1860_v11 = vsub.f32 1.0, %v1859_v10 }
 0x9f9   :  { %v1861_v17 = vmul.f32 %v3899_v7, %v1860_v11 }
 0x9fb   :  { %v1862_v59 = vadd.f32 %v3899_v7, %v1861_v17 }
 0x9fd   :  { %v1866_v28 = vsel %vm1865_vm3, %v3899_v7, %v1862_v59 }
 0x9fe   :  { %v1871_v33 = vsel %vm1868_vm4, %v1870_v25, %v1866_v28 }
 0x9ff   :  { %v1873_v35 = vsel %vm4539_vm5, %v3901_v30, %v1871_v33  ;;  %v5603_v33 = vld [vmem:[#allocation11 + $0x170] sm:$0xff] }
 0xa00   :  { %1878 = vrot.lane.b32.xlu2 %v1873_v35, %s6404_s9  ;;  %1876 = vrot.lane.b32.xlu1 %v1873_v35, %s6402_s13 }
 0xa01   :  { %1874 = vrot.lane.b32.xlu0 %v1873_v35, %s6403_s6 }
 0xa5a   :  { %v1879_v47 = vpop.permute.xlu2 %1878 }
 0xa72   :  { %v1877_v20 = vpop.permute.xlu1 %1876 }
 0xa73   :  { %v1881_v27 = vmul.f32 %v1877_v20, %v1873_v35  ;;  %v1875_v36 = vpop.permute.xlu0 %1874  ;;  %v5607_v35 = vld [vmem:[#allocation11 + $0x168] sm:$0xff] }
 0xa74   :  { %v1880_v45 = vmul.f32 %v1875_v36, %v5559_v56 }
 0xa76   :  { %v5572_v50 = vadd.f32 %v1881_v27, %v1880_v45 }
 0xa78   :  { %3902 = vtanh.f32 %v5572_v50 }
 0xa79   :  { %3904 = vpow2.f32 %v3688_v62 }
 0xa7e   :  { %v3903_v51 = vpop.eup %3902 }
 0xa7f   :  { %v1884_v53 = vmul.f32 %v3903_v51, %v1879_v47  ;;  %v3905_v6 = vpop.eup %3904 }
 0xa80   :  { %v1536_v52 = vadd.f32 1.0, %v3905_v6 }
 0xa81   :  { %1903 = vmatmul.f32.vlgmr.msrb.gmra.mxu2 %v1884_v53 }
 0xa82   :  { %v1548_v11 = vand.u32 2147483648, %v1536_v52  ;;  %vm1542_vm11 = vweird.f32 %v1536_v52  ;;  %v1546_v17 = vand.u32 2147483647, %v1536_v52 }
 0xa84   :  { %v1549_v59 = vor.u32 1.1754944e-38, %v1548_v11  ;;  %vm1547_vm1 = vcmp.eq.f32.partialorder %v1546_v17, 8.507059e+37 }
 0xa89   :  { %2156 = vmatmul.f32.vlgmr.msra.gmra.mxu2 %v5493_v26 }
 0xa91   :  { %2159 = vmatmul.f32.gmra.mxu2 %v5533_v4 }
 0xa99   :  { %2162 = vmatmul.f32.gmra.mxu2 %v5562_v60 }
 0xaa1   :  { %2165 = vmatmul.f32.gmra.mxu2 %v1884_v53 }
 0xb04   :  { %v1904_v29 = vpop.f32.mrf.mxu2 }
 0xb05   :  { %v1907_v8 = vadd.f32 %v1904_v29, %v1626_v12 }
 0xb07   :  { %v3696_v16 = vmul.f32 -1.442695, %v1907_v8 }
 0xb09   :  { %3906 = vpow2.f32 %v3696_v16 }
 0xb0a   :  { %3908 = vrcp.f32 %v1536_v52 }
 0xb0f   :  { %v3907_v41 = vpop.eup %3906 }
 0xb10   :  { %v1912_v26 = vadd.f32 1.0, %v3907_v41  ;;  %v3909_v43 = vpop.eup %3908 }
 0xb11   :  { %v1538_v4 = vmul.f32 %v3909_v43, %v1536_v52  ;;  %vm1543_vm10 = vweird.f32 %v3909_v43 }
 0xb12   :  { %3910 = vrcp.f32 %v1912_v26  ;;  %v1924_v60 = vand.u32 2147483648, %v1912_v26  ;;  %v1922_v31 = vand.u32 2147483647, %v1912_v26  ;;  %vm1918_vm7 = vweird.f32 %v1912_v26  ;;  %vm1544_vm0 = vmor %vm1542_vm11, %vm1543_vm10 }
 0xb13   :  { %v1539_v57 = vsub.f32 1.0, %v1538_v4  ;;  %3912 = vtanh.f32 %v1907_v8  ;;  %v1628_v8 = vpop.f32.mrf.mxu1  ;;  %v2157_v4 = vpop.f32.mrf.mxu2 }
 0xb14   :  { %v1925_v63 = vor.u32 1.1754944e-38, %v1924_v60  ;;  %vm1923_vm9 = vcmp.eq.f32.partialorder %v1922_v31, 8.507059e+37  ;;  %3914 = vtanh.f32 %v5551_v38  ;;  %v5601_v38 = vld [vmem:[#allocation11 + $0x178] sm:$0xff]  ;;  %v1629_v16 = vadd.f32 %v5467_v9, %v1628_v8 }
 0xb15   :  { %v1540_v61 = vmul.f32 %v3909_v43, %v1539_v57  ;;  %2211 = vmatpush.msra.mxu3 %v5601_v38  ;;  %2266 = vmatpush.msrb.mxu1 %v5601_v38 }
 0xb16   :  { %2321 = vmatpush.msrb.mxu0 %v5601_v38  ;;  %2541 = vmatpush.msrb.mxu2 %v5601_v38 }
 0xb17   :  { %v1541_v5 = vadd.f32 %v3909_v43, %v1540_v61  ;;  %2212 = vmatpush.msra.mxu3 %v5603_v33  ;;  %2267 = vmatpush.msrb.mxu1 %v5603_v33 }
 0xb18   :  { %v3911_v55 = vpop.eup %3910  ;;  %2322 = vmatpush.msrb.mxu0 %v5603_v33  ;;  %2542 = vmatpush.msrb.mxu2 %v5603_v33 }
 0xb19   :  { %v1914_v56 = vmul.f32 %v3911_v55, %v1912_v26  ;;  %vm1919_vm6 = vweird.f32 %v3911_v55  ;;  %v3913_v7 = vpop.eup %3912  ;;  %v1545_v19 = vsel %vm1544_vm0, %v3909_v43, %v1541_v5  ;;  %2213 = vmatpush.msra.mxu3 %v5607_v35  ;;  %2268 = vmatpush.msrb.mxu1 %v5607_v35  ;;  %v5749_v26 = vld [vmem:[%s6401_s18 + $0x2] ss:$0 sm:$0xff] }
 0xb1a   :  { %vm1920_vm8 = vmor %vm1918_vm7, %vm1919_vm6  ;;  %v1550_v25 = vsel %vm1547_vm1, %v1549_v59, %v1545_v19  ;;  %v3915_v28 = vpop.eup %3914  ;;  %2323 = vmatpush.msrb.mxu0 %v5607_v35  ;;  %2543 = vmatpush.msrb.mxu2 %v5607_v35 }
 0xb1b   :  { %v1915_v58 = vsub.f32 1.0, %v1914_v56  ;;  %v5593_v30 = vsel %vm4539_vm5, %v3915_v28, %v1550_v25  ;;  %2214 = vmatpush.msra.mxu3 %v5613_v37  ;;  %2269 = vmatpush.msrb.mxu1 %v5613_v37 }
 0xb1c   :  { %2324 = vmatpush.msrb.mxu0 %v5613_v37  ;;  %2544 = vmatpush.msrb.mxu2 %v5613_v37 }
 0xb1d   :  { %v1916_v49 = vmul.f32 %v3911_v55, %v1915_v58  ;;  %2215 = vmatpush.msra.mxu3 %v5619_v39  ;;  %2270 = vmatpush.msrb.mxu1 %v5619_v39 }
 0xb1e   :  { %2325 = vmatpush.msrb.mxu0 %v5619_v39  ;;  %2545 = vmatpush.msrb.mxu2 %v5619_v39 }
 0xb1f   :  { %v1917_v32 = vadd.f32 %v3911_v55, %v1916_v49  ;;  %2216 = vmatpush.msra.mxu3 %v5631_v42  ;;  %2271 = vmatpush.msrb.mxu1 %v5631_v42 }
 0xb20   :  { %2326 = vmatpush.msrb.mxu0 %v5631_v42  ;;  %2546 = vmatpush.msrb.mxu2 %v5631_v42 }
 0xb21   :  { %v1921_v3 = vsel %vm1920_vm8, %v3911_v55, %v1917_v32  ;;  %2217 = vmatpush.msra.mxu3 %v5635_v46  ;;  %2272 = vmatpush.msrb.mxu1 %v5635_v46  ;;  %v2158_v55 = vadd.f32 %v5749_v26, %v2157_v4 }
 0xb22   :  { %v1926_v10 = vsel %vm1923_vm9, %v1925_v63, %v1921_v3  ;;  %2327 = vmatpush.msrb.mxu0 %v5635_v46  ;;  %2547 = vmatpush.msrb.mxu2 %v5635_v46 }
 0xb23   :  { %v5582_v15 = vsel %vm4539_vm5, %v3913_v7, %v1926_v10  ;;  %2218 = vmatpush.msra.mxu3 %v5641_v44  ;;  %2273 = vmatpush.msrb.mxu1 %v5641_v44 }
 0xb24   :  { %1933 = vrot.lane.b32.xlu2 %v5582_v15, %s6404_s9  ;;  %1931 = vrot.lane.b32.xlu1 %v5582_v15, %s6402_s13 }
 0xb25   :  { %1929 = vrot.lane.b32.xlu0 %v5582_v15, %s6403_s6  ;;  %2328 = vmatpush.msrb.mxu0 %v5641_v44 }
 0xb26   :  { %2548 = vmatpush.msrb.mxu2 %v5641_v44  ;;  %2219 = vmatpush.msra.mxu3 %v5646_v48 }
 0xb27   :  { %2274 = vmatpush.msrb.mxu1 %v5646_v48  ;;  %2329 = vmatpush.msrb.mxu0 %v5646_v48 }
 0xb28   :  { %2549 = vmatpush.msrb.mxu2 %v5646_v48  ;;  %2220 = vmatpush.msra.mxu3 %v5653_v0 }
 0xb29   :  { %2275 = vmatpush.msrb.mxu1 %v5653_v0  ;;  %2330 = vmatpush.msrb.mxu0 %v5653_v0 }
 0xb2a   :  { %2550 = vmatpush.msrb.mxu2 %v5653_v0  ;;  %2221 = vmatpush.msra.mxu3 %v5659_v1 }
 0xb2b   :  { %2276 = vmatpush.msrb.mxu1 %v5659_v1  ;;  %2331 = vmatpush.msrb.mxu0 %v5659_v1 }
 0xb2c   :  { %1555 = vrot.lane.b32.xlu1 %v5593_v30, %s6402_s13  ;;  %2551 = vmatpush.msrb.mxu2 %v5659_v1 }
 0xb2d   :  { %1553 = vrot.lane.b32.xlu0 %v5593_v30, %s6403_s6  ;;  %2222 = vmatpush.msra.mxu3 %v5665_v2 }
 0xb2e   :  { %2277 = vmatpush.msrb.mxu1 %v5665_v2  ;;  %2332 = vmatpush.msrb.mxu0 %v5665_v2 }
 0xb2f   :  { %2552 = vmatpush.msrb.mxu2 %v5665_v2  ;;  %2223 = vmatpush.msra.mxu3 %v5671_v21 }
 0xb30   :  { %2278 = vmatpush.msrb.mxu1 %v5671_v21  ;;  %2333 = vmatpush.msrb.mxu0 %v5671_v21 }
 0xb31   :  { %2553 = vmatpush.msrb.mxu2 %v5671_v21  ;;  %2224 = vmatpush.msra.mxu3 %v5677_v23 }
 0xb32   :  { %2279 = vmatpush.msrb.mxu1 %v5677_v23  ;;  %2334 = vmatpush.msrb.mxu0 %v5677_v23 }
 0xb33   :  { %2554 = vmatpush.msrb.mxu2 %v5677_v23  ;;  %2225 = vmatpush.msra.mxu3 %v5683_v24 }
 0xb34   :  { %1557 = vrot.lane.b32.xlu1 %v5593_v30, %s6404_s9  ;;  %2280 = vmatpush.msrb.mxu1 %v5683_v24 }
 0xb35   :  { %2335 = vmatpush.msrb.mxu0 %v5683_v24  ;;  %2555 = vmatpush.msrb.mxu2 %v5683_v24 }
 0xb36   :  { %2226 = vmatpush.msra.mxu3 %v5689_v40  ;;  %2281 = vmatpush.msrb.mxu1 %v5689_v40 }
 0xb37   :  { %2336 = vmatpush.msrb.mxu0 %v5689_v40  ;;  %2556 = vmatpush.msrb.mxu2 %v5689_v40 }
 0xb7e   :  { %v1934_v62 = vpop.permute.xlu2 %1933 }
 0xb96   :  { %v1932_v13 = vpop.permute.xlu1 %1931 }
 0xb97   :  { %v1936_v18 = vmul.f32 %v1932_v13, %v5582_v15  ;;  %v1930_v22 = vpop.permute.xlu0 %1929 }
 0xb98   :  { %v1935_v20 = vmul.f32 %v1930_v22, %v5572_v50 }
 0xb9a   :  { %v5699_v27 = vadd.f32 %v1936_v18, %v1935_v20 }
 0xb9c   :  { %3916 = vtanh.f32 %v5699_v27 }
 0xb9e   :  { %v1556_v36 = vpop.permute.xlu1 %1555 }
 0xb9f   :  { %v1560_v45 = vmul.f32 %v1556_v36, %v5593_v30  ;;  %v1554_v51 = vpop.permute.xlu0 %1553 }
 0xba0   :  { %v1559_v47 = vmul.f32 %v1554_v51, %v5525_v34  ;;  %v3703_v34 = vld [vmem:[%s6400_s12 + $0x10] sm:$0xff] }
 0xba2   :  { %v3917_v53 = vpop.eup %3916  ;;  %v1561_v54 = vadd.f32 %v1560_v45, %v1559_v47 }
 0xba3   :  { %v1939_v12 = vmul.f32 %v3917_v53, %v1934_v62 }
 0xba4   :  { %3918 = vtanh.f32 %v1561_v54  ;;  %1566 = vst [vmem:[%s6406_s28] sm:$0xff] %v1561_v54 }
 0xba5   :  { %1958 = vmatmul.f32.vlgmr.msrb.gmra.mxu3 %v1939_v12  ;;  %2168 = vmatmul.f32.gmra.mxu2 %v1939_v12 }
 0xba6   :  { %2376 = vmatpush.msrb.mxu3 %v5601_v38  ;;  %v1558_v29 = vpop.permute.xlu1 %1557 }
 0xba8   :  { %2377 = vmatpush.msrb.mxu3 %v5603_v33 }
 0xbaa   :  { %v3919_v50 = vpop.eup %3918  ;;  %2378 = vmatpush.msrb.mxu3 %v5607_v35 }
 0xbab   :  { %v1563_v6 = vmul.f32 %v3919_v50, %v1558_v29 }
 0xbac   :  { %2379 = vmatpush.msrb.mxu3 %v5613_v37 }
 0xbad   :  { %1565 = vst [vmem:[%s6407_s0] sm:$0xff] %v1563_v6  ;;  %1633 = vmatmul.f32.gmra.mxu1 %v1563_v6  ;;  %2227 = vmatmul.f32.vlgmr.msra.gmra.mxu3 %v3703_v34  ;;  %v3704_v34 = vld [vmem:[%s6405_s21 + $0x10] sm:$0xff] }
 0xbae   :  { %2380 = vmatpush.msrb.mxu3 %v5619_v39 }
 0xbb0   :  { %2381 = vmatpush.msrb.mxu3 %v5631_v42 }
 0xbb2   :  { %2382 = vmatpush.msrb.mxu3 %v5635_v46 }
 0xbb4   :  { %2383 = vmatpush.msrb.mxu3 %v5641_v44 }
 0xbb6   :  { %2384 = vmatpush.msrb.mxu3 %v5646_v48 }
 0xbb8   :  { %2385 = vmatpush.msrb.mxu3 %v5653_v0 }
 0xbba   :  { %2386 = vmatpush.msrb.mxu3 %v5659_v1 }
 0xbbc   :  { %2387 = vmatpush.msrb.mxu3 %v5665_v2 }
 0xbbe   :  { %2388 = vmatpush.msrb.mxu3 %v5671_v21 }
 0xbc0   :  { %2389 = vmatpush.msrb.mxu3 %v5677_v23 }
 0xbc2   :  { %2390 = vmatpush.msrb.mxu3 %v5683_v24 }
 0xbc4   :  { %2391 = vmatpush.msrb.mxu3 %v5689_v40 }
 0xbc6   :  { %2596 = vmatpush.msra.mxu3 %v5601_v38 }
 0xbc8   :  { %2597 = vmatpush.msra.mxu3 %v5603_v33 }
 0xbca   :  { %2598 = vmatpush.msra.mxu3 %v5607_v35 }
 0xbcc   :  { %2599 = vmatpush.msra.mxu3 %v5613_v37 }
 0xbce   :  { %2600 = vmatpush.msra.mxu3 %v5619_v39 }
 0xbd0   :  { %2601 = vmatpush.msra.mxu3 %v5631_v42 }
 0xbd2   :  { %2602 = vmatpush.msra.mxu3 %v5635_v46 }
 0xbd4   :  { %2603 = vmatpush.msra.mxu3 %v5641_v44 }
 0xbd6   :  { %2604 = vmatpush.msra.mxu3 %v5646_v48 }
 0xbd8   :  { %2605 = vmatpush.msra.mxu3 %v5653_v0 }
 0xbda   :  { %2606 = vmatpush.msra.mxu3 %v5659_v1 }
 0xbdc   :  { %2607 = vmatpush.msra.mxu3 %v5665_v2 }
 0xbde   :  { %2608 = vmatpush.msra.mxu3 %v5671_v21 }
 0xbe0   :  { %2609 = vmatpush.msra.mxu3 %v5677_v23 }
 0xbe2   :  { %2610 = vmatpush.msra.mxu3 %v5683_v24 }
 0xbe4   :  { %2611 = vmatpush.msra.mxu3 %v5689_v40 }
 0xc28   :  { %v1959_v52 = vpop.f32.mrf.mxu3 }
 0xc29   :  { %v1962_v41 = vadd.f32 %v1959_v52, %v1629_v16 }
 0xc2b   :  { %v3697_v43 = vmul.f32 -1.442695, %v1962_v41 }
 0xc2d   :  { %3920 = vpow2.f32 %v3697_v43 }
 0xc30   :  { %v2228_v56 = vpop.f32.mrf.mxu3 }
 0xc31   :  { %v2231_v57 = vadd.f32 %v2228_v56, %v2158_v55 }
 0xc33   :  { %v3921_v58 = vpop.eup %3920  ;;  %v3705_v60 = vmul.f32 -1.442695, %v2231_v57 }
 0xc34   :  { %v1967_v49 = vadd.f32 1.0, %v3921_v58  ;;  %v1631_v58 = vpop.f32.mrf.mxu1 }
 0xc35   :  { %3922 = vpow2.f32 %v3705_v60 }
 0xc36   :  { %3924 = vrcp.f32 %v1967_v49  ;;  %v1979_v3 = vand.u32 2147483648, %v1967_v49  ;;  %v1977_v7 = vand.u32 2147483647, %v1967_v49  ;;  %vm1973_vm13 = vweird.f32 %v1967_v49 }
 0xc38   :  { %v1980_v15 = vor.u32 1.1754944e-38, %v1979_v3  ;;  %vm1978_vm15 = vcmp.eq.f32.partialorder %v1977_v7, 8.507059e+37 }
 0xc3b   :  { %v3923_v9 = vpop.eup %3922 }
 0xc3c   :  { %v3925_v31 = vpop.eup %3924  ;;  %v2236_v61 = vadd.f32 1.0, %v3923_v9  ;;  %v5791_v60 = vpop.f32.mrf.mxu1 }
 0xc3d   :  { %v1969_v32 = vmul.f32 %v3925_v31, %v1967_v49  ;;  %vm1974_vm12 = vweird.f32 %v3925_v31  ;;  %v5796_v49 = vld [vmem:[%s6401_s18 + $0x1] ss:$0 sm:$0xff] }
 0xc3e   :  { %3926 = vrcp.f32 %v2236_v61  ;;  %vm1975_vm14 = vmor %vm1973_vm13, %vm1974_vm12  ;;  %v2248_v13 = vand.u32 2147483648, %v2236_v61  ;;  %v2246_v22 = vand.u32 2147483647, %v2236_v61  ;;  %vm2242_vm3 = vweird.f32 %v2236_v61 }
 0xc3f   :  { %v1970_v63 = vsub.f32 1.0, %v1969_v32  ;;  %3928 = vtanh.f32 %v1962_v41  ;;  %v1632_v9 = vadd.f32 %v5796_v49, %v1631_v58 }
 0xc40   :  { %3930 = vtanh.f32 %v2231_v57  ;;  %v2249_v36 = vor.u32 1.1754944e-38, %v2248_v13  ;;  %vm2247_vm6 = vcmp.eq.f32.partialorder %v2246_v22, 8.507059e+37 }
 0xc41   :  { %v1971_v5 = vmul.f32 %v3925_v31, %v1970_v63  ;;  %v2160_v63 = vpop.f32.mrf.mxu2 }
 0xc42   :  { %v2161_v3 = vadd.f32 %v5749_v26, %v2160_v63 }
 0xc43   :  { %v1972_v10 = vadd.f32 %v3925_v31, %v1971_v5 }
 0xc44   :  { %v3927_v11 = vpop.eup %3926 }
 0xc45   :  { %v1976_v17 = vsel %vm1975_vm14, %v3925_v31, %v1972_v10  ;;  %v2238_v19 = vmul.f32 %v3927_v11, %v2236_v61  ;;  %v3929_v59 = vpop.eup %3928  ;;  %vm2243_vm2 = vweird.f32 %v3927_v11 }
 0xc46   :  { %v1981_v25 = vsel %vm1978_vm15, %v1980_v15, %v1976_v17  ;;  %vm2244_vm4 = vmor %vm2242_vm3, %vm2243_vm2  ;;  %v3931_v51 = vpop.eup %3930 }
 0xc47   :  { %v1983_v28 = vsel %vm4539_vm5, %v3929_v59, %v1981_v25  ;;  %v2239_v30 = vsub.f32 1.0, %v2238_v19 }
 0xc48   :  { %1988 = vrot.lane.b32.xlu1 %v1983_v28, %s6404_s9  ;;  %1986 = vrot.lane.b32.xlu0 %v1983_v28, %s6402_s13 }
 0xc49   :  { %1984 = vrot.lane.b32.xlu2 %v1983_v28, %s6403_s6  ;;  %v2240_v18 = vmul.f32 %v3927_v11, %v2239_v30 }
 0xc4b   :  { %v2241_v20 = vadd.f32 %v3927_v11, %v2240_v18 }
 0xc4d   :  { %v2245_v45 = vsel %vm2244_vm4, %v3927_v11, %v2241_v20 }
 0xc4e   :  { %v2250_v47 = vsel %vm2247_vm6, %v2249_v36, %v2245_v45 }
 0xc4f   :  { %v2252_v53 = vsel %vm4539_vm5, %v3931_v51, %v2250_v47 }
 0xc50   :  { %2255 = vrot.lane.b32.xlu0 %v2252_v53, %s6402_s13 }
 0xc51   :  { %2253 = vrot.lane.b32.xlu2 %v2252_v53, %s6403_s6 }
 0xc59   :  { %2257 = vrot.lane.b32.xlu2 %v2252_v53, %s6404_s9 }
 0xca3   :  { %v1985_v62 = vpop.permute.xlu2 %1984 }
 0xca4   :  { %v1990_v12 = vmul.f32 %v1985_v62, %v5699_v27 }
 0xcab   :  { %v2254_v6 = vpop.permute.xlu2 %2253 }
 0xcac   :  { %v2259_v16 = vmul.f32 %v3704_v34, %v2254_v6 }
 0xcb3   :  { %v2258_v56 = vpop.permute.xlu2 %2257 }
 0xcba   :  { %v1987_v54 = vpop.permute.xlu0 %1986  ;;  %v1989_v43 = vpop.permute.xlu1 %1988 }
 0xcbb   :  { %v1991_v50 = vmul.f32 %v1987_v54, %v1983_v28 }
 0xcbd   :  { %v5763_v29 = vadd.f32 %v1991_v50, %v1990_v12 }
 0xcbf   :  { %3932 = vtanh.f32 %v5763_v29 }
 0xcc2   :  { %v2256_v8 = vpop.permute.xlu0 %2255 }
 0xcc3   :  { %v2260_v52 = vmul.f32 %v2256_v8, %v2252_v53 }
 0xcc5   :  { %v3933_v41 = vpop.eup %3932  ;;  %v5769_v4 = vadd.f32 %v2260_v52, %v2259_v16 }
 0xcc6   :  { %v1994_v55 = vmul.f32 %v3933_v41, %v1989_v43 }
 0xcc7   :  { %3934 = vtanh.f32 %v5769_v4 }
 0xcc8   :  { %2013 = vmatmul.f32.vlgmr.msra.gmra.mxu1 %v1994_v55  ;;  %2171 = vmatmul.f32.gmra.mxu2 %v1994_v55 }
 0xcc9   :  { %2431 = vmatpush.msra.mxu1 %v5601_v38 }
 0xccb   :  { %2432 = vmatpush.msra.mxu1 %v5603_v33 }
 0xccd   :  { %v3935_v27 = vpop.eup %3934  ;;  %2433 = vmatpush.msra.mxu1 %v5607_v35 }
 0xcce   :  { %v5775_v57 = vmul.f32 %v3935_v27, %v2258_v56 }
 0xccf   :  { %2434 = vmatpush.msra.mxu1 %v5613_v37 }
 0xcd0   :  { %2282 = vmatmul.f32.vlgmr.msrb.gmra.mxu1 %v5775_v57 }
 0xcd1   :  { %2435 = vmatpush.msra.mxu1 %v5619_v39 }
 0xcd3   :  { %2436 = vmatpush.msra.mxu1 %v5631_v42 }
 0xcd5   :  { %2437 = vmatpush.msra.mxu1 %v5635_v46 }
 0xcd7   :  { %2438 = vmatpush.msra.mxu1 %v5641_v44 }
 0xcd9   :  { %2439 = vmatpush.msra.mxu1 %v5646_v48 }
 0xcdb   :  { %2440 = vmatpush.msra.mxu1 %v5653_v0 }
 0xcdd   :  { %2441 = vmatpush.msra.mxu1 %v5659_v1 }
 0xcdf   :  { %2442 = vmatpush.msra.mxu1 %v5665_v2 }
 0xce1   :  { %2443 = vmatpush.msra.mxu1 %v5671_v21 }
 0xce3   :  { %2444 = vmatpush.msra.mxu1 %v5677_v23 }
 0xce5   :  { %2445 = vmatpush.msra.mxu1 %v5683_v24 }
 0xce7   :  { %2446 = vmatpush.msra.mxu1 %v5689_v40 }
 0xd45   :  { %v2014_v31 = vpop.f32.mrf.mxu1 }
 0xd46   :  { %v2017_v61 = vadd.f32 %v2014_v31, %v1632_v9 }
 0xd48   :  { %v3698_v32 = vmul.f32 -1.442695, %v2017_v61 }
 0xd4a   :  { %3936 = vpow2.f32 %v3698_v32 }
 0xd4d   :  { %v2283_v5 = vpop.f32.mrf.mxu1 }
 0xd4e   :  { %v2286_v7 = vadd.f32 %v2283_v5, %v2161_v3 }
 0xd50   :  { %v3937_v10 = vpop.eup %3936  ;;  %v3706_v11 = vmul.f32 -1.442695, %v2286_v7 }
 0xd51   :  { %v2022_v15 = vadd.f32 1.0, %v3937_v10 }
 0xd52   :  { %3938 = vpow2.f32 %v3706_v11 }
 0xd53   :  { %3940 = vrcp.f32 %v2022_v15  ;;  %v2034_v30 = vand.u32 2147483648, %v2022_v15  ;;  %v2032_v18 = vand.u32 2147483647, %v2022_v15  ;;  %vm2028_vm8 = vweird.f32 %v2022_v15 }
 0xd55   :  { %v2035_v36 = vor.u32 1.1754944e-38, %v2034_v30  ;;  %vm2033_vm10 = vcmp.eq.f32.partialorder %v2032_v18, 8.507059e+37 }
 0xd58   :  { %v3939_v17 = vpop.eup %3938 }
 0xd59   :  { %v3941_v19 = vpop.eup %3940  ;;  %v2291_v59 = vadd.f32 1.0, %v3939_v17 }
 0xd5a   :  { %v2024_v25 = vmul.f32 %v3941_v19, %v2022_v15  ;;  %vm2029_vm7 = vweird.f32 %v3941_v19 }
 0xd5b   :  { %3942 = vrcp.f32 %v2291_v59  ;;  %vm2030_vm9 = vmor %vm2028_vm8, %vm2029_vm7  ;;  %v2303_v12 = vand.u32 2147483648, %v2291_v59  ;;  %v2301_v34 = vand.u32 2147483647, %v2291_v59  ;;  %vm2297_vm0 = vweird.f32 %v2291_v59 }
 0xd5c   :  { %v2025_v28 = vsub.f32 1.0, %v2024_v25  ;;  %3944 = vtanh.f32 %v2017_v61 }
 0xd5d   :  { %3946 = vtanh.f32 %v2286_v7  ;;  %v2304_v8 = vor.u32 1.1754944e-38, %v2303_v12  ;;  %vm2302_vm12 = vcmp.eq.f32.partialorder %v2301_v34, 8.507059e+37 }
 0xd5e   :  { %v2026_v13 = vmul.f32 %v3941_v19, %v2025_v28 }
 0xd60   :  { %v2027_v22 = vadd.f32 %v3941_v19, %v2026_v13 }
 0xd61   :  { %v3943_v20 = vpop.eup %3942 }
 0xd62   :  { %v2031_v45 = vsel %vm2030_vm9, %v3941_v19, %v2027_v22  ;;  %v2293_v51 = vmul.f32 %v3943_v20, %v2291_v59  ;;  %v3945_v47 = vpop.eup %3944  ;;  %vm2298_vm11 = vweird.f32 %v3943_v20 }
 0xd63   :  { %v2036_v53 = vsel %vm2033_vm10, %v2035_v36, %v2031_v45  ;;  %vm2299_vm1 = vmor %vm2297_vm0, %vm2298_vm11  ;;  %v3947_v52 = vpop.eup %3946 }
 0xd64   :  { %v2038_v62 = vsel %vm4539_vm5, %v3945_v47, %v2036_v53  ;;  %v2294_v54 = vsub.f32 1.0, %v2293_v51 }
 0xd65   :  { %2041 = vrot.lane.b32.xlu1 %v2038_v62, %s6402_s13  ;;  %2039 = vrot.lane.b32.xlu0 %v2038_v62, %s6403_s6 }
 0xd66   :  { %v2295_v50 = vmul.f32 %v3943_v20, %v2294_v54 }
 0xd68   :  { %v2296_v6 = vadd.f32 %v3943_v20, %v2295_v50 }
 0xd6a   :  { %v2300_v16 = vsel %vm2299_vm1, %v3943_v20, %v2296_v6 }
 0xd6b   :  { %v2305_v41 = vsel %vm2302_vm12, %v2304_v8, %v2300_v16 }
 0xd6c   :  { %v2307_v43 = vsel %vm4539_vm5, %v3947_v52, %v2305_v41 }
 0xd6d   :  { %2043 = vrot.lane.b32.xlu1 %v2038_v62, %s6404_s9  ;;  %2310 = vrot.lane.b32.xlu0 %v2307_v43, %s6402_s13 }
 0xd6e   :  { %2308 = vrot.lane.b32.xlu2 %v2307_v43, %s6403_s6 }
 0xd76   :  { %2312 = vrot.lane.b32.xlu2 %v2307_v43, %s6404_s9 }
 0xdc8   :  { %v2309_v31 = vpop.permute.xlu2 %2308 }
 0xdc9   :  { %v2314_v32 = vmul.f32 %v2309_v31, %v5769_v4  ;;  %v2678_v31 = vld [vmem:[#allocation9 + $0x178] sm:$0xff] }
 0xdca   :  { %2684 = vmatpush.msrb.mxu1 %v2678_v31  ;;  %v5887_v31 = vld [vmem:[#allocation11 + $0x1f0] sm:$0xff] }
 0xdd0   :  { %v2313_v11 = vpop.permute.xlu2 %2312 }
 0xdd7   :  { %v2042_v55 = vpop.permute.xlu1 %2041  ;;  %v2040_v27 = vpop.permute.xlu0 %2039 }
 0xdd8   :  { %v2046_v56 = vmul.f32 %v2042_v55, %v2038_v62  ;;  %v2045_v58 = vmul.f32 %v2040_v27, %v5763_v29 }
 0xdda   :  { %v5811_v9 = vadd.f32 %v2046_v56, %v2045_v58 }
 0xddc   :  { %3948 = vtanh.f32 %v5811_v9 }
 0xddf   :  { %v2311_v61 = vpop.permute.xlu0 %2310  ;;  %v2044_v5 = vpop.permute.xlu1 %2043 }
 0xde0   :  { %v2315_v63 = vmul.f32 %v2311_v61, %v2307_v43  ;;  %v2677_v61 = vld [vmem:[#allocation9 + $0x170] sm:$0xff] }
 0xde1   :  { %2685 = vmatpush.msrb.mxu1 %v2677_v61  ;;  %v5891_v61 = vld [vmem:[#allocation11 + $0x1e8] sm:$0xff] }
 0xde2   :  { %v3949_v3 = vpop.eup %3948  ;;  %v2316_v7 = vadd.f32 %v2315_v63, %v2314_v32  ;;  %v2676_v32 = vld [vmem:[#allocation9 + $0x168] sm:$0xff]  ;;  %v2675_v63 = vld [vmem:[#allocation9 + $0x160] sm:$0xff] }
 0xde3   :  { %v2049_v10 = vmul.f32 %v3949_v3, %v2044_v5  ;;  %2686 = vmatpush.msrb.mxu1 %v2676_v32  ;;  %v2674_v3 = vld [vmem:[#allocation9 + $0x158] sm:$0xff]  ;;  %v2673_v5 = vld [vmem:[#allocation9 + $0x150] sm:$0xff]  ;;  %v5897_v32 = vld [vmem:[#allocation11 + $0x1e0] sm:$0xff] }
 0xde4   :  { %3950 = vtanh.f32 %v2316_v7 }
 0xde5   :  { %2068 = vmatmul.f32.vlgmr.msra.gmra.mxu0 %v2049_v10  ;;  %2174 = vmatmul.f32.gmra.mxu2 %v2049_v10  ;;  %v2671_v10 = vld [vmem:[#allocation9 + $0x140] sm:$0xff] }
 0xde6   :  { %2486 = vmatpush.msra.mxu0 %v5601_v38  ;;  %2687 = vmatpush.msrb.mxu1 %v2675_v63  ;;  %v5903_v63 = vld [vmem:[#allocation11 + $0x1d8] sm:$0xff] }
 0xde8   :  { %2487 = vmatpush.msra.mxu0 %v5603_v33  ;;  %v2163_v33 = vpop.f32.mrf.mxu2  ;;  %2688 = vmatpush.msrb.mxu1 %v2674_v3  ;;  %v5915_v3 = vld [vmem:[#allocation11 + $0x1d0] sm:$0xff] }
 0xdea   :  { %v3951_v29 = vpop.eup %3950  ;;  %2488 = vmatpush.msra.mxu0 %v5607_v35  ;;  %v2164_v35 = vadd.f32 %v5749_v26, %v2163_v33  ;;  %2689 = vmatpush.msrb.mxu1 %v2673_v5  ;;  %v2668_v33 = vld [vmem:[#allocation9 + $0x128] sm:$0xff] }
 0xdeb   :  { %v5818_v15 = vmul.f32 %v3951_v29, %v2313_v11  ;;  %v2670_v29 = vld [vmem:[#allocation9 + $0x138] sm:$0xff]  ;;  %v2669_v11 = vld [vmem:[#allocation9 + $0x130] sm:$0xff]  ;;  %v5919_v5 = vld [vmem:[#allocation11 + $0x1c8] sm:$0xff] }
 0xdec   :  { %2489 = vmatpush.msra.mxu0 %v5613_v37 }
 0xded   :  { %2337 = vmatmul.f32.vlgmr.msrb.gmra.mxu0 %v5818_v15 }
 0xdee   :  { %2490 = vmatpush.msra.mxu0 %v5619_v39 }
 0xdf0   :  { %2491 = vmatpush.msra.mxu0 %v5631_v42  ;;  %v2166_v45 = vpop.f32.mrf.mxu2 }
 0xdf1   :  { %v2167_v51 = vadd.f32 %v5749_v26, %v2166_v45 }
 0xdf2   :  { %2492 = vmatpush.msra.mxu0 %v5635_v46 }
 0xdf4   :  { %2493 = vmatpush.msra.mxu0 %v5641_v44 }
 0xdf6   :  { %2494 = vmatpush.msra.mxu0 %v5646_v48 }
 0xdf8   :  { %2495 = vmatpush.msra.mxu0 %v5653_v0 }
 0xdfa   :  { %2496 = vmatpush.msra.mxu0 %v5659_v1 }
 0xdfc   :  { %2497 = vmatpush.msra.mxu0 %v5665_v2 }
 0xdfe   :  { %2498 = vmatpush.msra.mxu0 %v5671_v21 }
 0xe00   :  { %2499 = vmatpush.msra.mxu0 %v5677_v23 }
 0xe02   :  { %2500 = vmatpush.msra.mxu0 %v5683_v24 }
 0xe04   :  { %2501 = vmatpush.msra.mxu0 %v5689_v40 }
 0xe62   :  { %v5834_v38 = vpop.f32.mrf.mxu0 }
 0xe6a   :  { %v2338_v37 = vpop.f32.mrf.mxu0 }
 0xe6b   :  { %v2341_v39 = vadd.f32 %v2338_v37, %v2164_v35  ;;  %v2667_v35 = vld [vmem:[#allocation9 + $0x120] sm:$0xff]  ;;  %v2666_v37 = vld [vmem:[#allocation9 + $0x118] sm:$0xff] }
 0xe6d   :  { %v3707_v42 = vmul.f32 -1.442695, %v2341_v39 }
 0xe6f   :  { %3952 = vpow2.f32 %v3707_v42  ;;  %v2664_v42 = vld [vmem:[#allocation9 + $0x108] sm:$0xff] }
 0xe75   :  { %v3953_v46 = vpop.eup %3952 }
 0xe76   :  { %v2346_v44 = vadd.f32 1.0, %v3953_v46  ;;  %v2663_v46 = vld [vmem:[#allocation9 + $0x100] sm:$0xff] }
 0xe78   :  { %3954 = vrcp.f32 %v2346_v44  ;;  %v2358_v2 = vand.u32 2147483648, %v2346_v44  ;;  %v2356_v23 = vand.u32 2147483647, %v2346_v44  ;;  %vm2352_vm14 = vweird.f32 %v2346_v44 }
 0xe79   :  { %3956 = vtanh.f32 %v2341_v39  ;;  %v2665_v39 = vld [vmem:[#allocation9 + $0x110] sm:$0xff] }
 0xe7a   :  { %v2359_v40 = vor.u32 1.1754944e-38, %v2358_v2  ;;  %vm2357_vm2 = vcmp.eq.f32.partialorder %v2356_v23, 8.507059e+37 }
 0xe7e   :  { %v3955_v48 = vpop.eup %3954 }
 0xe7f   :  { %v2348_v0 = vmul.f32 %v3955_v48, %v2346_v44  ;;  %vm2353_vm13 = vweird.f32 %v3955_v48  ;;  %v3957_v17 = vpop.eup %3956 }
 0xe80   :  { %vm2354_vm15 = vmor %vm2352_vm14, %vm2353_vm13 }
 0xe81   :  { %v2349_v1 = vsub.f32 1.0, %v2348_v0 }
 0xe83   :  { %v2350_v21 = vmul.f32 %v3955_v48, %v2349_v1 }
 0xe85   :  { %v2351_v24 = vadd.f32 %v3955_v48, %v2350_v21 }
 0xe87   :  { %v2355_v4 = vsel %vm2354_vm15, %v3955_v48, %v2351_v24 }
 0xe88   :  { %v2360_v19 = vsel %vm2357_vm2, %v2359_v40, %v2355_v4  ;;  %v1635_v40 = vadd.f32 %v5796_v49, %v5791_v60 }
 0xe89   :  { %v2362_v59 = vsel %vm4539_vm5, %v3957_v17, %v2360_v19  ;;  %v2169_v19 = vpop.f32.mrf.mxu2 }
 0xe8a   :  { %2367 = vrot.lane.b32.xlu2 %v2362_v59, %s6404_s9  ;;  %2365 = vrot.lane.b32.xlu1 %v2362_v59, %s6402_s13  ;;  %v2072_v4 = vadd.f32 %v5834_v38, %v1635_v40 }
 0xe8b   :  { %2363 = vrot.lane.b32.xlu0 %v2362_v59, %s6403_s6 }
 0xe8c   :  { %v3699_v17 = vmul.f32 -1.442695, %v2072_v4 }
 0xee4   :  { %v2368_v20 = vpop.permute.xlu2 %2367 }
 0xefc   :  { %v2366_v25 = vpop.permute.xlu1 %2365 }
 0xefd   :  { %v2370_v28 = vmul.f32 %v2366_v25, %v2362_v59  ;;  %v2364_v30 = vpop.permute.xlu0 %2363  ;;  %v2170_v59 = vadd.f32 %v5749_v26, %v2169_v19 }
 0xefe   :  { %v2369_v13 = vmul.f32 %v2364_v30, %v2316_v7  ;;  %v2672_v7 = vld [vmem:[#allocation9 + $0x148] sm:$0xff] }
 0xeff   :  { %2690 = vmatpush.msrb.mxu1 %v2672_v7  ;;  %v5925_v7 = vld [vmem:[#allocation11 + $0x1c0] sm:$0xff] }
 0xf00   :  { %v5842_v18 = vadd.f32 %v2370_v28, %v2369_v13 }
 0xf01   :  { %2691 = vmatpush.msrb.mxu1 %v2671_v10  ;;  %v5930_v10 = vld [vmem:[#allocation11 + $0x1b8] sm:$0xff] }
 0xf02   :  { %3958 = vtanh.f32 %v5842_v18 }
 0xf03   :  { %2692 = vmatpush.msrb.mxu1 %v2670_v29  ;;  %v5937_v29 = vld [vmem:[#allocation11 + $0x1b0] sm:$0xff] }
 0xf05   :  { %2693 = vmatpush.msrb.mxu1 %v2669_v11  ;;  %v5943_v11 = vld [vmem:[#allocation11 + $0x1a8] sm:$0xff] }
 0xf07   :  { %2694 = vmatpush.msrb.mxu1 %v2668_v33  ;;  %v5949_v33 = vld [vmem:[#allocation11 + $0x1a0] sm:$0xff] }
 0xf08   :  { %v3959_v22 = vpop.eup %3958 }
 0xf09   :  { %v5845_v36 = vmul.f32 %v3959_v22, %v2368_v20  ;;  %2695 = vmatpush.msrb.mxu1 %v2667_v35  ;;  %v5955_v35 = vld [vmem:[#allocation11 + $0x198] sm:$0xff] }
 0xf0b   :  { %2392 = vmatmul.f32.vlgmr.msrb.gmra.mxu3 %v5845_v36  ;;  %2696 = vmatpush.msrb.mxu1 %v2666_v37  ;;  %v5961_v37 = vld [vmem:[#allocation11 + $0x190] sm:$0xff] }
 0xf0d   :  { %2697 = vmatpush.msrb.mxu1 %v2665_v39  ;;  %v5967_v39 = vld [vmem:[#allocation11 + $0x188] sm:$0xff] }
 0xf0f   :  { %2698 = vmatpush.msrb.mxu1 %v2664_v42  ;;  %v5973_v42 = vld [vmem:[#allocation11 + $0x180] sm:$0xff] }
 0xf11   :  { %2699 = vmatpush.msrb.mxu1 %v2663_v46 }
 0xf8e   :  { %v2393_v47 = vpop.f32.mrf.mxu3 }
 0xf8f   :  { %v2396_v53 = vadd.f32 %v2393_v47, %v2167_v51 }
 0xf91   :  { %v3708_v62 = vmul.f32 -1.442695, %v2396_v53 }
 0xf93   :  { %3960 = vpow2.f32 %v3708_v62 }
 0xf99   :  { %v3961_v54 = vpop.eup %3960 }
 0xf9a   :  { %v2401_v12 = vadd.f32 1.0, %v3961_v54 }
 0xf9c   :  { %3962 = vrcp.f32 %v2401_v12  ;;  %v2413_v8 = vand.u32 2147483648, %v2401_v12  ;;  %v2411_v52 = vand.u32 2147483647, %v2401_v12  ;;  %vm2407_vm4 = vweird.f32 %v2401_v12 }
 0xf9d   :  { %3964 = vtanh.f32 %v2396_v53 }
 0xf9e   :  { %v2414_v43 = vor.u32 1.1754944e-38, %v2413_v8  ;;  %vm2412_vm7 = vcmp.eq.f32.partialorder %v2411_v52, 8.507059e+37 }
 0xfa2   :  { %v3963_v50 = vpop.eup %3962 }
 0xfa3   :  { %v2403_v34 = vmul.f32 %v3963_v50, %v2401_v12  ;;  %vm2408_vm3 = vweird.f32 %v3963_v50  ;;  %v3965_v27 = vpop.eup %3964 }
 0xfa4   :  { %vm2409_vm6 = vmor %vm2407_vm4, %vm2408_vm3 }
 0xfa5   :  { %v2404_v6 = vsub.f32 1.0, %v2403_v34 }
 0xfa7   :  { %v2405_v16 = vmul.f32 %v3963_v50, %v2404_v6 }
 0xfa9   :  { %v2406_v41 = vadd.f32 %v3963_v50, %v2405_v16 }
 0xfab   :  { %v2410_v55 = vsel %vm2409_vm6, %v3963_v50, %v2406_v41 }
 0xfac   :  { %v2415_v56 = vsel %vm2412_vm7, %v2414_v43, %v2410_v55 }
 0xfad   :  { %v2417_v58 = vsel %vm4539_vm5, %v3965_v27, %v2415_v56 }
 0xfae   :  { %2422 = vrot.lane.b32.xlu2 %v2417_v58, %s6404_s9  ;;  %2420 = vrot.lane.b32.xlu1 %v2417_v58, %s6402_s13 }
 0xfaf   :  { %2418 = vrot.lane.b32.xlu0 %v2417_v58, %s6403_s6 }
0x1008   :  { %v2423_v23 = vpop.permute.xlu2 %2422 }
0x1020   :  { %v2421_v44 = vpop.permute.xlu1 %2420 }
0x1021   :  { %v2425_v48 = vmul.f32 %v2421_v44, %v2417_v58  ;;  %v2419_v0 = vpop.permute.xlu0 %2418  ;;  %v5885_v58 = vld [vmem:[#allocation11 + $0x1f8] sm:$0xff] }
0x1022   :  { %v2424_v1 = vmul.f32 %v2419_v0, %v5842_v18  ;;  %2755 = vmatpush.msrb.mxu0 %v5885_v58  ;;  %2810 = vmatpush.msra.mxu2 %v5885_v58 }
0x1023   :  { %2865 = vmatpush.msrb.mxu3 %v5885_v58 }
0x1024   :  { %v5855_v2 = vadd.f32 %v2425_v48, %v2424_v1  ;;  %2756 = vmatpush.msrb.mxu0 %v5887_v31  ;;  %2811 = vmatpush.msra.mxu2 %v5887_v31 }
0x1025   :  { %2866 = vmatpush.msrb.mxu3 %v5887_v31 }
0x1026   :  { %3966 = vtanh.f32 %v5855_v2  ;;  %2757 = vmatpush.msrb.mxu0 %v5891_v61  ;;  %2812 = vmatpush.msra.mxu2 %v5891_v61 }
0x1027   :  { %3968 = vpow2.f32 %v3699_v17  ;;  %2867 = vmatpush.msrb.mxu3 %v5891_v61 }
0x1028   :  { %2758 = vmatpush.msrb.mxu0 %v5897_v32  ;;  %2813 = vmatpush.msra.mxu2 %v5897_v32 }
0x1029   :  { %2868 = vmatpush.msrb.mxu3 %v5897_v32 }
0x102a   :  { %2759 = vmatpush.msrb.mxu0 %v5903_v63  ;;  %2814 = vmatpush.msra.mxu2 %v5903_v63 }
0x102b   :  { %2869 = vmatpush.msrb.mxu3 %v5903_v63 }
0x102c   :  { %v3967_v21 = vpop.eup %3966  ;;  %2760 = vmatpush.msrb.mxu0 %v5915_v3  ;;  %2815 = vmatpush.msra.mxu2 %v5915_v3 }
0x102d   :  { %v2428_v24 = vmul.f32 %v3967_v21, %v2423_v23  ;;  %v3969_v28 = vpop.eup %3968  ;;  %2870 = vmatpush.msrb.mxu3 %v5915_v3 }
0x102e   :  { %2761 = vmatpush.msrb.mxu0 %v5919_v5  ;;  %2816 = vmatpush.msra.mxu2 %v5919_v5 }
0x102f   :  { %2447 = vmatmul.f32.vlgmr.msra.gmra.mxu1 %v2428_v24  ;;  %2871 = vmatpush.msrb.mxu3 %v5919_v5 }
0x1030   :  { %3085 = vmatpush.msra.mxu1 %v5885_v58  ;;  %2762 = vmatpush.msrb.mxu0 %v5925_v7 }
0x1031   :  { %2817 = vmatpush.msra.mxu2 %v5925_v7  ;;  %2872 = vmatpush.msrb.mxu3 %v5925_v7 }
0x1032   :  { %3086 = vmatpush.msra.mxu1 %v5887_v31  ;;  %2763 = vmatpush.msrb.mxu0 %v5930_v10 }
0x1033   :  { %2818 = vmatpush.msra.mxu2 %v5930_v10  ;;  %2873 = vmatpush.msrb.mxu3 %v5930_v10 }
0x1034   :  { %3087 = vmatpush.msra.mxu1 %v5891_v61  ;;  %2764 = vmatpush.msrb.mxu0 %v5937_v29 }
0x1035   :  { %2819 = vmatpush.msra.mxu2 %v5937_v29  ;;  %2874 = vmatpush.msrb.mxu3 %v5937_v29 }
0x1036   :  { %3088 = vmatpush.msra.mxu1 %v5897_v32  ;;  %2765 = vmatpush.msrb.mxu0 %v5943_v11 }
0x1037   :  { %2700 = vmatmul.f32.vlgmr.msrb.gmra.mxu1 %v5775_v57  ;;  %v2077_v57 = vadd.f32 1.0, %v3969_v28  ;;  %2820 = vmatpush.msra.mxu2 %v5943_v11 }
0x1038   :  { %3089 = vmatpush.msra.mxu1 %v5903_v63  ;;  %2875 = vmatpush.msrb.mxu3 %v5943_v11 }
0x1039   :  { %v2089_v8 = vand.u32 2147483648, %v2077_v57  ;;  %vm2083_vm1 = vweird.f32 %v2077_v57  ;;  %v2087_v52 = vand.u32 2147483647, %v2077_v57  ;;  %2766 = vmatpush.msrb.mxu0 %v5949_v33  ;;  %2821 = vmatpush.msra.mxu2 %v5949_v33 }
0x103a   :  { %3090 = vmatpush.msra.mxu1 %v5915_v3  ;;  %2876 = vmatpush.msrb.mxu3 %v5949_v33 }
0x103b   :  { %v2090_v43 = vor.u32 1.1754944e-38, %v2089_v8  ;;  %vm2088_vm13 = vcmp.eq.f32.partialorder %v2087_v52, 8.507059e+37  ;;  %2767 = vmatpush.msrb.mxu0 %v5955_v35  ;;  %2822 = vmatpush.msra.mxu2 %v5955_v35 }
0x103c   :  { %3091 = vmatpush.msra.mxu1 %v5919_v5  ;;  %2877 = vmatpush.msrb.mxu3 %v5955_v35 }
0x103d   :  { %2768 = vmatpush.msrb.mxu0 %v5961_v37  ;;  %2823 = vmatpush.msra.mxu2 %v5961_v37 }
0x103e   :  { %3092 = vmatpush.msra.mxu1 %v5925_v7  ;;  %2878 = vmatpush.msrb.mxu3 %v5961_v37 }
0x103f   :  { %2703 = vmatmul.f32.gmra.mxu1 %v5818_v15  ;;  %2769 = vmatpush.msrb.mxu0 %v5967_v39 }
0x1040   :  { %3093 = vmatpush.msra.mxu1 %v5930_v10  ;;  %2824 = vmatpush.msra.mxu2 %v5967_v39 }
0x1041   :  { %2879 = vmatpush.msrb.mxu3 %v5967_v39  ;;  %2770 = vmatpush.msrb.mxu0 %v5973_v42 }
0x1042   :  { %3094 = vmatpush.msra.mxu1 %v5937_v29  ;;  %2825 = vmatpush.msra.mxu2 %v5973_v42 }
0x1043   :  { %2880 = vmatpush.msrb.mxu3 %v5973_v42 }
0x1044   :  { %3095 = vmatpush.msra.mxu1 %v5943_v11 }
0x1046   :  { %3096 = vmatpush.msra.mxu1 %v5949_v33 }
0x1047   :  { %2706 = vmatmul.f32.gmra.mxu1 %v5845_v36 }
0x1048   :  { %3097 = vmatpush.msra.mxu1 %v5955_v35 }
0x104a   :  { %3098 = vmatpush.msra.mxu1 %v5961_v37 }
0x104c   :  { %3099 = vmatpush.msra.mxu1 %v5967_v39 }
0x104e   :  { %3100 = vmatpush.msra.mxu1 %v5973_v42 }
0x104f   :  { %2709 = vmatmul.f32.gmra.mxu1 %v2428_v24 }
0x10ac   :  { %v2448_v25 = vpop.f32.mrf.mxu1 }
0x10ad   :  { %v2451_v30 = vadd.f32 %v2448_v25, %v2170_v59 }
0x10af   :  { %v3709_v13 = vmul.f32 -1.442695, %v2451_v30 }
0x10b1   :  { %3970 = vpow2.f32 %v3709_v13 }
0x10b2   :  { %3972 = vrcp.f32 %v2077_v57 }
0x10b7   :  { %v3971_v15 = vpop.eup %3970 }
0x10b8   :  { %v2456_v18 = vadd.f32 1.0, %v3971_v15  ;;  %v3973_v22 = vpop.eup %3972 }
0x10b9   :  { %v2079_v20 = vmul.f32 %v3973_v22, %v2077_v57  ;;  %vm2084_vm0 = vweird.f32 %v3973_v22 }
0x10ba   :  { %3974 = vrcp.f32 %v2456_v18  ;;  %v2468_v45 = vand.u32 2147483648, %v2456_v18  ;;  %v2466_v47 = vand.u32 2147483647, %v2456_v18  ;;  %vm2462_vm9 = vweird.f32 %v2456_v18  ;;  %vm2085_vm12 = vmor %vm2083_vm1, %vm2084_vm0 }
0x10bb   :  { %v2080_v38 = vsub.f32 1.0, %v2079_v20  ;;  %3976 = vtanh.f32 %v2451_v30  ;;  %v2172_v30 = vpop.f32.mrf.mxu2  ;;  %v2701_v20 = vpop.f32.mrf.mxu1 }
0x10bc   :  { %v2469_v54 = vor.u32 1.1754944e-38, %v2468_v45  ;;  %vm2467_vm11 = vcmp.eq.f32.partialorder %v2466_v47, 8.507059e+37  ;;  %3978 = vtanh.f32 %v2072_v4  ;;  %v2173_v13 = vadd.f32 %v5749_v26, %v2172_v30 }
0x10bd   :  { %v2081_v53 = vmul.f32 %v3973_v22, %v2080_v38 }
0x10bf   :  { %v2082_v50 = vadd.f32 %v3973_v22, %v2081_v53 }
0x10c0   :  { %v3975_v60 = vpop.eup %3974 }
0x10c1   :  { %v2458_v49 = vmul.f32 %v3975_v60, %v2456_v18  ;;  %vm2463_vm8 = vweird.f32 %v3975_v60  ;;  %v3977_v34 = vpop.eup %3976  ;;  %v2086_v41 = vsel %vm2085_vm12, %v3973_v22, %v2082_v50  ;;  %v6033_v18 = vld [vmem:[%s6401_s18 + $0x3] ss:$0 sm:$0xff] }
0x10c2   :  { %vm2464_vm10 = vmor %vm2462_vm9, %vm2463_vm8  ;;  %v2091_v55 = vsel %vm2088_vm13, %v2090_v43, %v2086_v41  ;;  %v3979_v27 = vpop.eup %3978 }
0x10c3   :  { %v2459_v36 = vsub.f32 1.0, %v2458_v49  ;;  %v5877_v56 = vsel %vm4539_vm5, %v3979_v27, %v2091_v55 }
0x10c5   :  { %v2460_v51 = vmul.f32 %v3975_v60, %v2459_v36 }
0x10c7   :  { %v2461_v62 = vadd.f32 %v3975_v60, %v2460_v51 }
0x10c9   :  { %v2465_v12 = vsel %vm2464_vm10, %v3975_v60, %v2461_v62  ;;  %v2702_v60 = vadd.f32 %v6033_v18, %v2701_v20 }
0x10ca   :  { %v2470_v6 = vsel %vm2467_vm11, %v2469_v54, %v2465_v12 }
0x10cb   :  { %v5867_v16 = vsel %vm4539_vm5, %v3977_v34, %v2470_v6 }
0x10cc   :  { %2477 = vrot.lane.b32.xlu2 %v5867_v16, %s6404_s9  ;;  %2475 = vrot.lane.b32.xlu1 %v5867_v16, %s6402_s13 }
0x10cd   :  { %2473 = vrot.lane.b32.xlu0 %v5867_v16, %s6403_s6 }
0x10d4   :  { %2096 = vrot.lane.b32.xlu1 %v5877_v56, %s6402_s13 }
0x10d5   :  { %2094 = vrot.lane.b32.xlu0 %v5877_v56, %s6403_s6 }
0x10dc   :  { %2098 = vrot.lane.b32.xlu1 %v5877_v56, %s6404_s9 }
0x1126   :  { %v2478_v17 = vpop.permute.xlu2 %2477 }
0x113e   :  { %v2476_v46 = vpop.permute.xlu1 %2475 }
0x113f   :  { %v2480_v44 = vmul.f32 %v2476_v46, %v5867_v16  ;;  %v2474_v48 = vpop.permute.xlu0 %2473 }
0x1140   :  { %v2479_v0 = vmul.f32 %v2474_v48, %v5855_v2 }
0x1142   :  { %v5983_v1 = vadd.f32 %v2480_v44, %v2479_v0 }
0x1144   :  { %3980 = vtanh.f32 %v5983_v1 }
0x1146   :  { %v2097_v21 = vpop.permute.xlu1 %2096 }
0x1147   :  { %v2101_v23 = vmul.f32 %v2097_v21, %v5877_v56  ;;  %v2095_v24 = vpop.permute.xlu0 %2094 }
0x1148   :  { %v2100_v40 = vmul.f32 %v2095_v24, %v5811_v9  ;;  %v3716_v9 = vld [vmem:[%s6400_s12 + $0x18] sm:$0xff] }
0x114a   :  { %v3981_v4 = vpop.eup %3980  ;;  %v2102_v19 = vadd.f32 %v2101_v23, %v2100_v40 }
0x114b   :  { %v2483_v59 = vmul.f32 %v3981_v4, %v2478_v17 }
0x114c   :  { %3982 = vtanh.f32 %v2102_v19  ;;  %3701 = vst [vmem:[%s6406_s28 + $0x8] sm:$0xff] %v2102_v19 }
0x114d   :  { %2502 = vmatmul.f32.vlgmr.msra.gmra.mxu0 %v2483_v59  ;;  %2712 = vmatmul.f32.gmra.mxu1 %v2483_v59 }
0x114e   :  { %2920 = vmatpush.msra.mxu0 %v5885_v58  ;;  %v2099_v25 = vpop.permute.xlu1 %2098 }
0x1150   :  { %2921 = vmatpush.msra.mxu0 %v5887_v31 }
0x1152   :  { %v3983_v2 = vpop.eup %3982  ;;  %2922 = vmatpush.msra.mxu0 %v5891_v61 }
0x1153   :  { %v2104_v28 = vmul.f32 %v3983_v2, %v2099_v25 }
0x1154   :  { %2923 = vmatpush.msra.mxu0 %v5897_v32 }
0x1155   :  { %3700 = vst [vmem:[%s6407_s0 + $0x8] sm:$0xff] %v2104_v28  ;;  %2177 = vmatmul.f32.gmra.mxu2 %v2104_v28  ;;  %2771 = vmatmul.f32.vlgmr.msrb.gmra.mxu0 %v3716_v9  ;;  %v3717_v9 = vld [vmem:[%s6405_s21 + $0x18] sm:$0xff] }
0x1156   :  { %2924 = vmatpush.msra.mxu0 %v5903_v63 }
0x1158   :  { %2925 = vmatpush.msra.mxu0 %v5915_v3 }
0x115a   :  { %2926 = vmatpush.msra.mxu0 %v5919_v5 }
0x115c   :  { %2927 = vmatpush.msra.mxu0 %v5925_v7 }
0x115e   :  { %2928 = vmatpush.msra.mxu0 %v5930_v10 }
0x1160   :  { %2929 = vmatpush.msra.mxu0 %v5937_v29 }
0x1162   :  { %2930 = vmatpush.msra.mxu0 %v5943_v11 }
0x1164   :  { %2931 = vmatpush.msra.mxu0 %v5949_v33 }
0x1166   :  { %2932 = vmatpush.msra.mxu0 %v5955_v35 }
0x1168   :  { %2933 = vmatpush.msra.mxu0 %v5961_v37 }
0x116a   :  { %2934 = vmatpush.msra.mxu0 %v5967_v39 }
0x116c   :  { %2935 = vmatpush.msra.mxu0 %v5973_v42 }
0x116e   :  { %3140 = vmatpush.msrb.mxu0 %v5885_v58 }
0x1170   :  { %3141 = vmatpush.msrb.mxu0 %v5887_v31 }
0x1172   :  { %3142 = vmatpush.msrb.mxu0 %v5891_v61 }
0x1174   :  { %3143 = vmatpush.msrb.mxu0 %v5897_v32 }
0x1176   :  { %3144 = vmatpush.msrb.mxu0 %v5903_v63 }
0x1178   :  { %3145 = vmatpush.msrb.mxu0 %v5915_v3 }
0x117a   :  { %3146 = vmatpush.msrb.mxu0 %v5919_v5 }
0x117c   :  { %3147 = vmatpush.msrb.mxu0 %v5925_v7 }
0x117e   :  { %3148 = vmatpush.msrb.mxu0 %v5930_v10 }
0x1180   :  { %3149 = vmatpush.msrb.mxu0 %v5937_v29 }
0x1182   :  { %3150 = vmatpush.msrb.mxu0 %v5943_v11 }
0x1184   :  { %3151 = vmatpush.msrb.mxu0 %v5949_v33 }
0x1186   :  { %3152 = vmatpush.msrb.mxu0 %v5955_v35 }
0x1188   :  { %3153 = vmatpush.msrb.mxu0 %v5961_v37 }
0x118a   :  { %3154 = vmatpush.msrb.mxu0 %v5967_v39 }
0x118c   :  { %3155 = vmatpush.msrb.mxu0 %v5973_v42 }
0x11ca   :  { %v2503_v57 = vpop.f32.mrf.mxu0 }
0x11cb   :  { %v2506_v15 = vadd.f32 %v2503_v57, %v2173_v13 }
0x11cd   :  { %v3710_v22 = vmul.f32 -1.442695, %v2506_v15 }
0x11cf   :  { %3984 = vpow2.f32 %v3710_v22 }
0x11d2   :  { %v2772_v49 = vpop.f32.mrf.mxu0 }
0x11d3   :  { %v2775_v38 = vadd.f32 %v2772_v49, %v2702_v60 }
0x11d5   :  { %v3985_v36 = vpop.eup %3984  ;;  %v3718_v45 = vmul.f32 -1.442695, %v2775_v38 }
0x11d6   :  { %v2511_v51 = vadd.f32 1.0, %v3985_v36  ;;  %v2175_v36 = vpop.f32.mrf.mxu2 }
0x11d7   :  { %3986 = vpow2.f32 %v3718_v45 }
0x11d8   :  { %3988 = vrcp.f32 %v2511_v51  ;;  %v2523_v12 = vand.u32 2147483648, %v2511_v51  ;;  %v2521_v34 = vand.u32 2147483647, %v2511_v51  ;;  %vm2517_vm15 = vweird.f32 %v2511_v51 }
0x11da   :  { %v2524_v16 = vor.u32 1.1754944e-38, %v2523_v12  ;;  %vm2522_vm3 = vcmp.eq.f32.partialorder %v2521_v34, 8.507059e+37 }
0x11dd   :  { %v3987_v26 = vpop.eup %3986 }
0x11de   :  { %v3989_v47 = vpop.eup %3988  ;;  %v2780_v53 = vadd.f32 1.0, %v3987_v26  ;;  %v6075_v45 = vpop.f32.mrf.mxu2 }
0x11df   :  { %v2513_v62 = vmul.f32 %v3989_v47, %v2511_v51  ;;  %vm2518_vm14 = vweird.f32 %v3989_v47  ;;  %v6080_v51 = vld [vmem:[%s6401_s18 + $0x2] ss:$0 sm:$0xff] }
0x11e0   :  { %3990 = vrcp.f32 %v2780_v53  ;;  %vm2519_vm2 = vmor %vm2517_vm15, %vm2518_vm14  ;;  %v2792_v46 = vand.u32 2147483648, %v2780_v53  ;;  %v2790_v48 = vand.u32 2147483647, %v2780_v53  ;;  %vm2786_vm6 = vweird.f32 %v2780_v53 }
0x11e1   :  { %v2514_v54 = vsub.f32 1.0, %v2513_v62  ;;  %3992 = vtanh.f32 %v2506_v15  ;;  %v2176_v26 = vadd.f32 %v6080_v51, %v2175_v36 }
0x11e2   :  { %3994 = vtanh.f32 %v2775_v38  ;;  %v2793_v21 = vor.u32 1.1754944e-38, %v2792_v46  ;;  %vm2791_vm8 = vcmp.eq.f32.partialorder %v2790_v48, 8.507059e+37 }
0x11e3   :  { %v2515_v50 = vmul.f32 %v3989_v47, %v2514_v54  ;;  %v2704_v54 = vpop.f32.mrf.mxu1 }
0x11e4   :  { %v2705_v12 = vadd.f32 %v6033_v18, %v2704_v54 }
0x11e5   :  { %v2516_v6 = vadd.f32 %v3989_v47, %v2515_v50 }
0x11e6   :  { %v3991_v8 = vpop.eup %3990 }
0x11e7   :  { %v2520_v52 = vsel %vm2519_vm2, %v3989_v47, %v2516_v6  ;;  %v2782_v41 = vmul.f32 %v3991_v8, %v2780_v53  ;;  %v3993_v43 = vpop.eup %3992  ;;  %vm2787_vm4 = vweird.f32 %v3991_v8 }
0x11e8   :  { %v2525_v55 = vsel %vm2522_vm3, %v2524_v16, %v2520_v52  ;;  %vm2788_vm7 = vmor %vm2786_vm6, %vm2787_vm4  ;;  %v3995_v24 = vpop.eup %3994 }
0x11e9   :  { %v2527_v27 = vsel %vm4539_vm5, %v3993_v43, %v2525_v55  ;;  %v2783_v56 = vsub.f32 1.0, %v2782_v41 }
0x11ea   :  { %2532 = vrot.lane.b32.xlu1 %v2527_v27, %s6404_s9  ;;  %2530 = vrot.lane.b32.xlu0 %v2527_v27, %s6402_s13 }
0x11eb   :  { %2528 = vrot.lane.b32.xlu2 %v2527_v27, %s6403_s6  ;;  %v2784_v44 = vmul.f32 %v3991_v8, %v2783_v56 }
0x11ed   :  { %v2785_v0 = vadd.f32 %v3991_v8, %v2784_v44 }
0x11ef   :  { %v2789_v23 = vsel %vm2788_vm7, %v3991_v8, %v2785_v0 }
0x11f0   :  { %v2794_v40 = vsel %vm2791_vm8, %v2793_v21, %v2789_v23 }
0x11f1   :  { %v2796_v4 = vsel %vm4539_vm5, %v3995_v24, %v2794_v40 }
0x11f2   :  { %2799 = vrot.lane.b32.xlu0 %v2796_v4, %s6402_s13 }
0x11f3   :  { %2797 = vrot.lane.b32.xlu2 %v2796_v4, %s6403_s6 }
0x11fb   :  { %2801 = vrot.lane.b32.xlu2 %v2796_v4, %s6404_s9 }
0x1245   :  { %v2529_v17 = vpop.permute.xlu2 %2528 }
0x1246   :  { %v2534_v59 = vmul.f32 %v2529_v17, %v5983_v1 }
0x124d   :  { %v2798_v28 = vpop.permute.xlu2 %2797 }
0x124e   :  { %v2803_v13 = vmul.f32 %v3717_v9, %v2798_v28 }
0x1255   :  { %v2802_v49 = vpop.permute.xlu2 %2801 }
0x125c   :  { %v2531_v19 = vpop.permute.xlu0 %2530  ;;  %v2533_v22 = vpop.permute.xlu1 %2532 }
0x125d   :  { %v2535_v2 = vmul.f32 %v2531_v19, %v2527_v27 }
0x125f   :  { %v6047_v25 = vadd.f32 %v2535_v2, %v2534_v59 }
0x1261   :  { %3996 = vtanh.f32 %v6047_v25 }
0x1264   :  { %v2800_v30 = vpop.permute.xlu0 %2799 }
0x1265   :  { %v2804_v57 = vmul.f32 %v2800_v30, %v2796_v4 }
0x1267   :  { %v3997_v15 = vpop.eup %3996  ;;  %v6053_v20 = vadd.f32 %v2804_v57, %v2803_v13 }
0x1268   :  { %v2538_v60 = vmul.f32 %v3997_v15, %v2533_v22 }
0x1269   :  { %3998 = vtanh.f32 %v6053_v20 }
0x126a   :  { %2557 = vmatmul.f32.vlgmr.msrb.gmra.mxu2 %v2538_v60  ;;  %2715 = vmatmul.f32.gmra.mxu1 %v2538_v60 }
0x126b   :  { %2975 = vmatpush.msrb.mxu2 %v5885_v58 }
0x126d   :  { %2976 = vmatpush.msrb.mxu2 %v5887_v31 }
0x126f   :  { %v3999_v1 = vpop.eup %3998  ;;  %2977 = vmatpush.msrb.mxu2 %v5891_v61 }
0x1270   :  { %v6059_v38 = vmul.f32 %v3999_v1, %v2802_v49 }
0x1271   :  { %2978 = vmatpush.msrb.mxu2 %v5897_v32 }
0x1272   :  { %2826 = vmatmul.f32.vlgmr.msra.gmra.mxu2 %v6059_v38 }
0x1273   :  { %2979 = vmatpush.msrb.mxu2 %v5903_v63 }
0x1275   :  { %2980 = vmatpush.msrb.mxu2 %v5915_v3 }
0x1277   :  { %2981 = vmatpush.msrb.mxu2 %v5919_v5 }
0x1279   :  { %2982 = vmatpush.msrb.mxu2 %v5925_v7 }
0x127b   :  { %2983 = vmatpush.msrb.mxu2 %v5930_v10 }
0x127d   :  { %2984 = vmatpush.msrb.mxu2 %v5937_v29 }
0x127f   :  { %2985 = vmatpush.msrb.mxu2 %v5943_v11 }
0x1281   :  { %2986 = vmatpush.msrb.mxu2 %v5949_v33 }
0x1283   :  { %2987 = vmatpush.msrb.mxu2 %v5955_v35 }
0x1285   :  { %2988 = vmatpush.msrb.mxu2 %v5961_v37 }
0x1287   :  { %2989 = vmatpush.msrb.mxu2 %v5967_v39 }
0x1289   :  { %2990 = vmatpush.msrb.mxu2 %v5973_v42 }
0x12ed   :  { %v2558_v47 = vpop.f32.mrf.mxu2 }
0x12ee   :  { %v2561_v53 = vadd.f32 %v2558_v47, %v2176_v26 }
0x12f0   :  { %v3711_v62 = vmul.f32 -1.442695, %v2561_v53 }
0x12f2   :  { %4000 = vpow2.f32 %v3711_v62 }
0x12f5   :  { %v2827_v50 = vpop.f32.mrf.mxu2 }
0x12f6   :  { %v2830_v34 = vadd.f32 %v2827_v50, %v2705_v12 }
0x12f8   :  { %v4001_v6 = vpop.eup %4000  ;;  %v3719_v8 = vmul.f32 -1.442695, %v2830_v34 }
0x12f9   :  { %v2566_v16 = vadd.f32 1.0, %v4001_v6 }
0x12fa   :  { %4002 = vpow2.f32 %v3719_v8 }
0x12fb   :  { %4004 = vrcp.f32 %v2566_v16  ;;  %v2578_v56 = vand.u32 2147483648, %v2566_v16  ;;  %v2576_v44 = vand.u32 2147483647, %v2566_v16  ;;  %vm2572_vm10 = vweird.f32 %v2566_v16 }
0x12fd   :  { %v2579_v21 = vor.u32 1.1754944e-38, %v2578_v56  ;;  %vm2577_vm0 = vcmp.eq.f32.partialorder %v2576_v44, 8.507059e+37 }
0x1300   :  { %v4003_v52 = vpop.eup %4002 }
0x1301   :  { %v4005_v41 = vpop.eup %4004  ;;  %v2835_v43 = vadd.f32 1.0, %v4003_v52 }
0x1302   :  { %v2568_v55 = vmul.f32 %v4005_v41, %v2566_v16  ;;  %vm2573_vm9 = vweird.f32 %v4005_v41 }
0x1303   :  { %4006 = vrcp.f32 %v2835_v43  ;;  %vm2574_vm11 = vmor %vm2572_vm10, %vm2573_vm9  ;;  %v2847_v59 = vand.u32 2147483648, %v2835_v43  ;;  %v2845_v9 = vand.u32 2147483647, %v2835_v43  ;;  %vm2841_vm12 = vweird.f32 %v2835_v43 }
0x1304   :  { %v2569_v27 = vsub.f32 1.0, %v2568_v55  ;;  %4008 = vtanh.f32 %v2561_v53 }
0x1305   :  { %4010 = vtanh.f32 %v2830_v34  ;;  %v2848_v30 = vor.u32 1.1754944e-38, %v2847_v59  ;;  %vm2846_vm14 = vcmp.eq.f32.partialorder %v2845_v9, 8.507059e+37 }
0x1306   :  { %v2570_v46 = vmul.f32 %v4005_v41, %v2569_v27 }
0x1308   :  { %v2571_v48 = vadd.f32 %v4005_v41, %v2570_v46 }
0x1309   :  { %v4007_v0 = vpop.eup %4006 }
0x130a   :  { %v2575_v23 = vsel %vm2574_vm11, %v4005_v41, %v2571_v48  ;;  %v2837_v24 = vmul.f32 %v4007_v0, %v2835_v43  ;;  %v4009_v40 = vpop.eup %4008  ;;  %vm2842_vm1 = vweird.f32 %v4007_v0 }
0x130b   :  { %v2580_v4 = vsel %vm2577_vm0, %v2579_v21, %v2575_v23  ;;  %vm2843_vm13 = vmor %vm2841_vm12, %vm2842_vm1  ;;  %v4011_v57 = vpop.eup %4010 }
0x130c   :  { %v2582_v17 = vsel %vm4539_vm5, %v4009_v40, %v2580_v4  ;;  %v2838_v19 = vsub.f32 1.0, %v2837_v24 }
0x130d   :  { %2585 = vrot.lane.b32.xlu1 %v2582_v17, %s6402_s13  ;;  %2583 = vrot.lane.b32.xlu0 %v2582_v17, %s6403_s6 }
0x130e   :  { %v2839_v2 = vmul.f32 %v4007_v0, %v2838_v19 }
0x1310   :  { %v2840_v28 = vadd.f32 %v4007_v0, %v2839_v2 }
0x1312   :  { %v2844_v13 = vsel %vm2843_vm13, %v4007_v0, %v2840_v28 }
0x1313   :  { %v2849_v15 = vsel %vm2846_vm14, %v2848_v30, %v2844_v13 }
0x1314   :  { %v2851_v22 = vsel %vm4539_vm5, %v4011_v57, %v2849_v15 }
0x1315   :  { %2587 = vrot.lane.b32.xlu1 %v2582_v17, %s6404_s9  ;;  %2854 = vrot.lane.b32.xlu0 %v2851_v22, %s6402_s13 }
0x1316   :  { %2852 = vrot.lane.b32.xlu2 %v2851_v22, %s6403_s6 }
0x131e   :  { %2856 = vrot.lane.b32.xlu2 %v2851_v22, %s6404_s9 }
0x1370   :  { %v2853_v47 = vpop.permute.xlu2 %2852 }
0x1371   :  { %v2858_v62 = vmul.f32 %v2853_v47, %v6053_v20  ;;  %v3221_v47 = vld [vmem:[#allocation12 + $0x78] sm:$0xff] }
0x1372   :  { %3226 = vmatpush.msra.mxu2 %v3221_v47 }
0x1378   :  { %v2857_v8 = vpop.permute.xlu2 %2856 }
0x137f   :  { %v2586_v60 = vpop.permute.xlu1 %2585  ;;  %v2584_v1 = vpop.permute.xlu0 %2583 }
0x1380   :  { %v2590_v49 = vmul.f32 %v2586_v60, %v2582_v17  ;;  %v2589_v36 = vmul.f32 %v2584_v1, %v6047_v25 }
0x1382   :  { %v6095_v26 = vadd.f32 %v2590_v49, %v2589_v36 }
0x1384   :  { %4012 = vtanh.f32 %v6095_v26 }
0x1387   :  { %v2855_v53 = vpop.permute.xlu0 %2854  ;;  %v2588_v50 = vpop.permute.xlu1 %2587 }
0x1388   :  { %v2859_v54 = vmul.f32 %v2855_v53, %v2851_v22  ;;  %v3220_v53 = vld [vmem:[#allocation12 + $0x70] sm:$0xff] }
0x1389   :  { %3227 = vmatpush.msra.mxu2 %v3220_v53 }
0x138a   :  { %v4013_v12 = vpop.eup %4012  ;;  %v2860_v34 = vadd.f32 %v2859_v54, %v2858_v62  ;;  %v3219_v62 = vld [vmem:[#allocation12 + $0x68] sm:$0xff]  ;;  %v3218_v54 = vld [vmem:[#allocation12 + $0x60] sm:$0xff] }
0x138b   :  { %v2593_v6 = vmul.f32 %v4013_v12, %v2588_v50  ;;  %3228 = vmatpush.msra.mxu2 %v3219_v62  ;;  %v3217_v12 = vld [vmem:[#allocation12 + $0x58] sm:$0xff]  ;;  %v3216_v50 = vld [vmem:[#allocation12 + $0x50] sm:$0xff] }
0x138c   :  { %4014 = vtanh.f32 %v2860_v34 }
0x138d   :  { %2612 = vmatmul.f32.vlgmr.msra.gmra.mxu3 %v2593_v6  ;;  %2718 = vmatmul.f32.gmra.mxu1 %v2593_v6  ;;  %v3214_v6 = vld [vmem:[#allocation12 + $0x40] sm:$0xff] }
0x138e   :  { %3030 = vmatpush.msra.mxu3 %v5885_v58  ;;  %3229 = vmatpush.msra.mxu2 %v3218_v54 }
0x1390   :  { %3031 = vmatpush.msra.mxu3 %v5887_v31  ;;  %v2707_v31 = vpop.f32.mrf.mxu1  ;;  %3230 = vmatpush.msra.mxu2 %v3217_v12 }
0x1392   :  { %v4015_v25 = vpop.eup %4014  ;;  %3032 = vmatpush.msra.mxu3 %v5891_v61  ;;  %v2708_v61 = vadd.f32 %v6033_v18, %v2707_v31  ;;  %3231 = vmatpush.msra.mxu2 %v3216_v50  ;;  %v3211_v31 = vld [vmem:[#allocation12 + $0x28] sm:$0xff] }
0x1393   :  { %v6102_v16 = vmul.f32 %v4015_v25, %v2857_v8  ;;  %v3213_v25 = vld [vmem:[#allocation12 + $0x38] sm:$0xff]  ;;  %v3212_v8 = vld [vmem:[#allocation12 + $0x30] sm:$0xff] }
0x1394   :  { %3033 = vmatpush.msra.mxu3 %v5897_v32 }
0x1395   :  { %2881 = vmatmul.f32.vlgmr.msrb.gmra.mxu3 %v6102_v16 }
0x1396   :  { %3034 = vmatpush.msra.mxu3 %v5903_v63 }
0x1398   :  { %3035 = vmatpush.msra.mxu3 %v5915_v3  ;;  %v2710_v23 = vpop.f32.mrf.mxu1 }
0x1399   :  { %v2711_v24 = vadd.f32 %v6033_v18, %v2710_v23 }
0x139a   :  { %3036 = vmatpush.msra.mxu3 %v5919_v5 }
0x139c   :  { %3037 = vmatpush.msra.mxu3 %v5925_v7 }
0x139e   :  { %3038 = vmatpush.msra.mxu3 %v5930_v10 }
0x13a0   :  { %3039 = vmatpush.msra.mxu3 %v5937_v29 }
0x13a2   :  { %3040 = vmatpush.msra.mxu3 %v5943_v11 }
0x13a4   :  { %3041 = vmatpush.msra.mxu3 %v5949_v33 }
0x13a6   :  { %3042 = vmatpush.msra.mxu3 %v5955_v35 }
0x13a8   :  { %3043 = vmatpush.msra.mxu3 %v5961_v37 }
0x13aa   :  { %3044 = vmatpush.msra.mxu3 %v5967_v39 }
0x13ac   :  { %3045 = vmatpush.msra.mxu3 %v5973_v42 }
0x1410   :  { %v6118_v58 = vpop.f32.mrf.mxu3 }
0x1418   :  { %v2882_v32 = vpop.f32.mrf.mxu3 }
0x1419   :  { %v2885_v63 = vadd.f32 %v2882_v32, %v2708_v61  ;;  %v3210_v61 = vld [vmem:[#allocation12 + $0x20] sm:$0xff]  ;;  %v3209_v32 = vld [vmem:[#allocation12 + $0x18] sm:$0xff] }
0x141b   :  { %v3720_v3 = vmul.f32 -1.442695, %v2885_v63 }
0x141d   :  { %4016 = vpow2.f32 %v3720_v3  ;;  %v3207_v3 = vld [vmem:[#allocation12 + $0x8] sm:$0xff] }
0x1423   :  { %v4017_v5 = vpop.eup %4016 }
0x1424   :  { %v2890_v7 = vadd.f32 1.0, %v4017_v5  ;;  %v3206_v5 = vld [vmem:[#allocation12] sm:$0xff] }
0x1426   :  { %4018 = vrcp.f32 %v2890_v7  ;;  %v2902_v33 = vand.u32 2147483648, %v2890_v7  ;;  %v2900_v37 = vand.u32 2147483647, %v2890_v7  ;;  %vm2896_vm2 = vweird.f32 %v2890_v7 }
0x1427   :  { %4020 = vtanh.f32 %v2885_v63  ;;  %v3208_v63 = vld [vmem:[#allocation12 + $0x10] sm:$0xff] }
0x1428   :  { %v2903_v42 = vor.u32 1.1754944e-38, %v2902_v33  ;;  %vm2901_vm4 = vcmp.eq.f32.partialorder %v2900_v37, 8.507059e+37 }
0x142c   :  { %v4019_v10 = vpop.eup %4018 }
0x142d   :  { %v2892_v29 = vmul.f32 %v4019_v10, %v2890_v7  ;;  %vm2897_vm15 = vweird.f32 %v4019_v10  ;;  %v4021_v52 = vpop.eup %4020 }
0x142e   :  { %vm2898_vm3 = vmor %vm2896_vm2, %vm2897_vm15 }
0x142f   :  { %v2893_v11 = vsub.f32 1.0, %v2892_v29 }
0x1431   :  { %v2894_v35 = vmul.f32 %v4019_v10, %v2893_v11 }
0x1433   :  { %v2895_v39 = vadd.f32 %v4019_v10, %v2894_v35 }
0x1435   :  { %v2899_v20 = vsel %vm2898_vm3, %v4019_v10, %v2895_v39 }
0x1436   :  { %v2904_v41 = vsel %vm2901_vm4, %v2903_v42, %v2899_v20  ;;  %v2179_v42 = vadd.f32 %v6080_v51, %v6075_v45 }
0x1437   :  { %v2906_v43 = vsel %vm4539_vm5, %v4021_v52, %v2904_v41  ;;  %v2713_v41 = vpop.f32.mrf.mxu1 }
0x1438   :  { %2911 = vrot.lane.b32.xlu2 %v2906_v43, %s6404_s9  ;;  %2909 = vrot.lane.b32.xlu1 %v2906_v43, %s6402_s13  ;;  %v2616_v20 = vadd.f32 %v6118_v58, %v2179_v42 }
0x1439   :  { %2907 = vrot.lane.b32.xlu0 %v2906_v43, %s6403_s6 }
0x143a   :  { %v3712_v52 = vmul.f32 -1.442695, %v2616_v20 }
0x1492   :  { %v2912_v0 = vpop.permute.xlu2 %2911 }
0x14aa   :  { %v2910_v55 = vpop.permute.xlu1 %2909 }
0x14ab   :  { %v2914_v27 = vmul.f32 %v2910_v55, %v2906_v43  ;;  %v2908_v56 = vpop.permute.xlu0 %2907  ;;  %v2714_v43 = vadd.f32 %v6033_v18, %v2713_v41 }
0x14ac   :  { %v2913_v46 = vmul.f32 %v2908_v56, %v2860_v34  ;;  %v3215_v34 = vld [vmem:[#allocation12 + $0x48] sm:$0xff] }
0x14ad   :  { %3232 = vmatpush.msra.mxu2 %v3215_v34 }
0x14ae   :  { %v6126_v44 = vadd.f32 %v2914_v27, %v2913_v46 }
0x14af   :  { %3233 = vmatpush.msra.mxu2 %v3214_v6 }
0x14b0   :  { %4022 = vtanh.f32 %v6126_v44 }
0x14b1   :  { %3234 = vmatpush.msra.mxu2 %v3213_v25 }
0x14b3   :  { %3235 = vmatpush.msra.mxu2 %v3212_v8 }
0x14b5   :  { %3236 = vmatpush.msra.mxu2 %v3211_v31 }
0x14b6   :  { %v4023_v48 = vpop.eup %4022 }
0x14b7   :  { %v6129_v21 = vmul.f32 %v4023_v48, %v2912_v0  ;;  %3237 = vmatpush.msra.mxu2 %v3210_v61 }
0x14b9   :  { %2936 = vmatmul.f32.vlgmr.msra.gmra.mxu0 %v6129_v21  ;;  %3238 = vmatpush.msra.mxu2 %v3209_v32 }
0x14bb   :  { %3239 = vmatpush.msra.mxu2 %v3208_v63 }
0x14bd   :  { %3240 = vmatpush.msra.mxu2 %v3207_v3 }
0x14bf   :  { %3241 = vmatpush.msra.mxu2 %v3206_v5 }
0x1536   :  { %v2937_v40 = vpop.f32.mrf.mxu0 }
0x1537   :  { %v2940_v4 = vadd.f32 %v2937_v40, %v2711_v24 }
0x1539   :  { %v3721_v17 = vmul.f32 -1.442695, %v2940_v4 }
0x153b   :  { %4024 = vpow2.f32 %v3721_v17 }
0x1541   :  { %v4025_v19 = vpop.eup %4024 }
0x1542   :  { %v2945_v59 = vadd.f32 1.0, %v4025_v19 }
0x1544   :  { %4026 = vrcp.f32 %v2945_v59  ;;  %v2957_v30 = vand.u32 2147483648, %v2945_v59  ;;  %v2955_v57 = vand.u32 2147483647, %v2945_v59  ;;  %vm2951_vm7 = vweird.f32 %v2945_v59 }
0x1545   :  { %4028 = vtanh.f32 %v2940_v4 }
0x1546   :  { %v2958_v22 = vor.u32 1.1754944e-38, %v2957_v30  ;;  %vm2956_vm9 = vcmp.eq.f32.partialorder %v2955_v57, 8.507059e+37 }
0x154a   :  { %v4027_v2 = vpop.eup %4026 }
0x154b   :  { %v2947_v9 = vmul.f32 %v4027_v2, %v2945_v59  ;;  %vm2952_vm6 = vweird.f32 %v4027_v2  ;;  %v4029_v1 = vpop.eup %4028 }
0x154c   :  { %vm2953_vm8 = vmor %vm2951_vm7, %vm2952_vm6 }
0x154d   :  { %v2948_v28 = vsub.f32 1.0, %v2947_v9 }
0x154f   :  { %v2949_v13 = vmul.f32 %v4027_v2, %v2948_v28 }
0x1551   :  { %v2950_v15 = vadd.f32 %v4027_v2, %v2949_v13 }
0x1553   :  { %v2954_v60 = vsel %vm2953_vm8, %v4027_v2, %v2950_v15 }
0x1554   :  { %v2959_v49 = vsel %vm2956_vm9, %v2958_v22, %v2954_v60 }
0x1555   :  { %v2961_v36 = vsel %vm4539_vm5, %v4029_v1, %v2959_v49 }
0x1556   :  { %2966 = vrot.lane.b32.xlu2 %v2961_v36, %s6404_s9  ;;  %2964 = vrot.lane.b32.xlu1 %v2961_v36, %s6402_s13 }
0x1557   :  { %2962 = vrot.lane.b32.xlu0 %v2961_v36, %s6403_s6 }
0x15b0   :  { %v2967_v37 = vpop.permute.xlu2 %2966 }
0x15c8   :  { %v2965_v7 = vpop.permute.xlu1 %2964 }
0x15c9   :  { %v2969_v10 = vmul.f32 %v2965_v7, %v2961_v36  ;;  %v2963_v29 = vpop.permute.xlu0 %2962 }
0x15ca   :  { %v2968_v11 = vmul.f32 %v2963_v29, %v6126_v44 }
0x15cc   :  { %v6139_v33 = vadd.f32 %v2969_v10, %v2968_v11 }
0x15ce   :  { %4030 = vtanh.f32 %v6139_v33 }
0x15cf   :  { %4032 = vpow2.f32 %v3712_v52 }
0x15d4   :  { %v4031_v35 = vpop.eup %4030 }
0x15d5   :  { %v2972_v39 = vmul.f32 %v4031_v35, %v2967_v37  ;;  %v4033_v55 = vpop.eup %4032 }
0x15d6   :  { %v2621_v46 = vadd.f32 1.0, %v4033_v55 }
0x15d7   :  { %2991 = vmatmul.f32.vlgmr.msrb.gmra.mxu2 %v2972_v39 }
0x15d8   :  { %v2633_v49 = vand.u32 2147483648, %v2621_v46  ;;  %vm2627_vm13 = vweird.f32 %v2621_v46  ;;  %v2631_v47 = vand.u32 2147483647, %v2621_v46 }
0x15da   :  { %v2634_v12 = vor.u32 1.1754944e-38, %v2633_v49  ;;  %vm2632_vm15 = vcmp.eq.f32.partialorder %v2631_v47, 8.507059e+37 }
0x15df   :  { %3242 = vmatmul.f32.vlgmr.msra.gmra.mxu2 %v6059_v38 }
0x15e7   :  { %3245 = vmatmul.f32.gmra.mxu2 %v6102_v16  ;;  %v6152_v16 = vld [vmem:[%s6408_s19] ss:$0 sm:$0xff] }
0x15ef   :  { %3248 = vmatmul.f32.gmra.mxu2 %v6129_v21 }
0x15f7   :  { %3251 = vmatmul.f32.gmra.mxu2 %v2972_v39 }
0x165a   :  { %v2992_v27 = vpop.f32.mrf.mxu2 }
0x165b   :  { %v2995_v56 = vadd.f32 %v2992_v27, %v2714_v43 }
0x165d   :  { %v3722_v38 = vmul.f32 -1.442695, %v2995_v56 }
0x165f   :  { %4034 = vpow2.f32 %v3722_v38 }
0x1660   :  { %4036 = vrcp.f32 %v2621_v46 }
0x1662   :  { %v3243_v45 = vpop.f32.mrf.mxu2 }
0x1663   :  { %v3244_v51 = vadd.f32 %v6152_v16, %v3243_v45 }
0x1665   :  { %v4035_v58 = vpop.eup %4034  ;;  %3267 = vst [vmem:[%s6409_s7] sm:$0xff] %v3244_v51 }
0x1666   :  { %v3000_v44 = vadd.f32 1.0, %v4035_v58  ;;  %v4037_v48 = vpop.eup %4036 }
0x1667   :  { %v2623_v21 = vmul.f32 %v4037_v48, %v2621_v46  ;;  %vm2628_vm12 = vweird.f32 %v4037_v48 }
0x1668   :  { %4038 = vrcp.f32 %v3000_v44  ;;  %v3012_v59 = vand.u32 2147483648, %v3000_v44  ;;  %v3010_v30 = vand.u32 2147483647, %v3000_v44  ;;  %vm3006_vm11 = vweird.f32 %v3000_v44  ;;  %vm2629_vm14 = vmor %vm2627_vm13, %vm2628_vm12 }
0x1669   :  { %v2624_v40 = vsub.f32 1.0, %v2623_v21  ;;  %4040 = vtanh.f32 %v2995_v56 }
0x166a   :  { %v3246_v0 = vpop.f32.mrf.mxu2  ;;  %v3013_v57 = vor.u32 1.1754944e-38, %v3012_v59  ;;  %vm3011_vm1 = vcmp.eq.f32.partialorder %v3010_v30, 8.507059e+37  ;;  %4042 = vtanh.f32 %v2616_v20 }
0x166b   :  { %v3247_v23 = vadd.f32 %v6152_v16, %v3246_v0  ;;  %v2625_v2 = vmul.f32 %v4037_v48, %v2624_v40 }
0x166d   :  { %3268 = vst [vmem:[%s6409_s7 + $0x8] sm:$0xff] %v3247_v23  ;;  %v2626_v22 = vadd.f32 %v4037_v48, %v2625_v2 }
0x166e   :  { %v4039_v24 = vpop.eup %4038 }
0x166f   :  { %v3002_v4 = vmul.f32 %v4039_v24, %v3000_v44  ;;  %vm3007_vm10 = vweird.f32 %v4039_v24  ;;  %v4041_v60 = vpop.eup %4040  ;;  %v2630_v54 = vsel %vm2629_vm14, %v4037_v48, %v2626_v22 }
0x1670   :  { %vm3008_vm0 = vmor %vm3006_vm11, %vm3007_vm10  ;;  %v2635_v50 = vsel %vm2632_vm15, %v2634_v12, %v2630_v54  ;;  %v4043_v34 = vpop.eup %4042 }
0x1671   :  { %v3003_v17 = vsub.f32 1.0, %v3002_v4  ;;  %v2637_v6 = vsel %vm4539_vm5, %v4043_v34, %v2635_v50 }
0x1672   :  { %v3249_v19 = vpop.f32.mrf.mxu2 }
0x1673   :  { %v3250_v9 = vadd.f32 %v6152_v16, %v3249_v19  ;;  %v3004_v28 = vmul.f32 %v4039_v24, %v3003_v17 }
0x1675   :  { %3269 = vst [vmem:[%s6409_s7 + $0x10] sm:$0xff] %v3250_v9  ;;  %v3005_v13 = vadd.f32 %v4039_v24, %v3004_v28 }
0x1677   :  { %v3009_v15 = vsel %vm3008_vm0, %v4039_v24, %v3005_v13 }
0x1678   :  { %v3014_v1 = vsel %vm3011_vm1, %v3013_v57, %v3009_v15 }
0x1679   :  { %v3016_v36 = vsel %vm4539_vm5, %v4041_v60, %v3014_v1 }
0x167a   :  { %v3252_v53 = vpop.f32.mrf.mxu2  ;;  %3021 = vrot.lane.b32.xlu2 %v3016_v36, %s6404_s9  ;;  %3019 = vrot.lane.b32.xlu1 %v3016_v36, %s6402_s13 }
0x167b   :  { %v3253_v62 = vadd.f32 %v6152_v16, %v3252_v53  ;;  %3017 = vrot.lane.b32.xlu0 %v3016_v36, %s6403_s6 }
0x167d   :  { %3270 = vst [vmem:[%s6409_s7 + $0x18] sm:$0xff] %v3253_v62 }
0x1682   :  { %2640 = vrot.lane.b32.xlu1 %v2637_v6, %s6402_s13 }
0x1683   :  { %2638 = vrot.lane.b32.xlu0 %v2637_v6, %s6403_s6 }
0x168a   :  { %2642 = vrot.lane.b32.xlu1 %v2637_v6, %s6404_s9 }
0x16d4   :  { %v3022_v29 = vpop.permute.xlu2 %3021 }
0x16ec   :  { %v3020_v25 = vpop.permute.xlu1 %3019 }
0x16ed   :  { %v3024_v8 = vmul.f32 %v3020_v25, %v3016_v36  ;;  %v3018_v31 = vpop.permute.xlu0 %3017 }
0x16ee   :  { %v3023_v61 = vmul.f32 %v3018_v31, %v6139_v33 }
0x16f0   :  { %v3025_v32 = vadd.f32 %v3024_v8, %v3023_v61 }
0x16f2   :  { %4044 = vtanh.f32 %v3025_v32 }
0x16f4   :  { %v2641_v63 = vpop.permute.xlu1 %2640 }
0x16f5   :  { %v2645_v3 = vmul.f32 %v2641_v63, %v2637_v6  ;;  %v2639_v5 = vpop.permute.xlu0 %2638 }
0x16f6   :  { %v2644_v7 = vmul.f32 %v2639_v5, %v6095_v26  ;;  %v2716_v26 = vpop.f32.mrf.mxu1 }
0x16f7   :  { %v2717_v42 = vadd.f32 %v6033_v18, %v2716_v26 }
0x16f8   :  { %v4045_v10 = vpop.eup %4044  ;;  %v2646_v11 = vadd.f32 %v2645_v3, %v2644_v7 }
0x16f9   :  { %v3027_v35 = vmul.f32 %v4045_v10, %v3022_v29 }
0x16fa   :  { %4046 = vtanh.f32 %v2646_v11  ;;  %3714 = vst [vmem:[%s6406_s28 + $0x10] sm:$0xff] %v2646_v11 }
0x16fb   :  { %3046 = vmatmul.f32.vlgmr.msra.gmra.mxu3 %v3027_v35  ;;  %3254 = vmatmul.f32.gmra.mxu2 %v3027_v35 }
0x16fc   :  { %v2643_v33 = vpop.permute.xlu1 %2642 }
0x16fe   :  { %v2719_v13 = vpop.f32.mrf.mxu1 }
0x16ff   :  { %v2720_v15 = vadd.f32 %v6033_v18, %v2719_v13 }
0x1700   :  { %v4047_v37 = vpop.eup %4046 }
0x1701   :  { %v2648_v39 = vmul.f32 %v4047_v37, %v2643_v33 }
0x1703   :  { %3713 = vst [vmem:[%s6407_s0 + $0x10] sm:$0xff] %v2648_v39  ;;  %2721 = vmatmul.f32.gmra.mxu1 %v2648_v39 }
0x177e   :  { %v3047_v20 = vpop.f32.mrf.mxu3  ;;  %v3255_v52 = vpop.f32.mrf.mxu2 }
0x177f   :  { %v3050_v41 = vadd.f32 %v3047_v20, %v2717_v42  ;;  %v3256_v43 = vadd.f32 %v6152_v16, %v3255_v52 }
0x1780   :  { %v2722_v57 = vpop.f32.mrf.mxu1 }
0x1781   :  { %v3723_v55 = vmul.f32 -1.442695, %v3050_v41  ;;  %3271 = vst [vmem:[%s6409_s7 + $0x20] sm:$0xff] %v3256_v43  ;;  %v2723_v33 = vadd.f32 %v6033_v18, %v2722_v57 }
0x1783   :  { %4048 = vpow2.f32 %v3723_v55 }
0x1789   :  { %v4049_v27 = vpop.eup %4048 }
0x178a   :  { %v3055_v56 = vadd.f32 1.0, %v4049_v27 }
0x178c   :  { %4050 = vrcp.f32 %v3055_v56  ;;  %v3067_v51 = vand.u32 2147483648, %v3055_v56  ;;  %v3065_v44 = vand.u32 2147483647, %v3055_v56  ;;  %vm3061_vm3 = vweird.f32 %v3055_v56 }
0x178d   :  { %4052 = vtanh.f32 %v3050_v41 }
0x178e   :  { %v3068_v0 = vor.u32 1.1754944e-38, %v3067_v51  ;;  %vm3066_vm6 = vcmp.eq.f32.partialorder %v3065_v44, 8.507059e+37 }
0x1792   :  { %v4051_v46 = vpop.eup %4050 }
0x1793   :  { %v3057_v38 = vmul.f32 %v4051_v46, %v3055_v56  ;;  %vm3062_vm2 = vweird.f32 %v4051_v46  ;;  %v4053_v23 = vpop.eup %4052 }
0x1794   :  { %vm3063_vm4 = vmor %vm3061_vm3, %vm3062_vm2 }
0x1795   :  { %v3058_v45 = vsub.f32 1.0, %v3057_v38 }
0x1797   :  { %v3059_v58 = vmul.f32 %v4051_v46, %v3058_v45 }
0x1799   :  { %v3060_v48 = vadd.f32 %v4051_v46, %v3059_v58 }
0x179b   :  { %v3064_v21 = vsel %vm3063_vm4, %v4051_v46, %v3060_v48 }
0x179c   :  { %v3069_v24 = vsel %vm3066_vm6, %v3068_v0, %v3064_v21 }
0x179d   :  { %v3071_v40 = vsel %vm4539_vm5, %v4053_v23, %v3069_v24 }
0x179e   :  { %3074 = vrot.lane.b32.xlu0 %v3071_v40, %s6402_s13  ;;  %3072 = vrot.lane.b32.xlu2 %v3071_v40, %s6403_s6 }
0x17a6   :  { %3076 = vrot.lane.b32.xlu2 %v3071_v40, %s6404_s9 }
0x17f8   :  { %v3073_v4 = vpop.permute.xlu2 %3072 }
0x17f9   :  { %v3078_v19 = vmul.f32 %v3073_v4, %v3025_v32 }
0x1800   :  { %v3077_v28 = vpop.permute.xlu2 %3076 }
0x1810   :  { %v3075_v17 = vpop.permute.xlu0 %3074 }
0x1811   :  { %v3079_v59 = vmul.f32 %v3075_v17, %v3071_v40 }
0x1813   :  { %v3080_v2 = vadd.f32 %v3079_v59, %v3078_v19 }
0x1815   :  { %4054 = vtanh.f32 %v3080_v2 }
0x181b   :  { %v4055_v9 = vpop.eup %4054 }
0x181c   :  { %v3082_v30 = vmul.f32 %v4055_v9, %v3077_v28 }
0x181e   :  { %3101 = vmatmul.f32.vlgmr.msra.gmra.mxu1 %v3082_v30  ;;  %3257 = vmatmul.f32.gmra.mxu2 %v3082_v30 }
0x189b   :  { %v3102_v22 = vpop.f32.mrf.mxu1 }
0x189c   :  { %v3105_v60 = vadd.f32 %v3102_v22, %v2720_v15 }
0x189e   :  { %v3724_v1 = vmul.f32 -1.442695, %v3105_v60 }
0x18a0   :  { %4056 = vpow2.f32 %v3724_v1 }
0x18a1   :  { %v3258_v49 = vpop.f32.mrf.mxu2 }
0x18a2   :  { %v3259_v36 = vadd.f32 %v6152_v16, %v3258_v49 }
0x18a4   :  { %3272 = vst [vmem:[%s6409_s7 + $0x28] sm:$0xff] %v3259_v36 }
0x18a6   :  { %v4057_v47 = vpop.eup %4056 }
0x18a7   :  { %v3110_v53 = vadd.f32 1.0, %v4057_v47 }
0x18a9   :  { %4058 = vrcp.f32 %v3110_v53  ;;  %v3122_v50 = vand.u32 2147483648, %v3110_v53  ;;  %v3120_v6 = vand.u32 2147483647, %v3110_v53  ;;  %vm3116_vm8 = vweird.f32 %v3110_v53 }
0x18aa   :  { %4060 = vtanh.f32 %v3105_v60 }
0x18ab   :  { %v3123_v8 = vor.u32 1.1754944e-38, %v3122_v50  ;;  %vm3121_vm10 = vcmp.eq.f32.partialorder %v3120_v6, 8.507059e+37 }
0x18af   :  { %v4059_v62 = vpop.eup %4058 }
0x18b0   :  { %v3112_v54 = vmul.f32 %v4059_v62, %v3110_v53  ;;  %vm3117_vm7 = vweird.f32 %v4059_v62  ;;  %v4061_v61 = vpop.eup %4060 }
0x18b1   :  { %vm3118_vm9 = vmor %vm3116_vm8, %vm3117_vm7 }
0x18b2   :  { %v3113_v12 = vsub.f32 1.0, %v3112_v54 }
0x18b4   :  { %v3114_v34 = vmul.f32 %v4059_v62, %v3113_v12 }
0x18b6   :  { %v3115_v25 = vadd.f32 %v4059_v62, %v3114_v34 }
0x18b8   :  { %v3119_v31 = vsel %vm3118_vm9, %v4059_v62, %v3115_v25 }
0x18b9   :  { %v3124_v32 = vsel %vm3121_vm10, %v3123_v8, %v3119_v31 }
0x18ba   :  { %v3126_v63 = vsel %vm4539_vm5, %v4061_v61, %v3124_v32 }
0x18bb   :  { %3131 = vrot.lane.b32.xlu2 %v3126_v63, %s6404_s9  ;;  %3129 = vrot.lane.b32.xlu1 %v3126_v63, %s6402_s13 }
0x18bc   :  { %3127 = vrot.lane.b32.xlu0 %v3126_v63, %s6403_s6 }
0x1915   :  { %v3132_v35 = vpop.permute.xlu2 %3131 }
0x192d   :  { %v3130_v3 = vpop.permute.xlu1 %3129 }
0x192e   :  { %v3134_v5 = vmul.f32 %v3130_v3, %v3126_v63  ;;  %v3128_v7 = vpop.permute.xlu0 %3127 }
0x192f   :  { %v3133_v10 = vmul.f32 %v3128_v7, %v3080_v2 }
0x1931   :  { %v3135_v29 = vadd.f32 %v3134_v5, %v3133_v10 }
0x1933   :  { %4062 = vtanh.f32 %v3135_v29 }
0x1939   :  { %v4063_v11 = vpop.eup %4062 }
0x193a   :  { %v3137_v37 = vmul.f32 %v4063_v11, %v3132_v35 }
0x193c   :  { %3156 = vmatmul.f32.vlgmr.msrb.gmra.mxu0 %v3137_v37  ;;  %3260 = vmatmul.f32.gmra.mxu2 %v3137_v37 }
0x19b9   :  { %v3157_v39 = vpop.f32.mrf.mxu0 }
0x19ba   :  { %v3160_v26 = vadd.f32 %v3157_v39, %v2723_v33 }
0x19bc   :  { %v3725_v42 = vmul.f32 -1.442695, %v3160_v26 }
0x19be   :  { %4064 = vpow2.f32 %v3725_v42 }
0x19bf   :  { %v3261_v20 = vpop.f32.mrf.mxu2 }
0x19c0   :  { %v3262_v52 = vadd.f32 %v6152_v16, %v3261_v20 }
0x19c2   :  { %3273 = vst [vmem:[%s6409_s7 + $0x30] sm:$0xff] %v3262_v52 }
0x19c4   :  { %v4065_v41 = vpop.eup %4064 }
0x19c5   :  { %v3165_v43 = vadd.f32 1.0, %v4065_v41 }
0x19c7   :  { %4066 = vrcp.f32 %v3165_v43  ;;  %v3177_v46 = vand.u32 2147483648, %v3165_v43  ;;  %v3175_v38 = vand.u32 2147483647, %v3165_v43  ;;  %vm3171_vm0 = vweird.f32 %v3165_v43 }
0x19c8   :  { %4068 = vtanh.f32 %v3160_v26 }
0x19c9   :  { %v3178_v51 = vor.u32 1.1754944e-38, %v3177_v46  ;;  %vm3176_vm12 = vcmp.eq.f32.partialorder %v3175_v38, 8.507059e+37 }
0x19cd   :  { %v4067_v55 = vpop.eup %4066 }
0x19ce   :  { %v3167_v27 = vmul.f32 %v4067_v55, %v3165_v43  ;;  %vm3172_vm11 = vweird.f32 %v4067_v55  ;;  %v4069_v44 = vpop.eup %4068 }
0x19cf   :  { %vm3173_vm1 = vmor %vm3171_vm0, %vm3172_vm11 }
0x19d0   :  { %v3168_v56 = vsub.f32 1.0, %v3167_v27 }
0x19d2   :  { %v3169_v18 = vmul.f32 %v4067_v55, %v3168_v56 }
0x19d4   :  { %v3170_v45 = vadd.f32 %v4067_v55, %v3169_v18 }
0x19d6   :  { %v3174_v58 = vsel %vm3173_vm1, %v4067_v55, %v3170_v45 }
0x19d7   :  { %v3179_v48 = vsel %vm3176_vm12, %v3178_v51, %v3174_v58 }
0x19d8   :  { %v3181_v0 = vsel %vm4539_vm5, %v4069_v44, %v3179_v48 }
0x19d9   :  { %3186 = vrot.lane.b32.xlu2 %v3181_v0, %s6404_s9  ;;  %3184 = vrot.lane.b32.xlu1 %v3181_v0, %s6402_s13 }
0x19da   :  { %3182 = vrot.lane.b32.xlu0 %v3181_v0, %s6403_s6 }
0x1a33   :  { %v3187_v19 = vpop.permute.xlu2 %3186 }
0x1a4b   :  { %v3185_v21 = vpop.permute.xlu1 %3184 }
0x1a4c   :  { %v3189_v23 = vmul.f32 %v3185_v21, %v3181_v0  ;;  %v3183_v24 = vpop.permute.xlu0 %3182 }
0x1a4d   :  { %v3188_v40 = vmul.f32 %v3183_v24, %v3135_v29 }
0x1a4f   :  { %v3190_v4 = vadd.f32 %v3189_v23, %v3188_v40 }
0x1a51   :  { %4070 = vtanh.f32 %v3190_v4  ;;  %3727 = vst [vmem:[%s6406_s28 + $0x18] sm:$0xff] %v3190_v4 }
0x1a57   :  { %v4071_v17 = vpop.eup %4070 }
0x1a58   :  { %v3192_v14 = vmul.f32 %v4071_v17, %v3187_v19 }
0x1a5a   :  { %3726 = vst [vmem:[%s6407_s0 + $0x18] sm:$0xff] %v3192_v14  ;;  %3263 = vmatmul.f32.gmra.mxu2 %v3192_v14 }
0x1add   :  { %v3264_v59 = vpop.f32.mrf.mxu2 }
0x1ade   :  { %v3265_v2 = vadd.f32 %v6152_v16, %v3264_v59 }
0x1ae0   :  { %3274 = vst [vmem:[%s6409_s7 + $0x38] sm:$0xff] %v3265_v2 }
0x1ae1   :  { %3287 = vsyncpa [#allocation8], 1 }
0x1ae2   :  { %3288 = vsyncpa [#allocation10], 1 }
0x1ae3   :  { %3289 = vsyncpa [#allocation13], 1 }

</bundles_post_ra>
